<compile_context>
chip_gen: v5e
topology: v5e:2x2
jax: 0.10.0
libtpu: 0.0.40
codegen_flags: <defaults>
</compile_context>

<pallas_src>
import functools
import math

import jax
import jax.numpy as jnp
from jax.experimental import pallas as pl
from jax.experimental.pallas import tpu as pltpu


def _silu(x):
    # x * sigmoid(x); reciprocal goes to the EUP approximate-recip path so the
    # divide stays off the VALU slots.
    return x * pl.reciprocal(1.0 + jnp.exp(-x), approx=True)


def _head_level_kernel(H, W, C, NC,
                       x_ref,
                       w_stem, s_stem, b_stem,
                       w_cr1, s_cr1, b_cr1,
                       w_c2, s_c2, b_c2,
                       w_r2, s_r2, b_r2,
                       w_cls, b_cls, w_ro, b_ro,
                       out_ref,
                       pad_ref):
    # Zero the padded scratch once per image.  Only the 1-wide border must be
    # zero (the interior is fully overwritten before every read), but a single
    # full zero-fill per image is cheap and safe under megacore grid sharding.
    pad_ref[...] = jnp.zeros((H + 2, W + 2, C), jnp.float32)

    x = x_ref[0]                                   # (H, W, Cin) bf16
    cin = x.shape[-1]

    # ---- stem: 1x1 conv (bf16 MXU, f32 accumulate) + folded BN + SiLU ----
    h = jnp.dot(x.reshape(H * W, cin), w_stem[...],
                preferred_element_type=jnp.float32)
    h = _silu(h * s_stem[...] + b_stem[...])       # (H*W, C) f32

    def conv3x3(feat, w_ref, s_ref, b_ref):
        # Write the feature into the padded interior, gather the 9 shifted taps
        # as one (H*W, 9C) im2col slab, and run ONE K=9C MXU matmul.
        pad_ref[1:H + 1, 1:W + 1, :] = feat.reshape(H, W, C)
        col = jnp.concatenate(
            [pad_ref[kh:kh + H, kw:kw + W, :].reshape(H * W, C)
             for kh in range(3) for kw in range(3)], axis=-1)
        y = jnp.dot(col.astype(jnp.bfloat16), w_ref[...],
                    preferred_element_type=jnp.float32)
        return _silu(y * s_ref[...] + b_ref[...])

    # ---- first conv of BOTH branches fused along output channels (2C) ----
    y1 = conv3x3(h, w_cr1, s_cr1, b_cr1)           # (H*W, 2C)
    cls_feat = conv3x3(y1[:, :C], w_c2, s_c2, b_c2)   # (H*W, C)
    reg_feat = conv3x3(y1[:, C:], w_r2, s_r2, b_r2)   # (H*W, C)

    # ---- 1x1 prediction heads (reg|obj fused into one (C,5) matmul) ----
    ro_out = jnp.dot(reg_feat.astype(jnp.bfloat16), w_ro[...],
                     preferred_element_type=jnp.float32) + b_ro[...]
    cls_out = jnp.dot(cls_feat.astype(jnp.bfloat16), w_cls[...],
                      preferred_element_type=jnp.float32) + b_cls[...]

    # single store of [reg(4) | obj(1) | cls(NC)]  (torch.cat along channels)
    out_ref[0] = jnp.concatenate([ro_out, cls_out],
                                 axis=-1).reshape(H, W, 5 + NC)


_KPARAM_NAMES = ['w_stem', 's_stem', 'b_stem',
                 'w_cr1', 's_cr1', 'b_cr1',
                 'w_c2', 's_c2', 'b_c2',
                 'w_r2', 's_r2', 'b_r2',
                 'w_cls', 'b_cls', 'w_ro', 'b_ro']


def yolox_head_level(x, kparams):
    """x: (N, H, W, Cin) float32 NHWC.  Returns (N, H, W, 4 + 1 + num_classes)."""
    N, H, W, Cin = x.shape
    C = kparams['w_c2'].shape[1]
    NC = kparams['w_cls'].shape[1]

    x_bf16 = x.astype(jnp.bfloat16)   # halve HBM read of the feature map

    def full_spec(a):
        return pl.BlockSpec(a.shape, lambda n, _nd=a.ndim: (0,) * _nd)

    in_specs = [pl.BlockSpec((1, H, W, Cin), lambda n: (n, 0, 0, 0))]
    in_specs += [full_spec(kparams[nm]) for nm in _KPARAM_NAMES]

    kern = functools.partial(_head_level_kernel, H, W, C, NC)

    out = pl.pallas_call(
        kern,
        out_shape=jax.ShapeDtypeStruct((N, H, W, 5 + NC), jnp.float32),
        grid_spec=pltpu.PrefetchScalarGridSpec(
            num_scalar_prefetch=0,
            grid=(N,),
            in_specs=in_specs,
            out_specs=pl.BlockSpec((1, H, W, 5 + NC), lambda n: (n, 0, 0, 0)),
            scratch_shapes=[pltpu.VMEM((H + 2, W + 2, C), jnp.float32)]),
        compiler_params=pltpu.CompilerParams(
            dimension_semantics=("parallel",)),   # v7x: shard images over 2 TCs
    )(x_bf16, *[kparams[nm] for nm in _KPARAM_NAMES])
    return out


# ----------------------------- parameter setup -----------------------------

def _bn_fold(key, C):
    """Eval-mode BatchNorm folded into (scale, bias)."""
    kg, kb, km, kv = jax.random.split(key, 4)
    gamma = 1.0 + 0.1 * jax.random.normal(kg, (C,), jnp.float32)
    beta = 0.1 * jax.random.normal(kb, (C,), jnp.float32)
    mean = 0.1 * jax.random.normal(km, (C,), jnp.float32)
    var = jnp.abs(1.0 + 0.1 * jax.random.normal(kv, (C,), jnp.float32))
    eps = 1e-3  # init_weights sets BN eps = 0.001
    scale = gamma / jnp.sqrt(var + eps)
    bias = beta - mean * scale
    return scale.reshape(1, C), bias.reshape(1, C)


def _conv3_w(key, Cin, Cout):
    # PyTorch weight (Cout, Cin, 3, 3) -> per-tap (9, Cin, Cout)
    w = 0.05 * jax.random.normal(key, (3, 3, Cin, Cout), jnp.float32)
    return w.reshape(9, Cin, Cout)


def make_level_params(key, Cin, C, NC):
    """'PyTorch-like' f32 parameters (used by the pure-JAX reference)."""
    ks = jax.random.split(key, 14)
    p = {}
    p['w_stem'] = 0.05 * jax.random.normal(ks[0], (Cin, C), jnp.float32)
    p['s_stem'], p['b_stem'] = _bn_fold(ks[1], C)
    p['w_c1'] = _conv3_w(ks[2], C, C); p['s_c1'], p['b_c1'] = _bn_fold(ks[3], C)
    p['w_c2'] = _conv3_w(ks[4], C, C); p['s_c2'], p['b_c2'] = _bn_fold(ks[5], C)
    p['w_r1'] = _conv3_w(ks[6], C, C); p['s_r1'], p['b_r1'] = _bn_fold(ks[7], C)
    p['w_r2'] = _conv3_w(ks[8], C, C); p['s_r2'], p['b_r2'] = _bn_fold(ks[9], C)
    prior = -math.log((1.0 - 0.01) / 0.01)  # init_weights(prior_prob=0.01)
    p['w_cls'] = 0.05 * jax.random.normal(ks[10], (C, NC), jnp.float32)
    p['b_cls'] = jnp.full((1, NC), prior, jnp.float32)
    p['w_reg'] = 0.05 * jax.random.normal(ks[11], (C, 4), jnp.float32)
    p['b_reg'] = 0.05 * jax.random.normal(ks[12], (1, 4), jnp.float32)
    p['w_obj'] = 0.05 * jax.random.normal(ks[13], (C, 1), jnp.float32)
    p['b_obj'] = jnp.full((1, 1), prior, jnp.float32)
    return p


def pack_params_for_kernel(p, C):
    """Fold/fuse parameters into the layout the kernel consumes.

    * 3x3 conv weights (9, Cin, Cout) -> im2col layout (9*Cin, Cout), bf16.
    * cls_conv1 and reg_conv1 fused along output channels -> (9C, 2C).
    * reg/obj 1x1 preds fused -> (C, 5).
    """
    bf = jnp.bfloat16
    kp = {}
    kp['w_stem'] = p['w_stem'].astype(bf)
    kp['s_stem'], kp['b_stem'] = p['s_stem'], p['b_stem']

    w_c1 = p['w_c1'].reshape(9 * C, C)
    w_r1 = p['w_r1'].reshape(9 * C, C)
    kp['w_cr1'] = jnp.concatenate([w_c1, w_r1], axis=1).astype(bf)
    kp['s_cr1'] = jnp.concatenate([p['s_c1'], p['s_r1']], axis=1)
    kp['b_cr1'] = jnp.concatenate([p['b_c1'], p['b_r1']], axis=1)

    kp['w_c2'] = p['w_c2'].reshape(9 * C, C).astype(bf)
    kp['s_c2'], kp['b_c2'] = p['s_c2'], p['b_c2']
    kp['w_r2'] = p['w_r2'].reshape(9 * C, C).astype(bf)
    kp['s_r2'], kp['b_r2'] = p['s_r2'], p['b_r2']

    kp['w_cls'] = p['w_cls'].astype(bf)
    kp['b_cls'] = p['b_cls']
    kp['w_ro'] = jnp.concatenate([p['w_reg'], p['w_obj']], axis=1).astype(bf)
    kp['b_ro'] = jnp.concatenate([p['b_reg'], p['b_obj']], axis=1)
    return kp


# --------------------------- pure-JAX reference ----------------------------

def _ref_level(x, p):
    N, H, W, Cin = x.shape

    def silu(v):
        return v * jax.nn.sigmoid(v)

    def conv1(v, w):
        return jnp.einsum('nhwc,cd->nhwd', v, w)

    def conv3(v, w9, s, b):
        vp = jnp.pad(v, ((0, 0), (1, 1), (1, 1), (0, 0)))
        acc = 0.0
        for kh in range(3):
            for kw in range(3):
                acc = acc + jnp.einsum('nhwc,cd->nhwd',
                                       vp[:, kh:kh + H, kw:kw + W, :],
                                       w9[kh * 3 + kw])
        return silu(acc * s[0] + b[0])

    h = silu(conv1(x, p['w_stem']) * p['s_stem'][0] + p['b_stem'][0])
    cls_f = conv3(conv3(h, p['w_c1'], p['s_c1'], p['b_c1']),
                  p['w_c2'], p['s_c2'], p['b_c2'])
    reg_f = conv3(conv3(h, p['w_r1'], p['s_r1'], p['b_r1']),
                  p['w_r2'], p['s_r2'], p['b_r2'])
    cls_o = conv1(cls_f, p['w_cls']) + p['b_cls'][0]
    reg_o = conv1(reg_f, p['w_reg']) + p['b_reg'][0]
    obj_o = conv1(reg_f, p['w_obj']) + p['b_obj'][0]
    return jnp.concatenate([reg_o, obj_o, cls_o], axis=-1)


# ---------------------------------- main -----------------------------------

if __name__ == "__main__":
    key = jax.random.PRNGKey(0)
    num_classes = 8
    width = 0.125
    in_channels = [128, 256, 512]              # * width -> [16, 32, 64]
    hidden = int(256 * width)                  # 32
    N = 2
    spatial = [16, 8, 4]                       # FPN strides 8/16/32

    keys = jax.random.split(key, 2 * len(in_channels))
    feats_nhwc, ref_params, kern_params = [], [], []
    for k in range(len(in_channels)):
        cin = int(in_channels[k] * width)
        hk = spatial[k]
        x_nchw = jax.random.normal(keys[2 * k], (N, cin, hk, hk), jnp.float32)
        feats_nhwc.append(jnp.transpose(x_nchw, (0, 2, 3, 1)))   # NCHW -> NHWC
        p = make_level_params(keys[2 * k + 1], cin, hidden, num_classes)
        ref_params.append(p)
        kern_params.append(pack_params_for_kernel(p, hidden))

    outputs = [yolox_head_level(feats_nhwc[k], kern_params[k])
               for k in range(len(in_channels))]
    outputs = jax.block_until_ready(outputs)

    for k in range(len(in_channels)):
        ref = _ref_level(feats_nhwc[k], ref_params[k])
        assert outputs[k].shape == ref.shape, (outputs[k].shape, ref.shape)
        err = float(jnp.max(jnp.abs(outputs[k] - ref)))
        assert err < 2e-2, f"level {k} max abs err {err}"   # bf16 MXU inputs

    print("KERNEL_OK")
</pallas_src>

<mosaic_0001>
module attributes {stable_mosaic.version = 11 : i64} {
  func.func @_head_level_kernel(%arg0: i32, %arg1: memref<1x16x16x16xbf16, #tpu.memory_space<vmem>>, %arg2: memref<16x32xbf16, #tpu.memory_space<vmem>>, %arg3: memref<1x32xf32, #tpu.memory_space<vmem>>, %arg4: memref<1x32xf32, #tpu.memory_space<vmem>>, %arg5: memref<288x64xbf16, #tpu.memory_space<vmem>>, %arg6: memref<1x64xf32, #tpu.memory_space<vmem>>, %arg7: memref<1x64xf32, #tpu.memory_space<vmem>>, %arg8: memref<288x32xbf16, #tpu.memory_space<vmem>>, %arg9: memref<1x32xf32, #tpu.memory_space<vmem>>, %arg10: memref<1x32xf32, #tpu.memory_space<vmem>>, %arg11: memref<288x32xbf16, #tpu.memory_space<vmem>>, %arg12: memref<1x32xf32, #tpu.memory_space<vmem>>, %arg13: memref<1x32xf32, #tpu.memory_space<vmem>>, %arg14: memref<32x8xbf16, #tpu.memory_space<vmem>>, %arg15: memref<1x8xf32, #tpu.memory_space<vmem>>, %arg16: memref<32x5xbf16, #tpu.memory_space<vmem>>, %arg17: memref<1x5xf32, #tpu.memory_space<vmem>>, %arg18: memref<1x16x16x13xf32, #tpu.memory_space<vmem>>, %arg19: memref<18x18x32xf32, #tpu.memory_space<vmem>>) attributes {dimension_semantics = [#tpu.dimension_semantics<parallel>], iteration_bounds = array<i64: 2>, scalar_prefetch = 0 : i64, scratch_operands = 1 : i64, tpu.core_type = #tpu.core_type<tc>, window_params = [{transform_indices = @transform_0, window_bounds = array<i64: 1, 16, 16, 16>}, {pipeline_mode = #tpu.pipeline_mode<synchronous>, transform_indices = @transform_1, window_bounds = array<i64: 16, 32>}, {pipeline_mode = #tpu.pipeline_mode<synchronous>, transform_indices = @transform_2, window_bounds = array<i64: 1, 32>}, {pipeline_mode = #tpu.pipeline_mode<synchronous>, transform_indices = @transform_3, window_bounds = array<i64: 1, 32>}, {pipeline_mode = #tpu.pipeline_mode<synchronous>, transform_indices = @transform_4, window_bounds = array<i64: 288, 64>}, {pipeline_mode = #tpu.pipeline_mode<synchronous>, transform_indices = @transform_5, window_bounds = array<i64: 1, 64>}, {pipeline_mode = #tpu.pipeline_mode<synchronous>, transform_indices = @transform_6, window_bounds = array<i64: 1, 64>}, {pipeline_mode = #tpu.pipeline_mode<synchronous>, transform_indices = @transform_7, window_bounds = array<i64: 288, 32>}, {pipeline_mode = #tpu.pipeline_mode<synchronous>, transform_indices = @transform_8, window_bounds = array<i64: 1, 32>}, {pipeline_mode = #tpu.pipeline_mode<synchronous>, transform_indices = @transform_9, window_bounds = array<i64: 1, 32>}, {pipeline_mode = #tpu.pipeline_mode<synchronous>, transform_indices = @transform_10, window_bounds = array<i64: 288, 32>}, {pipeline_mode = #tpu.pipeline_mode<synchronous>, transform_indices = @transform_11, window_bounds = array<i64: 1, 32>}, {pipeline_mode = #tpu.pipeline_mode<synchronous>, transform_indices = @transform_12, window_bounds = array<i64: 1, 32>}, {pipeline_mode = #tpu.pipeline_mode<synchronous>, transform_indices = @transform_13, window_bounds = array<i64: 32, 8>}, {pipeline_mode = #tpu.pipeline_mode<synchronous>, transform_indices = @transform_14, window_bounds = array<i64: 1, 8>}, {pipeline_mode = #tpu.pipeline_mode<synchronous>, transform_indices = @transform_15, window_bounds = array<i64: 32, 5>}, {pipeline_mode = #tpu.pipeline_mode<synchronous>, transform_indices = @transform_16, window_bounds = array<i64: 1, 5>}, {transform_indices = @transform_17, window_bounds = array<i64: 1, 16, 16, 13>}]} {
    %cst = arith.constant 0.000000e+00 : f32
    %0 = vector.broadcast %cst : f32 to vector<18x18x32xf32>
    %c0 = arith.constant 0 : index
    %c0_0 = arith.constant 0 : index
    %c0_1 = arith.constant 0 : index
    %1 = vector.load %arg19[%c0, %c0_0, %c0_1] : memref<18x18x32xf32, #tpu.memory_space<vmem>>, vector<18x18x32xf32>
    tpu.vector_store %arg19[%c0, %c0_0, %c0_1], %0 {strides = array<i32>} : memref<18x18x32xf32, #tpu.memory_space<vmem>>, vector<18x18x32xf32>,
    %c0_2 = arith.constant 0 : index
    %c0_3 = arith.constant 0 : index
    %c0_4 = arith.constant 0 : index
    %c0_5 = arith.constant 0 : index
    %2 = vector.load %arg1[%c0_2, %c0_3, %c0_4, %c0_5] : memref<1x16x16x16xbf16, #tpu.memory_space<vmem>>, vector<1x16x16x16xbf16>
    %3 = vector.shape_cast %2 : vector<1x16x16x16xbf16> to vector<16x16x16xbf16>
    %4 = vector.shape_cast %3 : vector<16x16x16xbf16> to vector<256x16xbf16>
    %c0_6 = arith.constant 0 : index
    %c0_7 = arith.constant 0 : index
    %5 = vector.load %arg2[%c0_6, %c0_7] : memref<16x32xbf16, #tpu.memory_space<vmem>>, vector<16x32xbf16>
    %cst_8 = arith.constant dense<0.000000e+00> : vector<256x32xf32>
    %6 = tpu.matmul %4, %5, %cst_8 {dimension_numbers = #tpu.dot_dimension_numbers<[1], [0], [0], [1], [0, 0, 1, 1], [], []>} : vector<256x16xbf16>, vector<16x32xbf16>, vector<256x32xf32> -> vector<256x32xf32>
    %c0_9 = arith.constant 0 : index
    %c0_10 = arith.constant 0 : index
    %7 = vector.load %arg3[%c0_9, %c0_10] : memref<1x32xf32, #tpu.memory_space<vmem>>, vector<1x32xf32>
    %8 = vector.broadcast %7 : vector<1x32xf32> to vector<256x32xf32>
    %9 = arith.mulf %6, %8 : vector<256x32xf32>
    %c0_11 = arith.constant 0 : index
    %c0_12 = arith.constant 0 : index
    %10 = vector.load %arg4[%c0_11, %c0_12] : memref<1x32xf32, #tpu.memory_space<vmem>>, vector<1x32xf32>
    %11 = vector.broadcast %10 : vector<1x32xf32> to vector<256x32xf32>
    %12 = arith.addf %9, %11 : vector<256x32xf32>
    %cst_13 = arith.constant 0.000000e+00 : f32
    %13 = vector.broadcast %cst_13 : f32 to vector<256x32xf32>
    %14 = arith.subf %13, %12 : vector<256x32xf32>
    %15 = math.exp %14 : vector<256x32xf32>
    %cst_14 = arith.constant 1.000000e+00 : f32
    %16 = vector.broadcast %cst_14 : f32 to vector<256x32xf32>
    %17 = arith.addf %16, %15 : vector<256x32xf32>
    %18 = tpu.reciprocal %17 {approx = true} : vector<256x32xf32> -> vector<256x32xf32>
    %19 = arith.mulf %12, %18 : vector<256x32xf32>
    %20 = vector.shape_cast %19 : vector<256x32xf32> to vector<16x16x32xf32>
    %c1 = arith.constant 1 : index
    %c1_15 = arith.constant 1 : index
    %c0_16 = arith.constant 0 : index
    %21 = vector.load %arg19[%c1, %c1_15, %c0_16] : memref<18x18x32xf32, #tpu.memory_space<vmem>>, vector<16x16x32xf32>
    tpu.vector_store %arg19[%c1, %c1_15, %c0_16], %20 {strides = array<i32>} : memref<18x18x32xf32, #tpu.memory_space<vmem>>, vector<16x16x32xf32>,
    %c0_17 = arith.constant 0 : index
    %c0_18 = arith.constant 0 : index
    %c0_19 = arith.constant 0 : index
    %22 = vector.load %arg19[%c0_17, %c0_18, %c0_19] : memref<18x18x32xf32, #tpu.memory_space<vmem>>, vector<16x16x32xf32>
    %23 = vector.shape_cast %22 : vector<16x16x32xf32> to vector<256x32xf32>
    %c0_20 = arith.constant 0 : index
    %c1_21 = arith.constant 1 : index
    %c0_22 = arith.constant 0 : index
    %24 = vector.load %arg19[%c0_20, %c1_21, %c0_22] : memref<18x18x32xf32, #tpu.memory_space<vmem>>, vector<16x16x32xf32>
    %25 = vector.shape_cast %24 : vector<16x16x32xf32> to vector<256x32xf32>
    %c0_23 = arith.constant 0 : index
    %c2 = arith.constant 2 : index
    %c0_24 = arith.constant 0 : index
    %26 = vector.load %arg19[%c0_23, %c2, %c0_24] : memref<18x18x32xf32, #tpu.memory_space<vmem>>, vector<16x16x32xf32>
    %27 = vector.shape_cast %26 : vector<16x16x32xf32> to vector<256x32xf32>
    %c1_25 = arith.constant 1 : index
    %c0_26 = arith.constant 0 : index
    %c0_27 = arith.constant 0 : index
    %28 = vector.load %arg19[%c1_25, %c0_26, %c0_27] : memref<18x18x32xf32, #tpu.memory_space<vmem>>, vector<16x16x32xf32>
    %29 = vector.shape_cast %28 : vector<16x16x32xf32> to vector<256x32xf32>
    %c1_28 = arith.constant 1 : index
    %c1_29 = arith.constant 1 : index
    %c0_30 = arith.constant 0 : index
    %30 = vector.load %arg19[%c1_28, %c1_29, %c0_30] : memref<18x18x32xf32, #tpu.memory_space<vmem>>, vector<16x16x32xf32>
    %31 = vector.shape_cast %30 : vector<16x16x32xf32> to vector<256x32xf32>
    %c1_31 = arith.constant 1 : index
    %c2_32 = arith.constant 2 : index
    %c0_33 = arith.constant 0 : index
    %32 = vector.load %arg19[%c1_31, %c2_32, %c0_33] : memref<18x18x32xf32, #tpu.memory_space<vmem>>, vector<16x16x32xf32>
    %33 = vector.shape_cast %32 : vector<16x16x32xf32> to vector<256x32xf32>
    %c2_34 = arith.constant 2 : index
    %c0_35 = arith.constant 0 : index
    %c0_36 = arith.constant 0 : index
    %34 = vector.load %arg19[%c2_34, %c0_35, %c0_36] : memref<18x18x32xf32, #tpu.memory_space<vmem>>, vector<16x16x32xf32>
    %35 = vector.shape_cast %34 : vector<16x16x32xf32> to vector<256x32xf32>
    %c2_37 = arith.constant 2 : index
    %c1_38 = arith.constant 1 : index
    %c0_39 = arith.constant 0 : index
    %36 = vector.load %arg19[%c2_37, %c1_38, %c0_39] : memref<18x18x32xf32, #tpu.memory_space<vmem>>, vector<16x16x32xf32>
    %37 = vector.shape_cast %36 : vector<16x16x32xf32> to vector<256x32xf32>
    %c2_40 = arith.constant 2 : index
    %c2_41 = arith.constant 2 : index
    %c0_42 = arith.constant 0 : index
    %38 = vector.load %arg19[%c2_40, %c2_41, %c0_42] : memref<18x18x32xf32, #tpu.memory_space<vmem>>, vector<16x16x32xf32>
    %39 = vector.shape_cast %38 : vector<16x16x32xf32> to vector<256x32xf32>
    %40 = tpu.concatenate %23, %25, %27, %29, %31, %33, %35, %37, %39 in 1 : vector<256x32xf32>, vector<256x32xf32>, vector<256x32xf32>, vector<256x32xf32>, vector<256x32xf32>, vector<256x32xf32>, vector<256x32xf32>, vector<256x32xf32>, vector<256x32xf32> -> vector<256x288xf32>
    %41 = arith.truncf %40 : vector<256x288xf32> to vector<256x288xbf16>
    %c0_43 = arith.constant 0 : index
    %c0_44 = arith.constant 0 : index
    %42 = vector.load %arg5[%c0_43, %c0_44] : memref<288x64xbf16, #tpu.memory_space<vmem>>, vector<288x64xbf16>
    %cst_45 = arith.constant dense<0.000000e+00> : vector<256x64xf32>
    %43 = tpu.matmul %41, %42, %cst_45 {dimension_numbers = #tpu.dot_dimension_numbers<[1], [0], [0], [1], [0, 0, 1, 1], [], []>} : vector<256x288xbf16>, vector<288x64xbf16>, vector<256x64xf32> -> vector<256x64xf32>
    %c0_46 = arith.constant 0 : index
    %c0_47 = arith.constant 0 : index
    %44 = vector.load %arg6[%c0_46, %c0_47] : memref<1x64xf32, #tpu.memory_space<vmem>>, vector<1x64xf32>
    %45 = vector.broadcast %44 : vector<1x64xf32> to vector<256x64xf32>
    %46 = arith.mulf %43, %45 : vector<256x64xf32>
    %c0_48 = arith.constant 0 : index
    %c0_49 = arith.constant 0 : index
    %47 = vector.load %arg7[%c0_48, %c0_49] : memref<1x64xf32, #tpu.memory_space<vmem>>, vector<1x64xf32>
    %48 = vector.broadcast %47 : vector<1x64xf32> to vector<256x64xf32>
    %49 = arith.addf %46, %48 : vector<256x64xf32>
    %cst_50 = arith.constant 0.000000e+00 : f32
    %50 = vector.broadcast %cst_50 : f32 to vector<256x64xf32>
    %51 = arith.subf %50, %49 : vector<256x64xf32>
    %52 = math.exp %51 : vector<256x64xf32>
    %cst_51 = arith.constant 1.000000e+00 : f32
    %53 = vector.broadcast %cst_51 : f32 to vector<256x64xf32>
    %54 = arith.addf %53, %52 : vector<256x64xf32>
    %55 = tpu.reciprocal %54 {approx = true} : vector<256x64xf32> -> vector<256x64xf32>
    %56 = arith.mulf %49, %55 : vector<256x64xf32>
    %57 = vector.extract_strided_slice %56 {offsets = [0, 0], sizes = [256, 32], strides = [1, 1]} : vector<256x64xf32> to vector<256x32xf32>
    %58 = vector.shape_cast %57 : vector<256x32xf32> to vector<16x16x32xf32>
    %c1_52 = arith.constant 1 : index
    %c1_53 = arith.constant 1 : index
    %c0_54 = arith.constant 0 : index
    %59 = vector.load %arg19[%c1_52, %c1_53, %c0_54] : memref<18x18x32xf32, #tpu.memory_space<vmem>>, vector<16x16x32xf32>
    tpu.vector_store %arg19[%c1_52, %c1_53, %c0_54], %58 {strides = array<i32>} : memref<18x18x32xf32, #tpu.memory_space<vmem>>, vector<16x16x32xf32>,
    %c0_55 = arith.constant 0 : index
    %c0_56 = arith.constant 0 : index
    %c0_57 = arith.constant 0 : index
    %60 = vector.load %arg19[%c0_55, %c0_56, %c0_57] : memref<18x18x32xf32, #tpu.memory_space<vmem>>, vector<16x16x32xf32>
    %61 = vector.shape_cast %60 : vector<16x16x32xf32> to vector<256x32xf32>
    %c0_58 = arith.constant 0 : index
    %c1_59 = arith.constant 1 : index
    %c0_60 = arith.constant 0 : index
    %62 = vector.load %arg19[%c0_58, %c1_59, %c0_60] : memref<18x18x32xf32, #tpu.memory_space<vmem>>, vector<16x16x32xf32>
    %63 = vector.shape_cast %62 : vector<16x16x32xf32> to vector<256x32xf32>
    %c0_61 = arith.constant 0 : index
    %c2_62 = arith.constant 2 : index
    %c0_63 = arith.constant 0 : index
    %64 = vector.load %arg19[%c0_61, %c2_62, %c0_63] : memref<18x18x32xf32, #tpu.memory_space<vmem>>, vector<16x16x32xf32>
    %65 = vector.shape_cast %64 : vector<16x16x32xf32> to vector<256x32xf32>
    %c1_64 = arith.constant 1 : index
    %c0_65 = arith.constant 0 : index
    %c0_66 = arith.constant 0 : index
    %66 = vector.load %arg19[%c1_64, %c0_65, %c0_66] : memref<18x18x32xf32, #tpu.memory_space<vmem>>, vector<16x16x32xf32>
    %67 = vector.shape_cast %66 : vector<16x16x32xf32> to vector<256x32xf32>
    %c1_67 = arith.constant 1 : index
    %c1_68 = arith.constant 1 : index
    %c0_69 = arith.constant 0 : index
    %68 = vector.load %arg19[%c1_67, %c1_68, %c0_69] : memref<18x18x32xf32, #tpu.memory_space<vmem>>, vector<16x16x32xf32>
    %69 = vector.shape_cast %68 : vector<16x16x32xf32> to vector<256x32xf32>
    %c1_70 = arith.constant 1 : index
    %c2_71 = arith.constant 2 : index
    %c0_72 = arith.constant 0 : index
    %70 = vector.load %arg19[%c1_70, %c2_71, %c0_72] : memref<18x18x32xf32, #tpu.memory_space<vmem>>, vector<16x16x32xf32>
    %71 = vector.shape_cast %70 : vector<16x16x32xf32> to vector<256x32xf32>
    %c2_73 = arith.constant 2 : index
    %c0_74 = arith.constant 0 : index
    %c0_75 = arith.constant 0 : index
    %72 = vector.load %arg19[%c2_73, %c0_74, %c0_75] : memref<18x18x32xf32, #tpu.memory_space<vmem>>, vector<16x16x32xf32>
    %73 = vector.shape_cast %72 : vector<16x16x32xf32> to vector<256x32xf32>
    %c2_76 = arith.constant 2 : index
    %c1_77 = arith.constant 1 : index
    %c0_78 = arith.constant 0 : index
    %74 = vector.load %arg19[%c2_76, %c1_77, %c0_78] : memref<18x18x32xf32, #tpu.memory_space<vmem>>, vector<16x16x32xf32>
    %75 = vector.shape_cast %74 : vector<16x16x32xf32> to vector<256x32xf32>
    %c2_79 = arith.constant 2 : index
    %c2_80 = arith.constant 2 : index
    %c0_81 = arith.constant 0 : index
    %76 = vector.load %arg19[%c2_79, %c2_80, %c0_81] : memref<18x18x32xf32, #tpu.memory_space<vmem>>, vector<16x16x32xf32>
    %77 = vector.shape_cast %76 : vector<16x16x32xf32> to vector<256x32xf32>
    %78 = tpu.concatenate %61, %63, %65, %67, %69, %71, %73, %75, %77 in 1 : vector<256x32xf32>, vector<256x32xf32>, vector<256x32xf32>, vector<256x32xf32>, vector<256x32xf32>, vector<256x32xf32>, vector<256x32xf32>, vector<256x32xf32>, vector<256x32xf32> -> vector<256x288xf32>
    %79 = arith.truncf %78 : vector<256x288xf32> to vector<256x288xbf16>
    %c0_82 = arith.constant 0 : index
    %c0_83 = arith.constant 0 : index
    %80 = vector.load %arg8[%c0_82, %c0_83] : memref<288x32xbf16, #tpu.memory_space<vmem>>, vector<288x32xbf16>
    %cst_84 = arith.constant dense<0.000000e+00> : vector<256x32xf32>
    %81 = tpu.matmul %79, %80, %cst_84 {dimension_numbers = #tpu.dot_dimension_numbers<[1], [0], [0], [1], [0, 0, 1, 1], [], []>} : vector<256x288xbf16>, vector<288x32xbf16>, vector<256x32xf32> -> vector<256x32xf32>
    %c0_85 = arith.constant 0 : index
    %c0_86 = arith.constant 0 : index
    %82 = vector.load %arg9[%c0_85, %c0_86] : memref<1x32xf32, #tpu.memory_space<vmem>>, vector<1x32xf32>
    %83 = vector.broadcast %82 : vector<1x32xf32> to vector<256x32xf32>
    %84 = arith.mulf %81, %83 : vector<256x32xf32>
    %c0_87 = arith.constant 0 : index
    %c0_88 = arith.constant 0 : index
    %85 = vector.load %arg10[%c0_87, %c0_88] : memref<1x32xf32, #tpu.memory_space<vmem>>, vector<1x32xf32>
    %86 = vector.broadcast %85 : vector<1x32xf32> to vector<256x32xf32>
    %87 = arith.addf %84, %86 : vector<256x32xf32>
    %cst_89 = arith.constant 0.000000e+00 : f32
    %88 = vector.broadcast %cst_89 : f32 to vector<256x32xf32>
    %89 = arith.subf %88, %87 : vector<256x32xf32>
    %90 = math.exp %89 : vector<256x32xf32>
    %cst_90 = arith.constant 1.000000e+00 : f32
    %91 = vector.broadcast %cst_90 : f32 to vector<256x32xf32>
    %92 = arith.addf %91, %90 : vector<256x32xf32>
    %93 = tpu.reciprocal %92 {approx = true} : vector<256x32xf32> -> vector<256x32xf32>
    %94 = arith.mulf %87, %93 : vector<256x32xf32>
    %95 = vector.extract_strided_slice %56 {offsets = [0, 32], sizes = [256, 32], strides = [1, 1]} : vector<256x64xf32> to vector<256x32xf32>
    %96 = vector.shape_cast %95 : vector<256x32xf32> to vector<16x16x32xf32>
    %c1_91 = arith.constant 1 : index
    %c1_92 = arith.constant 1 : index
    %c0_93 = arith.constant 0 : index
    %97 = vector.load %arg19[%c1_91, %c1_92, %c0_93] : memref<18x18x32xf32, #tpu.memory_space<vmem>>, vector<16x16x32xf32>
    tpu.vector_store %arg19[%c1_91, %c1_92, %c0_93], %96 {strides = array<i32>} : memref<18x18x32xf32, #tpu.memory_space<vmem>>, vector<16x16x32xf32>,
    %c0_94 = arith.constant 0 : index
    %c0_95 = arith.constant 0 : index
    %c0_96 = arith.constant 0 : index
    %98 = vector.load %arg19[%c0_94, %c0_95, %c0_96] : memref<18x18x32xf32, #tpu.memory_space<vmem>>, vector<16x16x32xf32>
    %99 = vector.shape_cast %98 : vector<16x16x32xf32> to vector<256x32xf32>
    %c0_97 = arith.constant 0 : index
    %c1_98 = arith.constant 1 : index
    %c0_99 = arith.constant 0 : index
    %100 = vector.load %arg19[%c0_97, %c1_98, %c0_99] : memref<18x18x32xf32, #tpu.memory_space<vmem>>, vector<16x16x32xf32>
    %101 = vector.shape_cast %100 : vector<16x16x32xf32> to vector<256x32xf32>
    %c0_100 = arith.constant 0 : index
    %c2_101 = arith.constant 2 : index
    %c0_102 = arith.constant 0 : index
    %102 = vector.load %arg19[%c0_100, %c2_101, %c0_102] : memref<18x18x32xf32, #tpu.memory_space<vmem>>, vector<16x16x32xf32>
    %103 = vector.shape_cast %102 : vector<16x16x32xf32> to vector<256x32xf32>
    %c1_103 = arith.constant 1 : index
    %c0_104 = arith.constant 0 : index
    %c0_105 = arith.constant 0 : index
    %104 = vector.load %arg19[%c1_103, %c0_104, %c0_105] : memref<18x18x32xf32, #tpu.memory_space<vmem>>, vector<16x16x32xf32>
    %105 = vector.shape_cast %104 : vector<16x16x32xf32> to vector<256x32xf32>
    %c1_106 = arith.constant 1 : index
    %c1_107 = arith.constant 1 : index
    %c0_108 = arith.constant 0 : index
    %106 = vector.load %arg19[%c1_106, %c1_107, %c0_108] : memref<18x18x32xf32, #tpu.memory_space<vmem>>, vector<16x16x32xf32>
    %107 = vector.shape_cast %106 : vector<16x16x32xf32> to vector<256x32xf32>
    %c1_109 = arith.constant 1 : index
    %c2_110 = arith.constant 2 : index
    %c0_111 = arith.constant 0 : index
    %108 = vector.load %arg19[%c1_109, %c2_110, %c0_111] : memref<18x18x32xf32, #tpu.memory_space<vmem>>, vector<16x16x32xf32>
    %109 = vector.shape_cast %108 : vector<16x16x32xf32> to vector<256x32xf32>
    %c2_112 = arith.constant 2 : index
    %c0_113 = arith.constant 0 : index
    %c0_114 = arith.constant 0 : index
    %110 = vector.load %arg19[%c2_112, %c0_113, %c0_114] : memref<18x18x32xf32, #tpu.memory_space<vmem>>, vector<16x16x32xf32>
    %111 = vector.shape_cast %110 : vector<16x16x32xf32> to vector<256x32xf32>
    %c2_115 = arith.constant 2 : index
    %c1_116 = arith.constant 1 : index
    %c0_117 = arith.constant 0 : index
    %112 = vector.load %arg19[%c2_115, %c1_116, %c0_117] : memref<18x18x32xf32, #tpu.memory_space<vmem>>, vector<16x16x32xf32>
    %113 = vector.shape_cast %112 : vector<16x16x32xf32> to vector<256x32xf32>
    %c2_118 = arith.constant 2 : index
    %c2_119 = arith.constant 2 : index
    %c0_120 = arith.constant 0 : index
    %114 = vector.load %arg19[%c2_118, %c2_119, %c0_120] : memref<18x18x32xf32, #tpu.memory_space<vmem>>, vector<16x16x32xf32>
    %115 = vector.shape_cast %114 : vector<16x16x32xf32> to vector<256x32xf32>
    %116 = tpu.concatenate %99, %101, %103, %105, %107, %109, %111, %113, %115 in 1 : vector<256x32xf32>, vector<256x32xf32>, vector<256x32xf32>, vector<256x32xf32>, vector<256x32xf32>, vector<256x32xf32>, vector<256x32xf32>, vector<256x32xf32>, vector<256x32xf32> -> vector<256x288xf32>
    %117 = arith.truncf %116 : vector<256x288xf32> to vector<256x288xbf16>
    %c0_121 = arith.constant 0 : index
    %c0_122 = arith.constant 0 : index
    %118 = vector.load %arg11[%c0_121, %c0_122] : memref<288x32xbf16, #tpu.memory_space<vmem>>, vector<288x32xbf16>
    %cst_123 = arith.constant dense<0.000000e+00> : vector<256x32xf32>
    %119 = tpu.matmul %117, %118, %cst_123 {dimension_numbers = #tpu.dot_dimension_numbers<[1], [0], [0], [1], [0, 0, 1, 1], [], []>} : vector<256x288xbf16>, vector<288x32xbf16>, vector<256x32xf32> -> vector<256x32xf32>
    %c0_124 = arith.constant 0 : index
    %c0_125 = arith.constant 0 : index
    %120 = vector.load %arg12[%c0_124, %c0_125] : memref<1x32xf32, #tpu.memory_space<vmem>>, vector<1x32xf32>
    %121 = vector.broadcast %120 : vector<1x32xf32> to vector<256x32xf32>
    %122 = arith.mulf %119, %121 : vector<256x32xf32>
    %c0_126 = arith.constant 0 : index
    %c0_127 = arith.constant 0 : index
    %123 = vector.load %arg13[%c0_126, %c0_127] : memref<1x32xf32, #tpu.memory_space<vmem>>, vector<1x32xf32>
    %124 = vector.broadcast %123 : vector<1x32xf32> to vector<256x32xf32>
    %125 = arith.addf %122, %124 : vector<256x32xf32>
    %cst_128 = arith.constant 0.000000e+00 : f32
    %126 = vector.broadcast %cst_128 : f32 to vector<256x32xf32>
    %127 = arith.subf %126, %125 : vector<256x32xf32>
    %128 = math.exp %127 : vector<256x32xf32>
    %cst_129 = arith.constant 1.000000e+00 : f32
    %129 = vector.broadcast %cst_129 : f32 to vector<256x32xf32>
    %130 = arith.addf %129, %128 : vector<256x32xf32>
    %131 = tpu.reciprocal %130 {approx = true} : vector<256x32xf32> -> vector<256x32xf32>
    %132 = arith.mulf %125, %131 : vector<256x32xf32>
    %133 = arith.truncf %132 : vector<256x32xf32> to vector<256x32xbf16>
    %c0_130 = arith.constant 0 : index
    %c0_131 = arith.constant 0 : index
    %134 = vector.load %arg16[%c0_130, %c0_131] : memref<32x5xbf16, #tpu.memory_space<vmem>>, vector<32x5xbf16>
    %cst_132 = arith.constant dense<0.000000e+00> : vector<256x5xf32>
    %135 = tpu.matmul %133, %134, %cst_132 {dimension_numbers = #tpu.dot_dimension_numbers<[1], [0], [0], [1], [0, 0, 1, 1], [], []>} : vector<256x32xbf16>, vector<32x5xbf16>, vector<256x5xf32> -> vector<256x5xf32>
    %c0_133 = arith.constant 0 : index
    %c0_134 = arith.constant 0 : index
    %136 = vector.load %arg17[%c0_133, %c0_134] : memref<1x5xf32, #tpu.memory_space<vmem>>, vector<1x5xf32>
    %137 = vector.broadcast %136 : vector<1x5xf32> to vector<256x5xf32>
    %138 = arith.addf %135, %137 : vector<256x5xf32>
    %139 = arith.truncf %94 : vector<256x32xf32> to vector<256x32xbf16>
    %c0_135 = arith.constant 0 : index
    %c0_136 = arith.constant 0 : index
    %140 = vector.load %arg14[%c0_135, %c0_136] : memref<32x8xbf16, #tpu.memory_space<vmem>>, vector<32x8xbf16>
    %cst_137 = arith.constant dense<0.000000e+00> : vector<256x8xf32>
    %141 = tpu.matmul %139, %140, %cst_137 {dimension_numbers = #tpu.dot_dimension_numbers<[1], [0], [0], [1], [0, 0, 1, 1], [], []>} : vector<256x32xbf16>, vector<32x8xbf16>, vector<256x8xf32> -> vector<256x8xf32>
    %c0_138 = arith.constant 0 : index
    %c0_139 = arith.constant 0 : index
    %142 = vector.load %arg15[%c0_138, %c0_139] : memref<1x8xf32, #tpu.memory_space<vmem>>, vector<1x8xf32>
    %143 = vector.broadcast %142 : vector<1x8xf32> to vector<256x8xf32>
    %144 = arith.addf %141, %143 : vector<256x8xf32>
    %145 = tpu.concatenate %138, %144 in 1 : vector<256x5xf32>, vector<256x8xf32> -> vector<256x13xf32>
    %146 = vector.shape_cast %145 : vector<256x13xf32> to vector<16x16x13xf32>
    %c0_140 = arith.constant 0 : index
    %c0_141 = arith.constant 0 : index
    %c0_142 = arith.constant 0 : index
    %c0_143 = arith.constant 0 : index
    %147 = vector.load %arg18[%c0_140, %c0_141, %c0_142, %c0_143] : memref<1x16x16x13xf32, #tpu.memory_space<vmem>>, vector<1x16x16x13xf32>
    %148 = vector.shape_cast %147 : vector<1x16x16x13xf32> to vector<16x16x13xf32>
    %149 = vector.shape_cast %146 : vector<16x16x13xf32> to vector<1x16x16x13xf32>
    tpu.vector_store %arg18[%c0_140, %c0_141, %c0_142, %c0_143], %149 {strides = array<i32>} : memref<1x16x16x13xf32, #tpu.memory_space<vmem>>, vector<1x16x16x13xf32>,
    return
  }
  func.func @transform_0(%arg0: i32) -> (i32, i32, i32, i32) {
    %c0_i32 = arith.constant 0 : i32
    %c0_i32_0 = arith.constant 0 : i32
    %c0_i32_1 = arith.constant 0 : i32
    %c0_i32_2 = arith.constant 0 : i32
    return %arg0, %c0_i32, %c0_i32_0, %c0_i32_1 : i32, i32, i32, i32
  }
  func.func @transform_1(%arg0: i32) -> (i32, i32) {
    %c0_i32 = arith.constant 0 : i32
    %c0_i32_0 = arith.constant 0 : i32
    %c0_i32_1 = arith.constant 0 : i32
    return %c0_i32, %c0_i32_0 : i32, i32
  }
  func.func @transform_2(%arg0: i32) -> (i32, i32) {
    %c0_i32 = arith.constant 0 : i32
    %c0_i32_0 = arith.constant 0 : i32
    %c0_i32_1 = arith.constant 0 : i32
    return %c0_i32, %c0_i32_0 : i32, i32
  }
  func.func @transform_3(%arg0: i32) -> (i32, i32) {
    %c0_i32 = arith.constant 0 : i32
    %c0_i32_0 = arith.constant 0 : i32
    %c0_i32_1 = arith.constant 0 : i32
    return %c0_i32, %c0_i32_0 : i32, i32
  }
  func.func @transform_4(%arg0: i32) -> (i32, i32) {
    %c0_i32 = arith.constant 0 : i32
    %c0_i32_0 = arith.constant 0 : i32
    %c0_i32_1 = arith.constant 0 : i32
    return %c0_i32, %c0_i32_0 : i32, i32
  }
  func.func @transform_5(%arg0: i32) -> (i32, i32) {
    %c0_i32 = arith.constant 0 : i32
    %c0_i32_0 = arith.constant 0 : i32
    %c0_i32_1 = arith.constant 0 : i32
    return %c0_i32, %c0_i32_0 : i32, i32
  }
  func.func @transform_6(%arg0: i32) -> (i32, i32) {
    %c0_i32 = arith.constant 0 : i32
    %c0_i32_0 = arith.constant 0 : i32
    %c0_i32_1 = arith.constant 0 : i32
    return %c0_i32, %c0_i32_0 : i32, i32
  }
  func.func @transform_7(%arg0: i32) -> (i32, i32) {
    %c0_i32 = arith.constant 0 : i32
    %c0_i32_0 = arith.constant 0 : i32
    %c0_i32_1 = arith.constant 0 : i32
    return %c0_i32, %c0_i32_0 : i32, i32
  }
  func.func @transform_8(%arg0: i32) -> (i32, i32) {
    %c0_i32 = arith.constant 0 : i32
    %c0_i32_0 = arith.constant 0 : i32
    %c0_i32_1 = arith.constant 0 : i32
    return %c0_i32, %c0_i32_0 : i32, i32
  }
  func.func @transform_9(%arg0: i32) -> (i32, i32) {
    %c0_i32 = arith.constant 0 : i32
    %c0_i32_0 = arith.constant 0 : i32
    %c0_i32_1 = arith.constant 0 : i32
    return %c0_i32, %c0_i32_0 : i32, i32
  }
  func.func @transform_10(%arg0: i32) -> (i32, i32) {
    %c0_i32 = arith.constant 0 : i32
    %c0_i32_0 = arith.constant 0 : i32
    %c0_i32_1 = arith.constant 0 : i32
    return %c0_i32, %c0_i32_0 : i32, i32
  }
  func.func @transform_11(%arg0: i32) -> (i32, i32) {
    %c0_i32 = arith.constant 0 : i32
    %c0_i32_0 = arith.constant 0 : i32
    %c0_i32_1 = arith.constant 0 : i32
    return %c0_i32, %c0_i32_0 : i32, i32
  }
  func.func @transform_12(%arg0: i32) -> (i32, i32) {
    %c0_i32 = arith.constant 0 : i32
    %c0_i32_0 = arith.constant 0 : i32
    %c0_i32_1 = arith.constant 0 : i32
    return %c0_i32, %c0_i32_0 : i32, i32
  }
  func.func @transform_13(%arg0: i32) -> (i32, i32) {
    %c0_i32 = arith.constant 0 : i32
    %c0_i32_0 = arith.constant 0 : i32
    %c0_i32_1 = arith.constant 0 : i32
    return %c0_i32, %c0_i32_0 : i32, i32
  }
  func.func @transform_14(%arg0: i32) -> (i32, i32) {
    %c0_i32 = arith.constant 0 : i32
    %c0_i32_0 = arith.constant 0 : i32
    %c0_i32_1 = arith.constant 0 : i32
    return %c0_i32, %c0_i32_0 : i32, i32
  }
  func.func @transform_15(%arg0: i32) -> (i32, i32) {
    %c0_i32 = arith.constant 0 : i32
    %c0_i32_0 = arith.constant 0 : i32
    %c0_i32_1 = arith.constant 0 : i32
    return %c0_i32, %c0_i32_0 : i32, i32
  }
  func.func @transform_16(%arg0: i32) -> (i32, i32) {
    %c0_i32 = arith.constant 0 : i32
    %c0_i32_0 = arith.constant 0 : i32
    %c0_i32_1 = arith.constant 0 : i32
    return %c0_i32, %c0_i32_0 : i32, i32
  }
  func.func @transform_17(%arg0: i32) -> (i32, i32, i32, i32) {
    %c0_i32 = arith.constant 0 : i32
    %c0_i32_0 = arith.constant 0 : i32
    %c0_i32_1 = arith.constant 0 : i32
    %c0_i32_2 = arith.constant 0 : i32
    return %arg0, %c0_i32, %c0_i32_0, %c0_i32_1 : i32, i32, i32, i32
  }
}

</mosaic_0001>

<bundles_post_ra>
// kernel: tpu_custom_call.1
= control target key start
LH: loop header
LB: loop body
LE: loop exit
PB: predicated region body
PF: predicated region fallthrough
CT: control target
= control target key end

     0   :  { %s10626_s24 = smov 0   ;;  %s14854_s0 = inlined_call_operand.vmem [shape: bf16[2,16,16,16], index: 0, kind: input, shape index: {}]   ;;  %s14855_s1 = inlined_call_operand.vmem [shape: bf16[16,32], index: 1, kind: input, shape index: {}]   ;;  %s14856_s2 = inlined_call_operand.vmem [shape: f32[1,32], index: 2, kind: input, shape index: {}]   ;;  %s14857_s3 = inlined_call_operand.vmem [shape: f32[1,32], index: 3, kind: input, shape index: {}]   ;;  %s14858_s4 = inlined_call_operand.vmem [shape: bf16[288,64], index: 4, kind: input, shape index: {}]   ;;  %s14859_s5 = inlined_call_operand.vmem [shape: f32[1,64], index: 5, kind: input, shape index: {}]   ;;  %s14860_s6 = inlined_call_operand.vmem [shape: f32[1,64], index: 6, kind: input, shape index: {}]   ;;  %s14861_s7 = inlined_call_operand.vmem [shape: bf16[288,32], index: 7, kind: input, shape index: {}]   ;;  %s14862_s8 = inlined_call_operand.vmem [shape: f32[1,32], index: 8, kind: input, shape index: {}]   ;;  %s14863_s9 = inlined_call_operand.vmem [shape: f32[1,32], index: 9, kind: input, shape index: {}]   ;;  %s14864_s10 = inlined_call_operand.vmem [shape: bf16[288,32], index: 10, kind: input, shape index: {}]   ;;  %s14865_s11 = inlined_call_operand.vmem [shape: f32[1,32], index: 11, kind: input, shape index: {}]   ;;  %s14866_s12 = inlined_call_operand.vmem [shape: f32[1,32], index: 12, kind: input, shape index: {}]   ;;  %s14867_s13 = inlined_call_operand.vmem [shape: bf16[32,8], index: 13, kind: input, shape index: {}]   ;;  %s14868_s14 = inlined_call_operand.vmem [shape: f32[1,8], index: 14, kind: input, shape index: {}]   ;;  %s14869_s15 = inlined_call_operand.vmem [shape: bf16[32,5], index: 15, kind: input, shape index: {}]   ;;  %s14870_s16 = inlined_call_operand.vmem [shape: f32[1,5], index: 16, kind: input, shape index: {}]   ;;  %s14871_s17 = inlined_call_operand.vmem [shape: f32[2,16,16,13], index: 17, kind: output, shape index: {}]  }
   0x1   :  { %14881 = sst [smem:[#allocation59_spill]] %s14854_s0 }
   0x2   :  { %14882 = sst [smem:[#allocation60_spill]] %s14855_s1 }
   0x3 LB: > { %s8008_s25 = sadd.s32 4294967295, %s10529_s24   ;;  %p8012_p0 = scmp.ge.s32.totalorder %s10529_s24, 1  ;;  %s10529_s24 = sphi %s10626_s24, %s27_s24  }
   0x4   : > { %p487_p1 = scmp.lt.s32.totalorder %s10529_s24, 3 }
   0x6   : > { %p488_p2 = pnand %p8012_p0, %p487_p1 }
   0x8   : > { %491 = sbr.rel (%p488_p2) target bundleno = 1786 (0x6fa), region = 88 }
   0xd   : > { %s14883_s28 = sld [smem:[#allocation60_spill]]  ;;  %p539_p3 = scmp.lt.s32.totalorder %s8008_s25, 1  ;;  %vm726_vm0 = vcmask 130048   ;;  %vm550_vm1 = vcmask 261120   ;;  %v10531_v7 = vmov 0.0   ;;  %vm553_vm2 = vcmask 254976  }
   0xe   : > { %s14884_s18 = sld [smem:[#allocation59_spill]]  ;;  %555 = vst.msk [vmem:[#allocation2 + $0x18] sm:$0xff] %vm550_vm1, %v10531_v7  ;;  %v10746_v10 = vld [vmem:[%s14856_s2] ss:$0 sm:$0xff]  ;;  %s10532_s23 = smov 64   ;;  %v8451_v42 = vld [vmem:[%s14858_s4 + $0x88] sm:$0xff] }
   0xf   : > { %s15016_s25 = smov (!%p539_p3, %s8008_s25), 1  ;;  %556 = vst.msk [vmem:[#allocation2 + $0x20] sm:$0xff] %vm550_vm1, %v10531_v7  ;;  %v10755_v13 = vld [vmem:[%s14857_s3] ss:$0 sm:$0xff]  ;;  %s10533_s26 = smov 32   ;;  %2836 = vmatpush.bf16.msra.mxu3 %v8451_v42  ;;  %vm2250_vm3 = vcmask 523264  }
  0x10   : > { %s8415_s29 = sshll.u32 %s15016_s25, 7  ;;  %551 = vst.msk [vmem:[#allocation2] sm:$0xff] %vm550_vm1, %v10531_v7  ;;  %s10534_s27 = smov 96   ;;  %v8450_v50 = vld [vmem:[%s14858_s4 + $0x80] sm:$0xff]  ;;  %vm2283_vm4 = vcmask 785408   ;;  %vm7887_vm5 = vcmask 39936  }
  0x11   : > { %552 = vst.msk [vmem:[#allocation2 + $0x8] sm:$0xff] %vm550_vm1, %v10531_v7  ;;  %s10535_s20 = smov 5   ;;  %vm7920_vm6 = vcmask 105472  }
  0x12   : > { %558 = vst.msk [vmem:[#allocation2 + $0x30] sm:$0xff] %vm550_vm1, %v10531_v7 }
  0x13   : > { %v8433_v0 = vld [vmem:[%s14883_s28] sm:$0xff]  ;;  %559 = vst.msk [vmem:[#allocation2 + $0x38] sm:$0xff] %vm550_vm1, %v10531_v7  ;;  %2837 = vmatpush.bf16.msra.mxu3 %v8450_v50 }
  0x14   : > { %782 = vmatpush.bf16.msra.mxu0 %v8433_v0  ;;  %s10643_s19 = scalar_lea.vmem %s14884_s18, %s8415_s29  ;;  %561 = vst.msk [vmem:[#allocation2 + $0x48] sm:$0xff] %vm550_vm1, %v10531_v7 }
  0x15   : > { %v8417_v1 = vld [vmem:[%s10643_s19] sm:$0xff]  ;;  %v8418_v2 = vld [vmem:[%s10643_s19 + $0x8] sm:$0xff]  ;;  %v8419_v3 = vld [vmem:[%s10643_s19 + $0x10] sm:$0xff]  ;;  %562 = vst.msk [vmem:[#allocation2 + $0x50] sm:$0xff] %vm550_vm1, %v10531_v7 }
  0x16   : > { %v8420_v4 = vld [vmem:[%s10643_s19 + $0x18] sm:$0xff]  ;;  %v8421_v5 = vld [vmem:[%s10643_s19 + $0x20] sm:$0xff]  ;;  %v8422_v6 = vld [vmem:[%s10643_s19 + $0x28] sm:$0xff]  ;;  %564 = vst.msk [vmem:[#allocation2 + $0x60] sm:$0xff] %vm550_vm1, %v10531_v7 }
  0x17   : > { %8085 = vmatmul.msk.bf16.vlgmr.msra.gmra.mxu0 %vm726_vm0, %v8417_v1  ;;  %565 = vst.msk [vmem:[#allocation2 + $0x68] sm:$0xff] %vm550_vm1, %v10531_v7  ;;  %v8423_v8 = vld [vmem:[%s10643_s19 + $0x30] sm:$0xff]  ;;  %v8424_v9 = vld [vmem:[%s10643_s19 + $0x38] sm:$0xff]  ;;  %v8425_v14 = vld [vmem:[%s10643_s19 + $0x40] sm:$0xff] }
  0x18   : > { %567 = vst.msk [vmem:[#allocation2 + $0x78] sm:$0xff] %vm550_vm1, %v10531_v7  ;;  %v1225_v11 = vld [vmem:[#allocation2 + $0x2] sm:$0xff]  ;;  %v8427_v55 = vld [vmem:[%s10643_s19 + $0x50] sm:$0xff] }
  0x19   : > { %568 = vst.msk [vmem:[#allocation2 + $0x80] sm:$0xff] %vm550_vm1, %v10531_v7  ;;  %v1193_v12 = vld [vmem:[#allocation2 + $0x1] sm:$0xff] }
  0x1a   : > { %570 = vst.msk [vmem:[#allocation2 + $0x90] sm:$0xff] %vm550_vm1, %v10531_v7  ;;  %v8426_v34 = vld [vmem:[%s10643_s19 + $0x48] sm:$0xff] }
  0x1b   : > { %571 = vst.msk [vmem:[#allocation2 + $0x98] sm:$0xff] %vm550_vm1, %v10531_v7 }
  0x1c   : > { %573 = vst.msk [vmem:[#allocation2 + $0xa8] sm:$0xff] %vm550_vm1, %v10531_v7 }
  0x1d   : > { %574 = vst.msk [vmem:[#allocation2 + $0xb0] sm:$0xff] %vm550_vm1, %v10531_v7 }
  0x1e   : > { %576 = vst.msk [vmem:[#allocation2 + $0xc0] sm:$0xff] %vm550_vm1, %v10531_v7 }
  0x1f   : > { %577 = vst.msk [vmem:[#allocation2 + $0xc8] sm:$0xff] %vm550_vm1, %v10531_v7 }
  0x20   : > { %579 = vst.msk [vmem:[#allocation2 + $0xd8] sm:$0xff] %vm550_vm1, %v10531_v7 }
  0x21   : > { %580 = vst.msk [vmem:[#allocation2 + $0xe0] sm:$0xff] %vm550_vm1, %v10531_v7 }
  0x22   : > { %582 = vst.msk [vmem:[#allocation2 + $0xf0] sm:$0xff] %vm550_vm1, %v10531_v7 }
  0x23   : > { %583 = vst.msk [vmem:[#allocation2 + $0xf8] sm:$0xff] %vm550_vm1, %v10531_v7 }
  0x24   : > { %585 = vst.msk [vmem:[#allocation2 + $0x108] sm:$0xff] %vm550_vm1, %v10531_v7 }
  0x25   : > { %586 = vst.msk [vmem:[#allocation2 + $0x110] sm:$0xff] %vm550_vm1, %v10531_v7 }
  0x26   : > { %588 = vst.msk [vmem:[#allocation2 + $0x120] sm:$0xff] %vm550_vm1, %v10531_v7 }
  0x27   : > { %8086 = vmatmul.msk.bf16.gmra.mxu0 %vm726_vm0, %v8418_v2  ;;  %589 = vst.msk [vmem:[#allocation2 + $0x128] sm:$0xff] %vm550_vm1, %v10531_v7 }
  0x28   : > { %591 = vst.msk [vmem:[#allocation2 + $0x138] sm:$0xff] %vm550_vm1, %v10531_v7 }
  0x29   : > { %592 = vst.msk [vmem:[#allocation2 + $0x140] sm:$0xff] %vm550_vm1, %v10531_v7 }
  0x2a   : > { %594 = vst.msk [vmem:[#allocation2 + $0x150] sm:$0xff] %vm550_vm1, %v10531_v7 }
  0x2b   : > { %595 = vst.msk [vmem:[#allocation2 + $0x158] sm:$0xff] %vm550_vm1, %v10531_v7 }
  0x2c   : > { %597 = vst.msk [vmem:[#allocation2 + $0x168] sm:$0xff] %vm550_vm1, %v10531_v7 }
  0x2d   : > { %598 = vst.msk [vmem:[#allocation2 + $0x170] sm:$0xff] %vm550_vm1, %v10531_v7 }
  0x2e   : > { %600 = vst.msk [vmem:[#allocation2 + $0x180] sm:$0xff] %vm550_vm1, %v10531_v7 }
  0x2f   : > { %601 = vst.msk [vmem:[#allocation2 + $0x188] sm:$0xff] %vm550_vm1, %v10531_v7 }
  0x30   : > { %603 = vst.msk [vmem:[#allocation2 + $0x198] sm:$0xff] %vm550_vm1, %v10531_v7 }
  0x31   : > { %604 = vst.msk [vmem:[#allocation2 + $0x1a0] sm:$0xff] %vm550_vm1, %v10531_v7 }
  0x32   : > { %557 = vst.msk [vmem:[#allocation2 + $0x28] sm:$0x3] %vm553_vm2, %v10531_v7 }
  0x33   : > { %554 = vst.msk [vmem:[#allocation2 + $0x10] sm:$0x3] %vm553_vm2, %v10531_v7 }
  0x34   : > { %560 = vst.msk [vmem:[#allocation2 + $0x40] sm:$0x3] %vm553_vm2, %v10531_v7 }
  0x35   : > { %563 = vst.msk [vmem:[#allocation2 + $0x58] sm:$0x3] %vm553_vm2, %v10531_v7 }
  0x36   : > { %566 = vst.msk [vmem:[#allocation2 + $0x70] sm:$0x3] %vm553_vm2, %v10531_v7 }
  0x37   : > { %8087 = vmatmul.msk.bf16.gmra.mxu0 %vm726_vm0, %v8419_v3  ;;  %569 = vst.msk [vmem:[#allocation2 + $0x88] sm:$0x3] %vm553_vm2, %v10531_v7  ;;  %v1384_v22 = vld [vmem:[#allocation2 + $0x198] sm:$0xff] }
  0x38   : > { %572 = vst.msk [vmem:[#allocation2 + $0xa0] sm:$0x3] %vm553_vm2, %v10531_v7  ;;  %v1385_v23 = vld [vmem:[#allocation2 + $0x1a0] sm:$0xff] }
  0x39   : > { %575 = vst.msk [vmem:[#allocation2 + $0xb8] sm:$0x3] %vm553_vm2, %v10531_v7  ;;  %v8515_v26 = vpack.i.bf16 %v1385_v23, %v1384_v22  ;;  %v1416_v31 = vld [vmem:[#allocation2 + $0x199] sm:$0xff] }
  0x3a   : > { %578 = vst.msk [vmem:[#allocation2 + $0xd0] sm:$0x3] %vm553_vm2, %v10531_v7  ;;  %v1226_v16 = vld [vmem:[#allocation2 + $0xa] sm:$0xff] }
  0x3b   : > { %v1194_v17 = vld [vmem:[#allocation2 + $0x9] sm:$0xff]  ;;  %581 = vst.msk [vmem:[#allocation2 + $0xe8] sm:$0x3] %vm553_vm2, %v10531_v7  ;;  %v10765_v19 = vpack.i.bf16 %v1226_v16, %v1225_v11 }
  0x3c   : > { %v10767_v20 = vpack.i.bf16 %v1194_v17, %v1193_v12  ;;  %584 = vst.msk [vmem:[#allocation2 + $0x100] sm:$0x3] %vm553_vm2, %v10531_v7 }
  0x3d   : > { %587 = vst.msk [vmem:[#allocation2 + $0x118] sm:$0x3] %vm553_vm2, %v10531_v7  ;;  %8511 = vrot.lane.b32.xlu1 %v10765_v19, %s10532_s23 }
  0x3e   : > { %590 = vst.msk [vmem:[#allocation2 + $0x130] sm:$0x3] %vm553_vm2, %v10531_v7  ;;  %8506 = vrot.lane.b32.xlu0 %v10767_v20, %s10533_s26 }
  0x3f   : > { %593 = vst.msk [vmem:[#allocation2 + $0x148] sm:$0x3] %vm553_vm2, %v10531_v7 }
  0x40   : > { %596 = vst.msk [vmem:[#allocation2 + $0x160] sm:$0x3] %vm553_vm2, %v10531_v7 }
  0x41   : > { %599 = vst.msk [vmem:[#allocation2 + $0x178] sm:$0x3] %vm553_vm2, %v10531_v7 }
  0x42   : > { %602 = vst.msk [vmem:[#allocation2 + $0x190] sm:$0x3] %vm553_vm2, %v10531_v7 }
  0x43   : > { %605 = vst.msk [vmem:[#allocation2 + $0x1a8] sm:$0x3] %vm553_vm2, %v10531_v7 }
  0x45   : > { %8516 = vrot.lane.b32.xlu1 %v8515_v26, %s10532_s23 }
  0x46   : > { %8526 = vrot.lane.b32.xlu0 %v10767_v20, %s10533_s26 }
  0x47   : > { %8088 = vmatmul.msk.bf16.gmra.mxu0 %vm726_vm0, %v8420_v4 }
  0x4a   : > { %v1417_v37 = vld [vmem:[#allocation2 + $0x1a1] sm:$0xff] }
  0x4b   : > { %v8520_v39 = vpack.i.bf16 %v1417_v37, %v1416_v31 }
  0x4d   : > { %8521 = vrot.lane.b32.xlu2 %v8520_v39, %s10534_s27  ;;  %8531 = vrot.lane.b32.xlu1 %v10765_v19, %s10532_s23 }
  0x55   : > { %8541 = vrot.lane.b32.xlu2 %v8520_v39, %s10534_s27  ;;  %8536 = vrot.lane.b32.xlu1 %v8515_v26, %s10532_s23 }
  0x57   : > { %8089 = vmatmul.msk.bf16.gmra.mxu0 %vm726_vm0, %v8421_v5 }
  0x5d   : > { %8551 = vrot.lane.b32.xlu2 %v10765_v19, %s10532_s23  ;;  %8546 = vrot.lane.b32.xlu1 %v10767_v20, %s10533_s26 }
  0x67   : > { %8090 = vmatmul.msk.bf16.gmra.mxu0 %vm726_vm0, %v8422_v6 }
  0x77   : > { %8091 = vmatmul.msk.bf16.gmra.mxu0 %vm726_vm0, %v8423_v8 }
  0x87   : > { %8092 = vmatmul.msk.bf16.gmra.mxu0 %vm726_vm0, %v8424_v9 }
  0x94   : > { %v784_v15 = vpop.f32.mrf.mxu0 }
  0x95   : > { %v868_v18 = vmul.f32 %v10746_v10, %v784_v15 }
  0x97   : > { %v904_v21 = vadd.f32 %v10755_v13, %v868_v18  ;;  %8093 = vmatmul.msk.bf16.gmra.mxu0 %vm726_vm0, %v8425_v14  ;;  %v8428_v18 = vld [vmem:[%s10643_s19 + $0x58] sm:$0xff] }
  0x99   : > { %v936_v24 = vsub.f32 0.0, %v904_v21 }
  0x9b   : > { %v968_v25 = vmul.f32 1.442695, %v936_v24 }
  0x9c   : > { %v786_v27 = vpop.f32.mrf.mxu0 }
  0x9d   : > { %9955 = vpow2.f32 %v968_v25  ;;  %v869_v28 = vmul.f32 %v10746_v10, %v786_v27 }
  0x9f   : > { %v905_v29 = vadd.f32 %v10755_v13, %v869_v28 }
  0xa1   : > { %v937_v30 = vsub.f32 0.0, %v905_v29 }
  0xa3   : > { %v9956_v32 = vpop.eup %9955  ;;  %v970_v33 = vmul.f32 1.442695, %v937_v30 }
  0xa4   : > { %v1032_v35 = vadd.f32 1.0, %v9956_v32  ;;  %v789_v36 = vpop.f32.mrf.mxu0 }
  0xa5   : > { %9957 = vpow2.f32 %v970_v33  ;;  %v870_v38 = vmul.f32 %v10746_v10, %v789_v36 }
  0xa6   : > { %9959 = vrcp.f32 %v1032_v35 }
  0xa7   : > { %v906_v40 = vadd.f32 %v10755_v13, %v870_v38  ;;  %8094 = vmatmul.msk.bf16.gmra.mxu0 %vm726_vm0, %v8426_v34 }
  0xa9   : > { %v938_v41 = vsub.f32 0.0, %v906_v40 }
  0xab   : > { %v9958_v43 = vpop.eup %9957  ;;  %v972_v44 = vmul.f32 1.442695, %v938_v41 }
  0xac   : > { %v9960_v45 = vpop.eup %9959  ;;  %v1033_v46 = vadd.f32 1.0, %v9958_v43  ;;  %v791_v47 = vpop.f32.mrf.mxu0 }
  0xad   : > { %v1096_v48 = vmul.f32 %v9960_v45, %v904_v21  ;;  %9961 = vpow2.f32 %v972_v44  ;;  %v871_v49 = vmul.f32 %v10746_v10, %v791_v47  ;;  %v8429_v47 = vld [vmem:[%s10643_s19 + $0x60] sm:$0xff] }
  0xae   : > { %9963 = vrcp.f32 %v1033_v46 }
  0xaf   : > { %1129 = vst.msk [vmem:[#allocation2 + $0x19] sm:$0xff] %vm550_vm1, %v1096_v48  ;;  %v907_v51 = vadd.f32 %v10755_v13, %v871_v49 }
  0xb1   : > { %v939_v52 = vsub.f32 0.0, %v907_v51 }
  0xb3   : > { %v9962_v53 = vpop.eup %9961  ;;  %v974_v54 = vmul.f32 1.442695, %v939_v52 }
  0xb4   : > { %v9964_v56 = vpop.eup %9963  ;;  %v1034_v57 = vadd.f32 1.0, %v9962_v53  ;;  %v794_v58 = vpop.f32.mrf.mxu0 }
  0xb5   : > { %v1097_v59 = vmul.f32 %v9964_v56, %v905_v29  ;;  %9965 = vpow2.f32 %v974_v54  ;;  %v872_v60 = vmul.f32 %v10746_v10, %v794_v58 }
  0xb6   : > { %9967 = vrcp.f32 %v1034_v57  ;;  %v1195_v6 = vld [vmem:[#allocation2 + $0x19] sm:$0xff] }
  0xb7   : > { %1130 = vst.msk [vmem:[#allocation2 + $0x21] sm:$0xff] %vm550_vm1, %v1097_v59  ;;  %v908_v61 = vadd.f32 %v10755_v13, %v872_v60  ;;  %8095 = vmatmul.msk.bf16.gmra.mxu0 %vm726_vm0, %v8427_v55  ;;  %v1257_v25 = vld [vmem:[#allocation2 + $0x18] sm:$0xff] }
  0xb9   : > { %v940_v62 = vsub.f32 0.0, %v908_v61 }
  0xbb   : > { %v9966_v63 = vpop.eup %9965  ;;  %v976_v0 = vmul.f32 1.442695, %v940_v62 }
  0xbc   : > { %v9968_v1 = vpop.eup %9967  ;;  %v1035_v2 = vadd.f32 1.0, %v9966_v63  ;;  %v796_v3 = vpop.f32.mrf.mxu0 }
  0xbd   : > { %v1098_v4 = vmul.f32 %v9968_v1, %v906_v40  ;;  %9969 = vpow2.f32 %v976_v0  ;;  %v873_v5 = vmul.f32 %v10746_v10, %v796_v3 }
  0xbe   : > { %9971 = vrcp.f32 %v1035_v2  ;;  %v1227_v7 = vld [vmem:[#allocation2 + $0x1a] sm:$0xff]  ;;  %v1228_v8 = vld [vmem:[#allocation2 + $0x22] sm:$0xff] }
  0xbf   : > { %v1196_v9 = vld [vmem:[#allocation2 + $0x21] sm:$0xff]  ;;  %1131 = vst.msk [vmem:[#allocation2 + $0x31] sm:$0xff] %vm550_vm1, %v1098_v4  ;;  %v909_v11 = vadd.f32 %v10755_v13, %v873_v5  ;;  %v8560_v12 = vpack.i.bf16 %v1228_v8, %v1227_v7 }
  0xc0   : > { %v8555_v14 = vpack.i.bf16 %v1196_v9, %v1195_v6  ;;  %v1258_v22 = vld [vmem:[#allocation2 + $0x20] sm:$0xff] }
  0xc1   : > { %v941_v15 = vsub.f32 0.0, %v909_v11  ;;  %8561 = vrot.lane.b32.xlu2 %v8560_v12, %s10532_s23  ;;  %v8565_v27 = vpack.i.bf16 %v1258_v22, %v1257_v25  ;;  %v8441_v25 = vld [vmem:[%s14858_s4 + $0x38] sm:$0xff] }
  0xc2   : > { %8556 = vrot.lane.b32.xlu0 %v8555_v14, %s10533_s26  ;;  %v8430_v14 = vld [vmem:[%s10643_s19 + $0x68] sm:$0xff]  ;;  %2652 = vmatpush.bf16.msra.mxu1 %v8441_v25 }
  0xc3   : > { %v9970_v16 = vpop.eup %9969  ;;  %v978_v17 = vmul.f32 1.442695, %v941_v15 }
  0xc4   : > { %v9972_v19 = vpop.eup %9971  ;;  %v1036_v20 = vadd.f32 1.0, %v9970_v16  ;;  %v799_v21 = vpop.f32.mrf.mxu0 }
  0xc5   : > { %v1099_v23 = vmul.f32 %v9972_v19, %v907_v51  ;;  %9973 = vpow2.f32 %v978_v17  ;;  %v874_v24 = vmul.f32 %v10746_v10, %v799_v21 }
  0xc6   : > { %9975 = vrcp.f32 %v1036_v20  ;;  %v1386_v36 = vld [vmem:[#allocation2 + $0x31] sm:$0xff] }
  0xc7   : > { %1132 = vst.msk [vmem:[#allocation2 + $0x39] sm:$0xff] %vm550_vm1, %v1099_v23  ;;  %v910_v26 = vadd.f32 %v10755_v13, %v874_v24  ;;  %8096 = vmatmul.msk.bf16.gmra.mxu0 %vm726_vm0, %v8428_v18  ;;  %v1259_v55 = vld [vmem:[#allocation2 + $0x30] sm:$0xff] }
  0xc9   : > { %v942_v28 = vsub.f32 0.0, %v910_v26  ;;  %8566 = vrot.lane.b32.xlu2 %v8565_v27, %s10534_s27 }
  0xca   : > { %8571 = vrot.lane.b32.xlu0 %v8560_v12, %s10533_s26 }
  0xcb   : > { %v9974_v29 = vpop.eup %9973  ;;  %v980_v30 = vmul.f32 1.442695, %v942_v28 }
  0xcc   : > { %v9976_v31 = vpop.eup %9975  ;;  %v1037_v32 = vadd.f32 1.0, %v9974_v29  ;;  %v801_v33 = vpop.f32.mrf.mxu0 }
  0xcd   : > { %v1100_v34 = vmul.f32 %v9976_v31, %v908_v61  ;;  %9977 = vpow2.f32 %v980_v30  ;;  %v875_v35 = vmul.f32 %v10746_v10, %v801_v33 }
  0xce   : > { %9979 = vrcp.f32 %v1037_v32  ;;  %v1418_v37 = vld [vmem:[#allocation2 + $0x32] sm:$0xff]  ;;  %v1419_v38 = vld [vmem:[#allocation2 + $0x3a] sm:$0xff] }
  0xcf   : > { %v1387_v39 = vld [vmem:[#allocation2 + $0x39] sm:$0xff]  ;;  %1133 = vst.msk [vmem:[#allocation2 + $0x49] sm:$0xff] %vm550_vm1, %v1100_v34  ;;  %v911_v40 = vadd.f32 %v10755_v13, %v875_v35  ;;  %v2414_v41 = vpack.c.bf16 %v1419_v38, %v1418_v37  ;;  %v8580_v43 = vpack.i.bf16 %v1419_v38, %v1418_v37  ;;  %v8440_v34 = vld [vmem:[%s14858_s4 + $0x30] sm:$0xff] }
  0xd0   : > { %v8600_v42 = vpack.i.bf16 %v1387_v39, %v1386_v36  ;;  %v1260_v53 = vld [vmem:[#allocation2 + $0x38] sm:$0xff]  ;;  %2653 = vmatpush.bf16.msra.mxu1 %v8440_v34 }
  0xd1   : > { %v943_v44 = vsub.f32 0.0, %v911_v40  ;;  %8173 = vmatmul.msk.bf16.vlgmr.msra.gmra.mxu3 %vm550_vm1, %v2414_v41  ;;  %v8585_v56 = vpack.i.bf16 %v1260_v53, %v1259_v55  ;;  %v8438_v53 = vld [vmem:[%s14858_s4 + $0x20] sm:$0xff] }
  0xd2   : > { %8601 = vrot.lane.b32.xlu2 %v8600_v42, %s10534_s27  ;;  %8581 = vrot.lane.b32.xlu0 %v8580_v43, %s10532_s23 }
  0xd3   : > { %8576 = vrot.lane.b32.xlu1 %v8600_v42, %s10533_s26  ;;  %v9978_v45 = vpop.eup %9977  ;;  %v982_v46 = vmul.f32 1.442695, %v943_v44 }
  0xd4   : > { %v9980_v48 = vpop.eup %9979  ;;  %v1038_v49 = vadd.f32 1.0, %v9978_v45  ;;  %v804_v50 = vpop.f32.mrf.mxu0 }
  0xd5   : > { %v1101_v51 = vmul.f32 %v9980_v48, %v909_v11  ;;  %9981 = vpow2.f32 %v982_v46  ;;  %v876_v52 = vmul.f32 %v10746_v10, %v804_v50  ;;  %v8431_v46 = vld [vmem:[%s10643_s19 + $0x70] sm:$0xff] }
  0xd6   : > { %9983 = vrcp.f32 %v1038_v49  ;;  %v1388_v1 = vld [vmem:[#allocation2 + $0x49] sm:$0xff] }
  0xd7   : > { %1134 = vst.msk [vmem:[#allocation2 + $0x51] sm:$0xff] %vm550_vm1, %v1101_v51  ;;  %v912_v54 = vadd.f32 %v10755_v13, %v876_v52  ;;  %8097 = vmatmul.msk.bf16.gmra.mxu0 %vm726_vm0, %v8429_v47  ;;  %v1356_v21 = vld [vmem:[#allocation2 + $0x48] sm:$0xff] }
  0xd9   : > { %v944_v57 = vsub.f32 0.0, %v912_v54 }
  0xda   : > { %8586 = vrot.lane.b32.xlu0 %v8585_v56, %s10534_s27 }
  0xdb   : > { %8591 = vrot.lane.b32.xlu1 %v8580_v43, %s10533_s26  ;;  %v9982_v58 = vpop.eup %9981  ;;  %v984_v59 = vmul.f32 1.442695, %v944_v57  ;;  %v8439_v43 = vld [vmem:[%s14858_s4 + $0x28] sm:$0xff] }
  0xdc   : > { %v9984_v60 = vpop.eup %9983  ;;  %v1039_v61 = vadd.f32 1.0, %v9982_v58  ;;  %v806_v62 = vpop.f32.mrf.mxu0  ;;  %2654 = vmatpush.bf16.msra.mxu1 %v8439_v43  ;;  %v8437_v58 = vld [vmem:[%s14858_s4 + $0x18] sm:$0xff] }
  0xdd   : > { %v1102_v63 = vmul.f32 %v9984_v60, %v910_v26  ;;  %9985 = vpow2.f32 %v984_v59  ;;  %v877_v0 = vmul.f32 %v10746_v10, %v806_v62 }
  0xde   : > { %9987 = vrcp.f32 %v1039_v61  ;;  %v1420_v2 = vld [vmem:[#allocation2 + $0x4a] sm:$0xff]  ;;  %v1421_v3 = vld [vmem:[#allocation2 + $0x52] sm:$0xff] }
  0xdf   : > { %v1389_v4 = vld [vmem:[#allocation2 + $0x51] sm:$0xff]  ;;  %1135 = vst.msk [vmem:[#allocation2 + $0x61] sm:$0xff] %vm550_vm1, %v1102_v63  ;;  %v10852_v5 = vadd.f32 %v10755_v13, %v877_v0  ;;  %v2417_v6 = vpack.c.bf16 %v1421_v3, %v1420_v2  ;;  %v8620_v8 = vpack.i.bf16 %v1421_v3, %v1420_v2 }
  0xe0   : > { %v8630_v7 = vpack.i.bf16 %v1389_v4, %v1388_v1  ;;  %v1357_v18 = vld [vmem:[#allocation2 + $0x50] sm:$0xff]  ;;  %2655 = vmatpush.bf16.msra.mxu1 %v8438_v53 }
  0xe1   : > { %v945_v9 = vsub.f32 0.0, %v10852_v5  ;;  %8174 = vmatmul.msk.bf16.gmra.mxu3 %vm550_vm1, %v2417_v6  ;;  %8621 = vrot.lane.b32.xlu2 %v8620_v8, %s10533_s26  ;;  %v8625_v23 = vpack.i.bf16 %v1357_v18, %v1356_v21  ;;  %v8436_v2 = vld [vmem:[%s14858_s4 + $0x10] sm:$0xff] }
  0xe2   : > { %8631 = vrot.lane.b32.xlu0 %v8630_v7, %s10534_s27 }
  0xe3   : > { %8596 = vrot.lane.b32.xlu1 %v8585_v56, %s10532_s23  ;;  %v9986_v11 = vpop.eup %9985  ;;  %v986_v12 = vmul.f32 1.442695, %v945_v9  ;;  %v10918_v9 = vpop.permute.xlu2 %8521 }
  0xe4   : > { %v9988_v15 = vpop.eup %9987  ;;  %v1040_v16 = vadd.f32 1.0, %v9986_v11  ;;  %v809_v17 = vpop.f32.mrf.mxu0  ;;  %2656 = vmatpush.bf16.msra.mxu1 %v8437_v58  ;;  %v8435_v11 = vld [vmem:[%s14858_s4 + $0x8] sm:$0xff] }
  0xe5   : > { %v1103_v19 = vmul.f32 %v9988_v15, %v911_v40  ;;  %9989 = vpow2.f32 %v986_v12  ;;  %v878_v20 = vmul.f32 %v10746_v10, %v809_v17  ;;  %v8432_v15 = vld [vmem:[%s10643_s19 + $0x78] sm:$0xff]  ;;  %v8507_v58 = vpop.permute.xlu0 %8506 }
  0xe6   : > { %9991 = vrcp.f32 %v1040_v16  ;;  %v1201_v33 = vld [vmem:[#allocation2 + $0x61] sm:$0xff] }
  0xe7   : > { %1136 = vst.msk [vmem:[#allocation2 + $0x69] sm:$0xff] %vm550_vm1, %v1103_v19  ;;  %v10863_v22 = vadd.f32 %v10755_v13, %v878_v20  ;;  %8098 = vmatmul.msk.bf16.gmra.mxu0 %vm726_vm0, %v8430_v14 }
  0xe8   : > { %2657 = vmatpush.bf16.msra.mxu1 %v8436_v2 }
  0xe9   : > { %v946_v24 = vsub.f32 0.0, %v10863_v22  ;;  %8626 = vrot.lane.b32.xlu2 %v8625_v23, %s10532_s23 }
  0xeb   : > { %8606 = vrot.lane.b32.xlu1 %v8630_v7, %s10533_s26  ;;  %v9990_v26 = vpop.eup %9989  ;;  %v988_v27 = vmul.f32 1.442695, %v946_v24 }
  0xec   : > { %v9992_v28 = vpop.eup %9991  ;;  %v1041_v29 = vadd.f32 1.0, %v9990_v26  ;;  %v811_v30 = vpop.f32.mrf.mxu0  ;;  %2658 = vmatpush.bf16.msra.mxu1 %v8435_v11 }
  0xed   : > { %v1104_v31 = vmul.f32 %v9992_v28, %v912_v54  ;;  %9993 = vpow2.f32 %v988_v27  ;;  %v879_v32 = vmul.f32 %v10746_v10, %v811_v30  ;;  %v1358_v54 = vld [vmem:[#allocation2 + $0x60] sm:$0xff]  ;;  %v10935_v30 = vpop.permute.xlu2 %8541 }
  0xee   : > { %9995 = vrcp.f32 %v1041_v29  ;;  %v1422_v35 = vld [vmem:[#allocation2 + $0x62] sm:$0xff]  ;;  %v1423_v36 = vld [vmem:[#allocation2 + $0x6a] sm:$0xff]  ;;  %14885 = vst [vmem:[#allocation3_spill] sm:$0xff] %v10935_v30 }
  0xef   : > { %v1202_v37 = vld [vmem:[#allocation2 + $0x69] sm:$0xff]  ;;  %1137 = vst.msk [vmem:[#allocation2 + $0x79] sm:$0xff] %vm550_vm1, %v1104_v31  ;;  %v10878_v38 = vadd.f32 %v10755_v13, %v879_v32  ;;  %v2420_v39 = vpack.c.bf16 %v1423_v36, %v1422_v35  ;;  %v8650_v40 = vpack.i.bf16 %v1423_v36, %v1422_v35 }
  0xf0   : > { %v8635_v41 = vpack.i.bf16 %v1202_v37, %v1201_v33  ;;  %v1359_v50 = vld [vmem:[#allocation2 + $0x68] sm:$0xff] }
  0xf1   : > { %v947_v42 = vsub.f32 0.0, %v10878_v38  ;;  %8175 = vmatmul.msk.bf16.gmra.mxu3 %vm550_vm1, %v2420_v39  ;;  %8651 = vrot.lane.b32.xlu0 %v8650_v40, %s10533_s26  ;;  %v8655_v56 = vpack.i.bf16 %v1359_v50, %v1358_v54 }
  0xf2   : > { %8636 = vrot.lane.b32.xlu2 %v8635_v41, %s10533_s26 }
  0xf3   : > { %8611 = vrot.lane.b32.xlu1 %v8620_v8, %s10532_s23  ;;  %v9994_v44 = vpop.eup %9993  ;;  %v990_v45 = vmul.f32 1.442695, %v947_v42 }
  0xf4   : > { %v9996_v47 = vpop.eup %9995  ;;  %v1042_v48 = vadd.f32 1.0, %v9994_v44  ;;  %v814_v49 = vpop.f32.mrf.mxu0 }
  0xf5   : > { %v1105_v51 = vmul.f32 %v9996_v47, %v10852_v5  ;;  %9997 = vpow2.f32 %v990_v45  ;;  %v880_v52 = vmul.f32 %v10746_v10, %v814_v49  ;;  %v10952_v47 = vpop.permute.xlu1 %8511 }
  0xf6   : > { %9999 = vrcp.f32 %v1042_v48  ;;  %v1265_v24 = vld [vmem:[#allocation2 + $0x78] sm:$0xff] }
  0xf7   : > { %1138 = vst.msk [vmem:[#allocation2 + $0x81] sm:$0xff] %vm550_vm1, %v1105_v51  ;;  %v10896_v55 = vadd.f32 %v10755_v13, %v880_v52  ;;  %8099 = vmatmul.msk.bf16.gmra.mxu0 %vm726_vm0, %v8431_v46  ;;  %v1203_v27 = vld [vmem:[#allocation2 + $0x79] sm:$0xff]  ;;  %v10948_v46 = vpop.permute.xlu2 %8551 }
  0xf9   : > { %v948_v57 = vsub.f32 0.0, %v10896_v55  ;;  %8656 = vrot.lane.b32.xlu0 %v8655_v56, %s10532_s23 }
  0xfa   : > { %8641 = vrot.lane.b32.xlu2 %v8650_v40, %s10532_s23 }
  0xfb   : > { %8616 = vrot.lane.b32.xlu1 %v8625_v23, %s10534_s27  ;;  %v9998_v59 = vpop.eup %9997  ;;  %v992_v60 = vmul.f32 1.442695, %v948_v57  ;;  %v8434_v23 = vld [vmem:[%s14858_s4] sm:$0xff] }
  0xfc   : > { %v10000_v61 = vpop.eup %9999  ;;  %v1043_v62 = vadd.f32 1.0, %v9998_v59  ;;  %v816_v63 = vpop.f32.mrf.mxu0  ;;  %2659 = vmatpush.bf16.msra.mxu1 %v8434_v23  ;;  %v8449_v59 = vld [vmem:[%s14858_s4 + $0x78] sm:$0xff] }
  0xfd   : > { %v1106_v0 = vmul.f32 %v10000_v61, %v10863_v22  ;;  %10001 = vpow2.f32 %v992_v60  ;;  %v881_v1 = vmul.f32 %v10746_v10, %v816_v63  ;;  %v10969_v2 = vpop.permute.xlu1 %8516  ;;  %2741 = vmatpush.bf16.msra.mxu2 %v8449_v59 }
  0xfe   : > { %10003 = vrcp.f32 %v1043_v62  ;;  %v1424_v3 = vld [vmem:[#allocation2 + $0x7a] sm:$0xff]  ;;  %v1425_v4 = vld [vmem:[#allocation2 + $0x82] sm:$0xff] }
  0xff   : > { %1139 = vst.msk [vmem:[#allocation2 + $0x91] sm:$0xff] %vm550_vm1, %v1106_v0  ;;  %v10913_v5 = vadd.f32 %v10755_v13, %v881_v1  ;;  %v2423_v6 = vpack.c.bf16 %v1425_v4, %v1424_v3  ;;  %v8670_v7 = vpack.i.bf16 %v1425_v4, %v1424_v3  ;;  %v1266_v19 = vld [vmem:[#allocation2 + $0x80] sm:$0xff]  ;;  %v8508_v4 = vunpack.i.l.bf16 %v8507_v58 }
 0x100   : > { %v1204_v22 = vld [vmem:[#allocation2 + $0x81] sm:$0xff]  ;;  %v8675_v26 = vpack.i.bf16 %v1266_v19, %v1265_v24  ;;  %v8448_v19 = vld [vmem:[%s14858_s4 + $0x70] sm:$0xff] }
 0x101   : > { %v949_v8 = vsub.f32 0.0, %v10913_v5  ;;  %8176 = vmatmul.msk.bf16.gmra.mxu3 %vm550_vm1, %v2423_v6  ;;  %8671 = vrot.lane.b32.xlu0 %v8670_v7, %s10532_s23  ;;  %v8665_v28 = vpack.i.bf16 %v1204_v22, %v1203_v27  ;;  %v8514_v22 = vunpack.i.h.bf16 %v10952_v47 }
 0x102   : > { %8646 = vrot.lane.b32.xlu2 %v8655_v56, %s10534_s27  ;;  %2742 = vmatpush.bf16.msra.mxu2 %v8448_v19 }
 0x103   : > { %8661 = vrot.lane.b32.xlu1 %v8635_v41, %s10534_s27  ;;  %v10002_v12 = vpop.eup %10001  ;;  %v994_v14 = vmul.f32 1.442695, %v949_v8 }
 0x104   : > { %v10004_v16 = vpop.eup %10003  ;;  %v1044_v17 = vadd.f32 1.0, %v10002_v12  ;;  %v819_v18 = vpop.f32.mrf.mxu0  ;;  %v1161_v12 = vld [vmem:[#allocation2] sm:$0xff] }
 0x105   : > { %v1107_v20 = vmul.f32 %v10004_v16, %v10878_v38  ;;  %10005 = vpow2.f32 %v994_v14  ;;  %v882_v21 = vmul.f32 %v10746_v10, %v819_v18  ;;  %v1162_v18 = vld [vmem:[#allocation2 + $0x8] sm:$0xff]  ;;  %v2218_v24 = vsel %vm550_vm1, %v1161_v12, %v8508_v4 }
 0x106   : > { %10007 = vrcp.f32 %v1044_v17  ;;  %v1205_v38 = vld [vmem:[#allocation2 + $0x91] sm:$0xff] }
 0x107   : > { %1140 = vst.msk [vmem:[#allocation2 + $0x99] sm:$0xff] %vm550_vm1, %v1107_v20  ;;  %v918_v25 = vadd.f32 %v10755_v13, %v882_v21  ;;  %8100 = vmatmul.msk.bf16.gmra.mxu0 %vm726_vm0, %v8432_v15  ;;  %v1362_v15 = vld [vmem:[#allocation2 + $0x90] sm:$0xff]  ;;  %v8513_v20 = vunpack.i.l.bf16 %v10952_v47 }
 0x109   : > { %v950_v29 = vsub.f32 0.0, %v918_v25  ;;  %8676 = vrot.lane.b32.xlu0 %v8675_v26, %s10534_s27 }
 0x10a   : > { %8666 = vrot.lane.b32.xlu2 %v8665_v28, %s10533_s26 }
 0x10b   : > { %8681 = vrot.lane.b32.xlu1 %v8670_v7, %s10533_s26  ;;  %v10006_v31 = vpop.eup %10005  ;;  %v996_v32 = vmul.f32 1.442695, %v950_v29  ;;  %v8509_v7 = vunpack.i.h.bf16 %v8507_v58  ;;  %v8447_v29 = vld [vmem:[%s14858_s4 + $0x68] sm:$0xff] }
 0x10c   : > { %v10008_v33 = vpop.eup %10007  ;;  %v1045_v34 = vadd.f32 1.0, %v10006_v31  ;;  %v821_v35 = vpop.f32.mrf.mxu0  ;;  %2743 = vmatpush.bf16.msra.mxu2 %v8447_v29 }
 0x10d   : > { %v1108_v36 = vmul.f32 %v10008_v33, %v10896_v55  ;;  %10009 = vpow2.f32 %v996_v32  ;;  %v883_v37 = vmul.f32 %v10746_v10, %v821_v35 }
 0x10e   : > { %10011 = vrcp.f32 %v1045_v34  ;;  %v1426_v39 = vld [vmem:[#allocation2 + $0x92] sm:$0xff]  ;;  %v1427_v40 = vld [vmem:[#allocation2 + $0x9a] sm:$0xff] }
 0x10f   : > { %v1206_v41 = vld [vmem:[#allocation2 + $0x99] sm:$0xff]  ;;  %1141 = vst.msk [vmem:[#allocation2 + $0xa9] sm:$0xff] %vm550_vm1, %v1108_v36  ;;  %v10943_v42 = vadd.f32 %v10755_v13, %v883_v37  ;;  %v2426_v43 = vpack.c.bf16 %v1427_v40, %v1426_v39  ;;  %v8710_v56 = vpack.i.bf16 %v1427_v40, %v1426_v39  ;;  %v2251_v36 = vsel %vm2250_vm3, %v2218_v24, %v8513_v20  ;;  %v8443_v24 = vld [vmem:[%s14858_s4 + $0x48] sm:$0xff] }
 0x110   : > { %v8695_v44 = vpack.i.bf16 %v1206_v41, %v1205_v38  ;;  %v1363_v6 = vld [vmem:[#allocation2 + $0x98] sm:$0xff] }
 0x111   : > { %v951_v45 = vsub.f32 0.0, %v10943_v42  ;;  %8177 = vmatmul.msk.bf16.gmra.mxu3 %vm550_vm1, %v2426_v43  ;;  %v8715_v21 = vpack.i.bf16 %v1363_v6, %v1362_v15 }
 0x112   : > { %8696 = vrot.lane.b32.xlu0 %v8695_v44, %s10533_s26  ;;  %8691 = vrot.lane.b32.xlu2 %v8665_v28, %s10534_s27 }
 0x113   : > { %8686 = vrot.lane.b32.xlu1 %v8675_v26, %s10532_s23  ;;  %v10010_v48 = vpop.eup %10009  ;;  %v998_v49 = vmul.f32 1.442695, %v951_v45 }
 0x114   : > { %v10012_v50 = vpop.eup %10011  ;;  %v1046_v51 = vadd.f32 1.0, %v10010_v48  ;;  %v824_v52 = vpop.f32.mrf.mxu0 }
 0x115   : > { %v1109_v53 = vmul.f32 %v10012_v50, %v10913_v5  ;;  %10013 = vpow2.f32 %v998_v49  ;;  %v884_v54 = vmul.f32 %v10746_v10, %v824_v52  ;;  %v10997_v48 = vpop.permute.xlu1 %8531 }
 0x116   : > { %10015 = vrcp.f32 %v1046_v51  ;;  %v1364_v37 = vld [vmem:[#allocation2 + $0xa8] sm:$0xff]  ;;  %v8446_v51 = vld [vmem:[%s14858_s4 + $0x60] sm:$0xff] }
 0x117   : > { %1142 = vst.msk [vmem:[#allocation2 + $0xb1] sm:$0xff] %vm550_vm1, %v1109_v53  ;;  %v10958_v55 = vadd.f32 %v10755_v13, %v884_v54  ;;  %v1207_v43 = vld [vmem:[#allocation2 + $0xa9] sm:$0xff]  ;;  %v11008_v54 = vpop.permute.xlu0 %8526  ;;  %2744 = vmatpush.bf16.msra.mxu2 %v8446_v51 }
 0x119   : > { %v952_v57 = vsub.f32 0.0, %v10958_v55 }
 0x11a   : > { %8721 = vrot.lane.b32.xlu0 %v8695_v44, %s10534_s27  ;;  %8711 = vrot.lane.b32.xlu2 %v8710_v56, %s10533_s26 }
 0x11b   : > { %8701 = vrot.lane.b32.xlu1 %v8710_v56, %s10532_s23  ;;  %v10014_v60 = vpop.eup %10013  ;;  %v1000_v61 = vmul.f32 1.442695, %v952_v57  ;;  %v10967_v62 = vpop.permute.xlu2 %8561 }
 0x11c   : > { %v10016_v63 = vpop.eup %10015  ;;  %v1047_v0 = vadd.f32 1.0, %v10014_v60  ;;  %v826_v1 = vpop.f32.mrf.mxu0 }
 0x11d   : > { %v1110_v3 = vmul.f32 %v10016_v63, %v918_v25  ;;  %10017 = vpow2.f32 %v1000_v61  ;;  %v885_v5 = vmul.f32 %v10746_v10, %v826_v1  ;;  %v2219_v25 = vsel %vm550_vm1, %v1162_v18, %v8509_v7  ;;  %v8445_v61 = vld [vmem:[%s14858_s4 + $0x58] sm:$0xff]  ;;  %v11021_v7 = vpop.permute.xlu1 %8536 }
 0x11e   : > { %10019 = vrcp.f32 %v1047_v0  ;;  %v1428_v8 = vld [vmem:[#allocation2 + $0xaa] sm:$0xff]  ;;  %v1429_v11 = vld [vmem:[#allocation2 + $0xb2] sm:$0xff]  ;;  %v2252_v41 = vsel %vm2250_vm3, %v2219_v25, %v8514_v22  ;;  %14886 = vst [vmem:[#allocation4_spill] sm:$0xff] %v11021_v7  ;;  %2745 = vmatpush.bf16.msra.mxu2 %v8445_v61  ;;  %v11078_v61 = vld [vmem:[%s14856_s2] ss:$0 sm:$0xff] }
 0x11f   : > { %1143 = vst.msk [vmem:[#allocation2 + $0xc1] sm:$0xff] %vm550_vm1, %v1110_v3  ;;  %v10974_v14 = vadd.f32 %v10755_v13, %v885_v5  ;;  %v2429_v16 = vpack.c.bf16 %v1429_v11, %v1428_v8  ;;  %v8740_v17 = vpack.i.bf16 %v1429_v11, %v1428_v8  ;;  %v1365_v38 = vld [vmem:[#allocation2 + $0xb0] sm:$0xff] }
 0x120   : > { %v1208_v44 = vld [vmem:[#allocation2 + $0xb1] sm:$0xff]  ;;  %v8745_v50 = vpack.i.bf16 %v1365_v38, %v1364_v37 }
 0x121   : > { %v953_v23 = vsub.f32 0.0, %v10974_v14  ;;  %8178 = vmatmul.msk.bf16.gmra.mxu3 %vm550_vm1, %v2429_v16  ;;  %v8725_v52 = vpack.i.bf16 %v1208_v44, %v1207_v43 }
 0x122   : > { %8741 = vrot.lane.b32.xlu0 %v8740_v17, %s10533_s26  ;;  %8716 = vrot.lane.b32.xlu2 %v8715_v21, %s10532_s23 }
 0x123   : > { %8706 = vrot.lane.b32.xlu1 %v8715_v21, %s10534_s27  ;;  %v10018_v26 = vpop.eup %10017  ;;  %v1002_v27 = vmul.f32 1.442695, %v953_v23  ;;  %v8567_v28 = vpop.permute.xlu2 %8566 }
 0x124   : > { %v10020_v31 = vpop.eup %10019  ;;  %v1048_v32 = vadd.f32 1.0, %v10018_v26  ;;  %v8569_v33 = vunpack.i.h.bf16 %v8567_v28  ;;  %v8568_v34 = vunpack.i.l.bf16 %v8567_v28  ;;  %v829_v35 = vpop.f32.mrf.mxu0 }
 0x125   : > { %v1111_v39 = vmul.f32 %v10020_v31, %v10943_v42  ;;  %10021 = vpow2.f32 %v1002_v27  ;;  %v886_v40 = vmul.f32 %v10746_v10, %v829_v35  ;;  %v8442_v31 = vld [vmem:[%s14858_s4 + $0x40] sm:$0xff] }
 0x126   : > { %10023 = vrcp.f32 %v1048_v32  ;;  %v2284_v45 = vsel %vm2283_vm4, %v2251_v36, %v8568_v34  ;;  %v2285_v47 = vsel %vm2283_vm4, %v2252_v41, %v8569_v33  ;;  %v1271_v11 = vld [vmem:[#allocation2 + $0xc0] sm:$0xff] }
 0x127   : > { %1144 = vst.msk [vmem:[#allocation2 + $0xc9] sm:$0xff] %vm550_vm1, %v1111_v39  ;;  %v11001_v49 = vadd.f32 %v10755_v13, %v886_v40  ;;  %v2412_v42 = vpack.c.bf16 %v2285_v47, %v2284_v45  ;;  %v1209_v19 = vld [vmem:[#allocation2 + $0xc1] sm:$0xff] }
 0x129   : > { %v954_v53 = vsub.f32 0.0, %v11001_v49  ;;  %2660 = vmatmul.bf16.vlgmr.msra.gmra.mxu1 %v2412_v42 }
 0x12a   : > { %8746 = vrot.lane.b32.xlu0 %v8745_v50, %s10532_s23  ;;  %8731 = vrot.lane.b32.xlu2 %v8740_v17, %s10532_s23 }
 0x12b   : > { %8726 = vrot.lane.b32.xlu1 %v8725_v52, %s10533_s26  ;;  %v10022_v56 = vpop.eup %10021  ;;  %v1004_v57 = vmul.f32 1.442695, %v954_v53 }
 0x12c   : > { %v10024_v58 = vpop.eup %10023  ;;  %v1049_v59 = vadd.f32 1.0, %v10022_v56  ;;  %v831_v60 = vpop.f32.mrf.mxu0 }
 0x12d   : > { %v1112_v63 = vmul.f32 %v10024_v58, %v10958_v55  ;;  %10025 = vpow2.f32 %v1004_v57  ;;  %v887_v0 = vmul.f32 %v10746_v10, %v831_v60  ;;  %v8444_v55 = vld [vmem:[%s14858_s4 + $0x50] sm:$0xff]  ;;  %v11031_v16 = vpop.permute.xlu2 %8601 }
 0x12e   : > { %10027 = vrcp.f32 %v1049_v59  ;;  %v1241_v1 = vld [vmem:[#allocation2 + $0xc2] sm:$0xff]  ;;  %v1242_v3 = vld [vmem:[#allocation2 + $0xca] sm:$0xff]  ;;  %2746 = vmatpush.bf16.msra.mxu2 %v8444_v55  ;;  %v1163_v55 = vld [vmem:[#allocation2 + $0x18] sm:$0xff] }
 0x12f   : > { %1145 = vst.msk [vmem:[#allocation2 + $0xd9] sm:$0xff] %vm550_vm1, %v1112_v63  ;;  %v11019_v4 = vadd.f32 %v10755_v13, %v887_v0  ;;  %v8760_v5 = vpack.i.bf16 %v1242_v3, %v1241_v1  ;;  %v2432_v6 = vpack.c.bf16 %v1242_v3, %v1241_v1  ;;  %v1272_v12 = vld [vmem:[#allocation2 + $0xc8] sm:$0xff] }
 0x130   : > { %v1210_v20 = vld [vmem:[#allocation2 + $0xc9] sm:$0xff]  ;;  %v8765_v27 = vpack.i.bf16 %v1272_v12, %v1271_v11 }
 0x131   : > { %v955_v8 = vsub.f32 0.0, %v11019_v4  ;;  %8179 = vmatmul.msk.bf16.gmra.mxu3 %vm550_vm1, %v2432_v6  ;;  %v8755_v28 = vpack.i.bf16 %v1210_v20, %v1209_v19  ;;  %v8563_v19 = vunpack.i.l.bf16 %v10967_v62 }
 0x132   : > { %8761 = vrot.lane.b32.xlu0 %v8760_v5, %s10532_s23  ;;  %8736 = vrot.lane.b32.xlu2 %v8745_v50, %s10534_s27 }
 0x133   : > { %8751 = vrot.lane.b32.xlu1 %v8725_v52, %s10534_s27  ;;  %v10026_v15 = vpop.eup %10025  ;;  %v1006_v17 = vmul.f32 1.442695, %v955_v8  ;;  %2747 = vmatpush.bf16.msra.mxu2 %v8443_v24  ;;  %v1164_v8 = vld [vmem:[#allocation2 + $0x20] sm:$0xff] }
 0x134   : > { %v11033_v18 = vpop.permute.xlu0 %8556  ;;  %v10028_v21 = vpop.eup %10027  ;;  %v1050_v22 = vadd.f32 1.0, %v10026_v15 }
 0x135   : > { %v834_v23 = vpop.f32.mrf.mxu0  ;;  %v1113_v25 = vmul.f32 %v10028_v21, %v10974_v14  ;;  %10029 = vpow2.f32 %v1006_v17  ;;  %v11051_v14 = vpop.permute.xlu1 %8546  ;;  %v8559_v1 = vunpack.i.h.bf16 %v11033_v18  ;;  %v8558_v3 = vunpack.i.l.bf16 %v11033_v18 }
 0x136   : > { %v888_v26 = vmul.f32 %v10746_v10, %v834_v23  ;;  %10031 = vrcp.f32 %v1050_v22  ;;  %v1211_v40 = vld [vmem:[#allocation2 + $0xd9] sm:$0xff]  ;;  %v8564_v18 = vunpack.i.h.bf16 %v10967_v62 }
 0x137   : > { %1146 = vst.msk [vmem:[#allocation2 + $0xe1] sm:$0xff] %vm550_vm1, %v1113_v25  ;;  %2748 = vmatpush.bf16.msra.mxu2 %v8442_v31  ;;  %v2220_v12 = vsel %vm550_vm1, %v1163_v55, %v8558_v3  ;;  %v2221_v15 = vsel %vm550_vm1, %v1164_v8, %v8559_v1  ;;  %v1368_v31 = vld [vmem:[#allocation2 + $0xd8] sm:$0xff] }
 0x138   : > { %v11042_v29 = vadd.f32 %v10755_v13, %v888_v26 }
 0x13a   : > { %v956_v32 = vsub.f32 0.0, %v11042_v29  ;;  %8766 = vrot.lane.b32.xlu0 %v8765_v27, %s10534_s27  ;;  %8756 = vrot.lane.b32.xlu2 %v8755_v28, %s10533_s26 }
 0x13b   : > { %8771 = vrot.lane.b32.xlu1 %v8760_v5, %s10533_s26  ;;  %v10030_v33 = vpop.eup %10029  ;;  %v11055_v36 = vpop.permute.xlu2 %8621 }
 0x13c   : > { %v1008_v34 = vmul.f32 1.442695, %v956_v32  ;;  %v11053_v35 = vpop.permute.xlu0 %8571  ;;  %v10032_v37 = vpop.eup %10031  ;;  %v1051_v38 = vadd.f32 1.0, %v10030_v33  ;;  %v2253_v33 = vsel %vm2250_vm3, %v2220_v12, %v8563_v19  ;;  %v1290_v12 = vld [vmem:[#allocation2 + $0x21] sm:$0xff] }
 0x13d   : > { %v836_v39 = vpop.f32.mrf.mxu0  ;;  %v1114_v41 = vmul.f32 %v10032_v37, %v11001_v49 }
 0x13e   : > { %10033 = vpow2.f32 %v1008_v34  ;;  %v889_v43 = vmul.f32 %v10746_v10, %v836_v39  ;;  %v1212_v44 = vld [vmem:[#allocation2 + $0xe1] sm:$0xff]  ;;  %v2254_v34 = vsel %vm2250_vm3, %v2221_v15, %v8564_v18 }
 0x13f   : > { %10035 = vrcp.f32 %v1051_v38  ;;  %v1432_v45 = vld [vmem:[#allocation2 + $0xda] sm:$0xff]  ;;  %v1433_v47 = vld [vmem:[#allocation2 + $0xe2] sm:$0xff]  ;;  %1147 = vst.msk [vmem:[#allocation2 + $0xf1] sm:$0xff] %vm550_vm1, %v1114_v41  ;;  %v8785_v50 = vpack.i.bf16 %v1212_v44, %v1211_v40 }
 0x140   : > { %v11061_v42 = vadd.f32 %v10755_v13, %v889_v43  ;;  %v2435_v51 = vpack.c.bf16 %v1433_v47, %v1432_v45  ;;  %v8800_v0 = vpack.i.bf16 %v1433_v47, %v1432_v45  ;;  %v1369_v32 = vld [vmem:[#allocation2 + $0xe0] sm:$0xff]  ;;  %v8574_v47 = vunpack.i.h.bf16 %v11053_v35 }
 0x141   : > { %v8805_v41 = vpack.i.bf16 %v1369_v32, %v1368_v31 }
 0x142   : > { %v957_v52 = vsub.f32 0.0, %v11061_v42  ;;  %8786 = vrot.lane.b32.xlu0 %v8785_v50, %s10533_s26  ;;  %8180 = vmatmul.msk.bf16.gmra.mxu3 %vm550_vm1, %v2435_v51  ;;  %v2317_v18 = vsel %vm550_vm1, %v1290_v12, %v8574_v47 }
 0x143   : > { %8776 = vrot.lane.b32.xlu1 %v8765_v27, %s10532_s23  ;;  %8781 = vrot.lane.b32.xlu2 %v8755_v28, %s10534_s27  ;;  %v11068_v53 = vpop.permute.xlu2 %8626 }
 0x144   : > { %v10034_v10 = vpop.eup %10033  ;;  %v1010_v49 = vmul.f32 1.442695, %v957_v52  ;;  %v11070_v13 = vpop.permute.xlu0 %8581 }
 0x145   : > { %v10036_v56 = vpop.eup %10035  ;;  %v1052_v57 = vadd.f32 1.0, %v10034_v10  ;;  %v11072_v58 = vpop.permute.xlu1 %8576 }
 0x146   : > { %v1115_v59 = vmul.f32 %v10036_v56, %v11019_v4  ;;  %10037 = vpow2.f32 %v1010_v49  ;;  %v839_v60 = vpop.f32.mrf.mxu0  ;;  %v11087_v4 = vld [vmem:[%s14857_s3] ss:$0 sm:$0xff]  ;;  %v1370_v52 = vld [vmem:[#allocation2 + $0xf0] sm:$0xff]  ;;  %v8604_v56 = vunpack.i.h.bf16 %v11031_v16  ;;  %v8579_v12 = vunpack.i.h.bf16 %v11072_v58 }
 0x147   : > { %10039 = vrcp.f32 %v1052_v57  ;;  %v890_v63 = vmul.f32 %v11078_v61, %v839_v60  ;;  %v8603_v57 = vunpack.i.l.bf16 %v11031_v16  ;;  %v1213_v60 = vld [vmem:[#allocation2 + $0xf1] sm:$0xff] }
 0x148   : > { %1148 = vst.msk [vmem:[#allocation2 + $0xf9] sm:$0xff] %vm550_vm1, %v1115_v59 }
 0x149   : > { %v11090_v5 = vadd.f32 %v11087_v4, %v890_v63 }
 0x14a   : > { %8811 = vrot.lane.b32.xlu0 %v8785_v50, %s10534_s27  ;;  %v8573_v50 = vunpack.i.l.bf16 %v11053_v35 }
 0x14b   : > { %v958_v6 = vsub.f32 0.0, %v11090_v5  ;;  %8801 = vrot.lane.b32.xlu2 %v8800_v0, %s10533_s26  ;;  %8791 = vrot.lane.b32.xlu1 %v8800_v0, %s10532_s23 }
 0x14c   : > { %v10038_v11 = vpop.eup %10037  ;;  %v8587_v22 = vpop.permute.xlu0 %8586 }
 0x14d   : > { %v10040_v17 = vpop.eup %10039  ;;  %v1053_v20 = vadd.f32 1.0, %v10038_v11  ;;  %v1012_v21 = vmul.f32 1.442695, %v958_v6  ;;  %v11100_v23 = vpop.permute.xlu1 %8591  ;;  %v8589_v25 = vunpack.i.h.bf16 %v8587_v22  ;;  %v8588_v26 = vunpack.i.l.bf16 %v8587_v22  ;;  %v1289_v11 = vld [vmem:[#allocation2 + $0x19] sm:$0xff] }
 0x14e   : > { %v1116_v24 = vmul.f32 %v10040_v17, %v11042_v29  ;;  %v11103_v27 = vpop.permute.xlu2 %8636  ;;  %v841_v28 = vpop.f32.mrf.mxu0  ;;  %v2316_v16 = vsel %vm550_vm1, %v1289_v11, %v8573_v50 }
 0x14f   : > { %10041 = vrcp.f32 %v1053_v20  ;;  %v1339_v62 = vld [vmem:[#allocation2 + $0xf2] sm:$0xff]  ;;  %v1340_v37 = vld [vmem:[#allocation2 + $0xfa] sm:$0xff]  ;;  %v891_v38 = vmul.f32 %v11078_v61, %v841_v28  ;;  %v2286_v29 = vsel %vm2283_vm4, %v2253_v33, %v8588_v26  ;;  %v2287_v39 = vsel %vm2283_vm4, %v2254_v34, %v8589_v25 }
 0x150   : > { %1149 = vst.msk [vmem:[#allocation2 + $0x109] sm:$0xff] %vm550_vm1, %v1116_v24  ;;  %10043 = vpow2.f32 %v1012_v21  ;;  %v2415_v40 = vpack.c.bf16 %v2287_v39, %v2286_v29  ;;  %v8830_v43 = vpack.i.bf16 %v1340_v37, %v1339_v62  ;;  %v2438_v45 = vpack.c.bf16 %v1340_v37, %v1339_v62  ;;  %v1371_v10 = vld [vmem:[#allocation2 + $0xf8] sm:$0xff] }
 0x151   : > { %v11112_v44 = vadd.f32 %v11087_v4, %v891_v38  ;;  %v1214_v63 = vld [vmem:[#allocation2 + $0xf9] sm:$0xff]  ;;  %v8835_v17 = vpack.i.bf16 %v1371_v10, %v1370_v52  ;;  %v8594_v29 = vunpack.i.h.bf16 %v11100_v23  ;;  %v8593_v39 = vunpack.i.l.bf16 %v11100_v23  ;;  %v1291_v52 = vld [vmem:[#allocation2 + $0x31] sm:$0xff] }
 0x152   : > { %2665 = vmatmul.bf16.gmra.mxu1 %v2415_v40  ;;  %8831 = vrot.lane.b32.xlu0 %v8830_v43, %s10533_s26  ;;  %v1292_v10 = vld [vmem:[#allocation2 + $0x39] sm:$0xff] }
 0x153   : > { %8806 = vrot.lane.b32.xlu2 %v8805_v41, %s10532_s23  ;;  %v959_v51 = vsub.f32 0.0, %v11112_v44  ;;  %8796 = vrot.lane.b32.xlu1 %v8805_v41, %s10534_s27 }
 0x154   : > { %8181 = vmatmul.msk.bf16.gmra.mxu3 %vm550_vm1, %v2438_v45  ;;  %v8632_v28 = vpop.permute.xlu0 %8631 }
 0x155   : > { %v10042_v49 = vpop.eup %10041  ;;  %v8597_v59 = vpop.permute.xlu1 %8596  ;;  %v1014_v1 = vmul.f32 1.442695, %v959_v51 }
 0x156   : > { %v10044_v35 = vpop.eup %10043  ;;  %v1117_v0 = vmul.f32 %v10042_v49, %v11061_v42  ;;  %v8599_v3 = vunpack.i.h.bf16 %v8597_v59  ;;  %v8598_v6 = vunpack.i.l.bf16 %v8597_v59  ;;  %v11124_v55 = vpop.permute.xlu2 %8641  ;;  %v8815_v42 = vpack.i.bf16 %v1214_v63, %v1213_v60 }
 0x157   : > { %v844_v8 = vpop.f32.mrf.mxu0  ;;  %v1054_v15 = vadd.f32 1.0, %v10044_v35  ;;  %10045 = vpow2.f32 %v1014_v1  ;;  %v8633_v49 = vunpack.i.l.bf16 %v8632_v28  ;;  %v8628_v59 = vunpack.i.l.bf16 %v11068_v53  ;;  %v1215_v35 = vld [vmem:[#allocation2 + $0x109] sm:$0xff] }
 0x158   : > { %1150 = vst.msk [vmem:[#allocation2 + $0x111] sm:$0xff] %vm550_vm1, %v1117_v0  ;;  %v892_v19 = vmul.f32 %v11078_v61, %v844_v8  ;;  %v2348_v20 = vsel %vm2250_vm3, %v2316_v16, %v8598_v6  ;;  %v2349_v21 = vsel %vm2250_vm3, %v2317_v18, %v8599_v3  ;;  %v8634_v60 = vunpack.i.h.bf16 %v8632_v28  ;;  %v1277_v6 = vld [vmem:[#allocation2 + $0x108] sm:$0xff] }
 0x159   : > { %10047 = vrcp.f32 %v1054_v15  ;;  %v2380_v22 = vsel %vm2283_vm4, %v2348_v20, %v8603_v57  ;;  %v2381_v25 = vsel %vm2283_vm4, %v2349_v21, %v8604_v56  ;;  %v2318_v56 = vsel %vm550_vm1, %v1291_v52, %v8593_v39 }
 0x15a   : > { %v11134_v24 = vadd.f32 %v11087_v4, %v892_v19  ;;  %v2413_v26 = vpack.c.bf16 %v2381_v25, %v2380_v22  ;;  %8836 = vrot.lane.b32.xlu0 %v8835_v17, %s10532_s23  ;;  %v2319_v57 = vsel %vm550_vm1, %v1292_v10, %v8594_v29  ;;  %v8578_v15 = vunpack.i.l.bf16 %v11072_v58 }
 0x15b   : > { %8821 = vrot.lane.b32.xlu2 %v8830_v43, %s10532_s23  ;;  %8816 = vrot.lane.b32.xlu1 %v8815_v42, %s10533_s26  ;;  %v2350_v16 = vsel %vm2250_vm3, %v2318_v56, %v8628_v59 }
 0x15c   : > { %v960_v31 = vsub.f32 0.0, %v11134_v24  ;;  %2749 = vmatmul.bf16.vlgmr.msra.gmra.mxu2 %v2413_v26  ;;  %v2382_v21 = vsel %vm2283_vm4, %v2350_v16, %v8633_v49 }
 0x15d   : > { %v11141_v32 = vpop.permute.xlu1 %8606  ;;  %v10046_v33 = vpop.eup %10045 }
 0x15e   : > { %v1016_v34 = vmul.f32 1.442695, %v960_v31  ;;  %v11143_v62 = vpop.permute.xlu2 %8646  ;;  %v1055_v40 = vadd.f32 1.0, %v10046_v33  ;;  %v8584_v33 = vunpack.i.h.bf16 %v11070_v13 }
 0x15f   : > { %v846_v37 = vpop.f32.mrf.mxu0  ;;  %v10048_v38 = vpop.eup %10047  ;;  %v1247_v43 = vld [vmem:[#allocation2 + $0x10a] sm:$0xff]  ;;  %v1248_v45 = vld [vmem:[#allocation2 + $0x112] sm:$0xff] }
 0x160   : > { %v893_v41 = vmul.f32 %v11078_v61, %v846_v37  ;;  %v1118_v47 = vmul.f32 %v10048_v38, %v11090_v5  ;;  %10049 = vpow2.f32 %v1016_v34  ;;  %v8850_v50 = vpack.i.bf16 %v1248_v45, %v1247_v43  ;;  %v1216_v0 = vld [vmem:[#allocation2 + $0x111] sm:$0xff] }
 0x161   : > { %10051 = vrcp.f32 %v1055_v40  ;;  %v8629_v5 = vunpack.i.h.bf16 %v11068_v53  ;;  %v1278_v8 = vld [vmem:[#allocation2 + $0x110] sm:$0xff]  ;;  %v8845_v20 = vpack.i.bf16 %v1216_v0, %v1215_v35  ;;  %v2441_v28 = vpack.c.bf16 %v1248_v45, %v1247_v43  ;;  %v1166_v38 = vld [vmem:[#allocation2 + $0x38] sm:$0xff] }
 0x162   : > { %v11150_v51 = vadd.f32 %v11087_v4, %v893_v41  ;;  %1151 = vst.msk [vmem:[#allocation2 + $0x121] sm:$0xff] %vm550_vm1, %v1118_v47  ;;  %8851 = vrot.lane.b32.xlu0 %v8850_v50, %s10532_s23  ;;  %v8855_v26 = vpack.i.bf16 %v1278_v8, %v1277_v6  ;;  %v8583_v34 = vunpack.i.l.bf16 %v11070_v13  ;;  %v2223_v41 = vsel %vm550_vm1, %v1166_v38, %v8579_v12 }
 0x163   : > { %8826 = vrot.lane.b32.xlu2 %v8835_v17, %s10534_s27  ;;  %8841 = vrot.lane.b32.xlu1 %v8815_v42, %s10534_s27  ;;  %v11161_v63 = vpop.permute.xlu0 %8651  ;;  %v2351_v18 = vsel %vm2250_vm3, %v2319_v57, %v8629_v5  ;;  %v8624_v13 = vunpack.i.h.bf16 %v11055_v36  ;;  %v8623_v57 = vunpack.i.l.bf16 %v11055_v36 }
 0x164   : > { %v961_v23 = vsub.f32 0.0, %v11150_v51  ;;  %v2383_v58 = vsel %vm2283_vm4, %v2351_v18, %v8634_v60  ;;  %8182 = vmatmul.msk.bf16.gmra.mxu3 %vm550_vm1, %v2441_v28  ;;  %v2256_v60 = vsel %vm2250_vm3, %v2223_v41, %v8584_v33  ;;  %v1294_v18 = vld [vmem:[#allocation2 + $0x51] sm:$0xff] }
 0x165   : > { %v11163_v3 = vpop.permute.xlu1 %8611  ;;  %v2416_v37 = vpack.c.bf16 %v2383_v58, %v2382_v21  ;;  %v8609_v58 = vunpack.i.h.bf16 %v11141_v32 }
 0x166   : > { %v1018_v1 = vmul.f32 1.442695, %v961_v23  ;;  %v10050_v11 = vpop.eup %10049  ;;  %v11167_v53 = vpop.permute.xlu2 %8666  ;;  %v8614_v28 = vunpack.i.h.bf16 %v11163_v3 }
 0x167   : > { %v849_v17 = vpop.f32.mrf.mxu0  ;;  %v10052_v19 = vpop.eup %10051  ;;  %v1056_v42 = vadd.f32 1.0, %v10050_v11 }
 0x168   : > { %10053 = vpow2.f32 %v1018_v1  ;;  %v1119_v22 = vmul.f32 %v10052_v19, %v11112_v44  ;;  %v894_v25 = vmul.f32 %v11078_v61, %v849_v17  ;;  %v1165_v44 = vld [vmem:[#allocation2 + $0x30] sm:$0xff] }
 0x169   : > { %10055 = vrcp.f32 %v1056_v42  ;;  %v2222_v40 = vsel %vm550_vm1, %v1165_v44, %v8578_v15  ;;  %v1217_v35 = vld [vmem:[#allocation2 + $0x121] sm:$0xff] }
 0x16a   : > { %1152 = vst.msk [vmem:[#allocation2 + $0x129] sm:$0xff] %vm550_vm1, %v1119_v22  ;;  %v11177_v31 = vadd.f32 %v11087_v4, %v894_v25  ;;  %8856 = vrot.lane.b32.xlu0 %v8855_v26, %s10534_s27  ;;  %v2255_v59 = vsel %vm2250_vm3, %v2222_v40, %v8583_v34  ;;  %v2321_v25 = vsel %vm550_vm1, %v1294_v18, %v8624_v13 }
 0x16b   : > { %8846 = vrot.lane.b32.xlu2 %v8845_v20, %s10533_s26  ;;  %8861 = vrot.lane.b32.xlu1 %v8850_v50, %s10533_s26  ;;  %v8657_v39 = vpop.permute.xlu0 %8656 }
 0x16c   : > { %v962_v29 = vsub.f32 0.0, %v11177_v31  ;;  %2754 = vmatmul.bf16.gmra.mxu2 %v2416_v37  ;;  %v8658_v12 = vunpack.i.l.bf16 %v8657_v39  ;;  %v8659_v17 = vunpack.i.h.bf16 %v8657_v39  ;;  %v8613_v37 = vunpack.i.l.bf16 %v11163_v3 }
 0x16d   : > { %v8617_v45 = vpop.permute.xlu1 %8616 }
 0x16e   : > { %v10054_v43 = vpop.eup %10053  ;;  %v1020_v52 = vmul.f32 1.442695, %v962_v29  ;;  %v8619_v10 = vunpack.i.h.bf16 %v8617_v45  ;;  %v8618_v49 = vunpack.i.l.bf16 %v8617_v45  ;;  %v11189_v23 = vpop.permute.xlu2 %8691  ;;  %v2353_v13 = vsel %vm2250_vm3, %v2321_v25, %v8659_v17 }
 0x16f   : > { %v1057_v47 = vadd.f32 1.0, %v10054_v43  ;;  %v851_v56 = vpop.f32.mrf.mxu0  ;;  %v10056_v50 = vpop.eup %10055 }
 0x170   : > { %v895_v5 = vmul.f32 %v11078_v61, %v851_v56  ;;  %v1120_v0 = vmul.f32 %v10056_v50, %v11134_v24  ;;  %v2288_v1 = vsel %vm2283_vm4, %v2255_v59, %v8618_v49  ;;  %v2289_v6 = vsel %vm2283_vm4, %v2256_v60, %v8619_v10  ;;  %v1293_v24 = vld [vmem:[#allocation2 + $0x49] sm:$0xff] }
 0x171   : > { %10057 = vrcp.f32 %v1057_v47  ;;  %v2418_v11 = vpack.c.bf16 %v2289_v6, %v2288_v1  ;;  %v1218_v36 = vld [vmem:[#allocation2 + $0x129] sm:$0xff]  ;;  %v2320_v22 = vsel %vm550_vm1, %v1293_v24, %v8623_v57  ;;  %v8649_v60 = vunpack.i.h.bf16 %v11143_v62  ;;  %v1374_v6 = vld [vmem:[#allocation2 + $0x120] sm:$0xff] }
 0x172   : > { %10059 = vpow2.f32 %v1020_v52  ;;  %v11199_v8 = vadd.f32 %v11087_v4, %v895_v5  ;;  %1153 = vst.msk [vmem:[#allocation2 + $0x139] sm:$0xff] %vm550_vm1, %v1120_v0  ;;  %v8875_v15 = vpack.i.bf16 %v1218_v36, %v1217_v35  ;;  %v11208_v42 = vld [vmem:[#allocation2 + $0x122] sm:$0xff]  ;;  %v11210_v21 = vld [vmem:[#allocation2 + $0x12a] sm:$0xff]  ;;  %v2352_v40 = vsel %vm2250_vm3, %v2320_v22, %v8658_v12 }
 0x173   : > { %2670 = vmatmul.bf16.gmra.mxu1 %v2418_v11  ;;  %8871 = vrot.lane.b32.xlu2 %v8845_v20, %s10534_s27  ;;  %v11206_v19 = vpop.permute.xlu0 %8671  ;;  %v8608_v20 = vunpack.i.l.bf16 %v11141_v32  ;;  %v8890_v32 = vpack.i.bf16 %v11210_v21, %v11208_v42  ;;  %v1167_v10 = vld [vmem:[#allocation2 + $0x48] sm:$0xff]  ;;  %v1168_v49 = vld [vmem:[#allocation2 + $0x50] sm:$0xff]  ;;  %v8648_v35 = vunpack.i.l.bf16 %v11143_v62 }
 0x174   : > { %v963_v16 = vsub.f32 0.0, %v11199_v8  ;;  %8866 = vrot.lane.b32.xlu1 %v8855_v26, %s10532_s23  ;;  %8876 = vrot.lane.b32.xlu0 %v8875_v15, %s10533_s26  ;;  %v2225_v50 = vsel %vm550_vm1, %v1168_v49, %v8609_v58  ;;  %v1375_v11 = vld [vmem:[#allocation2 + $0x128] sm:$0xff] }
 0x175   : > { %v8662_v26 = vpop.permute.xlu1 %8661  ;;  %v2258_v59 = vsel %vm2250_vm3, %v2225_v50, %v8614_v28  ;;  %v8653_v28 = vunpack.i.l.bf16 %v11161_v63  ;;  %v8693_v50 = vunpack.i.l.bf16 %v11189_v23 }
 0x176   : > { %v1022_v33 = vmul.f32 1.442695, %v963_v16  ;;  %v8664_v44 = vunpack.i.h.bf16 %v8662_v26  ;;  %v8663_v38 = vunpack.i.l.bf16 %v8662_v26  ;;  %v11218_v29 = vpop.permute.xlu2 %8711  ;;  %v2291_v62 = vsel %vm2283_vm4, %v2258_v59, %v8649_v60 }
 0x177   : > { %v10058_v34 = vpop.eup %10057  ;;  %v854_v39 = vpop.f32.mrf.mxu0 }
 0x178   : > { %v10060_v41 = vpop.eup %10059  ;;  %v1121_v43 = vmul.f32 %v10058_v34, %v11150_v51  ;;  %10061 = vpow2.f32 %v1022_v33  ;;  %v896_v47 = vmul.f32 %v11078_v61, %v854_v39  ;;  %v2384_v3 = vsel %vm2283_vm4, %v2352_v40, %v8663_v38  ;;  %v1295_v40 = vld [vmem:[#allocation2 + $0x61] sm:$0xff] }
 0x179   : > { %v1058_v45 = vadd.f32 1.0, %v10060_v41  ;;  %v2385_v52 = vsel %vm2283_vm4, %v2353_v13, %v8664_v44  ;;  %v2224_v51 = vsel %vm550_vm1, %v1167_v10, %v8608_v20  ;;  %v8654_v20 = vunpack.i.h.bf16 %v11161_v63  ;;  %v1376_v63 = vld [vmem:[#allocation2 + $0x138] sm:$0xff]  ;;  %v1296_v41 = vld [vmem:[#allocation2 + $0x69] sm:$0xff] }
 0x17a   : > { %1154 = vst.msk [vmem:[#allocation2 + $0x141] sm:$0xff] %vm550_vm1, %v1121_v43  ;;  %v2419_v56 = vpack.c.bf16 %v2385_v52, %v2384_v3  ;;  %v11232_v57 = vadd.f32 %v11087_v4, %v896_v47  ;;  %v2257_v5 = vsel %vm2250_vm3, %v2224_v51, %v8613_v37  ;;  %v8639_v43 = vunpack.i.h.bf16 %v11103_v27  ;;  %v1219_v3 = vld [vmem:[#allocation2 + $0x139] sm:$0xff] }
 0x17b   : > { %10063 = vrcp.f32 %v1058_v45  ;;  %8891 = vrot.lane.b32.xlu2 %v8890_v32, %s10533_s26  ;;  %v11242_v1 = vpop.permute.xlu0 %8676  ;;  %v2290_v17 = vsel %vm2283_vm4, %v2257_v5, %v8648_v35  ;;  %v8644_v13 = vunpack.i.h.bf16 %v11124_v55  ;;  %v8643_v10 = vunpack.i.l.bf16 %v11124_v55 }
 0x17c   : > { %v964_v0 = vsub.f32 0.0, %v11232_v57  ;;  %8881 = vrot.lane.b32.xlu1 %v8890_v32, %s10532_s23  ;;  %8901 = vrot.lane.b32.xlu0 %v8875_v15, %s10534_s27  ;;  %v8895_v15 = vpack.i.bf16 %v1375_v11, %v1374_v6  ;;  %v2421_v33 = vpack.c.bf16 %v2291_v62, %v2290_v17  ;;  %v8638_v32 = vunpack.i.l.bf16 %v11103_v27 }
 0x17d   : > { %2759 = vmatmul.bf16.gmra.mxu2 %v2419_v56  ;;  %v11244_v12 = vpop.permute.xlu1 %8681  ;;  %v8694_v51 = vunpack.i.h.bf16 %v11189_v23  ;;  %v8679_v23 = vunpack.i.h.bf16 %v11242_v1 }
 0x17e   : > { %v10062_v36 = vpop.eup %10061  ;;  %v1024_v24 = vmul.f32 1.442695, %v964_v0  ;;  %v11248_v18 = vpop.permute.xlu2 %8716 }
 0x17f   : > { %v1059_v16 = vadd.f32 1.0, %v10062_v36  ;;  %v856_v22 = vpop.f32.mrf.mxu0 }
 0x180   : > { %v897_v25 = vmul.f32 %v11078_v61, %v856_v22 }
 0x181   : > { %v10064_v58 = vpop.eup %10063  ;;  %10065 = vrcp.f32 %v1059_v16  ;;  %v11253_v26 = vld [vmem:[#allocation2 + $0x13a] sm:$0xff]  ;;  %v11255_v34 = vld [vmem:[#allocation2 + $0x142] sm:$0xff] }
 0x182   : > { %v1122_v37 = vmul.f32 %v10064_v58, %v11177_v31  ;;  %10067 = vpow2.f32 %v1024_v24  ;;  %v11259_v44 = vadd.f32 %v11087_v4, %v897_v25  ;;  %v8920_v38 = vpack.i.bf16 %v11255_v34, %v11253_v26  ;;  %v1377_v47 = vld [vmem:[#allocation2 + $0x140] sm:$0xff] }
 0x183   : > { %2675 = vmatmul.bf16.gmra.mxu1 %v2421_v33  ;;  %8896 = vrot.lane.b32.xlu2 %v8895_v15, %s10532_s23  ;;  %v2444_v31 = vpack.c.bf16 %v11210_v21, %v11208_v42  ;;  %v1220_v52 = vld [vmem:[#allocation2 + $0x141] sm:$0xff]  ;;  %v2322_v42 = vsel %vm550_vm1, %v1295_v40, %v8653_v28  ;;  %v2323_v21 = vsel %vm550_vm1, %v1296_v41, %v8654_v20  ;;  %v8678_v24 = vunpack.i.l.bf16 %v11242_v1 }
 0x184   : > { %1155 = vst.msk [vmem:[#allocation2 + $0x151] sm:$0xff] %vm550_vm1, %v1122_v37  ;;  %v965_v39 = vsub.f32 0.0, %v11259_v44  ;;  %8886 = vrot.lane.b32.xlu1 %v8895_v15, %s10534_s27  ;;  %8921 = vrot.lane.b32.xlu0 %v8920_v38, %s10533_s26  ;;  %v11273_v45 = vpop.permute.xlu0 %8696  ;;  %v8925_v6 = vpack.i.bf16 %v1377_v47, %v1376_v63  ;;  %v8905_v11 = vpack.i.bf16 %v1220_v52, %v1219_v3  ;;  %v1169_v58 = vld [vmem:[#allocation2 + $0x60] sm:$0xff]  ;;  %v1170_v20 = vld [vmem:[#allocation2 + $0x68] sm:$0xff]  ;;  %v8683_v52 = vunpack.i.l.bf16 %v11244_v12 }
 0x185   : > { %v8687_v56 = vpop.permute.xlu1 %8686  ;;  %8183 = vmatmul.msk.bf16.gmra.mxu3 %vm550_vm1, %v2444_v31  ;;  %v2226_v28 = vsel %vm550_vm1, %v1169_v58, %v8638_v32  ;;  %v2227_v33 = vsel %vm550_vm1, %v1170_v20, %v8639_v43 }
 0x186   : > { %v1026_v49 = vmul.f32 1.442695, %v965_v39  ;;  %v8689_v5 = vunpack.i.h.bf16 %v8687_v56  ;;  %v8688_v59 = vunpack.i.l.bf16 %v8687_v56  ;;  %v11281_v60 = vpop.permute.xlu2 %8731  ;;  %v2259_v39 = vsel %vm2250_vm3, %v2226_v28, %v8643_v10 }
 0x187   : > { %v10066_v27 = vpop.eup %10065  ;;  %v859_v35 = vpop.f32.mrf.mxu0  ;;  %v2260_v63 = vsel %vm2250_vm3, %v2227_v33, %v8644_v13  ;;  %v8684_v13 = vunpack.i.h.bf16 %v11244_v12  ;;  %v8718_v12 = vunpack.i.l.bf16 %v11248_v18 }
 0x188   : > { %v10068_v0 = vpop.eup %10067  ;;  %v1123_v55 = vmul.f32 %v10066_v27, %v11199_v8  ;;  %10069 = vpow2.f32 %v1026_v49  ;;  %v898_v17 = vmul.f32 %v11078_v61, %v859_v35  ;;  %v2354_v62 = vsel %vm2250_vm3, %v2322_v42, %v8688_v59  ;;  %v11327_v59 = vpop.f32.mrf.mxu3 }
 0x189   : > { %v1060_v36 = vadd.f32 1.0, %v10068_v0  ;;  %v2355_v16 = vsel %vm2250_vm3, %v2323_v21, %v8689_v5  ;;  %v2386_v22 = vsel %vm2283_vm4, %v2354_v62, %v8693_v50  ;;  %v2293_v31 = vsel %vm2283_vm4, %v2260_v63, %v8679_v23  ;;  %v1297_v5 = vld [vmem:[#allocation2 + $0x79] sm:$0xff] }
 0x18a   : > { %1156 = vst.msk [vmem:[#allocation2 + $0x159] sm:$0xff] %vm550_vm1, %v1123_v55  ;;  %v2387_v8 = vsel %vm2283_vm4, %v2355_v16, %v8694_v51  ;;  %v11293_v25 = vadd.f32 %v11087_v4, %v898_v17  ;;  %v2447_v27 = vpack.c.bf16 %v11255_v34, %v11253_v26  ;;  %v8719_v35 = vunpack.i.h.bf16 %v11248_v18 }
 0x18b   : > { %10071 = vrcp.f32 %v1060_v36  ;;  %v2422_v15 = vpack.c.bf16 %v2387_v8, %v2386_v22  ;;  %8911 = vrot.lane.b32.xlu2 %v8920_v38, %s10532_s23  ;;  %v2292_v38 = vsel %vm2283_vm4, %v2259_v39, %v8678_v24  ;;  %v1221_v36 = vld [vmem:[#allocation2 + $0x151] sm:$0xff]  ;;  %v8669_v22 = vunpack.i.h.bf16 %v11167_v53 }
 0x18c   : > { %v966_v37 = vsub.f32 0.0, %v11293_v25  ;;  %8926 = vrot.lane.b32.xlu0 %v8925_v6, %s10532_s23  ;;  %8906 = vrot.lane.b32.xlu1 %v8905_v11, %s10533_s26  ;;  %v11301_v1 = vpop.permute.xlu0 %8721  ;;  %v2424_v56 = vpack.c.bf16 %v2293_v31, %v2292_v38  ;;  %v8668_v8 = vunpack.i.l.bf16 %v11167_v53  ;;  %v8673_v53 = vunpack.i.l.bf16 %v11206_v19 }
 0x18d   : > { %2764 = vmatmul.bf16.gmra.mxu2 %v2422_v15  ;;  %v11305_v41 = vpop.permute.xlu1 %8701  ;;  %v8724_v34 = vunpack.i.h.bf16 %v11301_v1  ;;  %v8723_v0 = vunpack.i.l.bf16 %v11301_v1 }
 0x18e   : > { %v10070_v40 = vpop.eup %10069  ;;  %v1028_v32 = vmul.f32 1.442695, %v966_v37  ;;  %v11309_v47 = vpop.permute.xlu2 %8736 }
 0x18f   : > { %v1061_v43 = vadd.f32 1.0, %v10070_v40  ;;  %v861_v3 = vpop.f32.mrf.mxu0  ;;  %v8674_v40 = vunpack.i.h.bf16 %v11206_v19 }
 0x190   : > { %v899_v49 = vmul.f32 %v11078_v61, %v861_v3 }
 0x191   : > { %v10072_v10 = vpop.eup %10071  ;;  %10073 = vrcp.f32 %v1061_v43  ;;  %v11314_v42 = vld [vmem:[#allocation2 + $0x152] sm:$0xff]  ;;  %v11316_v21 = vld [vmem:[#allocation2 + $0x15a] sm:$0xff] }
 0x192   : > { %v1124_v51 = vmul.f32 %v10072_v10, %v11232_v57  ;;  %10075 = vpow2.f32 %v1028_v32  ;;  %v11322_v50 = vadd.f32 %v11087_v4, %v899_v49  ;;  %v8940_v61 = vpack.i.bf16 %v11316_v21, %v11314_v42  ;;  %v1298_v57 = vld [vmem:[#allocation2 + $0x81] sm:$0xff]  ;;  %v1222_v18 = vld [vmem:[#allocation2 + $0x159] sm:$0xff]  ;;  %v11359_v10 = vpop.f32.mrf.mxu3 }
 0x193   : > { %2680 = vmatmul.bf16.gmra.mxu1 %v2424_v56  ;;  %8916 = vrot.lane.b32.xlu2 %v8925_v6, %s10534_s27  ;;  %v2324_v4 = vsel %vm550_vm1, %v1297_v5, %v8683_v52  ;;  %v2325_v17 = vsel %vm550_vm1, %v1298_v57, %v8684_v13  ;;  %v1283_v6 = vld [vmem:[#allocation2 + $0x150] sm:$0xff]  ;;  %v1284_v23 = vld [vmem:[#allocation2 + $0x158] sm:$0xff]  ;;  %v8935_v28 = vpack.i.bf16 %v1222_v18, %v1221_v36  ;;  %v1172_v32 = vld [vmem:[#allocation2 + $0x80] sm:$0xff]  ;;  %v8714_v57 = vunpack.i.h.bf16 %v11218_v29 }
 0x194   : > { %1157 = vst.msk [vmem:[#allocation2 + $0x169] sm:$0xff] %vm550_vm1, %v1124_v51  ;;  %v967_v26 = vsub.f32 0.0, %v11322_v50  ;;  %8931 = vrot.lane.b32.xlu1 %v8905_v11, %s10534_s27  ;;  %8941 = vrot.lane.b32.xlu0 %v8940_v61, %s10532_s23  ;;  %v11338_v55 = vpop.permute.xlu0 %8741  ;;  %v2356_v15 = vsel %vm2250_vm3, %v2324_v4, %v8718_v12  ;;  %v2357_v33 = vsel %vm2250_vm3, %v2325_v17, %v8719_v35  ;;  %v1171_v43 = vld [vmem:[#allocation2 + $0x78] sm:$0xff]  ;;  %v8713_v4 = vunpack.i.l.bf16 %v11218_v29 }
 0x195   : > { %v8707_v16 = vpop.permute.xlu1 %8706  ;;  %8184 = vmatmul.msk.bf16.gmra.mxu3 %vm550_vm1, %v2447_v27  ;;  %v8945_v1 = vpack.i.bf16 %v1284_v23, %v1283_v6  ;;  %v2388_v39 = vsel %vm2283_vm4, %v2356_v15, %v8723_v0  ;;  %v2389_v63 = vsel %vm2283_vm4, %v2357_v33, %v8724_v34  ;;  %v2228_v52 = vsel %vm550_vm1, %v1171_v43, %v8668_v8  ;;  %v1299_v6 = vld [vmem:[#allocation2 + $0x91] sm:$0xff] }
 0x196   : > { %v1030_v62 = vmul.f32 1.442695, %v967_v26  ;;  %v11344_v11 = vpop.permute.xlu2 %8756  ;;  %v8709_v38 = vunpack.i.h.bf16 %v8707_v16  ;;  %v8708_v31 = vunpack.i.l.bf16 %v8707_v16  ;;  %v2229_v49 = vsel %vm550_vm1, %v1172_v32, %v8669_v22  ;;  %v1174_v43 = vld [vmem:[#allocation2 + $0x98] sm:$0xff] }
 0x197   : > { %v10074_v24 = vpop.eup %10073  ;;  %v2261_v56 = vsel %vm2250_vm3, %v2228_v52, %v8673_v53  ;;  %v2262_v27 = vsel %vm2250_vm3, %v2229_v49, %v8674_v40  ;;  %v2450_v17 = vpack.c.bf16 %v11316_v21, %v11314_v42  ;;  %v8699_v42 = vunpack.i.h.bf16 %v11273_v45 }
 0x198   : > { %v10076_v58 = vpop.eup %10075  ;;  %v1125_v20 = vmul.f32 %v10074_v24, %v11259_v44  ;;  %10077 = vpow2.f32 %v1030_v62  ;;  %v2425_v44 = vpack.c.bf16 %v2389_v63, %v2388_v39  ;;  %v2295_v5 = vsel %vm2283_vm4, %v2262_v27, %v8709_v38  ;;  %v1300_v24 = vld [vmem:[#allocation2 + $0x99] sm:$0xff] }
 0x199   : > { %v1062_v37 = vadd.f32 1.0, %v10076_v58  ;;  %v8698_v21 = vunpack.i.l.bf16 %v11273_v45  ;;  %v2326_v8 = vsel %vm550_vm1, %v1299_v6, %v8713_v4  ;;  %v2327_v15 = vsel %vm550_vm1, %v1300_v24, %v8714_v57 }
 0x19a   : > { %1158 = vst.msk [vmem:[#allocation2 + $0x171] sm:$0xff] %vm550_vm1, %v1125_v20  ;;  %v8704_v20 = vunpack.i.h.bf16 %v11305_v41  ;;  %v11393_v39 = vpop.f32.mrf.mxu3  ;;  %v8739_v32 = vunpack.i.h.bf16 %v11309_v47  ;;  %v2231_v52 = vsel %vm550_vm1, %v1174_v43, %v8699_v42 }
 0x19b   : > { %10079 = vrcp.f32 %v1062_v37  ;;  %8936 = vrot.lane.b32.xlu2 %v8935_v28, %s10533_s26  ;;  %v1223_v35 = vld [vmem:[#allocation2 + $0x169] sm:$0xff] }
 0x19c   : > { %8951 = vrot.lane.b32.xlu1 %v8940_v61, %s10533_s26  ;;  %8946 = vrot.lane.b32.xlu0 %v8945_v1, %s10534_s27  ;;  %v8747_v3 = vpop.permute.xlu0 %8746  ;;  %v2294_v61 = vsel %vm2283_vm4, %v2261_v56, %v8708_v31  ;;  %v1285_v27 = vld [vmem:[#allocation2 + $0x168] sm:$0xff] }
 0x19d   : > { %2769 = vmatmul.bf16.gmra.mxu2 %v2425_v44  ;;  %v11361_v13 = vpop.permute.xlu1 %8726  ;;  %v2427_v36 = vpack.c.bf16 %v2295_v5, %v2294_v61  ;;  %v8749_v62 = vunpack.i.h.bf16 %v8747_v3  ;;  %v8748_v16 = vunpack.i.l.bf16 %v8747_v3  ;;  %v1173_v44 = vld [vmem:[#allocation2 + $0x90] sm:$0xff] }
 0x19e   : > { %v10078_v19 = vpop.eup %10077  ;;  %v11365_v12 = vpop.permute.xlu2 %8781  ;;  %v2230_v3 = vsel %vm550_vm1, %v1173_v44, %v8698_v21  ;;  %v8728_v24 = vunpack.i.l.bf16 %v11361_v13  ;;  %v1176_v44 = vld [vmem:[#allocation2 + $0xb0] sm:$0xff] }
 0x19f   : > { %v1063_v51 = vadd.f32 1.0, %v10078_v19  ;;  %v2358_v40 = vsel %vm2250_vm3, %v2326_v8, %v8748_v16  ;;  %v2359_v53 = vsel %vm2250_vm3, %v2327_v15, %v8749_v62  ;;  %v2264_v19 = vsel %vm2250_vm3, %v2231_v52, %v8704_v20  ;;  %v1302_v20 = vld [vmem:[#allocation2 + $0xb1] sm:$0xff] }
 0x1a0   : > { %v8743_v62 = vunpack.i.l.bf16 %v11338_v55 }
 0x1a1   : > { %v10080_v26 = vpop.eup %10079  ;;  %10081 = vrcp.f32 %v1063_v51  ;;  %v1224_v34 = vld [vmem:[#allocation2 + $0x171] sm:$0xff] }
 0x1a2   : > { %v1126_v0 = vmul.f32 %v10080_v26, %v11293_v25  ;;  %v8965_v18 = vpack.i.bf16 %v1224_v34, %v1223_v35  ;;  %v11380_v25 = vld [vmem:[#allocation2 + $0x16a] sm:$0xff]  ;;  %v11382_v23 = vld [vmem:[#allocation2 + $0x172] sm:$0xff]  ;;  %v2297_v35 = vsel %vm2283_vm4, %v2264_v19, %v8739_v32  ;;  %v11424_v34 = vpop.f32.mrf.mxu3  ;;  %v8733_v19 = vunpack.i.l.bf16 %v11281_v60 }
 0x1a3   : > { %2685 = vmatmul.bf16.gmra.mxu1 %v2427_v36  ;;  %8961 = vrot.lane.b32.xlu2 %v8935_v28, %s10534_s27  ;;  %v8703_v28 = vunpack.i.l.bf16 %v11305_v41  ;;  %v8980_v63 = vpack.i.bf16 %v11382_v23, %v11380_v25  ;;  %v1286_v51 = vld [vmem:[#allocation2 + $0x170] sm:$0xff] }
 0x1a4   : > { %1159 = vst.msk [vmem:[#allocation2 + $0x181] sm:$0xff] %vm550_vm1, %v1126_v0  ;;  %8956 = vrot.lane.b32.xlu1 %v8945_v1, %s10532_s23  ;;  %8966 = vrot.lane.b32.xlu0 %v8965_v18, %s10533_s26  ;;  %v11378_v29 = vpop.permute.xlu0 %8761  ;;  %v8975_v26 = vpack.i.bf16 %v1286_v51, %v1285_v27 }
 0x1a5   : > { %v8752_v22 = vpop.permute.xlu1 %8751  ;;  %8185 = vmatmul.msk.bf16.gmra.mxu3 %vm550_vm1, %v2450_v17  ;;  %v2263_v49 = vsel %vm2250_vm3, %v2230_v3, %v8703_v28  ;;  %v8744_v17 = vunpack.i.h.bf16 %v11338_v55  ;;  %v8729_v55 = vunpack.i.h.bf16 %v11361_v13  ;;  %v8784_v28 = vunpack.i.h.bf16 %v11365_v12 }
 0x1a6   : > { %v8754_v33 = vunpack.i.h.bf16 %v8752_v22  ;;  %v8753_v37 = vunpack.i.l.bf16 %v8752_v22  ;;  %v11391_v1 = vpop.permute.xlu2 %8801 }
 0x1a7   : > { %v10082_v58 = vpop.eup %10081  ;;  %v2233_v3 = vsel %vm550_vm1, %v1176_v44, %v8729_v55 }
 0x1a8   : > { %v1127_v45 = vmul.f32 %v10082_v58, %v11322_v50  ;;  %v2390_v38 = vsel %vm2283_vm4, %v2358_v40, %v8753_v37  ;;  %v2391_v31 = vsel %vm2283_vm4, %v2359_v53, %v8754_v33  ;;  %v8738_v50 = vunpack.i.l.bf16 %v11309_v47  ;;  %v1301_v58 = vld [vmem:[#allocation2 + $0xa9] sm:$0xff] }
 0x1a9   : > { %v2428_v41 = vpack.c.bf16 %v2391_v31, %v2390_v38  ;;  %v8783_v33 = vunpack.i.l.bf16 %v11365_v12  ;;  %v2328_v37 = vsel %vm550_vm1, %v1301_v58, %v8743_v62  ;;  %v1175_v38 = vld [vmem:[#allocation2 + $0xa8] sm:$0xff]  ;;  %v8759_v58 = vunpack.i.h.bf16 %v11344_v11 }
 0x1aa   : > { %1160 = vst.msk [vmem:[#allocation2 + $0x189] sm:$0xff] %vm550_vm1, %v1127_v45  ;;  %v2296_v5 = vsel %vm2283_vm4, %v2263_v49, %v8738_v50  ;;  %v2329_v45 = vsel %vm550_vm1, %v1302_v20, %v8744_v17  ;;  %v2232_v43 = vsel %vm550_vm1, %v1175_v38, %v8728_v24  ;;  %v11454_v52 = vpop.f32.mrf.mxu3  ;;  %v8734_v49 = vunpack.i.h.bf16 %v11281_v60  ;;  %v1303_v24 = vld [vmem:[#allocation2 + $0xc1] sm:$0xff] }
 0x1ab   : > { %8981 = vrot.lane.b32.xlu2 %v8980_v63, %s10533_s26  ;;  %v2430_v0 = vpack.c.bf16 %v2297_v35, %v2296_v5  ;;  %v1382_v6 = vld [vmem:[#allocation2 + $0x180] sm:$0xff]  ;;  %v8758_v20 = vunpack.i.l.bf16 %v11344_v11 }
 0x1ac   : > { %8971 = vrot.lane.b32.xlu1 %v8980_v63, %s10532_s23  ;;  %8991 = vrot.lane.b32.xlu0 %v8965_v18, %s10534_s27  ;;  %v11412_v56 = vpop.permute.xlu0 %8766  ;;  %v2453_v18 = vpack.c.bf16 %v11382_v23, %v11380_v25  ;;  %v1414_v22 = vld [vmem:[#allocation2 + $0x181] sm:$0xff]  ;;  %v2266_v5 = vsel %vm2250_vm3, %v2233_v3, %v8734_v49 }
 0x1ad   : > { %2774 = vmatmul.bf16.gmra.mxu2 %v2428_v41  ;;  %v11414_v47 = vpop.permute.xlu1 %8771  ;;  %v8769_v12 = vunpack.i.h.bf16 %v11412_v56  ;;  %v8768_v32 = vunpack.i.l.bf16 %v11412_v56  ;;  %v2265_v56 = vsel %vm2250_vm3, %v2232_v43, %v8733_v19  ;;  %v1177_v38 = vld [vmem:[#allocation2 + $0xc0] sm:$0xff]  ;;  %v8804_v19 = vunpack.i.h.bf16 %v11391_v1 }
 0x1ae   : > { %v11416_v61 = vpop.permute.xlu2 %8806 }
 0x1af   : > { %v2299_v60 = vsel %vm2283_vm4, %v2266_v5, %v8769_v12  ;;  %v8809_v62 = vunpack.i.h.bf16 %v11416_v61 }
 0x1b1   : > { %v11420_v57 = vld [vmem:[#allocation2 + $0x182] sm:$0xff]  ;;  %v11422_v4 = vld [vmem:[#allocation2 + $0x18a] sm:$0xff] }
 0x1b2   : > { %v9000_v36 = vpack.i.bf16 %v11422_v4, %v11420_v57  ;;  %v1383_v21 = vld [vmem:[#allocation2 + $0x188] sm:$0xff]  ;;  %v2456_v17 = vpack.c.bf16 %v11422_v4, %v11420_v57 }
 0x1b3   : > { %2690 = vmatmul.bf16.gmra.mxu1 %v2430_v0  ;;  %8986 = vrot.lane.b32.xlu2 %v8975_v26, %s10532_s23  ;;  %v1415_v25 = vld [vmem:[#allocation2 + $0x189] sm:$0xff]  ;;  %v9005_v63 = vpack.i.bf16 %v1383_v21, %v1382_v6  ;;  %v8774_v0 = vunpack.i.h.bf16 %v11414_v47  ;;  %v8808_v6 = vunpack.i.l.bf16 %v11416_v61 }
 0x1b4   : > { %8976 = vrot.lane.b32.xlu1 %v8975_v26, %s10534_s27  ;;  %9001 = vrot.lane.b32.xlu0 %v9000_v36, %s10533_s26  ;;  %v11435_v16 = vpop.permute.xlu0 %8786  ;;  %v9010_v13 = vpack.i.bf16 %v1415_v25, %v1414_v22  ;;  %v2298_v26 = vsel %vm2283_vm4, %v2265_v56, %v8768_v32  ;;  %v8773_v36 = vunpack.i.l.bf16 %v11414_v47 }
 0x1b5   : > { %v8777_v42 = vpop.permute.xlu1 %8776  ;;  %8186 = vmatmul.msk.bf16.gmra.mxu3 %vm550_vm1, %v2453_v18  ;;  %v2433_v18 = vpack.c.bf16 %v2299_v60, %v2298_v26  ;;  %v8788_v60 = vunpack.i.l.bf16 %v11435_v16 }
 0x1b6   : > { %v8779_v23 = vunpack.i.h.bf16 %v8777_v42  ;;  %v8778_v8 = vunpack.i.l.bf16 %v8777_v42  ;;  %v11440_v15 = vpop.permute.xlu2 %8821  ;;  %v1304_v42 = vld [vmem:[#allocation2 + $0xc9] sm:$0xff]  ;;  %v2330_v25 = vsel %vm550_vm1, %v1303_v24, %v8773_v36  ;;  %v1306_v36 = vld [vmem:[#allocation2 + $0xe1] sm:$0xff] }
 0x1b7   : > { %v2331_v55 = vsel %vm550_vm1, %v1304_v42, %v8774_v0  ;;  %v2362_v61 = vsel %vm2250_vm3, %v2330_v25, %v8808_v6  ;;  %v1305_v0 = vld [vmem:[#allocation2 + $0xd9] sm:$0xff]  ;;  %v2333_v24 = vsel %vm550_vm1, %v1306_v36, %v8804_v19 }
 0x1b8   : > { %v2360_v40 = vsel %vm2250_vm3, %v2328_v37, %v8778_v8  ;;  %v2361_v53 = vsel %vm2250_vm3, %v2329_v45, %v8779_v23  ;;  %v11477_v23 = vpop.f32.mrf.mxu3  ;;  %v2363_v4 = vsel %vm2250_vm3, %v2331_v55, %v8809_v62  ;;  %v8764_v37 = vunpack.i.h.bf16 %v11378_v29 }
 0x1b9   : > { %v2392_v31 = vsel %vm2283_vm4, %v2360_v40, %v8783_v33  ;;  %v2393_v41 = vsel %vm2283_vm4, %v2361_v53, %v8784_v28  ;;  %v8763_v45 = vunpack.i.l.bf16 %v11378_v29  ;;  %v2661_v53 = vpop.f32.mrf.mxu1 }
 0x1ba   : > { %v2431_v50 = vpack.c.bf16 %v2393_v41, %v2392_v31  ;;  %v1178_v31 = vld [vmem:[#allocation2 + $0xc8] sm:$0xff]  ;;  %v2234_v41 = vsel %vm550_vm1, %v1177_v38, %v8758_v20 }
 0x1bb   : > { %8996 = vrot.lane.b32.xlu2 %v9005_v63, %s10534_s27  ;;  %v2235_v44 = vsel %vm550_vm1, %v1178_v31, %v8759_v58  ;;  %v2267_v11 = vsel %vm2250_vm3, %v2234_v41, %v8763_v45  ;;  %v1180_v58 = vld [vmem:[#allocation2 + $0xe0] sm:$0xff] }
 0x1bc   : > { %9006 = vrot.lane.b32.xlu0 %v9005_v63, %s10532_s23  ;;  %9011 = vrot.lane.b32.xlu1 %v9010_v13, %s10534_s27  ;;  %v8812_v27 = vpop.permute.xlu0 %8811  ;;  %v2268_v43 = vsel %vm2250_vm3, %v2235_v44, %v8764_v37 }
 0x1bd   : > { %2779 = vmatmul.bf16.gmra.mxu2 %v2431_v50  ;;  %v11461_v51 = vpop.permute.xlu1 %8791  ;;  %v8814_v21 = vunpack.i.h.bf16 %v8812_v27  ;;  %v8813_v22 = vunpack.i.l.bf16 %v8812_v27  ;;  %v8803_v27 = vunpack.i.l.bf16 %v11391_v1 }
 0x1be   : > { %v11465_v35 = vpop.permute.xlu2 %8826  ;;  %v8794_v1 = vunpack.i.h.bf16 %v11461_v51  ;;  %v8793_v42 = vunpack.i.l.bf16 %v11461_v51 }
 0x1bf   : > { %v2394_v28 = vsel %vm2283_vm4, %v2362_v61, %v8813_v22  ;;  %v2395_v33 = vsel %vm2283_vm4, %v2363_v4, %v8814_v21  ;;  %v2332_v6 = vsel %vm550_vm1, %v1305_v0, %v8803_v27  ;;  %v8828_v51 = vunpack.i.l.bf16 %v11465_v35 }
 0x1c0   : > { %v2434_v13 = vpack.c.bf16 %v2395_v33, %v2394_v28  ;;  %v8829_v28 = vunpack.i.h.bf16 %v11465_v35  ;;  %v11535_v35 = vld [vmem:[%s14859_s5] ss:$0 sm:$0xff]  ;;  %v11553_v0 = vpop.f32.mrf.mxu3 }
 0x1c1   : > { %v11504_v26 = vpop.f32.mrf.mxu1 }
 0x1c3   : > { %2695 = vmatmul.bf16.gmra.mxu1 %v2433_v18  ;;  %v8789_v18 = vunpack.i.h.bf16 %v11435_v16 }
 0x1c4   : > { %v11480_v8 = vpop.permute.xlu0 %8831 }
 0x1c5   : > { %8187 = vmatmul.msk.bf16.gmra.mxu3 %vm550_vm1, %v2456_v17  ;;  %v8797_v47 = vpop.permute.xlu1 %8796  ;;  %v2237_v37 = vsel %vm550_vm1, %v1180_v58, %v8789_v18 }
 0x1c6   : > { %v11482_v57 = vpop.permute.xlu2 %8846  ;;  %v8799_v63 = vunpack.i.h.bf16 %v8797_v47  ;;  %v8798_v40 = vunpack.i.l.bf16 %v8797_v47  ;;  %v1179_v47 = vld [vmem:[#allocation2 + $0xd8] sm:$0xff] }
 0x1c7   : > { %v2236_v20 = vsel %vm550_vm1, %v1179_v47, %v8788_v60 }
 0x1c8   : > { %v2300_v29 = vsel %vm2283_vm4, %v2267_v11, %v8798_v40  ;;  %v2301_v50 = vsel %vm2283_vm4, %v2268_v43, %v8799_v63  ;;  %v2269_v45 = vsel %vm2250_vm3, %v2236_v20, %v8793_v42  ;;  %v2270_v63 = vsel %vm2250_vm3, %v2237_v37, %v8794_v1 }
 0x1c9   : > { %v2436_v49 = vpack.c.bf16 %v2301_v50, %v2300_v29  ;;  %v2302_v31 = vsel %vm2283_vm4, %v2269_v45, %v8828_v51  ;;  %v2303_v41 = vsel %vm2283_vm4, %v2270_v63, %v8829_v28  ;;  %v8834_v50 = vunpack.i.h.bf16 %v11480_v8 }
 0x1ca   : > { %v2439_v43 = vpack.c.bf16 %v2303_v41, %v2302_v31  ;;  %v8823_v37 = vunpack.i.l.bf16 %v11440_v15 }
 0x1cc   : > { %v8837_v12 = vpop.permute.xlu0 %8836 }
 0x1cd   : > { %2784 = vmatmul.bf16.gmra.mxu2 %v2434_v13  ;;  %v11496_v32 = vpop.permute.xlu1 %8816  ;;  %v8839_v56 = vunpack.i.h.bf16 %v8837_v12  ;;  %v8838_v5 = vunpack.i.l.bf16 %v8837_v12 }
 0x1ce   : > { %v11500_v3 = vpop.permute.xlu2 %8871  ;;  %v8818_v19 = vunpack.i.l.bf16 %v11496_v32  ;;  %v8819_v27 = vunpack.i.h.bf16 %v11496_v32 }
 0x1cf   : > { %v2364_v25 = vsel %vm2250_vm3, %v2332_v6, %v8838_v5  ;;  %v2365_v55 = vsel %vm2250_vm3, %v2333_v24, %v8839_v56  ;;  %v11526_v40 = vpop.f32.mrf.mxu1  ;;  %v8873_v5 = vunpack.i.l.bf16 %v11500_v3  ;;  %v1308_v6 = vld [vmem:[#allocation2 + $0xf9] sm:$0xff]  ;;  %v1181_v24 = vld [vmem:[#allocation2 + $0xf0] sm:$0xff] }
 0x1d3   : > { %2700 = vmatmul.bf16.gmra.mxu1 %v2436_v49  ;;  %v8833_v49 = vunpack.i.l.bf16 %v11480_v8  ;;  %v8874_v8 = vunpack.i.h.bf16 %v11500_v3 }
 0x1d4   : > { %v11508_v62 = vpop.permute.xlu0 %8851 }
 0x1d5   : > { %v8842_v17 = vpop.permute.xlu1 %8841 }
 0x1d6   : > { %v8844_v21 = vunpack.i.h.bf16 %v8842_v17  ;;  %v8843_v22 = vunpack.i.l.bf16 %v8842_v17  ;;  %v11516_v61 = vpop.permute.xlu2 %8891  ;;  %v1307_v17 = vld [vmem:[#allocation2 + $0xf1] sm:$0xff] }
 0x1d7   : > { %v11556_v1 = vpop.f32.mrf.mxu1  ;;  %v2334_v32 = vsel %vm550_vm1, %v1307_v17, %v8833_v49 }
 0x1d8   : > { %v2396_v16 = vsel %vm2283_vm4, %v2364_v25, %v8843_v22  ;;  %v2397_v4 = vsel %vm2283_vm4, %v2365_v55, %v8844_v21  ;;  %v2335_v21 = vsel %vm550_vm1, %v1308_v6, %v8834_v50  ;;  %v1182_v22 = vld [vmem:[#allocation2 + $0xf8] sm:$0xff]  ;;  %v2238_v25 = vsel %vm550_vm1, %v1181_v24, %v8818_v19  ;;  %v1309_v6 = vld [vmem:[#allocation2 + $0x109] sm:$0xff] }
 0x1d9   : > { %v2437_v33 = vpack.c.bf16 %v2397_v4, %v2396_v16  ;;  %v2239_v4 = vsel %vm550_vm1, %v1182_v22, %v8819_v27 }
 0x1dc   : > { %v8857_v38 = vpop.permute.xlu0 %8856 }
 0x1dd   : > { %2789 = vmatmul.bf16.gmra.mxu2 %v2437_v33  ;;  %v11528_v13 = vpop.permute.xlu1 %8861  ;;  %v8859_v47 = vunpack.i.h.bf16 %v8857_v38  ;;  %v8858_v58 = vunpack.i.l.bf16 %v8857_v38  ;;  %v8824_v33 = vunpack.i.h.bf16 %v11440_v15 }
 0x1de   : > { %v11537_v12 = vpop.permute.xlu2 %8896  ;;  %v8864_v50 = vunpack.i.h.bf16 %v11528_v13  ;;  %v8863_v49 = vunpack.i.l.bf16 %v11528_v13  ;;  %v1310_v13 = vld [vmem:[#allocation2 + $0x111] sm:$0xff] }
 0x1df   : > { %v2750_v44 = vpop.f32.mrf.mxu2 }
 0x1e0   : > { %v2751_v11 = vadd.f32 %v2750_v44, %v2661_v53  ;;  %v11546_v53 = vld [vmem:[%s14860_s6] ss:$0 sm:$0xff]  ;;  %v2271_v44 = vsel %vm2250_vm3, %v2238_v25, %v8823_v37 }
 0x1e1   : > { %v2304_v15 = vsel %vm2283_vm4, %v2271_v44, %v8858_v58  ;;  %v8848_v58 = vunpack.i.l.bf16 %v11482_v57 }
 0x1e2   : > { %v2840_v29 = vadd.f32 %v11327_v59, %v2751_v11  ;;  %v2272_v11 = vsel %vm2250_vm3, %v2239_v4, %v8824_v33 }
 0x1e3   : > { %2705 = vmatmul.bf16.gmra.mxu1 %v2439_v43 }
 0x1e4   : > { %v2923_v56 = vmul.f32 %v11535_v35, %v2840_v29 }
 0x1e6   : > { %v8867_v60 = vpop.permute.xlu1 %8866  ;;  %v11551_v59 = vpop.permute.xlu0 %8876  ;;  %v11562_v55 = vadd.f32 %v11546_v53, %v2923_v56 }
 0x1e7   : > { %v8869_v36 = vunpack.i.h.bf16 %v8867_v60  ;;  %v8868_v18 = vunpack.i.l.bf16 %v8867_v60  ;;  %v2752_v42 = vpop.f32.mrf.mxu2  ;;  %v11574_v41 = vpop.permute.xlu2 %8911 }
 0x1e8   : > { %v2753_v3 = vadd.f32 %v2752_v42, %v11504_v26  ;;  %v2991_v51 = vsub.f32 0.0, %v11562_v55  ;;  %v8898_v42 = vunpack.i.l.bf16 %v11537_v12 }
 0x1e9   : > { %v2366_v16 = vsel %vm2250_vm3, %v2334_v32, %v8868_v18  ;;  %v2367_v20 = vsel %vm2250_vm3, %v2335_v21, %v8869_v36  ;;  %v8899_v18 = vunpack.i.h.bf16 %v11537_v12  ;;  %v2336_v32 = vsel %vm550_vm1, %v1309_v6, %v8863_v49 }
 0x1ea   : > { %v2398_v28 = vsel %vm2283_vm4, %v2366_v16, %v8873_v5  ;;  %v2842_v45 = vadd.f32 %v11359_v10, %v2753_v3  ;;  %v2399_v63 = vsel %vm2283_vm4, %v2367_v20, %v8874_v8  ;;  %v3023_v31 = vmul.f32 1.442695, %v2991_v51  ;;  %v11590_v5 = vpop.f32.mrf.mxu3 }
 0x1eb   : > { %v2440_v26 = vpack.c.bf16 %v2399_v63, %v2398_v28  ;;  %v2305_v10 = vsel %vm2283_vm4, %v2272_v11, %v8859_v47  ;;  %v2337_v21 = vsel %vm550_vm1, %v1310_v13, %v8864_v50  ;;  %v8854_v12 = vunpack.i.h.bf16 %v11508_v62  ;;  %v1184_v50 = vld [vmem:[#allocation2 + $0x110] sm:$0xff] }
 0x1ec   : > { %v2924_v38 = vmul.f32 %v11535_v35, %v2842_v45  ;;  %10083 = vpow2.f32 %v3023_v31  ;;  %v2442_v8 = vpack.c.bf16 %v2305_v10, %v2304_v15  ;;  %v8853_v51 = vunpack.i.l.bf16 %v11508_v62  ;;  %v1183_v10 = vld [vmem:[#allocation2 + $0x108] sm:$0xff] }
 0x1ed   : > { %2794 = vmatmul.bf16.gmra.mxu2 %v2440_v26  ;;  %v2368_v45 = vsel %vm2250_vm3, %v2336_v32, %v8898_v42  ;;  %v2369_v63 = vsel %vm2250_vm3, %v2337_v21, %v8899_v18 }
 0x1ee   : > { %v11579_v43 = vpop.permute.xlu1 %8881  ;;  %v8902_v29 = vpop.permute.xlu0 %8901  ;;  %v11588_v56 = vadd.f32 %v11546_v53, %v2924_v38 }
 0x1ef   : > { %v2755_v19 = vpop.f32.mrf.mxu2  ;;  %v8904_v25 = vunpack.i.h.bf16 %v8902_v29  ;;  %v11605_v20 = vpop.permute.xlu2 %8916 }
 0x1f0   : > { %v11585_v27 = vpop.f32.mrf.mxu1  ;;  %v2756_v60 = vadd.f32 %v2755_v19, %v11526_v40  ;;  %v2992_v36 = vsub.f32 0.0, %v11588_v56  ;;  %v8903_v40 = vunpack.i.l.bf16 %v8902_v29 }
 0x1f1   : > { %v2401_v38 = vsel %vm2283_vm4, %v2369_v63, %v8904_v25  ;;  %v8894_v25 = vunpack.i.h.bf16 %v11516_v61  ;;  %v1312_v63 = vld [vmem:[#allocation2 + $0x129] sm:$0xff] }
 0x1f2   : > { %v2845_v17 = vadd.f32 %v11393_v39, %v2756_v60  ;;  %v10084_v24 = vpop.eup %10083  ;;  %v3025_v22 = vmul.f32 1.442695, %v2992_v36  ;;  %v8849_v39 = vunpack.i.h.bf16 %v11482_v57  ;;  %v2400_v31 = vsel %vm2283_vm4, %v2368_v45, %v8903_v40  ;;  %v11619_v29 = vpop.f32.mrf.mxu3  ;;  %v1311_v45 = vld [vmem:[#allocation2 + $0x121] sm:$0xff] }
 0x1f3   : > { %2710 = vmatmul.bf16.gmra.mxu1 %v2442_v8  ;;  %v3087_v3 = vadd.f32 1.0, %v10084_v24  ;;  %v2443_v19 = vpack.c.bf16 %v2401_v38, %v2400_v31  ;;  %v2240_v60 = vsel %vm550_vm1, %v1183_v10, %v8848_v58  ;;  %v8893_v40 = vunpack.i.l.bf16 %v11516_v61 }
 0x1f4   : > { %v2925_v47 = vmul.f32 %v11535_v35, %v2845_v17  ;;  %10085 = vpow2.f32 %v3025_v22  ;;  %v2241_v8 = vsel %vm550_vm1, %v1184_v50, %v8849_v39  ;;  %v8878_v39 = vunpack.i.l.bf16 %v11551_v59 }
 0x1f5   : > { %10087 = vrcp.f32 %v3087_v3  ;;  %v2274_v36 = vsel %vm2250_vm3, %v2241_v8, %v8854_v12  ;;  %v2338_v31 = vsel %vm550_vm1, %v1311_v45, %v8893_v40  ;;  %v2339_v38 = vsel %vm550_vm1, %v1312_v63, %v8894_v25 }
 0x1f6   : > { %v8887_v16 = vpop.permute.xlu1 %8886  ;;  %v11600_v4 = vpop.permute.xlu0 %8921  ;;  %v11608_v28 = vadd.f32 %v11546_v53, %v2925_v47 }
 0x1f7   : > { %v2757_v33 = vpop.f32.mrf.mxu2  ;;  %v8889_v44 = vunpack.i.h.bf16 %v8887_v16  ;;  %v8888_v11 = vunpack.i.l.bf16 %v8887_v16  ;;  %v11636_v47 = vpop.permute.xlu2 %8936 }
 0x1f8   : > { %v11611_v37 = vpop.f32.mrf.mxu1  ;;  %v2993_v26 = vsub.f32 0.0, %v11608_v28  ;;  %v2758_v57 = vadd.f32 %v2757_v33, %v11556_v1  ;;  %v2273_v1 = vsel %vm2250_vm3, %v2240_v60, %v8853_v51 }
 0x1f9   : > { %v2306_v24 = vsel %vm2283_vm4, %v2273_v1, %v8888_v11  ;;  %v2307_v42 = vsel %vm2283_vm4, %v2274_v36, %v8889_v44  ;;  %v8879_v11 = vunpack.i.h.bf16 %v11551_v59 }
 0x1fa   : > { %v3027_v62 = vmul.f32 1.442695, %v2993_v26  ;;  %v2847_v15 = vadd.f32 %v11424_v34, %v2758_v57  ;;  %v10086_v49 = vpop.eup %10085  ;;  %v2445_v16 = vpack.c.bf16 %v2307_v42, %v2306_v24  ;;  %v11647_v26 = vpop.f32.mrf.mxu3  ;;  %v10470_v42 = vld [vmem:[#allocation2 + $0x128] sm:$0xff] }
 0x1fb   : > { %v3088_v18 = vadd.f32 1.0, %v10086_v49  ;;  %v10088_v17 = vpop.eup %10087  ;;  %v8884_v49 = vunpack.i.h.bf16 %v11579_v43 }
 0x1fc   : > { %10089 = vpow2.f32 %v3027_v62  ;;  %v2926_v6 = vmul.f32 %v11535_v35, %v2847_v15  ;;  %v3151_v32 = vmul.f32 %v10088_v17, %v11562_v55 }
 0x1fd   : > { %2799 = vmatmul.bf16.gmra.mxu2 %v2443_v19  ;;  %10091 = vrcp.f32 %v3088_v18  ;;  %v8883_v19 = vunpack.i.l.bf16 %v11579_v43 }
 0x1fe   : > { %v8927_v13 = vpop.permute.xlu0 %8926  ;;  %v11627_v34 = vpop.permute.xlu1 %8906  ;;  %5266 = vrot.lane.b32.xlu0 %v3151_v32, %s10534_s27  ;;  %3183 = vst.msk [vmem:[#allocation2 + $0x19] sm:$0xff] %vm550_vm1, %v3151_v32  ;;  %v11643_v55 = vadd.f32 %v11546_v53, %v2926_v6  ;;  %v8919_v32 = vunpack.i.h.bf16 %v11605_v20 }
 0x1ff   : > { %v8929_v61 = vunpack.i.h.bf16 %v8927_v13  ;;  %v8928_v33 = vunpack.i.l.bf16 %v8927_v13 }
 0x200   : > { %v2760_v21 = vpop.f32.mrf.mxu2  ;;  %v11632_v22 = vpop.f32.mrf.mxu1 }
 0x201   : > { %v2761_v3 = vadd.f32 %v2760_v21, %v11585_v27  ;;  %v2994_v27 = vsub.f32 0.0, %v11643_v55  ;;  %v2370_v59 = vsel %vm2250_vm3, %v2338_v31, %v8928_v33  ;;  %v2371_v17 = vsel %vm2250_vm3, %v2339_v38, %v8929_v61 }
 0x202   : > { %v10090_v58 = vpop.eup %10089  ;;  %v8918_v21 = vunpack.i.l.bf16 %v11605_v20  ;;  %v11690_v63 = vpop.f32.mrf.mxu3 }
 0x203   : > { %v2850_v12 = vadd.f32 %v11454_v52, %v2761_v3  ;;  %2715 = vmatmul.bf16.gmra.mxu1 %v2445_v16  ;;  %v3089_v51 = vadd.f32 1.0, %v10090_v58  ;;  %v10092_v44 = vpop.eup %10091  ;;  %v10469_v52 = vld [vmem:[#allocation2 + $0x120] sm:$0xff]  ;;  %v3029_v50 = vmul.f32 1.442695, %v2994_v27 }
 0x204   : > { %v2242_v62 = vsel %vm550_vm1, %v10469_v52, %v8878_v39  ;;  %v3152_v1 = vmul.f32 %v10092_v44, %v11588_v56  ;;  %v2243_v56 = vsel %vm550_vm1, %v10470_v42, %v8879_v11 }
 0x205   : > { %v2927_v57 = vmul.f32 %v11535_v35, %v2850_v12  ;;  %10093 = vrcp.f32 %v3089_v51  ;;  %v2275_v3 = vsel %vm2250_vm3, %v2242_v62, %v8883_v19  ;;  %v2276_v16 = vsel %vm2250_vm3, %v2243_v56, %v8884_v49  ;;  %v3249_v31 = vld [vmem:[#allocation2 + $0x19] sm:$0xff] }
 0x206   : > { %v8932_v15 = vpop.permute.xlu1 %8931  ;;  %v11654_v10 = vpop.permute.xlu0 %8941  ;;  %10095 = vpow2.f32 %v3029_v50  ;;  %5268 = vrot.lane.b32.xlu1 %v3152_v1, %s10534_s27  ;;  %3184 = vst.msk [vmem:[#allocation2 + $0x21] sm:$0xff] %vm550_vm1, %v3152_v1  ;;  %v2309_v45 = vsel %vm2283_vm4, %v2276_v16, %v8919_v32  ;;  %v8924_v19 = vunpack.i.h.bf16 %v11600_v4 }
 0x207   : > { %v8934_v60 = vunpack.i.h.bf16 %v8932_v15  ;;  %v8933_v8 = vunpack.i.l.bf16 %v8932_v15  ;;  %v11667_v43 = vadd.f32 %v11546_v53, %v2927_v57 }
 0x208   : > { %v2762_v36 = vpop.f32.mrf.mxu2  ;;  %v11659_v18 = vpop.f32.mrf.mxu1 }
 0x209   : > { %v2763_v6 = vadd.f32 %v2762_v36, %v11611_v37  ;;  %v2402_v13 = vsel %vm2283_vm4, %v2370_v59, %v8933_v8  ;;  %v2403_v24 = vsel %vm2283_vm4, %v2371_v17, %v8934_v60  ;;  %v11674_v37 = vpop.permute.xlu2 %8961  ;;  %v2995_v58 = vsub.f32 0.0, %v11667_v43 }
 0x20a   : > { %v2446_v25 = vpack.c.bf16 %v2403_v24, %v2402_v13  ;;  %v8923_v59 = vunpack.i.l.bf16 %v11600_v4  ;;  %v8909_v17 = vunpack.i.h.bf16 %v11627_v34  ;;  %v8913_v4 = vunpack.i.l.bf16 %v11574_v41  ;;  %v10471_v24 = vld [vmem:[#allocation2 + $0x141] sm:$0xff] }
 0x20b   : > { %v2852_v40 = vadd.f32 %v11477_v23, %v2763_v6  ;;  %v10094_v39 = vpop.eup %10093  ;;  %v2308_v23 = vsel %vm2283_vm4, %v2275_v3, %v8918_v21  ;;  %v3031_v44 = vmul.f32 1.442695, %v2995_v58  ;;  %v8908_v6 = vunpack.i.l.bf16 %v11627_v34 }
 0x20c   : > { %v11681_v12 = vmul.f32 %v10094_v39, %v11608_v28  ;;  %v10096_v51 = vpop.eup %10095  ;;  %v2448_v49 = vpack.c.bf16 %v2309_v45, %v2308_v23  ;;  %v2341_v42 = vsel %vm550_vm1, %v10471_v24, %v8924_v19  ;;  %v8964_v32 = vunpack.i.h.bf16 %v11674_v37  ;;  %v10472_v39 = vld [vmem:[#allocation2 + $0x139] sm:$0xff] }
 0x20d   : > { %v2928_v20 = vmul.f32 %v11535_v35, %v2852_v40  ;;  %2804 = vmatmul.bf16.gmra.mxu2 %v2446_v25  ;;  %v3090_v38 = vadd.f32 1.0, %v10096_v51  ;;  %v3250_v62 = vld [vmem:[#allocation2 + $0x21] sm:$0xff]  ;;  %v8963_v21 = vunpack.i.l.bf16 %v11674_v37  ;;  %v2340_v58 = vsel %vm550_vm1, %v10472_v39, %v8923_v59  ;;  %v11729_v37 = vpop.f32.mrf.mxu3 }
 0x20e   : > { %v11684_v61 = vpop.permute.xlu1 %8951  ;;  %v11686_v33 = vpop.permute.xlu0 %8946  ;;  %3185 = vst.msk [vmem:[#allocation2 + $0x31] sm:$0xff] %vm550_vm1, %v11681_v12  ;;  %v3375_v15 = vld [vmem:[#allocation2 + $0x1a] sm:$0xff]  ;;  %v3376_v50 = vld [vmem:[#allocation2 + $0x22] sm:$0xff]  ;;  %v9015_v60 = vpack.i.bf16 %v3250_v62, %v3249_v31 }
 0x20f   : > { %v11695_v28 = vadd.f32 %v11546_v53, %v2928_v20  ;;  %v9030_v8 = vpack.i.bf16 %v3376_v50, %v3375_v15  ;;  %10097 = vrcp.f32 %v3090_v38  ;;  %v11719_v3 = vld [vmem:[#allocation2 + $0x20] sm:$0xff]  ;;  %v10473_v20 = vld [vmem:[#allocation2 + $0x138] sm:$0xff]  ;;  %v8949_v38 = vunpack.i.h.bf16 %v11686_v33 }
 0x210   : > { %v2765_v27 = vpop.f32.mrf.mxu2  ;;  %v11697_v57 = vpop.f32.mrf.mxu1  ;;  %9016 = vrot.lane.b32.xlu1 %v9015_v60, %s10533_s26  ;;  %10099 = vpow2.f32 %v3031_v44  ;;  %v10474_v51 = vld [vmem:[#allocation2 + $0x140] sm:$0xff]  ;;  %v8948_v44 = vunpack.i.l.bf16 %v11686_v33  ;;  %v11735_v62 = vld [vmem:[#allocation2 + $0x18] sm:$0xff] }
 0x211   : > { %v2996_v11 = vsub.f32 0.0, %v11695_v28  ;;  %v2766_v52 = vadd.f32 %v2765_v27, %v11632_v22  ;;  %9031 = vrot.lane.b32.xlu0 %v9030_v8, %s10533_s26  ;;  %v11708_v22 = vpop.permute.xlu2 %8981  ;;  %9021 = vrot.lane.b32.xlu2 %v9030_v8, %s10532_s23  ;;  %v2245_v23 = vsel %vm550_vm1, %v10474_v51, %v8909_v17  ;;  %v9025_v50 = vpack.i.bf16 %v11719_v3, %v11735_v62 }
 0x213   : > { %v3033_v1 = vmul.f32 1.442695, %v2996_v11  ;;  %v2855_v36 = vadd.f32 %v11553_v0, %v2766_v52  ;;  %2720 = vmatmul.bf16.gmra.mxu1 %v2448_v49  ;;  %v8914_v0 = vunpack.i.h.bf16 %v11574_v41  ;;  %v2244_v41 = vsel %vm550_vm1, %v10473_v20, %v8908_v6 }
 0x215   : > { %10101 = vpow2.f32 %v3033_v1  ;;  %v2929_v13 = vmul.f32 %v11535_v35, %v2855_v36  ;;  %v10098_v16 = vpop.eup %10097 }
 0x216   : > { %v8957_v34 = vpop.permute.xlu1 %8956  ;;  %v11715_v56 = vpop.permute.xlu0 %8966  ;;  %v3154_v52 = vmul.f32 %v10098_v16, %v11643_v55 }
 0x217   : > { %v8959_v25 = vunpack.i.h.bf16 %v8957_v34  ;;  %v8958_v40 = vunpack.i.l.bf16 %v8957_v34  ;;  %v11727_v31 = vadd.f32 %v11546_v53, %v2929_v13  ;;  %v10100_v15 = vpop.eup %10099  ;;  %v2277_v13 = vsel %vm2250_vm3, %v2244_v41, %v8913_v4  ;;  %v11762_v4 = vpop.f32.mrf.mxu3 }
 0x218   : > { %v2767_v45 = vpop.f32.mrf.mxu2  ;;  %v11724_v27 = vpop.f32.mrf.mxu1  ;;  %3186 = vst.msk [vmem:[#allocation2 + $0x39] sm:$0xff] %vm550_vm1, %v3154_v52  ;;  %v3091_v33 = vadd.f32 1.0, %v10100_v15  ;;  %v2310_v34 = vsel %vm2283_vm4, %v2277_v13, %v8948_v44  ;;  %v10475_v15 = vld [vmem:[#allocation2 + $0x151] sm:$0xff] }
 0x219   : > { %v2768_v11 = vadd.f32 %v2767_v45, %v11659_v18  ;;  %v2372_v49 = vsel %vm2250_vm3, %v2340_v58, %v8958_v40  ;;  %v2373_v19 = vsel %vm2250_vm3, %v2341_v42, %v8959_v25  ;;  %v2997_v60 = vsub.f32 0.0, %v11727_v31  ;;  %5272 = vrot.lane.b32.xlu0 %v3154_v52, %s10534_s27  ;;  %9026 = vrot.lane.b32.xlu2 %v9025_v50, %s10534_s27  ;;  %v10476_v50 = vld [vmem:[#allocation2 + $0x159] sm:$0xff] }
 0x21a   : > { %v2404_v18 = vsel %vm2283_vm4, %v2372_v49, %v8963_v21  ;;  %v2405_v55 = vsel %vm2283_vm4, %v2373_v19, %v8964_v32  ;;  %10103 = vrcp.f32 %v3091_v33  ;;  %v8987_v21 = vpop.permute.xlu2 %8986  ;;  %v8954_v25 = vunpack.i.h.bf16 %v11684_v61 }
 0x21b   : > { %v10102_v8 = vpop.eup %10101  ;;  %v2857_v1 = vadd.f32 %v11590_v5, %v2768_v11  ;;  %v2449_v59 = vpack.c.bf16 %v2405_v55, %v2404_v18  ;;  %v3035_v17 = vmul.f32 1.442695, %v2997_v60  ;;  %v2278_v5 = vsel %vm2250_vm3, %v2245_v23, %v8914_v0 }
 0x21c   : > { %v3092_v36 = vadd.f32 1.0, %v10102_v8  ;;  %v2311_v32 = vsel %vm2283_vm4, %v2278_v5, %v8949_v38  ;;  %v8953_v40 = vunpack.i.l.bf16 %v11684_v61  ;;  %v8989_v61 = vunpack.i.h.bf16 %v8987_v21 }
 0x21d   : > { %v2930_v6 = vmul.f32 %v11535_v35, %v2857_v1  ;;  %2809 = vmatmul.bf16.gmra.mxu2 %v2449_v59  ;;  %v2451_v20 = vpack.c.bf16 %v2311_v32, %v2310_v34  ;;  %v8988_v38 = vunpack.i.l.bf16 %v8987_v21  ;;  %v2343_v49 = vsel %vm550_vm1, %v10476_v50, %v8954_v25 }
 0x21e   : > { %10105 = vrcp.f32 %v3092_v36  ;;  %v11751_v24 = vpop.permute.xlu1 %8971  ;;  %v8992_v42 = vpop.permute.xlu0 %8991  ;;  %v8944_v36 = vunpack.i.h.bf16 %v11654_v10 }
 0x21f   : > { %10107 = vpow2.f32 %v3035_v17  ;;  %v11760_v0 = vadd.f32 %v11546_v53, %v2930_v6  ;;  %v11765_v41 = vld [vmem:[#allocation2 + $0x32] sm:$0xff]  ;;  %v11767_v51 = vld [vmem:[#allocation2 + $0x3a] sm:$0xff]  ;;  %v8994_v1 = vunpack.i.h.bf16 %v8992_v42 }
 0x220   : > { %v2770_v16 = vpop.f32.mrf.mxu2  ;;  %v11757_v39 = vpop.f32.mrf.mxu1  ;;  %v9050_v11 = vpack.i.bf16 %v11767_v51, %v11765_v41  ;;  %v11801_v5 = vld [vmem:[#allocation2 + $0x38] sm:$0xff] }
 0x221   : > { %v2771_v58 = vadd.f32 %v2770_v16, %v11697_v57  ;;  %v2998_v23 = vsub.f32 0.0, %v11760_v0  ;;  %v10104_v45 = vpop.eup %10103  ;;  %v2342_v57 = vsel %vm550_vm1, %v10475_v15, %v8953_v40  ;;  %5270 = vrot.lane.b32.xlu2 %v11681_v12, %s10534_s27  ;;  %v8943_v12 = vunpack.i.l.bf16 %v11654_v10  ;;  %v11807_v25 = vld [vmem:[#allocation2 + $0x39] sm:$0xff] }
 0x222   : > { %v11776_v19 = vmul.f32 %v10104_v45, %v11667_v43  ;;  %9051 = vrot.lane.b32.xlu1 %v9050_v11, %s10533_s26  ;;  %9041 = vrot.lane.b32.xlu0 %v9050_v11, %s10532_s23  ;;  %v8939_v43 = vunpack.i.h.bf16 %v11636_v47  ;;  %v10477_v11 = vld [vmem:[#allocation2 + $0x150] sm:$0xff]  ;;  %v10478_v15 = vld [vmem:[#allocation2 + $0x158] sm:$0xff] }
 0x223   : > { %v2860_v44 = vadd.f32 %v11619_v29, %v2771_v58  ;;  %2725 = vmatmul.bf16.gmra.mxu1 %v2451_v20  ;;  %v3037_v60 = vmul.f32 1.442695, %v2998_v23  ;;  %v8993_v29 = vunpack.i.l.bf16 %v8992_v42  ;;  %v2374_v42 = vsel %vm2250_vm3, %v2342_v57, %v8988_v38  ;;  %v11811_v20 = vld [vmem:[#allocation2 + $0x30] sm:$0xff]  ;;  %v11813_v23 = vpop.f32.mrf.mxu3 }
 0x224   : > { %v10106_v52 = vpop.eup %10105  ;;  %3187 = vst.msk [vmem:[#allocation2 + $0x49] sm:$0xff] %vm550_vm1, %v11776_v19  ;;  %v9055_v38 = vpack.i.bf16 %v11801_v5, %v11811_v20  ;;  %v2247_v57 = vsel %vm550_vm1, %v10478_v15, %v8939_v43  ;;  %v1448_v15 = vld [vmem:[#allocation2 + $0x19a] sm:$0xff] }
 0x225   : > { %v11779_v8 = vmul.f32 %v10106_v52, %v11695_v28  ;;  %v2931_v18 = vmul.f32 %v11535_v35, %v2860_v44  ;;  %v10108_v55 = vpop.eup %10107  ;;  %10109 = vpow2.f32 %v3037_v60  ;;  %v8938_v28 = vunpack.i.l.bf16 %v11636_v47 }
 0x226   : > { %v11786_v33 = vpop.permute.xlu0 %9001  ;;  %v8977_v17 = vpop.permute.xlu1 %8976  ;;  %v2375_v47 = vsel %vm2250_vm3, %v2343_v49, %v8989_v61  ;;  %v3093_v34 = vadd.f32 1.0, %v10108_v55  ;;  %v2406_v40 = vsel %vm2283_vm4, %v2374_v42, %v8993_v29  ;;  %v2280_v60 = vsel %vm2250_vm3, %v2247_v57, %v8944_v36  ;;  %v1449_v57 = vld [vmem:[#allocation2 + $0x1a2] sm:$0xff] }
 0x227   : > { %3188 = vst.msk [vmem:[#allocation2 + $0x51] sm:$0xff] %vm550_vm1, %v11779_v8  ;;  %v11796_v59 = vadd.f32 %v11546_v53, %v2931_v18  ;;  %v2407_v10 = vsel %vm2283_vm4, %v2375_v47, %v8994_v1  ;;  %v8979_v16 = vunpack.i.h.bf16 %v8977_v17  ;;  %v8978_v58 = vunpack.i.l.bf16 %v8977_v17 }
 0x228   : > { %v2772_v6 = vpop.f32.mrf.mxu2  ;;  %v11799_v13 = vpop.f32.mrf.mxu1  ;;  %10111 = vrcp.f32 %v3093_v34  ;;  %v2246_v52 = vsel %vm550_vm1, %v10477_v11, %v8938_v28  ;;  %v2452_v49 = vpack.c.bf16 %v2407_v10, %v2406_v40  ;;  %v8984_v28 = vunpack.i.h.bf16 %v11708_v22 }
 0x229   : > { %v2999_v32 = vsub.f32 0.0, %v11796_v59  ;;  %v2773_v21 = vadd.f32 %v2772_v6, %v11724_v27  ;;  %v11818_v27 = vld [vmem:[#allocation2 + $0x31] sm:$0xff]  ;;  %v2313_v43 = vsel %vm2283_vm4, %v2280_v60, %v8979_v16  ;;  %v8983_v17 = vunpack.i.l.bf16 %v11708_v22  ;;  %v8469_v22 = vld [vmem:[%s14861_s7 + $0x88] sm:$0xff] }
 0x22a   : > { %v9035_v50 = vpack.i.bf16 %v11807_v25, %v11818_v27  ;;  %9056 = vrot.lane.b32.xlu1 %v9055_v38, %s10532_s23  ;;  %9046 = vrot.lane.b32.xlu0 %v9055_v38, %s10534_s27  ;;  %v10479_v38 = vld [vmem:[#allocation2 + $0x169] sm:$0xff]  ;;  %v2459_v60 = vpack.c.bf16 %v1449_v57, %v1448_v15 }
 0x22b   : > { %v3039_v45 = vmul.f32 1.442695, %v2999_v32  ;;  %v2862_v61 = vadd.f32 %v11647_v26, %v2773_v21  ;;  %v10110_v44 = vpop.eup %10109  ;;  %v2279_v26 = vsel %vm2250_vm3, %v2246_v52, %v8943_v12  ;;  %v3253_v36 = vld [vmem:[#allocation2 + $0x49] sm:$0xff]  ;;  %4887 = vmatpush.bf16.msrb.mxu1 %v8469_v22 }
 0x22c   : > { %v3094_v1 = vadd.f32 1.0, %v10110_v44  ;;  %9036 = vrot.lane.b32.xlu2 %v9035_v50, %s10533_s26  ;;  %v2312_v55 = vsel %vm2283_vm4, %v2279_v26, %v8978_v58  ;;  %v10480_v44 = vld [vmem:[#allocation2 + $0x171] sm:$0xff]  ;;  %8188 = vmatmul.msk.bf16.gmra.mxu3 %vm550_vm1, %v2459_v60 }
 0x22d   : > { %10113 = vpow2.f32 %v3039_v45  ;;  %v2932_v29 = vmul.f32 %v11535_v35, %v2862_v61  ;;  %2814 = vmatmul.bf16.gmra.mxu2 %v2452_v49  ;;  %v2454_v21 = vpack.c.bf16 %v2313_v43, %v2312_v55  ;;  %v2345_v11 = vsel %vm550_vm1, %v10480_v44, %v8984_v28 }
 0x22e   : > { %v3254_v18 = vld [vmem:[#allocation2 + $0x51] sm:$0xff]  ;;  %v9007_v6 = vpop.permute.xlu0 %9006  ;;  %v10112_v42 = vpop.eup %10111  ;;  %10115 = vrcp.f32 %v3094_v1  ;;  %v8968_v49 = vunpack.i.l.bf16 %v11715_v56 }
 0x22f   : > { %v11837_v32 = vpack.i.bf16 %v3254_v18, %v3253_v36  ;;  %v11840_v40 = vmul.f32 %v10112_v42, %v11727_v31  ;;  %v9009_v10 = vunpack.i.h.bf16 %v9007_v6  ;;  %v9008_v16 = vunpack.i.l.bf16 %v9007_v6  ;;  %v9012_v58 = vpop.permute.xlu1 %9011  ;;  %v8468_v6 = vld [vmem:[%s14861_s7 + $0x80] sm:$0xff]  ;;  %v11883_v22 = vld [vmem:[#allocation2 + $0x52] sm:$0xff] }
 0x230   : > { %v2775_v12 = vpop.f32.mrf.mxu2  ;;  %v11834_v47 = vpop.f32.mrf.mxu1  ;;  %v11846_v45 = vadd.f32 %v11546_v53, %v2932_v29  ;;  %v8969_v31 = vunpack.i.h.bf16 %v11715_v56  ;;  %v8973_v18 = vunpack.i.l.bf16 %v11751_v24  ;;  %v9014_v55 = vunpack.i.h.bf16 %v9012_v58  ;;  %4888 = vmatpush.bf16.msrb.mxu1 %v8468_v6 }
 0x231   : > { %v2776_v34 = vadd.f32 %v2775_v12, %v11757_v39  ;;  %v2344_v39 = vsel %vm550_vm1, %v10479_v38, %v8983_v17  ;;  %3189 = vst.msk [vmem:[#allocation2 + $0x61] sm:$0xff] %vm550_vm1, %v11840_v40  ;;  %v11856_v29 = vpop.f32.mrf.mxu3  ;;  %v9013_v43 = vunpack.i.l.bf16 %v9012_v58  ;;  %v2377_v17 = vsel %vm2250_vm3, %v2345_v11, %v9009_v10  ;;  %v8997_v12 = vpop.permute.xlu2 %8996  ;;  %v11881_v58 = vld [vmem:[#allocation2 + $0x4a] sm:$0xff] }
 0x232   : > { %v3000_v1 = vsub.f32 0.0, %v11846_v45  ;;  %5274 = vrot.lane.b32.xlu1 %v11776_v19, %s10534_s27  ;;  %9066 = vrot.lane.b32.xlu0 %v11837_v32, %s10533_s26  ;;  %v2376_v28 = vsel %vm2250_vm3, %v2344_v39, %v9008_v16  ;;  %v8974_v19 = vunpack.i.h.bf16 %v11751_v24  ;;  %v10482_v39 = vld [vmem:[#allocation2 + $0x170] sm:$0xff]  ;;  %v8999_v11 = vunpack.i.h.bf16 %v8997_v12 }
 0x233   : > { %v10114_v61 = vpop.eup %10113  ;;  %v2865_v52 = vadd.f32 %v11690_v63, %v2776_v34  ;;  %2730 = vmatmul.bf16.gmra.mxu1 %v2454_v21  ;;  %v2249_v44 = vsel %vm550_vm1, %v10482_v39, %v8969_v31  ;;  %v9003_v31 = vunpack.i.l.bf16 %v11786_v33 }
 0x234   : > { %v3095_v26 = vadd.f32 1.0, %v10114_v61  ;;  %v10116_v56 = vpop.eup %10115  ;;  %9061 = vrot.lane.b32.xlu2 %v9035_v50, %s10534_s27  ;;  %v3041_v42 = vmul.f32 1.442695, %v3000_v1  ;;  %v10481_v50 = vld [vmem:[#allocation2 + $0x168] sm:$0xff]  ;;  %v2409_v61 = vsel %vm2283_vm4, %v2377_v17, %v9014_v55 }
 0x235   : > { %v2933_v63 = vmul.f32 %v11535_v35, %v2865_v52  ;;  %v11873_v36 = vmul.f32 %v10116_v56, %v11760_v0  ;;  %v2248_v21 = vsel %vm550_vm1, %v10481_v50, %v8968_v49  ;;  %v2408_v0 = vsel %vm2283_vm4, %v2376_v28, %v9013_v43 }
 0x236   : > { %10117 = vrcp.f32 %v3095_v26  ;;  %v8998_v52 = vunpack.i.l.bf16 %v8997_v12  ;;  %v2281_v15 = vsel %vm2250_vm3, %v2248_v21, %v8973_v18  ;;  %v2282_v49 = vsel %vm2250_vm3, %v2249_v44, %v8974_v19  ;;  %v10483_v21 = vld [vmem:[#allocation2 + $0x181] sm:$0xff] }
 0x237   : > { %v11876_v34 = vadd.f32 %v11546_v53, %v2933_v63  ;;  %10119 = vpow2.f32 %v3041_v42  ;;  %3190 = vst.msk [vmem:[#allocation2 + $0x69] sm:$0xff] %vm550_vm1, %v11873_v36  ;;  %v2455_v1 = vpack.c.bf16 %v2409_v61, %v2408_v0  ;;  %v9004_v56 = vunpack.i.h.bf16 %v11786_v33  ;;  %v11922_v42 = vld [vmem:[#allocation2 + $0x50] sm:$0xff] }
 0x238   : > { %v2777_v10 = vpop.f32.mrf.mxu2  ;;  %v11879_v16 = vpop.f32.mrf.mxu1  ;;  %v2314_v18 = vsel %vm2283_vm4, %v2281_v15, %v8998_v52  ;;  %v8518_v33 = vunpack.i.l.bf16 %v10969_v2  ;;  %v10484_v61 = vld [vmem:[#allocation2 + $0x189] sm:$0xff]  ;;  %v8519_v52 = vunpack.i.h.bf16 %v10969_v2  ;;  %v8524_v2 = vunpack.i.h.bf16 %v10918_v9 }
 0x239   : > { %v2778_v24 = vadd.f32 %v2777_v10, %v11799_v13  ;;  %v3001_v38 = vsub.f32 0.0, %v11876_v34  ;;  %v9070_v13 = vpack.i.bf16 %v11883_v22, %v11881_v58  ;;  %v11909_v63 = vpop.f32.mrf.mxu3  ;;  %v2346_v10 = vsel %vm550_vm1, %v10483_v21, %v9003_v31 }
 0x23a   : > { %9091 = vrot.lane.b32.xlu0 %v11837_v32, %s10534_s27 }
 0x23b   : > { %v2867_v57 = vadd.f32 %v11729_v37, %v2778_v24  ;;  %v3043_v26 = vmul.f32 1.442695, %v3001_v38  ;;  %9071 = vrot.lane.b32.xlu1 %v9070_v13, %s10532_s23  ;;  %v11928_v24 = vld [vmem:[#allocation2 + $0x48] sm:$0xff]  ;;  %v2347_v38 = vsel %vm550_vm1, %v10484_v61, %v9004_v56 }
 0x23c   : > { %v10118_v60 = vpop.eup %10117  ;;  %5276 = vrot.lane.b32.xlu2 %v11779_v8, %s10534_s27  ;;  %v8459_v8 = vld [vmem:[%s14861_s7 + $0x38] sm:$0xff] }
 0x23d   : > { %v11898_v55 = vmul.f32 %v10118_v60, %v11796_v59  ;;  %v2934_v43 = vmul.f32 %v11535_v35, %v2867_v57  ;;  %10121 = vpow2.f32 %v3043_v26  ;;  %v10120_v37 = vpop.eup %10119  ;;  %2819 = vmatmul.bf16.gmra.mxu2 %v2455_v1  ;;  %v2315_v59 = vsel %vm2283_vm4, %v2282_v49, %v8999_v11  ;;  %4703 = vmatpush.bf16.msrb.mxu0 %v8459_v8  ;;  %v8458_v11 = vld [vmem:[%s14861_s7 + $0x30] sm:$0xff]  ;;  %v8457_v1 = vld [vmem:[%s14861_s7 + $0x28] sm:$0xff] }
 0x23e   : > { %v3096_v28 = vadd.f32 1.0, %v10120_v37  ;;  %v2457_v50 = vpack.c.bf16 %v2315_v59, %v2314_v18  ;;  %v8523_v49 = vunpack.i.l.bf16 %v10918_v9  ;;  %v2379_v26 = vsel %vm2250_vm3, %v2347_v38, %v8519_v52  ;;  %v11959_v18 = vld [vmem:[#allocation2 + $0x6a] sm:$0xff]  ;;  %v3411_v52 = vld [vmem:[#allocation2 + $0x60] sm:$0xff] }
 0x23f   : > { %3191 = vst.msk [vmem:[#allocation2 + $0x79] sm:$0xff] %vm550_vm1, %v11898_v55  ;;  %v11915_v32 = vadd.f32 %v11546_v53, %v2934_v43  ;;  %v2411_v56 = vsel %vm2283_vm4, %v2379_v26, %v8524_v2  ;;  %v3412_v38 = vld [vmem:[#allocation2 + $0x68] sm:$0xff]  ;;  %v8454_v2 = vld [vmem:[%s14861_s7 + $0x10] sm:$0xff] }
 0x240   : > { %v2780_v17 = vpop.f32.mrf.mxu2  ;;  %v11920_v6 = vpop.f32.mrf.mxu1  ;;  %10123 = vrcp.f32 %v3096_v28  ;;  %v9115_v26 = vpack.i.bf16 %v3412_v38, %v3411_v52  ;;  %v4468_v38 = vpack.c.bf16 %v11883_v22, %v11881_v58 }
 0x241   : > { %v3002_v19 = vsub.f32 0.0, %v11915_v32  ;;  %v2781_v12 = vadd.f32 %v2780_v17, %v11834_v47  ;;  %v9075_v47 = vpack.i.bf16 %v11922_v42, %v11928_v24  ;;  %4704 = vmatpush.bf16.msrb.mxu0 %v8458_v11  ;;  %v11947_v60 = vpop.f32.mrf.mxu3  ;;  %v3255_v11 = vld [vmem:[#allocation2 + $0x61] sm:$0xff] }
 0x242   : > { %5278 = vrot.lane.b32.xlu0 %v11840_v40, %s10534_s27 }
 0x243   : > { %v10122_v0 = vpop.eup %10121  ;;  %v3045_v39 = vmul.f32 1.442695, %v3002_v19  ;;  %v2870_v44 = vadd.f32 %v11762_v4, %v2781_v12  ;;  %2735 = vmatmul.bf16.gmra.mxu1 %v2457_v50  ;;  %9076 = vrot.lane.b32.xlu1 %v9075_v47, %s10534_s27  ;;  %v2378_v4 = vsel %vm2250_vm3, %v2346_v10, %v8518_v33 }
 0x244   : > { %v3097_v15 = vadd.f32 1.0, %v10122_v0  ;;  %9081 = vrot.lane.b32.xlu2 %v9070_v13, %s10533_s26  ;;  %v11957_v13 = vld [vmem:[#allocation2 + $0x62] sm:$0xff]  ;;  %v2410_v59 = vsel %vm2283_vm4, %v2378_v4, %v8523_v49 }
 0x245   : > { %10125 = vpow2.f32 %v3045_v39  ;;  %v2935_v57 = vmul.f32 %v11535_v35, %v2870_v44  ;;  %4705 = vmatpush.bf16.msrb.mxu0 %v8457_v1  ;;  %v9110_v12 = vpack.i.bf16 %v11959_v18, %v11957_v13  ;;  %v2458_v21 = vpack.c.bf16 %v2411_v56, %v2410_v59 }
 0x246   : > { %10127 = vrcp.f32 %v3097_v15  ;;  %v10124_v43 = vpop.eup %10123 }
 0x247   : > { %v11953_v40 = vadd.f32 %v11546_v53, %v2935_v57  ;;  %v11965_v28 = vmul.f32 %v10124_v43, %v11846_v45 }
 0x248   : > { %v2782_v37 = vpop.f32.mrf.mxu2  ;;  %v11955_v31 = vpop.f32.mrf.mxu1 }
 0x249   : > { %v2783_v9 = vadd.f32 %v2782_v37, %v11879_v16  ;;  %v3003_v8 = vsub.f32 0.0, %v11953_v40  ;;  %3192 = vst.msk [vmem:[#allocation2 + $0x81] sm:$0xff] %vm550_vm1, %v11965_v28  ;;  %v8456_v16 = vld [vmem:[%s14861_s7 + $0x20] sm:$0xff]  ;;  %v11992_v39 = vpop.f32.mrf.mxu3  ;;  %v8453_v37 = vld [vmem:[%s14861_s7 + $0x8] sm:$0xff] }
 0x24a   : > { %9111 = vrot.lane.b32.xlu0 %v9110_v12, %s10533_s26  ;;  %4706 = vmatpush.bf16.msrb.mxu0 %v8456_v16 }
 0x24b   : > { %v10126_v17 = vpop.eup %10125  ;;  %v2872_v19 = vadd.f32 %v11813_v23, %v2783_v9  ;;  %v3047_v50 = vmul.f32 1.442695, %v3003_v8  ;;  %5280 = vrot.lane.b32.xlu1 %v11873_v36, %s10534_s27 }
 0x24c   : > { %v10128_v33 = vpop.eup %10127  ;;  %v3098_v45 = vadd.f32 1.0, %v10126_v17  ;;  %9086 = vrot.lane.b32.xlu2 %v9075_v47, %s10532_s23 }
 0x24d   : > { %v2936_v10 = vmul.f32 %v11535_v35, %v2872_v19  ;;  %v11981_v23 = vmul.f32 %v10128_v33, %v11876_v34  ;;  %10129 = vpow2.f32 %v3047_v50  ;;  %2824 = vmatmul.bf16.gmra.mxu2 %v2458_v21  ;;  %v8455_v35 = vld [vmem:[%s14861_s7 + $0x18] sm:$0xff]  ;;  %v3256_v34 = vld [vmem:[#allocation2 + $0x69] sm:$0xff]  ;;  %v8452_v50 = vld [vmem:[%s14861_s7] sm:$0xff] }
 0x24e   : > { %10131 = vrcp.f32 %v3098_v45  ;;  %v9095_v49 = vpack.i.bf16 %v3256_v34, %v3255_v11  ;;  %4707 = vmatpush.bf16.msrb.mxu0 %v8455_v35 }
 0x24f   : > { %v11985_v0 = vadd.f32 %v11546_v53, %v2936_v10  ;;  %3193 = vst.msk [vmem:[#allocation2 + $0x91] sm:$0xff] %vm550_vm1, %v11981_v23  ;;  %v4465_v53 = vpack.c.bf16 %v11767_v51, %v11765_v41  ;;  %v12009_v41 = vld [vmem:[%s14859_s5] ss:$0 sm:$0xff] }
 0x250   : > { %v2785_v36 = vpop.f32.mrf.mxu2  ;;  %v2701_v61 = vpop.f32.mrf.mxu1  ;;  %v12051_v34 = vld [vmem:[#allocation2 + $0x82] sm:$0xff] }
 0x251   : > { %v3004_v44 = vsub.f32 0.0, %v11985_v0  ;;  %v2786_v47 = vadd.f32 %v2785_v36, %v11920_v6  ;;  %v12028_v56 = vpop.f32.mrf.mxu3  ;;  %v12049_v36 = vld [vmem:[#allocation2 + $0x7a] sm:$0xff] }
 0x252   : > { %9116 = vrot.lane.b32.xlu0 %v9115_v26, %s10532_s23  ;;  %4708 = vmatpush.bf16.msrb.mxu0 %v8454_v2  ;;  %v9140_v52 = vpack.i.bf16 %v12051_v34, %v12049_v36 }
 0x253   : > { %v10130_v15 = vpop.eup %10129  ;;  %v3049_v57 = vmul.f32 1.442695, %v3004_v44  ;;  %v2875_v4 = vadd.f32 %v11856_v29, %v2786_v47  ;;  %8261 = vmatmul.msk.bf16.vlgmr.msrb.gmra.mxu1 %vm550_vm1, %v4465_v53  ;;  %9096 = vrot.lane.b32.xlu1 %v9095_v49, %s10533_s26  ;;  %v12020_v29 = vld [vmem:[%s14860_s6] ss:$0 sm:$0xff] }
 0x254   : > { %v10132_v1 = vpop.eup %10131  ;;  %v3099_v6 = vadd.f32 1.0, %v10130_v15  ;;  %9101 = vrot.lane.b32.xlu2 %v9110_v12, %s10532_s23 }
 0x255   : > { %v12004_v43 = vmul.f32 %v10132_v1, %v11915_v32  ;;  %10133 = vpow2.f32 %v3049_v57  ;;  %v2937_v51 = vmul.f32 %v12009_v41, %v2875_v4  ;;  %v3258_v1 = vld [vmem:[#allocation2 + $0x81] sm:$0xff] }
 0x256   : > { %10135 = vrcp.f32 %v3099_v6  ;;  %4709 = vmatpush.bf16.msrb.mxu0 %v8453_v37 }
 0x257   : > { %3194 = vst.msk [vmem:[#allocation2 + $0x99] sm:$0xff] %vm550_vm1, %v12004_v43  ;;  %v12023_v32 = vadd.f32 %v12020_v29, %v2937_v51 }
 0x258   : > { %v2787_v59 = vpop.f32.mrf.mxu2  ;;  %v2703_v9 = vpop.f32.mrf.mxu1 }
 0x259   : > { %v3005_v8 = vsub.f32 0.0, %v12023_v32  ;;  %v2788_v17 = vadd.f32 %v2787_v59, %v11955_v31  ;;  %v12056_v47 = vpop.f32.mrf.mxu3 }
 0x25a   : > { %5284 = vrot.lane.b32.xlu0 %v11965_v28, %s10534_s27  ;;  %4710 = vmatpush.bf16.msrb.mxu0 %v8452_v50 }
 0x25b   : > { %v10134_v19 = vpop.eup %10133  ;;  %v3051_v12 = vmul.f32 1.442695, %v3005_v8  ;;  %v2877_v16 = vadd.f32 %v11909_v63, %v2788_v17  ;;  %9121 = vrot.lane.b32.xlu1 %v9095_v49, %s10534_s27  ;;  %v12077_v49 = vld [vmem:[#allocation2 + $0x80] sm:$0xff] }
 0x25c   : > { %v10136_v33 = vpop.eup %10135  ;;  %v3100_v45 = vadd.f32 1.0, %v10134_v19  ;;  %9106 = vrot.lane.b32.xlu2 %v9115_v26, %s10534_s27  ;;  %v3257_v17 = vld [vmem:[#allocation2 + $0x79] sm:$0xff] }
 0x25d   : > { %10137 = vpow2.f32 %v3051_v12  ;;  %v2938_v21 = vmul.f32 %v12009_v41, %v2877_v16  ;;  %v12041_v31 = vmul.f32 %v10136_v33, %v11953_v40  ;;  %v9125_v16 = vpack.i.bf16 %v3258_v1, %v3257_v17  ;;  %v12119_v1 = vld [vmem:[#allocation2 + $0x19] sm:$0xff] }
 0x25e   : > { %10139 = vrcp.f32 %v3100_v45 }
 0x25f   : > { %v12045_v63 = vadd.f32 %v12020_v29, %v2938_v21  ;;  %3195 = vst.msk [vmem:[#allocation2 + $0xa9] sm:$0xff] %vm550_vm1, %v12041_v31  ;;  %v3260_v21 = vld [vmem:[#allocation2 + $0x99] sm:$0xff] }
 0x260   : > { %v2790_v10 = vpop.f32.mrf.mxu2  ;;  %v2706_v35 = vpop.f32.mrf.mxu1 }
 0x261   : > { %v3006_v28 = vsub.f32 0.0, %v12045_v63  ;;  %v2791_v40 = vadd.f32 %v2790_v10, %v2701_v61  ;;  %v12085_v51 = vpop.f32.mrf.mxu3  ;;  %v8465_v10 = vld [vmem:[%s14861_s7 + $0x68] sm:$0xff] }
 0x262   : > { %9131 = vrot.lane.b32.xlu0 %v9140_v52, %s10532_s23 }
 0x263   : > { %v10138_v44 = vpop.eup %10137  ;;  %v3053_v53 = vmul.f32 1.442695, %v3006_v28  ;;  %v2880_v11 = vadd.f32 %v11947_v60, %v2791_v40  ;;  %8262 = vmatmul.msk.bf16.gmra.mxu1 %vm550_vm1, %v4468_v38  ;;  %9141 = vrot.lane.b32.xlu1 %v9140_v52, %s10533_s26  ;;  %v4471_v38 = vpack.c.bf16 %v11959_v18, %v11957_v13  ;;  %v3259_v52 = vld [vmem:[#allocation2 + $0x91] sm:$0xff]  ;;  %v8464_v13 = vld [vmem:[%s14861_s7 + $0x60] sm:$0xff]  ;;  %v8533_v18 = vunpack.i.l.bf16 %v10997_v48 }
 0x264   : > { %v10140_v15 = vpop.eup %10139  ;;  %v3101_v57 = vadd.f32 1.0, %v10138_v44  ;;  %5282 = vrot.lane.b32.xlu2 %v11898_v55, %s10534_s27  ;;  %v12083_v55 = vld [vmem:[#allocation2 + $0x78] sm:$0xff]  ;;  %v8529_v44 = vunpack.i.h.bf16 %v11008_v54 }
 0x265   : > { %10141 = vpow2.f32 %v3053_v53  ;;  %v2939_v4 = vmul.f32 %v12009_v41, %v2880_v11  ;;  %v12066_v58 = vmul.f32 %v10140_v15, %v11985_v0  ;;  %v8467_v0 = vld [vmem:[%s14861_s7 + $0x78] sm:$0xff]  ;;  %v9145_v8 = vpack.i.bf16 %v12077_v49, %v12083_v55 }
 0x266   : > { %10143 = vrcp.f32 %v3101_v57  ;;  %4792 = vmatpush.bf16.msrb.mxu3 %v8467_v0  ;;  %v8528_v53 = vunpack.i.l.bf16 %v11008_v54  ;;  %v8534_v54 = vunpack.i.h.bf16 %v10997_v48 }
 0x267   : > { %v12071_v22 = vadd.f32 %v12020_v29, %v2939_v4  ;;  %3196 = vst.msk [vmem:[#allocation2 + $0xb1] sm:$0xff] %vm550_vm1, %v12066_v58  ;;  %v9155_v4 = vpack.i.bf16 %v3260_v21, %v3259_v52 }
 0x268   : > { %v2792_v60 = vpop.f32.mrf.mxu2  ;;  %v12075_v61 = vpop.f32.mrf.mxu1 }
 0x269   : > { %v3007_v26 = vsub.f32 0.0, %v12071_v22  ;;  %v2793_v2 = vadd.f32 %v2792_v60, %v2703_v9  ;;  %v8466_v9 = vld [vmem:[%s14861_s7 + $0x70] sm:$0xff] }
 0x26a   : > { %9136 = vrot.lane.b32.xlu0 %v9145_v8, %s10534_s27  ;;  %4793 = vmatpush.bf16.msrb.mxu3 %v8466_v9  ;;  %v12146_v9 = vld [vmem:[#allocation2 + $0x92] sm:$0xff] }
 0x26b   : > { %v10142_v6 = vpop.eup %10141  ;;  %v3055_v37 = vmul.f32 1.442695, %v3007_v26  ;;  %v2882_v59 = vadd.f32 %v11992_v39, %v2793_v2  ;;  %9146 = vrot.lane.b32.xlu1 %v9145_v8, %s10532_s23  ;;  %v12105_v45 = vpop.permute.xlu2 %9021 }
 0x26c   : > { %v10144_v19 = vpop.eup %10143  ;;  %v3102_v12 = vadd.f32 1.0, %v10142_v6  ;;  %9126 = vrot.lane.b32.xlu2 %v9125_v16, %s10533_s26  ;;  %v10487_v6 = vld [vmem:[#allocation2 + $0x8] sm:$0xff] }
 0x26d   : > { %v12094_v50 = vmul.f32 %v10144_v19, %v12023_v32  ;;  %10145 = vpow2.f32 %v3055_v37  ;;  %v2940_v33 = vmul.f32 %v12009_v41, %v2882_v59  ;;  %v4272_v37 = vsel %vm550_vm1, %v10487_v6, %v8529_v44  ;;  %v10488_v59 = vld [vmem:[#allocation2] sm:$0xff] }
 0x26e   : > { %10147 = vrcp.f32 %v3102_v12  ;;  %4794 = vmatpush.bf16.msrb.mxu3 %v8465_v10  ;;  %v4271_v8 = vsel %vm550_vm1, %v10488_v59, %v8528_v53  ;;  %v4304_v10 = vsel %vm2250_vm3, %v4272_v37, %v8534_v54  ;;  %v8462_v54 = vld [vmem:[%s14861_s7 + $0x50] sm:$0xff]  ;;  %v3322_v37 = vld [vmem:[#allocation2 + $0x98] sm:$0xff]  ;;  %v8461_v59 = vld [vmem:[%s14861_s7 + $0x48] sm:$0xff] }
 0x26f   : > { %3197 = vst.msk [vmem:[#allocation2 + $0xc1] sm:$0xff] %vm550_vm1, %v12094_v50  ;;  %v12103_v39 = vadd.f32 %v12020_v29, %v2940_v33  ;;  %v12148_v33 = vld [vmem:[#allocation2 + $0x9a] sm:$0xff]  ;;  %v4303_v21 = vsel %vm2250_vm3, %v4271_v8, %v8533_v18 }
 0x270   : > { %v12107_v32 = vpop.f32.mrf.mxu1  ;;  %v2795_v40 = vpop.f32.mrf.mxu2  ;;  %v9160_v52 = vpack.i.bf16 %v12148_v33, %v12146_v9 }
 0x271   : > { %v3008_v28 = vsub.f32 0.0, %v12103_v39  ;;  %v2796_v11 = vadd.f32 %v2795_v40, %v2706_v35  ;;  %v5267_v2 = vpop.permute.xlu0 %5266  ;;  %v12126_v35 = vpop.f32.mrf.mxu3 }
 0x272   : > { %9156 = vrot.lane.b32.xlu0 %v9155_v4, %s10533_s26  ;;  %5362 = vst.msk [vmem:[#allocation2 + $0x19] sm:$0xff] %vm550_vm1, %v5267_v2  ;;  %4795 = vmatpush.bf16.msrb.mxu3 %v8464_v13  ;;  %v12162_v13 = vld [vmem:[#allocation2 + $0x21] sm:$0xff] }
 0x273   : > { %v10146_v15 = vpop.eup %10145  ;;  %v3057_v57 = vmul.f32 1.442695, %v3008_v28  ;;  %8263 = vmatmul.msk.bf16.gmra.mxu1 %vm550_vm1, %v4471_v38  ;;  %v2885_v26 = vadd.f32 %v12028_v56, %v2796_v11  ;;  %5286 = vrot.lane.b32.xlu1 %v11981_v23, %s10534_s27  ;;  %v9027_v23 = vpop.permute.xlu2 %9026 }
 0x274   : > { %v10148_v60 = vpop.eup %10147  ;;  %v3103_v0 = vadd.f32 1.0, %v10146_v15  ;;  %9151 = vrot.lane.b32.xlu2 %v9125_v16, %s10534_s27  ;;  %v9028_v19 = vunpack.i.l.bf16 %v9027_v23  ;;  %v8463_v16 = vld [vmem:[%s14861_s7 + $0x58] sm:$0xff] }
 0x275   : > { %10149 = vpow2.f32 %v3057_v57  ;;  %v12133_v56 = vmul.f32 %v10148_v60, %v12045_v63  ;;  %v2941_v48 = vmul.f32 %v12009_v41, %v2885_v26  ;;  %v9029_v63 = vunpack.i.h.bf16 %v9027_v23 }
 0x276   : > { %10151 = vrcp.f32 %v3103_v0  ;;  %v4335_v44 = vsel %vm2283_vm4, %v4303_v21, %v9028_v19  ;;  %4796 = vmatpush.bf16.msrb.mxu3 %v8463_v16 }
 0x277   : > { %3198 = vst.msk [vmem:[#allocation2 + $0xc9] sm:$0xff] %vm550_vm1, %v12133_v56  ;;  %v12142_v17 = vadd.f32 %v12020_v29, %v2941_v48  ;;  %v4336_v38 = vsel %vm2283_vm4, %v4304_v10, %v9029_v63  ;;  %v3321_v63 = vld [vmem:[#allocation2 + $0x90] sm:$0xff] }
 0x278   : > { %v12144_v12 = vpop.f32.mrf.mxu1  ;;  %v2797_v28 = vpop.f32.mrf.mxu2  ;;  %v4463_v15 = vpack.c.bf16 %v4336_v38, %v4335_v44  ;;  %v9165_v19 = vpack.i.bf16 %v3322_v37, %v3321_v63 }
 0x279   : > { %v3009_v40 = vsub.f32 0.0, %v12142_v17  ;;  %v2798_v53 = vadd.f32 %v2797_v28, %v12075_v61  ;;  %v5269_v2 = vpop.permute.xlu1 %5268  ;;  %v8460_v28 = vld [vmem:[%s14861_s7 + $0x40] sm:$0xff] }
 0x27a   : > { %9181 = vrot.lane.b32.xlu0 %v9155_v4, %s10534_s27  ;;  %5363 = vst.msk [vmem:[#allocation2 + $0x21] sm:$0xff] %vm550_vm1, %v5269_v2  ;;  %4711 = vmatmul.bf16.vlgmr.msrb.gmra.mxu0 %v4463_v15 }
 0x27b   : > { %v10150_v11 = vpop.eup %10149  ;;  %v3059_v0 = vmul.f32 1.442695, %v3009_v40  ;;  %v2887_v26 = vadd.f32 %v12056_v47, %v2798_v53  ;;  %9161 = vrot.lane.b32.xlu1 %v9160_v52, %s10532_s23  ;;  %v12176_v47 = vpop.f32.mrf.mxu3  ;;  %4797 = vmatpush.bf16.msrb.mxu3 %v8462_v54  ;;  %v12215_v53 = vld [vmem:[#allocation2 + $0xb2] sm:$0xff] }
 0x27c   : > { %v10152_v57 = vpop.eup %10151  ;;  %v3104_v60 = vadd.f32 1.0, %v10150_v11  ;;  %5288 = vrot.lane.b32.xlu2 %v12004_v43, %s10534_s27  ;;  %v5271_v6 = vpop.permute.xlu2 %5270  ;;  %v4474_v43 = vpack.c.bf16 %v12051_v34, %v12049_v36 }
 0x27d   : > { %v12171_v61 = vmul.f32 %v10152_v57, %v12071_v22  ;;  %v2942_v18 = vmul.f32 %v12009_v41, %v2887_v26  ;;  %5364 = vst.msk [vmem:[#allocation2 + $0x31] sm:$0xff] %vm550_vm1, %v5271_v6 }
 0x27e   : > { %10153 = vrcp.f32 %v3104_v60 }
 0x27f   : > { %10155 = vpow2.f32 %v3059_v0  ;;  %3199 = vst.msk [vmem:[#allocation2 + $0xd9] sm:$0xff] %vm550_vm1, %v12171_v61  ;;  %v12181_v4 = vadd.f32 %v12020_v29, %v2942_v18  ;;  %4798 = vmatpush.bf16.msrb.mxu3 %v8461_v59 }
 0x280   : > { %v2716_v22 = vpop.f32.mrf.mxu1  ;;  %v2800_v8 = vpop.f32.mrf.mxu2 }
 0x281   : > { %v3010_v48 = vsub.f32 0.0, %v12181_v4  ;;  %v2801_v23 = vadd.f32 %v2800_v8, %v12107_v32  ;;  %v3262_v8 = vld [vmem:[#allocation2 + $0xb1] sm:$0xff] }
 0x282   : > { %5290 = vrot.lane.b32.xlu0 %v12041_v31, %s10534_s27  ;;  %v12213_v31 = vld [vmem:[#allocation2 + $0xaa] sm:$0xff]  ;;  %v9017_v37 = vpop.permute.xlu1 %9016 }
 0x283   : > { %8264 = vmatmul.msk.bf16.gmra.mxu1 %vm550_vm1, %v4474_v43  ;;  %v3061_v21 = vmul.f32 1.442695, %v3010_v48  ;;  %v2890_v10 = vadd.f32 %v12085_v51, %v2801_v23  ;;  %9166 = vrot.lane.b32.xlu1 %v9165_v19, %s10534_s27  ;;  %v12204_v51 = vpop.permute.xlu0 %9031  ;;  %v12217_v15 = vpop.f32.mrf.mxu3  ;;  %v9200_v60 = vpack.i.bf16 %v12215_v53, %v12213_v31  ;;  %v4477_v23 = vpack.c.bf16 %v12148_v33, %v12146_v9 }
 0x284   : > { %v10154_v16 = vpop.eup %10153  ;;  %9171 = vrot.lane.b32.xlu2 %v9160_v52, %s10533_s26  ;;  %4799 = vmatpush.bf16.msrb.mxu3 %v8460_v28 }
 0x285   : > { %v10156_v36 = vpop.eup %10155  ;;  %v12197_v34 = vmul.f32 %v10154_v16, %v12103_v39  ;;  %10157 = vpow2.f32 %v3061_v21  ;;  %v2943_v40 = vmul.f32 %v12009_v41, %v2890_v10  ;;  %v3261_v21 = vld [vmem:[#allocation2 + $0xa9] sm:$0xff] }
 0x286   : > { %v3105_v32 = vadd.f32 1.0, %v10156_v36  ;;  %v12211_v38 = vpop.permute.xlu2 %9036  ;;  %v3417_v10 = vld [vmem:[#allocation2 + $0xa8] sm:$0xff]  ;;  %v9185_v28 = vpack.i.bf16 %v3262_v8, %v3261_v21  ;;  %v9033_v8 = vunpack.i.l.bf16 %v12204_v51  ;;  %v9024_v21 = vunpack.i.h.bf16 %v12105_v45 }
 0x287   : > { %3200 = vst.msk [vmem:[#allocation2 + $0xe1] sm:$0xff] %vm550_vm1, %v12197_v34  ;;  %v12209_v39 = vadd.f32 %v12020_v29, %v2943_v40 }
 0x288   : > { %10159 = vrcp.f32 %v3105_v32  ;;  %v2718_v44 = vpop.f32.mrf.mxu1  ;;  %v2802_v11 = vpop.f32.mrf.mxu2 }
 0x289   : > { %v3011_v52 = vsub.f32 0.0, %v12209_v39  ;;  %v2803_v57 = vadd.f32 %v2802_v11, %v12144_v12 }
 0x28a   : > { %9201 = vrot.lane.b32.xlu0 %v9200_v60, %s10533_s26 }
 0x28b   : > { %v10158_v0 = vpop.eup %10157  ;;  %v3063_v26 = vmul.f32 1.442695, %v3011_v52  ;;  %v2892_v2 = vadd.f32 %v12126_v35, %v2803_v57  ;;  %5292 = vrot.lane.b32.xlu1 %v12066_v58, %s10534_s27  ;;  %v5273_v12 = vpop.permute.xlu0 %5272  ;;  %v3418_v58 = vld [vmem:[#allocation2 + $0xb0] sm:$0xff] }
 0x28c   : > { %v3106_v54 = vadd.f32 1.0, %v10158_v0  ;;  %9176 = vrot.lane.b32.xlu2 %v9165_v19, %s10532_s23  ;;  %5365 = vst.msk [vmem:[#allocation2 + $0x39] sm:$0xff] %vm550_vm1, %v5273_v12  ;;  %v9205_v36 = vpack.i.bf16 %v3418_v58, %v3417_v10  ;;  %v12246_v32 = vpop.f32.mrf.mxu3  ;;  %v9034_v12 = vunpack.i.h.bf16 %v12204_v51  ;;  %v4480_v51 = vpack.c.bf16 %v12215_v53, %v12213_v31 }
 0x28d   : > { %10161 = vpow2.f32 %v3063_v26  ;;  %v2944_v6 = vmul.f32 %v12009_v41, %v2892_v2  ;;  %v12265_v2 = vld [vmem:[#allocation2 + $0x51] sm:$0xff]  ;;  %v4367_v31 = vsel %vm550_vm1, %v12119_v1, %v9033_v8 }
 0x28e   : > { %v10160_v18 = vpop.eup %10159  ;;  %10163 = vrcp.f32 %v3106_v54  ;;  %v12233_v35 = vpop.permute.xlu2 %9061 }
 0x28f   : > { %v12231_v59 = vadd.f32 %v12020_v29, %v2944_v6  ;;  %v12236_v43 = vmul.f32 %v10160_v18, %v12142_v17  ;;  %v9018_v18 = vunpack.i.l.bf16 %v9017_v37  ;;  %v9063_v1 = vunpack.i.l.bf16 %v12233_v35 }
 0x290   : > { %v2805_v48 = vpop.f32.mrf.mxu2  ;;  %v12241_v16 = vpop.f32.mrf.mxu1 }
 0x291   : > { %v3012_v63 = vsub.f32 0.0, %v12231_v59  ;;  %v2806_v19 = vadd.f32 %v2805_v48, %v2716_v22  ;;  %3201 = vst.msk [vmem:[#allocation2 + $0xf1] sm:$0xff] %vm550_vm1, %v12236_v43 }
 0x292   : > { %9206 = vrot.lane.b32.xlu0 %v9205_v36, %s10532_s23 }
 0x293   : > { %8265 = vmatmul.msk.bf16.gmra.mxu1 %vm550_vm1, %v4477_v23  ;;  %v10162_v17 = vpop.eup %10161  ;;  %v3065_v40 = vmul.f32 1.442695, %v3012_v63  ;;  %v2895_v9 = vadd.f32 %v12176_v47, %v2806_v19  ;;  %9186 = vrot.lane.b32.xlu1 %v9185_v28, %s10533_s26 }
 0x294   : > { %v10164_v33 = vpop.eup %10163  ;;  %v3107_v11 = vadd.f32 1.0, %v10162_v17  ;;  %9191 = vrot.lane.b32.xlu2 %v9200_v60, %s10532_s23  ;;  %v12256_v57 = vpop.permute.xlu1 %9051  ;;  %v4273_v17 = vsel %vm550_vm1, %v11735_v62, %v9018_v18 }
 0x295   : > { %v12252_v22 = vmul.f32 %v10164_v33, %v12181_v4  ;;  %10165 = vpow2.f32 %v3065_v40  ;;  %v2945_v52 = vmul.f32 %v12009_v41, %v2895_v9  ;;  %v12258_v0 = vpop.permute.xlu0 %9041  ;;  %v9019_v4 = vunpack.i.h.bf16 %v9017_v37 }
 0x296   : > { %10167 = vrcp.f32 %v3107_v11  ;;  %v5277_v26 = vpop.permute.xlu2 %5276 }
 0x297   : > { %3202 = vst.msk [vmem:[#allocation2 + $0xf9] sm:$0xff] %vm550_vm1, %v12252_v22  ;;  %v12263_v47 = vadd.f32 %v12020_v29, %v2945_v52  ;;  %v4274_v10 = vsel %vm550_vm1, %v11719_v3, %v9019_v4 }
 0x298   : > { %v2807_v54 = vpop.f32.mrf.mxu2  ;;  %5367 = vst.msk [vmem:[#allocation2 + $0x51] sm:$0xff] %vm550_vm1, %v5277_v26  ;;  %v12272_v63 = vpop.f32.mrf.mxu1  ;;  %v4306_v4 = vsel %vm2250_vm3, %v4274_v10, %v9024_v21 }
 0x299   : > { %v3013_v60 = vsub.f32 0.0, %v12263_v47  ;;  %v2808_v6 = vadd.f32 %v2807_v54, %v2718_v44  ;;  %v12282_v44 = vpop.f32.mrf.mxu3 }
 0x29a   : > { %5296 = vrot.lane.b32.xlu0 %v12133_v56, %s10534_s27  ;;  %v4368_v56 = vsel %vm550_vm1, %v12162_v13, %v9034_v12  ;;  %v12305_v13 = vld [vmem:[#allocation2 + $0xca] sm:$0xff]  ;;  %v9064_v12 = vunpack.i.h.bf16 %v12233_v35 }
 0x29b   : > { %v10166_v58 = vpop.eup %10165  ;;  %v3067_v48 = vmul.f32 1.442695, %v3013_v60  ;;  %v2897_v23 = vadd.f32 %v12217_v15, %v2808_v6  ;;  %9211 = vrot.lane.b32.xlu1 %v9185_v28, %s10534_s27  ;;  %v9023_v28 = vunpack.i.l.bf16 %v12105_v45  ;;  %v12303_v45 = vld [vmem:[#allocation2 + $0xc2] sm:$0xff] }
 0x29c   : > { %v10168_v19 = vpop.eup %10167  ;;  %v3108_v37 = vadd.f32 1.0, %v10166_v58  ;;  %9196 = vrot.lane.b32.xlu2 %v9205_v36, %s10534_s27  ;;  %v9057_v53 = vpop.permute.xlu1 %9056  ;;  %v9230_v8 = vpack.i.bf16 %v12305_v13, %v12303_v45 }
 0x29d   : > { %v12285_v15 = vmul.f32 %v10168_v19, %v12209_v39  ;;  %10169 = vpow2.f32 %v3067_v48  ;;  %v2946_v3 = vmul.f32 %v12009_v41, %v2897_v23  ;;  %v9047_v39 = vpop.permute.xlu0 %9046  ;;  %v9059_v40 = vunpack.i.h.bf16 %v9057_v53 }
 0x29e   : > { %10171 = vrcp.f32 %v3108_v37  ;;  %v9058_v9 = vunpack.i.l.bf16 %v9057_v53  ;;  %v9049_v36 = vunpack.i.h.bf16 %v9047_v39  ;;  %v12301_v33 = vpop.permute.xlu2 %9081  ;;  %v9048_v11 = vunpack.i.l.bf16 %v9047_v39  ;;  %v12335_v39 = vld [vmem:[#allocation2 + $0x49] sm:$0xff] }
 0x29f   : > { %3203 = vst.msk [vmem:[#allocation2 + $0x109] sm:$0xff] %vm550_vm1, %v12285_v15  ;;  %v12299_v62 = vadd.f32 %v12020_v29, %v2946_v3  ;;  %v4305_v26 = vsel %vm2250_vm3, %v4273_v17, %v9023_v28  ;;  %v4400_v60 = vsel %vm2250_vm3, %v4368_v56, %v9059_v40 }
 0x2a0   : > { %v2810_v52 = vpop.f32.mrf.mxu2  ;;  %v4399_v18 = vsel %vm2250_vm3, %v4367_v31, %v9058_v9  ;;  %v4337_v58 = vsel %vm2283_vm4, %v4305_v26, %v9048_v11  ;;  %v4338_v48 = vsel %vm2283_vm4, %v4306_v4, %v9049_v36  ;;  %v4432_v35 = vsel %vm2283_vm4, %v4400_v60, %v9064_v12  ;;  %v2726_v28 = vpop.f32.mrf.mxu1  ;;  %v12340_v9 = vld [vmem:[#allocation2 + $0xc8] sm:$0xff] }
 0x2a1   : > { %v3014_v54 = vsub.f32 0.0, %v12299_v62  ;;  %v2811_v6 = vadd.f32 %v2810_v52, %v12241_v16  ;;  %v4466_v10 = vpack.c.bf16 %v4338_v48, %v4337_v58  ;;  %v4431_v37 = vsel %vm2283_vm4, %v4399_v18, %v9063_v1  ;;  %v2904_v53 = vpop.f32.mrf.mxu3  ;;  %v12343_v36 = vld [vmem:[#allocation2 + $0xc9] sm:$0xff]  ;;  %v12347_v52 = vld [vmem:[#allocation2 + $0xc0] sm:$0xff] }
 0x2a2   : > { %9221 = vrot.lane.b32.xlu0 %v9230_v8, %s10532_s23  ;;  %v9235_v26 = vpack.i.bf16 %v12340_v9, %v12347_v52  ;;  %v12351_v4 = vld [vmem:[#allocation2 + $0xc1] sm:$0xff]  ;;  %v9054_v18 = vunpack.i.h.bf16 %v12256_v57  ;;  %v9053_v58 = vunpack.i.l.bf16 %v12256_v57 }
 0x2a3   : > { %8266 = vmatmul.msk.bf16.gmra.mxu1 %vm550_vm1, %v4480_v51  ;;  %v10170_v23 = vpop.eup %10169  ;;  %v3069_v19 = vmul.f32 1.442695, %v3014_v54  ;;  %v2900_v21 = vadd.f32 %v12246_v32, %v2811_v6  ;;  %9231 = vrot.lane.b32.xlu1 %v9230_v8, %s10533_s26  ;;  %v4464_v32 = vpack.c.bf16 %v4432_v35, %v4431_v37  ;;  %v9215_v12 = vpack.i.bf16 %v12343_v36, %v12351_v4  ;;  %v5491_v35 = vld [vmem:[#allocation2 + $0x20] sm:$0xff] }
 0x2a4   : > { %v10172_v17 = vpop.eup %10171  ;;  %v3109_v16 = vadd.f32 1.0, %v10170_v23  ;;  %5294 = vrot.lane.b32.xlu2 %v12094_v50, %s10534_s27  ;;  %4716 = vmatmul.bf16.gmra.mxu0 %v4466_v10  ;;  %v5275_v56 = vpop.permute.xlu1 %5274  ;;  %v4370_v57 = vsel %vm550_vm1, %v11807_v25, %v9054_v18 }
 0x2a5   : > { %v12326_v3 = vmul.f32 %v10172_v17, %v12231_v59  ;;  %10173 = vpow2.f32 %v3069_v19  ;;  %v2947_v51 = vmul.f32 %v12009_v41, %v2900_v21  ;;  %v12331_v31 = vpop.permute.xlu0 %9066  ;;  %4800 = vmatmul.bf16.vlgmr.msrb.gmra.mxu3 %v4464_v32  ;;  %5366 = vst.msk [vmem:[#allocation2 + $0x49] sm:$0xff] %vm550_vm1, %v5275_v56 }
 0x2a6   : > { %10175 = vrcp.f32 %v3109_v16  ;;  %v9087_v40 = vpop.permute.xlu2 %9086 }
 0x2a7   : > { %3204 = vst.msk [vmem:[#allocation2 + $0x111] sm:$0xff] %vm550_vm1, %v12326_v3  ;;  %v12338_v59 = vadd.f32 %v12020_v29, %v2947_v51  ;;  %v9089_v48 = vunpack.i.h.bf16 %v9087_v40  ;;  %v9088_v19 = vunpack.i.l.bf16 %v9087_v40  ;;  %v4369_v51 = vsel %vm550_vm1, %v11818_v27, %v9053_v58 }
 0x2a8   : > { %v2812_v50 = vpop.f32.mrf.mxu2  ;;  %v9038_v58 = vunpack.i.l.bf16 %v12211_v38 }
 0x2a9   : > { %v3015_v1 = vsub.f32 0.0, %v12338_v59  ;;  %v2813_v11 = vadd.f32 %v2812_v50, %v12272_v63  ;;  %v4402_v40 = vsel %vm2250_vm3, %v4370_v57, %v9089_v48  ;;  %v4483_v50 = vpack.c.bf16 %v12305_v13, %v12303_v45 }
 0x2aa   : > { %9226 = vrot.lane.b32.xlu0 %v9235_v26, %s10534_s27 }
 0x2ab   : > { %v10174_v54 = vpop.eup %10173  ;;  %v3071_v60 = vmul.f32 1.442695, %v3015_v1  ;;  %v2902_v6 = vadd.f32 %v12282_v44, %v2813_v11  ;;  %9236 = vrot.lane.b32.xlu1 %v9235_v26, %s10532_s23  ;;  %v2906_v1 = vpop.f32.mrf.mxu3  ;;  %v5490_v26 = vld [vmem:[#allocation2 + $0x18] sm:$0xff] }
 0x2ac   : > { %v10176_v8 = vpop.eup %10175  ;;  %v3110_v63 = vadd.f32 1.0, %v10174_v54  ;;  %9216 = vrot.lane.b32.xlu2 %v9215_v12, %s10533_s26  ;;  %v4401_v54 = vsel %vm2250_vm3, %v4369_v51, %v9088_v19  ;;  %v9043_v19 = vunpack.i.l.bf16 %v12258_v0 }
 0x2ad   : > { %v12361_v23 = vmul.f32 %v10176_v8, %v12263_v47  ;;  %10177 = vpow2.f32 %v3071_v60  ;;  %v2948_v21 = vmul.f32 %v12009_v41, %v2902_v6  ;;  %v12365_v44 = vpop.permute.xlu1 %9071  ;;  %v9092_v10 = vpop.permute.xlu0 %9091  ;;  %v9039_v60 = vunpack.i.h.bf16 %v12211_v38 }
 0x2ae   : > { %10179 = vrcp.f32 %v3110_v63  ;;  %v2728_v47 = vpop.f32.mrf.mxu1  ;;  %v9094_v17 = vunpack.i.h.bf16 %v9092_v10  ;;  %v12374_v16 = vpop.permute.xlu2 %9101  ;;  %v9093_v32 = vunpack.i.l.bf16 %v9092_v10  ;;  %v9245_v6 = vpack.i.bf16 %v5491_v35, %v5490_v26  ;;  %v12402_v35 = vld [vmem:[#allocation2 + $0x60] sm:$0xff] }
 0x2af   : > { %3205 = vst.msk [vmem:[#allocation2 + $0x121] sm:$0xff] %vm550_vm1, %v12361_v23  ;;  %v12372_v37 = vadd.f32 %v12020_v29, %v2948_v21 }
 0x2b0   : > { %v2815_v56 = vpop.f32.mrf.mxu2  ;;  %v4434_v18 = vsel %vm2283_vm4, %v4402_v40, %v9094_v17  ;;  %v4433_v27 = vsel %vm2283_vm4, %v4401_v54, %v9093_v32  ;;  %v12400_v17 = vld [vmem:[#allocation2 + $0x61] sm:$0xff] }
 0x2b1   : > { %v3016_v25 = vsub.f32 0.0, %v12372_v37  ;;  %v2816_v11 = vadd.f32 %v2815_v56, %v2726_v28  ;;  %v4467_v63 = vpack.c.bf16 %v4434_v18, %v4433_v27  ;;  %v9044_v28 = vunpack.i.h.bf16 %v12258_v0  ;;  %v12413_v32 = vld [vmem:[#allocation2 + $0xe1] sm:$0xff]  ;;  %v5428_v27 = vld [vmem:[#allocation2 + $0x19] sm:$0xff] }
 0x2b2   : > { %9246 = vrot.lane.b32.xlu0 %v9245_v6, %s10534_s27  ;;  %v5429_v56 = vld [vmem:[#allocation2 + $0x21] sm:$0xff]  ;;  %v12421_v6 = vld [vmem:[#allocation2 + $0xd9] sm:$0xff] }
 0x2b3   : > { %8267 = vmatmul.msk.bf16.gmra.mxu1 %vm550_vm1, %v4483_v50  ;;  %v10178_v8 = vpop.eup %10177  ;;  %v3073_v45 = vmul.f32 1.442695, %v3016_v25  ;;  %v2905_v13 = vadd.f32 %v2904_v53, %v2816_v11  ;;  %5298 = vrot.lane.b32.xlu1 %v12171_v61, %s10534_s27  ;;  %v4276_v53 = vsel %vm550_vm1, %v11801_v5, %v9039_v60  ;;  %v4275_v61 = vsel %vm550_vm1, %v11811_v20, %v9038_v58  ;;  %v12415_v40 = vld [vmem:[#allocation2 + $0x68] sm:$0xff]  ;;  %v5460_v25 = vld [vmem:[#allocation2 + $0x1a] sm:$0xff] }
 0x2b4   : > { %v10180_v48 = vpop.eup %10179  ;;  %v3111_v21 = vadd.f32 1.0, %v10178_v8  ;;  %9241 = vrot.lane.b32.xlu2 %v9215_v12, %s10534_s27  ;;  %v5461_v11 = vld [vmem:[#allocation2 + $0x22] sm:$0xff]  ;;  %v4307_v20 = vsel %vm2250_vm3, %v4275_v61, %v9043_v19  ;;  %v4308_v26 = vsel %vm2250_vm3, %v4276_v53, %v9044_v28  ;;  %v2909_v28 = vpop.f32.mrf.mxu3  ;;  %v3297_v61 = vld [vmem:[#allocation2 + $0xda] sm:$0xff] }
 0x2b5   : > { %v12394_v10 = vmul.f32 %v10180_v48, %v12299_v62  ;;  %10181 = vpow2.f32 %v3073_v45  ;;  %v2949_v38 = vmul.f32 %v12009_v41, %v2905_v13  ;;  %v9077_v57 = vpop.permute.xlu1 %9076  ;;  %v5279_v0 = vpop.permute.xlu0 %5278  ;;  %4805 = vmatmul.bf16.gmra.mxu3 %v4467_v63  ;;  %v9260_v45 = vpack.i.bf16 %v12413_v32, %v12421_v6 }
 0x2b6   : > { %10183 = vrcp.f32 %v3111_v21  ;;  %v9079_v12 = vunpack.i.h.bf16 %v9077_v57  ;;  %v9078_v51 = vunpack.i.l.bf16 %v9077_v57  ;;  %v12411_v5 = vpop.permute.xlu2 %9106  ;;  %5368 = vst.msk [vmem:[#allocation2 + $0x61] sm:$0xff] %vm550_vm1, %v5279_v0  ;;  %v2731_v18 = vpop.f32.mrf.mxu1  ;;  %v9250_v13 = vpack.i.bf16 %v5429_v56, %v5428_v27 }
 0x2b7   : > { %3206 = vst.msk [vmem:[#allocation2 + $0x129] sm:$0xff] %vm550_vm1, %v12394_v10  ;;  %v12409_v62 = vadd.f32 %v12020_v29, %v2949_v38  ;;  %v9255_v38 = vpack.i.bf16 %v5461_v11, %v5460_v25  ;;  %v9068_v27 = vunpack.i.l.bf16 %v12331_v31 }
 0x2b8   : > { %v2817_v50 = vpop.f32.mrf.mxu2  ;;  %v4339_v8 = vsel %vm2283_vm4, %v4307_v20, %v9078_v51  ;;  %v4340_v58 = vsel %vm2283_vm4, %v4308_v26, %v9079_v12  ;;  %v3298_v12 = vld [vmem:[#allocation2 + $0xe2] sm:$0xff]  ;;  %v12444_v20 = vld [vmem:[#allocation2 + $0x79] sm:$0xff] }
 0x2b9   : > { %v3017_v54 = vsub.f32 0.0, %v12409_v62  ;;  %v2818_v60 = vadd.f32 %v2817_v50, %v2728_v47  ;;  %v4469_v63 = vpack.c.bf16 %v4340_v58, %v4339_v8  ;;  %v4486_v11 = vpack.c.bf16 %v3298_v12, %v3297_v61 }
 0x2ba   : > { %9261 = vrot.lane.b32.xlu0 %v9260_v45, %s10533_s26  ;;  %v9265_v8 = vpack.i.bf16 %v3298_v12, %v3297_v61 }
 0x2bb   : > { %v10182_v48 = vpop.eup %10181  ;;  %v3075_v19 = vmul.f32 1.442695, %v3017_v54  ;;  %v2907_v21 = vadd.f32 %v2906_v1, %v2818_v60  ;;  %9251 = vrot.lane.b32.xlu1 %v9250_v13, %s10533_s26  ;;  %4721 = vmatmul.bf16.gmra.mxu0 %v4469_v63  ;;  %v9069_v60 = vunpack.i.h.bf16 %v12331_v31  ;;  %v9074_v13 = vunpack.i.h.bf16 %v12365_v44 }
 0x2bc   : > { %v10184_v53 = vpop.eup %10183  ;;  %v3112_v57 = vadd.f32 1.0, %v10182_v48  ;;  %9256 = vrot.lane.b32.xlu2 %v9255_v38, %s10532_s23  ;;  %v9073_v63 = vunpack.i.l.bf16 %v12365_v44  ;;  %v2911_v31 = vpop.f32.mrf.mxu3 }
 0x2bd   : > { %v12430_v47 = vmul.f32 %v10184_v53, %v12338_v59  ;;  %10185 = vpow2.f32 %v3075_v19  ;;  %v2950_v0 = vmul.f32 %v12009_v41, %v2907_v21  ;;  %v5281_v1 = vpop.permute.xlu1 %5280  ;;  %v12434_v51 = vpop.permute.xlu0 %9111  ;;  %v12441_v59 = vld [vmem:[#allocation2 + $0x69] sm:$0xff] }
 0x2be   : > { %10187 = vrcp.f32 %v3112_v57  ;;  %v5283_v50 = vpop.permute.xlu2 %5282  ;;  %5369 = vst.msk [vmem:[#allocation2 + $0x69] sm:$0xff] %vm550_vm1, %v5281_v1  ;;  %v2733_v19 = vpop.f32.mrf.mxu1  ;;  %v9108_v57 = vunpack.i.l.bf16 %v12411_v5  ;;  %v12476_v1 = vld [vmem:[#allocation2 + $0xe0] sm:$0xff] }
 0x2bf   : > { %3207 = vst.msk [vmem:[#allocation2 + $0x139] sm:$0xff] %vm550_vm1, %v12430_v47  ;;  %v12439_v56 = vadd.f32 %v12020_v29, %v2950_v0 }
 0x2c0   : > { %v2820_v25 = vpop.f32.mrf.mxu2  ;;  %5370 = vst.msk [vmem:[#allocation2 + $0x79] sm:$0xff] %vm550_vm1, %v5283_v50 }
 0x2c1   : > { %v3018_v26 = vsub.f32 0.0, %v12439_v56  ;;  %v2821_v54 = vadd.f32 %v2820_v25, %v2731_v18  ;;  %v9109_v18 = vunpack.i.h.bf16 %v12411_v5  ;;  %v4277_v5 = vsel %vm550_vm1, %v11928_v24, %v9068_v27 }
 0x2c2   : > { %9286 = vrot.lane.b32.xlu0 %v9260_v45, %s10534_s27 }
 0x2c3   : > { %8268 = vmatmul.msk.bf16.gmra.mxu1 %vm550_vm1, %v4486_v11  ;;  %v10186_v58 = vpop.eup %10185  ;;  %v3077_v48 = vmul.f32 1.442695, %v3018_v26  ;;  %v2910_v21 = vadd.f32 %v2909_v28, %v2821_v54  ;;  %9266 = vrot.lane.b32.xlu1 %v9265_v8, %s10532_s23  ;;  %v4278_v28 = vsel %vm550_vm1, %v11922_v42, %v9069_v60  ;;  %v12483_v54 = vld [vmem:[#allocation2 + $0xd8] sm:$0xff] }
 0x2c4   : > { %v10188_v38 = vpop.eup %10187  ;;  %v3113_v53 = vadd.f32 1.0, %v10186_v58  ;;  %5300 = vrot.lane.b32.xlu2 %v12197_v34, %s10534_s27  ;;  %v4309_v34 = vsel %vm2250_vm3, %v4277_v5, %v9073_v63  ;;  %v4310_v42 = vsel %vm2250_vm3, %v4278_v28, %v9074_v13  ;;  %v9270_v60 = vpack.i.bf16 %v12476_v1, %v12483_v54  ;;  %v2914_v28 = vpop.f32.mrf.mxu3  ;;  %v12501_v5 = vld [vmem:[#allocation2 + $0xf2] sm:$0xff] }
 0x2c5   : > { %v12458_v0 = vmul.f32 %v10188_v38, %v12372_v37  ;;  %10189 = vpow2.f32 %v3077_v48  ;;  %v2951_v44 = vmul.f32 %v12009_v41, %v2910_v21  ;;  %v12467_v45 = vpop.permute.xlu1 %9096  ;;  %v9117_v61 = vpop.permute.xlu0 %9116  ;;  %v4341_v24 = vsel %vm2283_vm4, %v4309_v34, %v9108_v57  ;;  %v12489_v21 = vld [vmem:[#allocation2 + $0x62] sm:$0xff]  ;;  %v12491_v38 = vld [vmem:[#allocation2 + $0x6a] sm:$0xff]  ;;  %v12503_v34 = vld [vmem:[#allocation2 + $0xfa] sm:$0xff] }
 0x2c6   : > { %10191 = vrcp.f32 %v3113_v53  ;;  %v12474_v12 = vpop.permute.xlu2 %9126  ;;  %v4342_v25 = vsel %vm2283_vm4, %v4310_v42, %v9109_v18  ;;  %v9083_v58 = vunpack.i.l.bf16 %v12301_v33  ;;  %14887 = vst [vmem:[#allocation5_spill] sm:$0xff] %v12489_v21  ;;  %v9118_v57 = vunpack.i.l.bf16 %v9117_v61 }
 0x2c7   : > { %3208 = vst.msk [vmem:[#allocation2 + $0x141] sm:$0xff] %vm550_vm1, %v12458_v0  ;;  %v12472_v37 = vadd.f32 %v12020_v29, %v2951_v44  ;;  %v9084_v29 = vunpack.i.h.bf16 %v12301_v33  ;;  %v4472_v48 = vpack.c.bf16 %v4342_v25, %v4341_v24  ;;  %v2736_v33 = vpop.f32.mrf.mxu1 }
 0x2c8   : > { %v2822_v50 = vpop.f32.mrf.mxu2  ;;  %14888 = vst [vmem:[#allocation6_spill] sm:$0xff] %v12491_v38 }
 0x2c9   : > { %v3019_v11 = vsub.f32 0.0, %v12472_v37  ;;  %v2823_v26 = vadd.f32 %v2822_v50, %v2733_v19  ;;  %v9119_v19 = vunpack.i.h.bf16 %v9117_v61 }
 0x2ca   : > { %5302 = vrot.lane.b32.xlu0 %v12236_v43, %s10534_s27  ;;  %v4372_v43 = vsel %vm550_vm1, %v12265_v2, %v9084_v29  ;;  %v12523_v29 = vld [vmem:[#allocation2 + $0x81] sm:$0xff] }
 0x2cb   : > { %v10190_v27 = vpop.eup %10189  ;;  %v3079_v63 = vmul.f32 1.442695, %v3019_v11  ;;  %v2912_v13 = vadd.f32 %v2911_v31, %v2823_v26  ;;  %9271 = vrot.lane.b32.xlu1 %v9270_v60, %s10534_s27  ;;  %4726 = vmatmul.bf16.gmra.mxu0 %v4472_v48  ;;  %v5493_v11 = vld [vmem:[#allocation2 + $0x38] sm:$0xff] }
 0x2cc   : > { %v10192_v53 = vpop.eup %10191  ;;  %v3114_v18 = vadd.f32 1.0, %v10190_v27  ;;  %9276 = vrot.lane.b32.xlu2 %v9265_v8, %s10533_s26  ;;  %v12516_v8 = vld [vmem:[%s14860_s6] ss:$0 sm:$0xff] }
 0x2cd   : > { %v12497_v44 = vmul.f32 %v10192_v53, %v12409_v62  ;;  %10193 = vpow2.f32 %v3079_v63  ;;  %v2952_v31 = vmul.f32 %v12009_v41, %v2912_v13  ;;  %v9122_v61 = vpop.permute.xlu1 %9121  ;;  %v5285_v42 = vpop.permute.xlu0 %5284  ;;  %v4371_v41 = vsel %vm550_vm1, %v12335_v39, %v9083_v58  ;;  %v5431_v26 = vld [vmem:[#allocation2 + $0x39] sm:$0xff]  ;;  %v5492_v53 = vld [vmem:[#allocation2 + $0x30] sm:$0xff] }
 0x2ce   : > { %10195 = vrcp.f32 %v3114_v18  ;;  %v9124_v2 = vunpack.i.h.bf16 %v9122_v61  ;;  %v9123_v24 = vunpack.i.l.bf16 %v9122_v61  ;;  %v12521_v25 = vpop.permute.xlu2 %9151  ;;  %v4403_v27 = vsel %vm2250_vm3, %v4371_v41, %v9118_v57  ;;  %5371 = vst.msk [vmem:[#allocation2 + $0x81] sm:$0xff] %vm550_vm1, %v5285_v42  ;;  %v5430_v18 = vld [vmem:[#allocation2 + $0x31] sm:$0xff] }
 0x2cf   : > { %3209 = vst.msk [vmem:[#allocation2 + $0x151] sm:$0xff] %vm550_vm1, %v12497_v44  ;;  %v12519_v50 = vadd.f32 %v12516_v8, %v2952_v31  ;;  %v4404_v58 = vsel %vm2250_vm3, %v4372_v43, %v9119_v19  ;;  %v4489_v63 = vpack.c.bf16 %v12503_v34, %v12501_v5  ;;  %v9290_v62 = vpack.i.bf16 %v5493_v11, %v5492_v53 }
 0x2d0   : > { %v2825_v39 = vpop.f32.mrf.mxu2  ;;  %v4435_v31 = vsel %vm2283_vm4, %v4403_v27, %v9123_v24  ;;  %v4436_v61 = vsel %vm2283_vm4, %v4404_v58, %v9124_v2  ;;  %v9295_v21 = vpack.i.bf16 %v5431_v26, %v5430_v18  ;;  %v10490_v2 = vld [vmem:[%s14859_s5] ss:$0 sm:$0xff]  ;;  %v12555_v26 = vld [vmem:[#allocation2 + $0x98] sm:$0xff]  ;;  %v12560_v18 = vld [vmem:[#allocation2 + $0x10a] sm:$0xff] }
 0x2d1   : > { %v3020_v13 = vsub.f32 0.0, %v12519_v50  ;;  %v2826_v48 = vadd.f32 %v2825_v39, %v2736_v33  ;;  %v4470_v38 = vpack.c.bf16 %v4436_v61, %v4435_v31  ;;  %v2738_v39 = vpop.f32.mrf.mxu1  ;;  %v5462_v58 = vld [vmem:[#allocation2 + $0x32] sm:$0xff]  ;;  %v9114_v61 = vunpack.i.h.bf16 %v12434_v51 }
 0x2d2   : > { %9291 = vrot.lane.b32.xlu0 %v9290_v62, %s10534_s27  ;;  %v12553_v62 = vld [vmem:[#allocation2 + $0x99] sm:$0xff] }
 0x2d3   : > { %8269 = vmatmul.msk.bf16.gmra.mxu1 %vm550_vm1, %v4489_v63  ;;  %v10194_v19 = vpop.eup %10193  ;;  %v3081_v57 = vmul.f32 1.442695, %v3020_v13  ;;  %v2915_v43 = vadd.f32 %v2914_v28, %v2826_v48  ;;  %9296 = vrot.lane.b32.xlu1 %v9295_v21, %s10533_s26  ;;  %v5463_v63 = vld [vmem:[#allocation2 + $0x3a] sm:$0xff]  ;;  %v9099_v13 = vunpack.i.h.bf16 %v12467_v45  ;;  %v12562_v31 = vld [vmem:[#allocation2 + $0x112] sm:$0xff] }
 0x2d4   : > { %v10196_v42 = vpop.eup %10195  ;;  %v3115_v41 = vadd.f32 1.0, %v10194_v19  ;;  %9281 = vrot.lane.b32.xlu2 %v9270_v60, %s10532_s23  ;;  %4810 = vmatmul.bf16.gmra.mxu3 %v4470_v38  ;;  %v2916_v38 = vpop.f32.mrf.mxu3  ;;  %v9113_v19 = vunpack.i.l.bf16 %v12434_v51  ;;  %v4492_v51 = vpack.c.bf16 %v12562_v31, %v12560_v18 }
 0x2d5   : > { %v12537_v33 = vmul.f32 %v10196_v42, %v12439_v56  ;;  %10197 = vpow2.f32 %v3081_v57  ;;  %v2953_v24 = vmul.f32 %v10490_v2, %v2915_v43  ;;  %v12543_v28 = vpop.permute.xlu1 %9141  ;;  %v12545_v11 = vpop.permute.xlu0 %9131  ;;  %v9098_v56 = vunpack.i.l.bf16 %v12467_v45 }
 0x2d6   : > { %10199 = vrcp.f32 %v3115_v41  ;;  %v5289_v60 = vpop.permute.xlu2 %5288  ;;  %v9320_v57 = vpack.i.bf16 %v12503_v34, %v12501_v5  ;;  %v9300_v45 = vpack.i.bf16 %v5463_v63, %v5462_v58 }
 0x2d7   : > { %3210 = vst.msk [vmem:[#allocation2 + $0x159] sm:$0xff] %vm550_vm1, %v12537_v33  ;;  %v12551_v21 = vadd.f32 %v12516_v8, %v2953_v24  ;;  %v4279_v42 = vsel %vm550_vm1, %v12402_v35, %v9098_v56  ;;  %v4280_v35 = vsel %vm550_vm1, %v12415_v40, %v9099_v13  ;;  %v4373_v56 = vsel %vm550_vm1, %v12400_v17, %v9113_v19 }
 0x2d8   : > { %v2827_v27 = vpop.f32.mrf.mxu2  ;;  %5373 = vst.msk [vmem:[#allocation2 + $0x99] sm:$0xff] %vm550_vm1, %v5289_v60  ;;  %v9153_v17 = vunpack.i.l.bf16 %v12521_v25 }
 0x2d9   : > { %v3021_v48 = vsub.f32 0.0, %v12551_v21  ;;  %v2828_v53 = vadd.f32 %v2827_v27, %v2738_v39  ;;  %v9104_v39 = vunpack.i.h.bf16 %v12374_v16  ;;  %v9103_v27 = vunpack.i.l.bf16 %v12374_v16 }
 0x2da   : > { %9321 = vrot.lane.b32.xlu0 %v9320_v57, %s10533_s26  ;;  %v4374_v16 = vsel %vm550_vm1, %v12441_v59, %v9114_v61  ;;  %v3424_v59 = vld [vmem:[#allocation2 + $0xf8] sm:$0xff] }
 0x2db   : > { %v10198_v43 = vpop.eup %10197  ;;  %v3083_v41 = vmul.f32 1.442695, %v3021_v48  ;;  %v2917_v24 = vadd.f32 %v2916_v38, %v2828_v53  ;;  %5304 = vrot.lane.b32.xlu1 %v12252_v22, %s10534_s27  ;;  %v4311_v58 = vsel %vm2250_vm3, %v4279_v42, %v9103_v27  ;;  %v12595_v48 = vld [vmem:[#allocation2 + $0xf9] sm:$0xff]  ;;  %v4312_v61 = vsel %vm2250_vm3, %v4280_v35, %v9104_v39 }
 0x2dc   : > { %v10200_v60 = vpop.eup %10199  ;;  %v3116_v30 = vadd.f32 1.0, %v10198_v43  ;;  %9301 = vrot.lane.b32.xlu2 %v9300_v45, %s10532_s23  ;;  %v3423_v43 = vld [vmem:[#allocation2 + $0xf0] sm:$0xff] }
 0x2dd   : > { %v12578_v5 = vmul.f32 %v10200_v60, %v12472_v37  ;;  %10201 = vpow2.f32 %v3083_v41  ;;  %v2954_v34 = vmul.f32 %v10490_v2, %v2917_v24  ;;  %v9147_v22 = vpop.permute.xlu1 %9146  ;;  %v9137_v38 = vpop.permute.xlu0 %9136  ;;  %v9325_v24 = vpack.i.bf16 %v3424_v59, %v3423_v43 }
 0x2de   : > { %10203 = vrcp.f32 %v3116_v30  ;;  %v9149_v37 = vunpack.i.h.bf16 %v9147_v22  ;;  %v9148_v63 = vunpack.i.l.bf16 %v9147_v22  ;;  %v9139_v2 = vunpack.i.h.bf16 %v9137_v38  ;;  %v12593_v13 = vpop.permute.xlu2 %9171 }
 0x2df   : > { %3211 = vst.msk [vmem:[#allocation2 + $0x169] sm:$0xff] %vm550_vm1, %v12578_v5  ;;  %v12591_v40 = vadd.f32 %v12516_v8, %v2954_v34  ;;  %v9154_v30 = vunpack.i.h.bf16 %v12521_v25  ;;  %v9138_v53 = vunpack.i.l.bf16 %v9137_v38  ;;  %v12601_v8 = vld [vmem:[#allocation2 + $0xf1] sm:$0xff] }
 0x2e0   : > { %v4344_v42 = vsel %vm2283_vm4, %v4312_v61, %v9139_v2  ;;  %v4405_v41 = vsel %vm2250_vm3, %v4373_v56, %v9148_v63  ;;  %v4406_v45 = vsel %vm2250_vm3, %v4374_v16, %v9149_v37  ;;  %v9305_v60 = vpack.i.bf16 %v12595_v48, %v12601_v8 }
 0x2e1   : > { %v3022_v19 = vsub.f32 0.0, %v12591_v40  ;;  %v4343_v25 = vsel %vm2283_vm4, %v4311_v58, %v9138_v53  ;;  %v4437_v27 = vsel %vm2283_vm4, %v4405_v41, %v9153_v17  ;;  %v4438_v22 = vsel %vm2283_vm4, %v4406_v45, %v9154_v30  ;;  %v12621_v58 = vld [vmem:[#allocation2 + $0x91] sm:$0xff]  ;;  %v5494_v30 = vld [vmem:[#allocation2 + $0x48] sm:$0xff] }
 0x2e2   : > { %v4475_v34 = vpack.c.bf16 %v4344_v42, %v4343_v25  ;;  %9326 = vrot.lane.b32.xlu0 %v9325_v24, %s10532_s23  ;;  %v4473_v16 = vpack.c.bf16 %v4438_v22, %v4437_v27  ;;  %v9144_v61 = vunpack.i.h.bf16 %v12543_v28  ;;  %v12638_v27 = vld [vmem:[#allocation2 + $0x122] sm:$0xff] }
 0x2e3   : > { %8270 = vmatmul.msk.bf16.gmra.mxu1 %vm550_vm1, %v4492_v51  ;;  %v10202_v39 = vpop.eup %10201  ;;  %v3085_v35 = vmul.f32 1.442695, %v3022_v19  ;;  %9306 = vrot.lane.b32.xlu1 %v9305_v60, %s10533_s26  ;;  %v8477_v51 = vld [vmem:[%s14864_s10 + $0x38] sm:$0xff]  ;;  %v9143_v19 = vunpack.i.l.bf16 %v12543_v28 }
 0x2e4   : > { %v10204_v38 = vpop.eup %10203  ;;  %v3117_v2 = vadd.f32 1.0, %v10202_v39  ;;  %9311 = vrot.lane.b32.xlu2 %v9320_v57, %s10532_s23  ;;  %4731 = vmatmul.bf16.gmra.mxu0 %v4475_v34  ;;  %v5495_v57 = vld [vmem:[#allocation2 + $0x50] sm:$0xff] }
 0x2e5   : > { %v12615_v56 = vmul.f32 %v10204_v38, %v12519_v50  ;;  %10205 = vpow2.f32 %v3085_v35  ;;  %4815 = vmatmul.bf16.gmra.mxu3 %v4473_v16  ;;  %v5287_v37 = vpop.permute.xlu1 %5286  ;;  %v12623_v63 = vpop.permute.xlu0 %9156  ;;  %v12627_v50 = vld [vmem:[#allocation2 + $0x90] sm:$0xff]  ;;  %6882 = vmatpush.bf16.msrb.mxu2 %v8477_v51  ;;  %v9335_v17 = vpack.i.bf16 %v5495_v57, %v5494_v30  ;;  %v9355_v57 = vpack.i.bf16 %v12562_v31, %v12560_v18  ;;  %v8475_v31 = vld [vmem:[%s14864_s10 + $0x28] sm:$0xff] }
 0x2e6   : > { %10207 = vrcp.f32 %v3117_v2  ;;  %v9177_v59 = vpop.permute.xlu2 %9176  ;;  %5372 = vst.msk [vmem:[#allocation2 + $0x91] sm:$0xff] %vm550_vm1, %v5287_v37  ;;  %v12640_v39 = vld [vmem:[#allocation2 + $0x12a] sm:$0xff] }
 0x2e7   : > { %3212 = vst.msk [vmem:[#allocation2 + $0x171] sm:$0xff] %vm550_vm1, %v12615_v56  ;;  %v9179_v41 = vunpack.i.h.bf16 %v9177_v59  ;;  %v9178_v45 = vunpack.i.l.bf16 %v9177_v59  ;;  %v5432_v38 = vld [vmem:[#allocation2 + $0x49] sm:$0xff]  ;;  %v4495_v37 = vpack.c.bf16 %v12640_v39, %v12638_v27  ;;  %v5433_v59 = vld [vmem:[#allocation2 + $0x51] sm:$0xff] }
 0x2e8   : > { %v5464_v2 = vld [vmem:[#allocation2 + $0x4a] sm:$0xff] }
 0x2ea   : > { %9336 = vrot.lane.b32.xlu0 %v9335_v17, %s10534_s27  ;;  %v5465_v17 = vld [vmem:[#allocation2 + $0x52] sm:$0xff] }
 0x2eb   : > { %v10206_v53 = vpop.eup %10205  ;;  %9331 = vrot.lane.b32.xlu1 %v9305_v60, %s10534_s27  ;;  %v4376_v60 = vsel %vm550_vm1, %v12523_v29, %v9144_v61  ;;  %v8476_v29 = vld [vmem:[%s14864_s10 + $0x30] sm:$0xff] }
 0x2ec   : > { %v10208_v43 = vpop.eup %10207  ;;  %v3118_v42 = vadd.f32 1.0, %v10206_v53  ;;  %9316 = vrot.lane.b32.xlu2 %v9325_v24, %s10534_s27  ;;  %v4408_v51 = vsel %vm2250_vm3, %v4376_v60, %v9179_v41  ;;  %v9340_v53 = vpack.i.bf16 %v5433_v59, %v5432_v38  ;;  %6883 = vmatpush.bf16.msrb.mxu2 %v8476_v29 }
 0x2ed   : > { %v12635_v25 = vmul.f32 %v10208_v43, %v12551_v21  ;;  %v12642_v35 = vpop.permute.xlu1 %9161  ;;  %v9182_v28 = vpop.permute.xlu0 %9181  ;;  %v4375_v21 = vsel %vm550_vm1, %v12444_v20, %v9143_v19  ;;  %v9129_v19 = vunpack.i.h.bf16 %v12474_v12  ;;  %v9128_v43 = vunpack.i.l.bf16 %v12474_v12 }
 0x2ee   : > { %10209 = vrcp.f32 %v3118_v42  ;;  %v9184_v34 = vunpack.i.h.bf16 %v9182_v28  ;;  %v9183_v22 = vunpack.i.l.bf16 %v9182_v28  ;;  %v12650_v24 = vpop.permute.xlu2 %9191  ;;  %v4407_v16 = vsel %vm2250_vm3, %v4375_v21, %v9178_v45  ;;  %v12677_v21 = vld [vmem:[#allocation2 + $0xa9] sm:$0xff] }
 0x2ef   : > { %14889 = vst [vmem:[#allocation7_spill] sm:$0xff] %v12635_v25  ;;  %v9345_v42 = vpack.i.bf16 %v5465_v17, %v5464_v2  ;;  %v9134_v45 = vunpack.i.h.bf16 %v12545_v11  ;;  %v9133_v28 = vunpack.i.l.bf16 %v12545_v11  ;;  %v4282_v11 = vsel %vm550_vm1, %v12077_v49, %v9129_v19  ;;  %v12687_v2 = vld [vmem:[#allocation2 + $0x110] sm:$0xff] }
 0x2f0   : > { %3213 = vst.msk [vmem:[#allocation2 + $0x181] sm:$0xff] %vm550_vm1, %v12635_v25  ;;  %v4439_v20 = vsel %vm2283_vm4, %v4407_v16, %v9183_v22  ;;  %v4440_v30 = vsel %vm2283_vm4, %v4408_v51, %v9184_v34  ;;  %v4281_v34 = vsel %vm550_vm1, %v12083_v55, %v9128_v43  ;;  %v12689_v16 = vld [vmem:[#allocation2 + $0xa8] sm:$0xff]  ;;  %v12691_v51 = vld [vmem:[#allocation2 + $0xb0] sm:$0xff]  ;;  %6884 = vmatpush.bf16.msrb.mxu2 %v8475_v31  ;;  %v12708_v43 = vld [vmem:[#allocation2 + $0x13a] sm:$0xff]  ;;  %v9173_v25 = vunpack.i.l.bf16 %v12593_v13 }
 0x2f1   : > { %v4476_v61 = vpack.c.bf16 %v4440_v30, %v4439_v20  ;;  %v4313_v49 = vsel %vm2250_vm3, %v4281_v34, %v9133_v28  ;;  %v4314_v29 = vsel %vm2250_vm3, %v4282_v11, %v9134_v45  ;;  %v12696_v55 = vld [vmem:[#allocation2 + $0x108] sm:$0xff]  ;;  %v8474_v30 = vld [vmem:[%s14864_s10 + $0x20] sm:$0xff]  ;;  %v12715_v28 = vld [vmem:[#allocation2 + $0xb1] sm:$0xff] }
 0x2f2   : > { %9356 = vrot.lane.b32.xlu0 %v9355_v57, %s10532_s23  ;;  %v9360_v17 = vpack.i.bf16 %v12687_v2, %v12696_v55  ;;  %v5496_v34 = vld [vmem:[#allocation2 + $0x60] sm:$0xff] }
 0x2f3   : > { %8271 = vmatmul.msk.bf16.gmra.mxu1 %vm550_vm1, %v4495_v37  ;;  %9341 = vrot.lane.b32.xlu1 %v9340_v53, %s10533_s26  ;;  %v3270_v37 = vld [vmem:[#allocation2 + $0x111] sm:$0xff]  ;;  %v3269_v53 = vld [vmem:[#allocation2 + $0x109] sm:$0xff] }
 0x2f4   : > { %v10210_v41 = vpop.eup %10209  ;;  %9346 = vrot.lane.b32.xlu2 %v9345_v42, %s10532_s23  ;;  %v9350_v19 = vpack.i.bf16 %v3270_v37, %v3269_v53  ;;  %6885 = vmatpush.bf16.msrb.mxu2 %v8474_v30  ;;  %v12710_v42 = vld [vmem:[#allocation2 + $0x142] sm:$0xff] }
 0x2f5   : > { %v12671_v18 = vmul.f32 %v10210_v41, %v12591_v40  ;;  %4820 = vmatmul.bf16.gmra.mxu3 %v4476_v61  ;;  %v9167_v12 = vpop.permute.xlu1 %9166  ;;  %v5291_v60 = vpop.permute.xlu0 %5290  ;;  %v8473_v41 = vld [vmem:[%s14864_s10 + $0x18] sm:$0xff]  ;;  %v4498_v11 = vpack.c.bf16 %v12710_v42, %v12708_v43 }
 0x2f6   : > { %v9169_v40 = vunpack.i.h.bf16 %v9167_v12  ;;  %v9168_v22 = vunpack.i.l.bf16 %v9167_v12  ;;  %v12685_v38 = vpop.permute.xlu2 %9196  ;;  %5374 = vst.msk [vmem:[#allocation2 + $0xa9] sm:$0xff] %vm550_vm1, %v5291_v60  ;;  %v12719_v12 = vpop.f32.mrf.mxu1 }
 0x2f7   : > { %14890 = vst [vmem:[#allocation8_spill] sm:$0xff] %v12671_v18  ;;  %v9198_v30 = vunpack.i.l.bf16 %v12685_v38 }
 0x2f8   : > { %3214 = vst.msk [vmem:[#allocation2 + $0x189] sm:$0xff] %vm550_vm1, %v12671_v18  ;;  %v4345_v59 = vsel %vm2283_vm4, %v4313_v49, %v9168_v22  ;;  %v4346_v20 = vsel %vm2283_vm4, %v4314_v29, %v9169_v40  ;;  %6886 = vmatpush.bf16.msrb.mxu2 %v8473_v41  ;;  %v9159_v40 = vunpack.i.h.bf16 %v12623_v63  ;;  %v9158_v22 = vunpack.i.l.bf16 %v12623_v63  ;;  %v8472_v49 = vld [vmem:[%s14864_s10 + $0x10] sm:$0xff] }
 0x2f9   : > { %v4478_v61 = vpack.c.bf16 %v4346_v20, %v4345_v59  ;;  %14891 = vst [vmem:[#allocation9_spill] sm:$0xff] %v12719_v12  ;;  %v9164_v29 = vunpack.i.h.bf16 %v12642_v35  ;;  %v9163_v59 = vunpack.i.l.bf16 %v12642_v35  ;;  %v9199_v20 = vunpack.i.h.bf16 %v12685_v38  ;;  %v8471_v38 = vld [vmem:[%s14864_s10 + $0x8] sm:$0xff] }
 0x2fa   : > { %9361 = vrot.lane.b32.xlu0 %v9360_v17, %s10534_s27  ;;  %v4284_v63 = vsel %vm550_vm1, %v12555_v26, %v9159_v40  ;;  %v4283_v53 = vsel %vm550_vm1, %v12627_v50, %v9158_v22  ;;  %v5467_v26 = vld [vmem:[#allocation2 + $0x6a] sm:$0xff]  ;;  %v3271_v40 = vld [vmem:[#allocation2 + $0x121] sm:$0xff]  ;;  %v9174_v12 = vunpack.i.h.bf16 %v12593_v13 }
 0x2fb   : > { %9366 = vrot.lane.b32.xlu1 %v9355_v57, %s10533_s26  ;;  %4736 = vmatmul.bf16.gmra.mxu0 %v4478_v61  ;;  %v5497_v57 = vld [vmem:[#allocation2 + $0x68] sm:$0xff] }
 0x2fc   : > { %9351 = vrot.lane.b32.xlu2 %v9350_v19, %s10533_s26  ;;  %v9380_v37 = vpack.i.bf16 %v5497_v57, %v5496_v34  ;;  %6887 = vmatpush.bf16.msrb.mxu2 %v8472_v49  ;;  %v5466_v57 = vld [vmem:[#allocation2 + $0x62] sm:$0xff] }
 0x2fd   : > { %v5293_v45 = vpop.permute.xlu1 %5292  ;;  %v12717_v31 = vpop.permute.xlu0 %9201  ;;  %v5434_v22 = vld [vmem:[#allocation2 + $0x61] sm:$0xff] }
 0x2fe   : > { %v5295_v60 = vpop.permute.xlu2 %5294  ;;  %5375 = vst.msk [vmem:[#allocation2 + $0xb1] sm:$0xff] %vm550_vm1, %v5293_v45  ;;  %v3272_v45 = vld [vmem:[#allocation2 + $0x129] sm:$0xff]  ;;  %v12753_v34 = vpop.f32.mrf.mxu1 }
 0x2ff   : > { %5376 = vst.msk [vmem:[#allocation2 + $0xc1] sm:$0xff] %vm550_vm1, %v5295_v60  ;;  %v4316_v60 = vsel %vm2250_vm3, %v4284_v63, %v9164_v29 }
 0x300   : > { %v4348_v50 = vsel %vm2283_vm4, %v4316_v60, %v9199_v20  ;;  %14892 = vst [vmem:[#allocation10_spill] sm:$0xff] %v12753_v34  ;;  %6888 = vmatpush.bf16.msrb.mxu2 %v8471_v38  ;;  %v8470_v20 = vld [vmem:[%s14864_s10] sm:$0xff] }
 0x301   : > { %v12765_v38 = vld [vmem:[#allocation2 + $0x15a] sm:$0xff] }
 0x302   : > { %9381 = vrot.lane.b32.xlu0 %v9380_v37, %s10534_s27  ;;  %v9395_v37 = vpack.i.bf16 %v3272_v45, %v3271_v40 }
 0x303   : > { %8272 = vmatmul.msk.bf16.gmra.mxu1 %vm550_vm1, %v4498_v11  ;;  %9371 = vrot.lane.b32.xlu1 %v9360_v17, %s10532_s23  ;;  %v5435_v17 = vld [vmem:[#allocation2 + $0x69] sm:$0xff] }
 0x304   : > { %9376 = vrot.lane.b32.xlu2 %v9350_v19, %s10534_s27  ;;  %v4315_v19 = vsel %vm2250_vm3, %v4283_v53, %v9163_v59  ;;  %v9385_v49 = vpack.i.bf16 %v5435_v17, %v5434_v22  ;;  %v9390_v59 = vpack.i.bf16 %v5467_v26, %v5466_v57  ;;  %6889 = vmatpush.bf16.msrb.mxu2 %v8470_v20  ;;  %v9204_v20 = vunpack.i.h.bf16 %v12717_v31 }
 0x305   : > { %v12742_v61 = vpop.permute.xlu1 %9186  ;;  %v9207_v35 = vpop.permute.xlu0 %9206  ;;  %v4347_v11 = vsel %vm2283_vm4, %v4315_v19, %v9198_v30  ;;  %v12763_v30 = vld [vmem:[#allocation2 + $0x152] sm:$0xff]  ;;  %v4377_v17 = vsel %vm550_vm1, %v12621_v58, %v9173_v25  ;;  %v9410_v58 = vpack.i.bf16 %v12640_v39, %v12638_v27  ;;  %v5499_v27 = vld [vmem:[#allocation2 + $0x80] sm:$0xff] }
 0x306   : > { %v12747_v41 = vpop.permute.xlu2 %9216  ;;  %v4481_v53 = vpack.c.bf16 %v4348_v50, %v4347_v11  ;;  %v9209_v29 = vunpack.i.h.bf16 %v9207_v35  ;;  %v9208_v63 = vunpack.i.l.bf16 %v9207_v35  ;;  %v4378_v35 = vsel %vm550_vm1, %v12553_v62, %v9174_v12  ;;  %v12783_v12 = vpop.f32.mrf.mxu1 }
 0x307   : > { %v4501_v50 = vpack.c.bf16 %v12765_v38, %v12763_v30  ;;  %14893 = vst [vmem:[#allocation11_spill] sm:$0xff] %v12783_v12  ;;  %v9189_v39 = vunpack.i.h.bf16 %v12742_v61 }
 0x308   : > { %v4409_v26 = vsel %vm2250_vm3, %v4377_v17, %v9208_v63  ;;  %v4410_v11 = vsel %vm2250_vm3, %v4378_v35, %v9209_v29  ;;  %v9188_v29 = vunpack.i.l.bf16 %v12742_v61  ;;  %v12798_v63 = vld [vmem:[#allocation2 + $0x120] sm:$0xff]  ;;  %v12804_v17 = vld [vmem:[#allocation2 + $0x16a] sm:$0xff] }
 0x30a   : > { %9396 = vrot.lane.b32.xlu0 %v9395_v37, %s10533_s26 }
 0x30b   : > { %9386 = vrot.lane.b32.xlu1 %v9385_v49, %s10533_s26  ;;  %4741 = vmatmul.bf16.gmra.mxu0 %v4481_v53  ;;  %v12794_v53 = vld [vmem:[#allocation2 + $0x128] sm:$0xff] }
 0x30c   : > { %9391 = vrot.lane.b32.xlu2 %v9390_v59, %s10532_s23 }
 0x30d   : > { %v9212_v13 = vpop.permute.xlu1 %9211  ;;  %v5297_v45 = vpop.permute.xlu0 %5296 }
 0x30e   : > { %v9214_v19 = vunpack.i.h.bf16 %v9212_v13  ;;  %v9213_v60 = vunpack.i.l.bf16 %v9212_v13  ;;  %v12771_v57 = vpop.permute.xlu2 %9241  ;;  %5377 = vst.msk [vmem:[#allocation2 + $0xc9] sm:$0xff] %vm550_vm1, %v5297_v45  ;;  %v9203_v13 = vunpack.i.l.bf16 %v12717_v31  ;;  %v9415_v45 = vpack.i.bf16 %v12794_v53, %v12798_v63  ;;  %v12812_v61 = vpop.f32.mrf.mxu1 }
 0x30f   : > { %14894 = vst [vmem:[#allocation12_spill] sm:$0xff] %v12812_v61  ;;  %v9194_v31 = vunpack.i.h.bf16 %v12650_v24 }
 0x310   : > { %v4441_v40 = vsel %vm2283_vm4, %v4409_v26, %v9213_v60  ;;  %v4442_v62 = vsel %vm2283_vm4, %v4410_v11, %v9214_v19  ;;  %v12806_v19 = vld [vmem:[#allocation2 + $0x172] sm:$0xff]  ;;  %v8549_v60 = vunpack.i.h.bf16 %v11051_v14  ;;  %v8548_v26 = vunpack.i.l.bf16 %v11051_v14 }
 0x311   : > { %v4479_v25 = vpack.c.bf16 %v4442_v62, %v4441_v40  ;;  %v4286_v11 = vsel %vm550_vm1, %v12691_v51, %v9189_v39  ;;  %v12822_v40 = vpack.i.bf16 %v12710_v42, %v12708_v43  ;;  %v9193_v14 = vunpack.i.l.bf16 %v12650_v24  ;;  %v5437_v43 = vld [vmem:[#allocation2 + $0x81] sm:$0xff] }
 0x312   : > { %9421 = vrot.lane.b32.xlu0 %v9395_v37, %s10534_s27  ;;  %v5498_v37 = vld [vmem:[#allocation2 + $0x78] sm:$0xff]  ;;  %v4380_v62 = vsel %vm550_vm1, %v12715_v28, %v9204_v20  ;;  %v4504_v51 = vpack.c.bf16 %v12806_v19, %v12804_v17  ;;  %v9244_v42 = vunpack.i.h.bf16 %v12771_v57  ;;  %v9243_v24 = vunpack.i.l.bf16 %v12771_v57  ;;  %v5469_v28 = vld [vmem:[#allocation2 + $0x82] sm:$0xff] }
 0x313   : > { %8273 = vmatmul.msk.bf16.gmra.mxu1 %vm550_vm1, %v4501_v50  ;;  %9401 = vrot.lane.b32.xlu1 %v9410_v58, %s10532_s23  ;;  %v9425_v35 = vpack.i.bf16 %v5499_v27, %v5498_v37  ;;  %v4285_v50 = vsel %vm550_vm1, %v12689_v16, %v9188_v29 }
 0x314   : > { %9411 = vrot.lane.b32.xlu2 %v9410_v58, %s10533_s26  ;;  %4825 = vmatmul.bf16.gmra.mxu3 %v4479_v25  ;;  %v4379_v58 = vsel %vm550_vm1, %v12677_v21, %v9203_v13  ;;  %v4317_v20 = vsel %vm2250_vm3, %v4285_v50, %v9193_v14  ;;  %v4318_v21 = vsel %vm2250_vm3, %v4286_v11, %v9194_v31  ;;  %v5436_v13 = vld [vmem:[#allocation2 + $0x79] sm:$0xff]  ;;  %v8554_v50 = vunpack.i.h.bf16 %v10948_v46 }
 0x315   : > { %v12788_v22 = vpop.permute.xlu1 %9231  ;;  %v12790_v49 = vpop.permute.xlu0 %9221  ;;  %v9430_v34 = vpack.i.bf16 %v5437_v43, %v5436_v13  ;;  %v8553_v14 = vunpack.i.l.bf16 %v10948_v46 }
 0x316   : > { %v12792_v59 = vpop.permute.xlu2 %9256 }
 0x31a   : > { %9426 = vrot.lane.b32.xlu0 %v9425_v35, %s10534_s27  ;;  %v5468_v35 = vld [vmem:[#allocation2 + $0x7a] sm:$0xff] }
 0x31b   : > { %9406 = vrot.lane.b32.xlu1 %v9415_v45, %s10534_s27  ;;  %v9435_v31 = vpack.i.bf16 %v5469_v28, %v5468_v35 }
 0x31c   : > { %9416 = vrot.lane.b32.xlu2 %v9415_v45, %s10532_s23 }
 0x31d   : > { %v9237_v25 = vpop.permute.xlu1 %9236  ;;  %v9227_v27 = vpop.permute.xlu0 %9226 }
 0x31e   : > { %v9239_v16 = vunpack.i.h.bf16 %v9237_v25  ;;  %v9238_v39 = vunpack.i.l.bf16 %v9237_v25  ;;  %v9229_v29 = vunpack.i.h.bf16 %v9227_v27  ;;  %v9228_v37 = vunpack.i.l.bf16 %v9227_v27  ;;  %v5301_v45 = vpop.permute.xlu2 %5300 }
 0x31f   : > { %5379 = vst.msk [vmem:[#allocation2 + $0xe1] sm:$0xff] %vm550_vm1, %v5301_v45  ;;  %v12858_v45 = vld [vmem:[#allocation2 + $0x141] sm:$0xff] }
 0x320   : > { %v4349_v61 = vsel %vm2283_vm4, %v4317_v20, %v9228_v37  ;;  %v4350_v25 = vsel %vm2283_vm4, %v4318_v21, %v9229_v29  ;;  %v4411_v27 = vsel %vm2250_vm3, %v4379_v58, %v9238_v39  ;;  %v4412_v12 = vsel %vm2250_vm3, %v4380_v62, %v9239_v16  ;;  %v10491_v62 = vld [vmem:[#allocation2 + $0x8] sm:$0xff]  ;;  %v10492_v58 = vld [vmem:[#allocation2] sm:$0xff] }
 0x321   : > { %v4484_v7 = vpack.c.bf16 %v4350_v25, %v4349_v61  ;;  %v4443_v57 = vsel %vm2283_vm4, %v4411_v27, %v9243_v24  ;;  %v4444_v18 = vsel %vm2283_vm4, %v4412_v12, %v9244_v42  ;;  %v6451_v61 = vsel %vm550_vm1, %v10491_v62, %v8549_v60  ;;  %v3430_v37 = vld [vmem:[#allocation2 + $0x140] sm:$0xff]  ;;  %v3429_v42 = vld [vmem:[#allocation2 + $0x138] sm:$0xff]  ;;  %v12874_v27 = vld [vmem:[#allocation2 + $0x18a] sm:$0xff] }
 0x322   : > { %v4482_v11 = vpack.c.bf16 %v4444_v18, %v4443_v57  ;;  %9456 = vrot.lane.b32.xlu0 %v12822_v40, %s10533_s26  ;;  %v6450_v16 = vsel %vm550_vm1, %v10492_v58, %v8548_v26  ;;  %v6483_v26 = vsel %vm2250_vm3, %v6451_v61, %v8554_v50  ;;  %v9460_v28 = vpack.i.bf16 %v3430_v37, %v3429_v42  ;;  %v12862_v20 = vld [vmem:[#allocation2 + $0x139] sm:$0xff]  ;;  %v12872_v25 = vld [vmem:[#allocation2 + $0x182] sm:$0xff]  ;;  %v5500_v50 = vld [vmem:[#allocation2 + $0x90] sm:$0xff] }
 0x323   : > { %8274 = vmatmul.msk.bf16.gmra.mxu1 %vm550_vm1, %v4504_v51  ;;  %9431 = vrot.lane.b32.xlu1 %v9430_v34, %s10533_s26  ;;  %v12851_v51 = vpop.f32.mrf.mxu1  ;;  %v4712_v34 = vpop.f32.mrf.mxu0  ;;  %v6482_v60 = vsel %vm2250_vm3, %v6450_v16, %v8553_v14  ;;  %v9440_v13 = vpack.i.bf16 %v12858_v45, %v12862_v20  ;;  %v5501_v14 = vld [vmem:[#allocation2 + $0x98] sm:$0xff]  ;;  %v4507_v62 = vpack.c.bf16 %v12874_v27, %v12872_v25 }
 0x324   : > { %9436 = vrot.lane.b32.xlu2 %v9435_v31, %s10532_s23  ;;  %4746 = vmatmul.bf16.gmra.mxu0 %v4484_v7  ;;  %14895 = vst [vmem:[#allocation13_spill] sm:$0xff] %v12851_v51  ;;  %v9470_v16 = vpack.i.bf16 %v5501_v14, %v5500_v50  ;;  %v5471_v50 = vld [vmem:[#allocation2 + $0x9a] sm:$0xff] }
 0x325   : > { %4830 = vmatmul.bf16.gmra.mxu3 %v4482_v11  ;;  %v5299_v18 = vpop.permute.xlu1 %5298  ;;  %v9247_v12 = vpop.permute.xlu0 %9246 }
 0x326   : > { %v9249_v46 = vunpack.i.h.bf16 %v9247_v12  ;;  %v9248_v39 = vunpack.i.l.bf16 %v9247_v12  ;;  %v12853_v29 = vpop.permute.xlu2 %9276  ;;  %5378 = vst.msk [vmem:[#allocation2 + $0xd9] sm:$0xff] %vm550_vm1, %v5299_v18  ;;  %v9234_v18 = vunpack.i.h.bf16 %v12788_v22  ;;  %v9233_v12 = vunpack.i.l.bf16 %v12788_v22 }
 0x328   : > { %v6515_v7 = vsel %vm2283_vm4, %v6483_v26, %v9249_v46  ;;  %v6514_v43 = vsel %vm2283_vm4, %v6482_v60, %v9248_v39  ;;  %v4801_v24 = vpop.f32.mrf.mxu3  ;;  %v3276_v60 = vld [vmem:[#allocation2 + $0x159] sm:$0xff]  ;;  %v4382_v42 = vsel %vm550_vm1, %v12343_v36, %v9234_v18  ;;  %v4381_v22 = vsel %vm550_vm1, %v12351_v4, %v9233_v12 }
 0x329   : > { %v6642_v35 = vpack.c.bf16 %v6515_v7, %v6514_v43  ;;  %v12864_v21 = vadd.f32 %v4801_v24, %v4712_v34  ;;  %v5470_v7 = vld [vmem:[#allocation2 + $0x92] sm:$0xff]  ;;  %v9219_v4 = vunpack.i.h.bf16 %v12747_v41  ;;  %v9218_v18 = vunpack.i.l.bf16 %v12747_v41 }
 0x32a   : > { %9461 = vrot.lane.b32.xlu0 %v9460_v28, %s10532_s23  ;;  %v5438_v43 = vld [vmem:[#allocation2 + $0x91] sm:$0xff] }
 0x32b   : > { %14896 = vst [vmem:[#allocation14_spill] sm:$0xff] %v12864_v21  ;;  %6890 = vmatmul.bf16.vlgmr.msrb.gmra.mxu2 %v6642_v35  ;;  %9441 = vrot.lane.b32.xlu1 %v9440_v13, %s10533_s26  ;;  %v12882_v61 = vpop.f32.mrf.mxu1  ;;  %v12884_v58 = vpop.f32.mrf.mxu0  ;;  %v4288_v41 = vsel %vm550_vm1, %v12340_v9, %v9219_v4 }
 0x32c   : > { %9446 = vrot.lane.b32.xlu2 %v12822_v40, %s10532_s23  ;;  %14897 = vst [vmem:[#allocation15_spill] sm:$0xff] %v12882_v61  ;;  %v9480_v61 = vpack.i.bf16 %v5471_v50, %v5470_v7 }
 0x32d   : > { %v12876_v57 = vpop.permute.xlu1 %9251  ;;  %v12878_v31 = vpop.permute.xlu0 %9261  ;;  %14898 = vst [vmem:[#allocation16_spill] sm:$0xff] %v12884_v58 }
 0x32e   : > { %v9282_v11 = vpop.permute.xlu2 %9281  ;;  %v9253_v9 = vunpack.i.l.bf16 %v12876_v57 }
 0x32f   : > { %v9284_v46 = vunpack.i.h.bf16 %v9282_v11  ;;  %v9283_v39 = vunpack.i.l.bf16 %v9282_v11  ;;  %v3275_v11 = vld [vmem:[#allocation2 + $0x151] sm:$0xff] }
 0x330   : > { %v12886_v40 = vpop.f32.mrf.mxu3 }
 0x331   : > { %14899 = vst [vmem:[#allocation17_spill] sm:$0xff] %v12886_v40  ;;  %v4413_v14 = vsel %vm2250_vm3, %v4381_v22, %v9283_v39  ;;  %v9223_v39 = vunpack.i.l.bf16 %v12790_v49 }
 0x332   : > { %9471 = vrot.lane.b32.xlu0 %v9470_v16, %s10534_s27 }
 0x333   : > { %8275 = vmatmul.msk.bf16.gmra.mxu1 %vm550_vm1, %v4507_v62  ;;  %9466 = vrot.lane.b32.xlu1 %v9440_v13, %s10534_s27  ;;  %v5439_v13 = vld [vmem:[#allocation2 + $0x99] sm:$0xff]  ;;  %v4414_v62 = vsel %vm2250_vm3, %v4382_v42, %v9284_v46  ;;  %v4717_v16 = vpop.f32.mrf.mxu0 }
 0x334   : > { %9451 = vrot.lane.b32.xlu2 %v9460_v28, %s10534_s27  ;;  %v9485_v28 = vpack.i.bf16 %v3276_v60, %v3275_v11  ;;  %v9475_v21 = vpack.i.bf16 %v5439_v13, %v5438_v43  ;;  %v9224_v60 = vunpack.i.h.bf16 %v12790_v49  ;;  %v12915_v43 = vld [vmem:[#allocation2 + $0xf0] sm:$0xff]  ;;  %v12917_v42 = vld [vmem:[#allocation2 + $0xf8] sm:$0xff]  ;;  %v5397_v13 = vld [vmem:[#allocation2 + $0x20] sm:$0xff] }
 0x335   : > { %v12894_v37 = vpop.permute.xlu1 %9266  ;;  %v9287_v34 = vpop.permute.xlu0 %9286 }
 0x336   : > { %v12896_v26 = vpop.permute.xlu2 %9301  ;;  %v9289_v24 = vunpack.i.h.bf16 %v9287_v34  ;;  %v9288_v35 = vunpack.i.l.bf16 %v9287_v34  ;;  %v4320_v22 = vsel %vm2250_vm3, %v4288_v41, %v9224_v60  ;;  %v12950_v41 = vld [vmem:[#allocation2 + $0x150] sm:$0xff] }
 0x338   : > { %v4806_v51 = vpop.f32.mrf.mxu3  ;;  %v4445_v40 = vsel %vm2283_vm4, %v4413_v14, %v9288_v35  ;;  %v4446_v36 = vsel %vm2283_vm4, %v4414_v62, %v9289_v24  ;;  %v9254_v24 = vunpack.i.h.bf16 %v12876_v57  ;;  %v5396_v14 = vld [vmem:[#allocation2 + $0x18] sm:$0xff] }
 0x339   : > { %v12908_v12 = vadd.f32 %v4806_v51, %v4717_v16  ;;  %v4485_v34 = vpack.c.bf16 %v4446_v36, %v4445_v40  ;;  %v4287_v51 = vsel %vm550_vm1, %v12347_v52, %v9218_v18  ;;  %v9500_v52 = vpack.i.bf16 %v12765_v38, %v12763_v30 }
 0x33a   : > { %9476 = vrot.lane.b32.xlu0 %v9475_v21, %s10533_s26  ;;  %v6453_v62 = vsel %vm550_vm1, %v5397_v13, %v9254_v24  ;;  %v9259_v16 = vunpack.i.h.bf16 %v12792_v59  ;;  %v6452_v36 = vsel %vm550_vm1, %v5396_v14, %v9253_v9  ;;  %v9258_v30 = vunpack.i.l.bf16 %v12792_v59 }
 0x33b   : > { %14900 = vst [vmem:[#allocation18_spill] sm:$0xff] %v12908_v12  ;;  %9481 = vrot.lane.b32.xlu1 %v9480_v61, %s10532_s23  ;;  %4835 = vmatmul.bf16.gmra.mxu3 %v4485_v34  ;;  %v4319_v61 = vsel %vm2250_vm3, %v4287_v51, %v9223_v39  ;;  %v12943_v34 = vld [vmem:[#allocation2 + $0x158] sm:$0xff]  ;;  %v12945_v39 = vld [vmem:[#allocation2 + $0xb0] sm:$0xff]  ;;  %v9269_v59 = vunpack.i.h.bf16 %v12894_v37 }
 0x33c   : > { %9486 = vrot.lane.b32.xlu2 %v9485_v28, %s10533_s26  ;;  %v6484_v51 = vsel %vm2250_vm3, %v6452_v36, %v9258_v30  ;;  %v5473_v30 = vld [vmem:[#allocation2 + $0xb2] sm:$0xff] }
 0x33d   : > { %v9272_v46 = vpop.permute.xlu1 %9271  ;;  %v5303_v7 = vpop.permute.xlu0 %5302 }
 0x33e   : > { %v9274_v49 = vunpack.i.h.bf16 %v9272_v46  ;;  %v9273_v40 = vunpack.i.l.bf16 %v9272_v46  ;;  %v12923_v21 = vpop.permute.xlu2 %9311  ;;  %5380 = vst.msk [vmem:[#allocation2 + $0xf1] sm:$0xff] %vm550_vm1, %v5303_v7  ;;  %v9264_v46 = vunpack.i.h.bf16 %v12878_v31  ;;  %v9263_v7 = vunpack.i.l.bf16 %v12878_v31 }
 0x340   : > { %v4351_v35 = vsel %vm2283_vm4, %v4319_v61, %v9273_v40  ;;  %v4352_v11 = vsel %vm2283_vm4, %v4320_v22, %v9274_v49  ;;  %v9268_v40 = vunpack.i.l.bf16 %v12894_v37  ;;  %v12956_v61 = vld [vmem:[#allocation2 + $0xa8] sm:$0xff]  ;;  %v9505_v22 = vpack.i.bf16 %v12943_v34, %v12950_v41 }
 0x341   : > { %v4487_v50 = vpack.c.bf16 %v4352_v11, %v4351_v35  ;;  %v12961_v35 = vpop.f32.mrf.mxu0  ;;  %v9515_v9 = vpack.i.bf16 %v12945_v39, %v12956_v61  ;;  %v4290_v37 = vsel %vm550_vm1, %v12476_v1, %v9264_v46 }
 0x342   : > { %9491 = vrot.lane.b32.xlu0 %v9500_v52, %s10532_s23  ;;  %14901 = vst [vmem:[#allocation19_spill] sm:$0xff] %v12961_v35 }
 0x343   : > { %4751 = vmatmul.bf16.gmra.mxu0 %v4487_v50  ;;  %9501 = vrot.lane.b32.xlu1 %v9500_v52, %s10533_s26  ;;  %v4289_v50 = vsel %vm550_vm1, %v12483_v54, %v9263_v7 }
 0x344   : > { %9511 = vrot.lane.b32.xlu2 %v9485_v28, %s10534_s27  ;;  %v6485_v28 = vsel %vm2250_vm3, %v6453_v62, %v9259_v16  ;;  %v4321_v62 = vsel %vm2250_vm3, %v4289_v50, %v9268_v40  ;;  %v4322_v16 = vsel %vm2250_vm3, %v4290_v37, %v9269_v59 }
 0x345   : > { %v9292_v57 = vpop.permute.xlu0 %9291  ;;  %v12940_v4 = vpop.permute.xlu1 %9296 }
 0x346   : > { %v9294_v38 = vunpack.i.h.bf16 %v9292_v57  ;;  %v9317_v18 = vpop.permute.xlu2 %9316  ;;  %v9293_v60 = vunpack.i.l.bf16 %v9292_v57  ;;  %v5472_v57 = vld [vmem:[#allocation2 + $0xaa] sm:$0xff]  ;;  %v9299_v37 = vunpack.i.h.bf16 %v12940_v4  ;;  %v9298_v50 = vunpack.i.l.bf16 %v12940_v4  ;;  %v13012_v4 = vld [vmem:[#allocation2 + $0x38] sm:$0xff] }
 0x347   : > { %v9319_v31 = vunpack.i.h.bf16 %v9317_v18  ;;  %v9318_v11 = vunpack.i.l.bf16 %v9317_v18  ;;  %v5441_v18 = vld [vmem:[#allocation2 + $0xb1] sm:$0xff] }
 0x348   : > { %v6517_v49 = vsel %vm2283_vm4, %v6485_v28, %v9294_v38  ;;  %v6516_v24 = vsel %vm2283_vm4, %v6484_v51, %v9293_v60  ;;  %v12981_v38 = vpop.f32.mrf.mxu3  ;;  %v5440_v60 = vld [vmem:[#allocation2 + $0xa9] sm:$0xff]  ;;  %v9525_v28 = vpack.i.bf16 %v5473_v30, %v5472_v57 }
 0x349   : > { %v6645_v52 = vpack.c.bf16 %v6517_v49, %v6516_v24  ;;  %v4353_v1 = vsel %vm2283_vm4, %v4321_v62, %v9318_v11  ;;  %v4354_v54 = vsel %vm2283_vm4, %v4322_v16, %v9319_v31  ;;  %14902 = vst [vmem:[#allocation20_spill] sm:$0xff] %v12981_v38  ;;  %v4722_v7 = vpop.f32.mrf.mxu0  ;;  %v9520_v51 = vpack.i.bf16 %v5441_v18, %v5440_v60  ;;  %v3278_v24 = vld [vmem:[#allocation2 + $0x171] sm:$0xff] }
 0x34a   : > { %9496 = vrot.lane.b32.xlu0 %v9505_v22, %s10534_s27  ;;  %v4490_v46 = vpack.c.bf16 %v4354_v54, %v4353_v1  ;;  %v9535_v49 = vpack.i.bf16 %v12806_v19, %v12804_v17  ;;  %v3340_v11 = vld [vmem:[#allocation2 + $0x170] sm:$0xff]  ;;  %v9278_v19 = vunpack.i.l.bf16 %v12853_v29 }
 0x34b   : > { %9506 = vrot.lane.b32.xlu1 %v9505_v22, %s10532_s23  ;;  %6895 = vmatmul.bf16.gmra.mxu2 %v6645_v52  ;;  %v12995_v17 = vld [vmem:[#allocation2 + $0x169] sm:$0xff] }
 0x34c   : > { %9516 = vrot.lane.b32.xlu2 %v9515_v9, %s10534_s27  ;;  %v9279_v9 = vunpack.i.h.bf16 %v12853_v29  ;;  %v9530_v62 = vpack.i.bf16 %v3278_v24, %v12995_v17  ;;  %v13010_v60 = vld [vmem:[#allocation2 + $0x30] sm:$0xff] }
 0x34d   : > { %v12972_v13 = vpop.permute.xlu0 %9321  ;;  %v5305_v14 = vpop.permute.xlu1 %5304 }
 0x34e   : > { %v12976_v36 = vpop.permute.xlu2 %9346  ;;  %5381 = vst.msk [vmem:[#allocation2 + $0xf9] sm:$0xff] %vm550_vm1, %v5305_v14  ;;  %v3339_v14 = vld [vmem:[#allocation2 + $0x168] sm:$0xff]  ;;  %v4384_v18 = vsel %vm550_vm1, %v12413_v32, %v9279_v9  ;;  %v6454_v32 = vsel %vm550_vm1, %v13010_v60, %v9298_v50 }
 0x34f   : > { %v9540_v30 = vpack.i.bf16 %v3340_v11, %v3339_v14 }
 0x351   : > { %v13008_v29 = vpop.f32.mrf.mxu0 }
 0x352   : > { %9526 = vrot.lane.b32.xlu0 %v9525_v28, %s10532_s23  ;;  %14904 = vst [vmem:[#allocation22_spill] sm:$0xff] %v13008_v29 }
 0x353   : > { %4756 = vmatmul.bf16.gmra.mxu0 %v4490_v46  ;;  %9536 = vrot.lane.b32.xlu1 %v9535_v49, %s10532_s23  ;;  %v4383_v46 = vsel %vm550_vm1, %v12421_v6, %v9278_v19  ;;  %v5505_v6 = vld [vmem:[#allocation2 + $0xc8] sm:$0xff] }
 0x354   : > { %9521 = vrot.lane.b32.xlu2 %v9520_v51, %s10533_s26  ;;  %v6455_v51 = vsel %vm550_vm1, %v13012_v4, %v9299_v37 }
 0x355   : > { %v9327_v59 = vpop.permute.xlu0 %9326  ;;  %v12988_v40 = vpop.permute.xlu1 %9306  ;;  %v13001_v16 = vld [vmem:[#allocation2 + $0xf2] sm:$0xff]  ;;  %v13003_v57 = vld [vmem:[#allocation2 + $0xfa] sm:$0xff] }
 0x356   : > { %v12990_v22 = vpop.permute.xlu2 %9351  ;;  %v9329_v1 = vunpack.i.h.bf16 %v9327_v59  ;;  %v9328_v54 = vunpack.i.l.bf16 %v9327_v59 }
 0x357   : > { %v4811_v31 = vpop.f32.mrf.mxu3 }
 0x358   : > { %v12993_v52 = vadd.f32 %v4811_v31, %v4722_v7  ;;  %v9304_v7 = vunpack.i.h.bf16 %v12896_v26  ;;  %v4415_v19 = vsel %vm2250_vm3, %v4383_v46, %v9328_v54  ;;  %v4416_v50 = vsel %vm2250_vm3, %v4384_v18, %v9329_v1 }
 0x359   : > { %v4727_v18 = vpop.f32.mrf.mxu0 }
 0x35a   : > { %14903 = vst [vmem:[#allocation21_spill] sm:$0xff] %v12993_v52  ;;  %9531 = vrot.lane.b32.xlu0 %v9530_v62, %s10533_s26 }
 0x35b   : > { %9541 = vrot.lane.b32.xlu1 %v9540_v30, %s10534_s27 }
 0x35c   : > { %9546 = vrot.lane.b32.xlu2 %v9535_v49, %s10533_s26  ;;  %v9303_v49 = vunpack.i.l.bf16 %v12896_v26  ;;  %v6487_v26 = vsel %vm2250_vm3, %v6455_v51, %v9304_v7 }
 0x35d   : > { %v9332_v59 = vpop.permute.xlu1 %9331  ;;  %v9337_v24 = vpop.permute.xlu0 %9336 }
 0x35e   : > { %v9334_v31 = vunpack.i.h.bf16 %v9332_v59  ;;  %v9333_v11 = vunpack.i.l.bf16 %v9332_v59  ;;  %v9339_v9 = vunpack.i.h.bf16 %v9337_v24  ;;  %v13026_v14 = vpop.permute.xlu2 %9376  ;;  %v9338_v28 = vunpack.i.l.bf16 %v9337_v24  ;;  %v5504_v59 = vld [vmem:[#allocation2 + $0xc0] sm:$0xff] }
 0x35f   : > { %v13028_v52 = vpop.f32.mrf.mxu3  ;;  %v6486_v12 = vsel %vm2250_vm3, %v6454_v32, %v9303_v49 }
 0x360   : > { %14905 = vst [vmem:[#allocation23_spill] sm:$0xff] %v13028_v52  ;;  %v4447_v29 = vsel %vm2283_vm4, %v4415_v19, %v9333_v11  ;;  %v4448_v37 = vsel %vm2283_vm4, %v4416_v50, %v9334_v31  ;;  %v6518_v35 = vsel %vm2283_vm4, %v6486_v12, %v9338_v28  ;;  %v6519_v24 = vsel %vm2283_vm4, %v6487_v26, %v9339_v9  ;;  %v5443_v12 = vld [vmem:[#allocation2 + $0xc9] sm:$0xff] }
 0x361   : > { %v4488_v38 = vpack.c.bf16 %v4448_v37, %v4447_v29  ;;  %v9560_v52 = vpack.i.bf16 %v5505_v6, %v5504_v59  ;;  %v6648_v58 = vpack.c.bf16 %v6519_v24, %v6518_v35  ;;  %v9309_v28 = vunpack.i.h.bf16 %v12988_v40  ;;  %v5475_v11 = vld [vmem:[#allocation2 + $0xca] sm:$0xff] }
 0x362   : > { %5308 = vrot.lane.b32.xlu0 %v12326_v3, %s10534_s27  ;;  %v9308_v35 = vunpack.i.l.bf16 %v12988_v40  ;;  %v5442_v3 = vld [vmem:[#allocation2 + $0xc1] sm:$0xff]  ;;  %v9314_v40 = vunpack.i.h.bf16 %v12923_v21  ;;  %v13072_v26 = vld [vmem:[#allocation2 + $0x189] sm:$0xff]  ;;  %v9324_v59 = vunpack.i.h.bf16 %v12972_v13  ;;  %v9580_v24 = vpack.i.bf16 %v12874_v27, %v12872_v25 }
 0x363   : > { %4840 = vmatmul.bf16.gmra.mxu3 %v4488_v38  ;;  %9561 = vrot.lane.b32.xlu1 %v9560_v52, %s10534_s27  ;;  %v9565_v38 = vpack.i.bf16 %v5443_v12, %v5442_v3 }
 0x364   : > { %9551 = vrot.lane.b32.xlu2 %v9540_v30, %s10532_s23  ;;  %6900 = vmatmul.bf16.gmra.mxu2 %v6648_v58  ;;  %v4292_v58 = vsel %vm550_vm1, %v12917_v42, %v9309_v28  ;;  %v4291_v52 = vsel %vm550_vm1, %v12915_v43, %v9308_v35  ;;  %v9313_v30 = vunpack.i.l.bf16 %v12923_v21  ;;  %v5474_v42 = vld [vmem:[#allocation2 + $0xc2] sm:$0xff]  ;;  %v4386_v27 = vsel %vm550_vm1, %v12595_v48, %v9324_v59 }
 0x365   : > { %v13042_v1 = vpop.permute.xlu0 %9356  ;;  %v9342_v54 = vpop.permute.xlu1 %9341  ;;  %v4324_v9 = vsel %vm2250_vm3, %v4292_v58, %v9314_v40  ;;  %v9570_v12 = vpack.i.bf16 %v5475_v11, %v5474_v42  ;;  %v13078_v35 = vld [vmem:[#allocation2 + $0x181] sm:$0xff]  ;;  %v9348_v58 = vunpack.i.l.bf16 %v12976_v36 }
 0x366   : > { %v13044_v29 = vpop.permute.xlu2 %9391  ;;  %v4323_v43 = vsel %vm2250_vm3, %v4291_v52, %v9313_v30  ;;  %v9344_v6 = vunpack.i.h.bf16 %v9342_v54  ;;  %v9343_v19 = vunpack.i.l.bf16 %v9342_v54  ;;  %v13080_v54 = vld [vmem:[#allocation2 + $0x48] sm:$0xff]  ;;  %v9590_v3 = vpack.i.bf16 %v13072_v26, %v13078_v35  ;;  %v3435_v59 = vld [vmem:[#allocation2 + $0x180] sm:$0xff] }
 0x367   : > { %v3436_v11 = vld [vmem:[#allocation2 + $0x188] sm:$0xff] }
 0x368   : > { %v4816_v46 = vpop.f32.mrf.mxu3 }
 0x369   : > { %v13048_v7 = vadd.f32 %v4816_v46, %v4727_v18  ;;  %v9323_v18 = vunpack.i.l.bf16 %v12972_v13  ;;  %v13082_v46 = vld [vmem:[#allocation2 + $0x50] sm:$0xff]  ;;  %v9349_v13 = vunpack.i.h.bf16 %v12976_v36  ;;  %v9378_v36 = vunpack.i.l.bf16 %v13026_v14 }
 0x36a   : > { %9556 = vrot.lane.b32.xlu0 %v9530_v62, %s10534_s27  ;;  %v6457_v25 = vsel %vm550_vm1, %v13082_v46, %v9344_v6 }
 0x36b   : > { %9566 = vrot.lane.b32.xlu1 %v9565_v38, %s10533_s26  ;;  %v6456_v38 = vsel %vm550_vm1, %v13080_v54, %v9343_v19  ;;  %v4385_v30 = vsel %vm550_vm1, %v12601_v8, %v9323_v18  ;;  %v6489_v6 = vsel %vm2250_vm3, %v6457_v25, %v9349_v13 }
 0x36c   : > { %5306 = vrot.lane.b32.xlu2 %v12285_v15, %s10534_s27  ;;  %v13066_v15 = vpop.f32.mrf.mxu0  ;;  %v6488_v48 = vsel %vm2250_vm3, %v6456_v38, %v9348_v58 }
 0x36d   : > { %v9362_v32 = vpop.permute.xlu0 %9361  ;;  %v13060_v51 = vpop.permute.xlu1 %9366 }
 0x36e   : > { %v9364_v49 = vunpack.i.h.bf16 %v9362_v32  ;;  %v9363_v62 = vunpack.i.l.bf16 %v9362_v32  ;;  %v13062_v31 = vpop.permute.xlu2 %9411 }
 0x370   : > { %v13068_v50 = vpop.f32.mrf.mxu3  ;;  %v4355_v21 = vsel %vm2283_vm4, %v4323_v43, %v9363_v62  ;;  %v4356_v37 = vsel %vm2283_vm4, %v4324_v9, %v9364_v49  ;;  %v9379_v43 = vunpack.i.h.bf16 %v13026_v14 }
 0x371   : > { %v4493_v28 = vpack.c.bf16 %v4356_v37, %v4355_v21 }
 0x372   : > { %9581 = vrot.lane.b32.xlu0 %v9580_v24, %s10533_s26 }
 0x373   : > { %4761 = vmatmul.bf16.gmra.mxu0 %v4493_v28  ;;  %9591 = vrot.lane.b32.xlu1 %v9590_v3, %s10534_s27  ;;  %v9585_v28 = vpack.i.bf16 %v3436_v11, %v3435_v59 }
 0x374   : > { %9571 = vrot.lane.b32.xlu2 %v9570_v12, %s10532_s23  ;;  %v4732_v19 = vpop.f32.mrf.mxu0 }
 0x375   : > { %v9382_v52 = vpop.permute.xlu0 %9381  ;;  %v9372_v40 = vpop.permute.xlu1 %9371 }
 0x376   : > { %v9384_v32 = vunpack.i.h.bf16 %v9382_v52  ;;  %v9383_v49 = vunpack.i.l.bf16 %v9382_v52  ;;  %v9374_v62 = vunpack.i.h.bf16 %v9372_v40  ;;  %v9417_v42 = vpop.permute.xlu2 %9416  ;;  %v9373_v9 = vunpack.i.l.bf16 %v9372_v40  ;;  %v5554_v52 = vld [vmem:[#allocation2 + $0x1a] sm:$0xff]  ;;  %v5555_v40 = vld [vmem:[#allocation2 + $0x22] sm:$0xff] }
 0x377   : > { %v9419_v11 = vunpack.i.h.bf16 %v9417_v42 }
 0x378   : > { %v4821_v21 = vpop.f32.mrf.mxu3  ;;  %v6520_v37 = vsel %vm2283_vm4, %v6488_v48, %v9383_v49  ;;  %v6521_v8 = vsel %vm2283_vm4, %v6489_v6, %v9384_v32  ;;  %v4418_v24 = vsel %vm2250_vm3, %v4386_v27, %v9374_v62  ;;  %v4417_v3 = vsel %vm2250_vm3, %v4385_v30, %v9373_v9  ;;  %v13119_v30 = vpop.f32.mrf.mxu1  ;;  %v3363_v9 = vld [vmem:[#allocation2 + $0x109] sm:$0xff]  ;;  %v3364_v48 = vld [vmem:[#allocation2 + $0x111] sm:$0xff] }
 0x379   : > { %v13106_v18 = vadd.f32 %v4821_v21, %v4732_v19  ;;  %v6651_v12 = vpack.c.bf16 %v6521_v8, %v6520_v37  ;;  %v4449_v38 = vsel %vm2283_vm4, %v4417_v3, %v9378_v36  ;;  %v4450_v25 = vsel %vm2283_vm4, %v4418_v24, %v9379_v43 }
 0x37a   : > { %9586 = vrot.lane.b32.xlu0 %v9585_v28, %s10532_s23  ;;  %v4491_v14 = vpack.c.bf16 %v4450_v25, %v4449_v38  ;;  %v9595_v32 = vpack.i.bf16 %v5555_v40, %v5554_v52  ;;  %v9369_v49 = vunpack.i.h.bf16 %v13060_v51  ;;  %v9368_v62 = vunpack.i.l.bf16 %v13060_v51  ;;  %v13143_v38 = vld [vmem:[#allocation2 + $0x31] sm:$0xff] }
 0x37b   : > { %6905 = vmatmul.bf16.gmra.mxu2 %v6651_v12  ;;  %5310 = vrot.lane.b32.xlu1 %v12361_v23, %s10534_s27  ;;  %v9418_v43 = vunpack.i.l.bf16 %v9417_v42  ;;  %v9600_v23 = vpack.i.bf16 %v13012_v4, %v13010_v60  ;;  %v13135_v60 = vld [vmem:[#allocation2 + $0x39] sm:$0xff]  ;;  %v9354_v12 = vunpack.i.h.bf16 %v12990_v22  ;;  %v9359_v40 = vunpack.i.h.bf16 %v13042_v1 }
 0x37c   : > { %9576 = vrot.lane.b32.xlu2 %v9585_v28, %s10534_s27  ;;  %4845 = vmatmul.bf16.gmra.mxu3 %v4491_v14  ;;  %v4388_v19 = vsel %vm550_vm1, %v3364_v48, %v9369_v49  ;;  %v4387_v51 = vsel %vm550_vm1, %v3363_v9, %v9368_v62  ;;  %v9353_v28 = vunpack.i.l.bf16 %v12990_v22  ;;  %v9605_v52 = vpack.i.bf16 %v13135_v60, %v13143_v38  ;;  %v13151_v49 = vpop.f32.mrf.mxu0  ;;  %v13153_v62 = vld [vmem:[#allocation2 + $0x68] sm:$0xff]  ;;  %v13157_v22 = vld [vmem:[#allocation2 + $0x60] sm:$0xff] }
 0x37d   : > { %v13115_v27 = vpop.permute.xlu0 %9396  ;;  %v9387_v13 = vpop.permute.xlu1 %9386  ;;  %v4419_v4 = vsel %vm2250_vm3, %v4387_v51, %v9418_v43  ;;  %v9394_v43 = vunpack.i.h.bf16 %v13044_v29  ;;  %v9393_v48 = vunpack.i.l.bf16 %v13044_v29 }
 0x37e   : > { %v13117_v58 = vpop.permute.xlu2 %9436  ;;  %v9389_v8 = vunpack.i.h.bf16 %v9387_v13  ;;  %v9388_v3 = vunpack.i.l.bf16 %v9387_v13 }
 0x380   : > { %v13145_v14 = vpop.f32.mrf.mxu1  ;;  %v6459_v13 = vsel %vm550_vm1, %v13153_v62, %v9389_v8  ;;  %v5556_v8 = vld [vmem:[#allocation2 + $0x32] sm:$0xff] }
 0x382   : > { %9596 = vrot.lane.b32.xlu0 %v9595_v32, %s10533_s26  ;;  %v9358_v32 = vunpack.i.l.bf16 %v13042_v1  ;;  %v4293_v1 = vsel %vm550_vm1, %v12696_v55, %v9353_v28  ;;  %v5620_v28 = vld [vmem:[#allocation2 + $0x49] sm:$0xff] }
 0x383   : > { %9601 = vrot.lane.b32.xlu1 %v9600_v23, %s10532_s23  ;;  %v6458_v23 = vsel %vm550_vm1, %v13157_v22, %v9388_v3 }
 0x384   : > { %5312 = vrot.lane.b32.xlu2 %v12394_v10, %s10534_s27  ;;  %v4420_v10 = vsel %vm2250_vm3, %v4388_v19, %v9419_v11  ;;  %v4294_v11 = vsel %vm550_vm1, %v12687_v2, %v9354_v12  ;;  %v6490_v29 = vsel %vm2250_vm3, %v6458_v23, %v9393_v48 }
 0x385   : > { %v9422_v6 = vpop.permute.xlu0 %9421  ;;  %v13129_v36 = vpop.permute.xlu1 %9401 }
 0x386   : > { %v9424_v42 = vunpack.i.h.bf16 %v9422_v6  ;;  %v9423_v21 = vunpack.i.l.bf16 %v9422_v6  ;;  %v13133_v37 = vpop.permute.xlu2 %9446 }
 0x388   : > { %v4451_v59 = vsel %vm2283_vm4, %v4419_v4, %v9423_v21  ;;  %v4452_v24 = vsel %vm2283_vm4, %v4420_v10, %v9424_v42  ;;  %v13172_v42 = vpop.f32.mrf.mxu3  ;;  %v4325_v21 = vsel %vm2250_vm3, %v4293_v1, %v9358_v32  ;;  %v4326_v4 = vsel %vm2250_vm3, %v4294_v11, %v9359_v40  ;;  %v5621_v32 = vld [vmem:[#allocation2 + $0x51] sm:$0xff]  ;;  %v4737_v11 = vpop.f32.mrf.mxu0 }
 0x389   : > { %v4494_v25 = vpack.c.bf16 %v4452_v24, %v4451_v59  ;;  %v6491_v10 = vsel %vm2250_vm3, %v6459_v13, %v9394_v43  ;;  %v9620_v1 = vpack.i.bf16 %v5621_v32, %v5620_v28  ;;  %v13185_v43 = vpop.f32.mrf.mxu1 }
 0x38a   : > { %5314 = vrot.lane.b32.xlu0 %v12430_v47, %s10534_s27 }
 0x38b   : > { %5316 = vrot.lane.b32.xlu1 %v12458_v0, %s10534_s27  ;;  %v5557_v0 = vld [vmem:[#allocation2 + $0x3a] sm:$0xff] }
 0x38c   : > { %9606 = vrot.lane.b32.xlu2 %v9605_v52, %s10534_s27  ;;  %4850 = vmatmul.bf16.gmra.mxu3 %v4494_v25  ;;  %v9615_v52 = vpack.i.bf16 %v13082_v46, %v13080_v54  ;;  %v9610_v13 = vpack.i.bf16 %v5557_v0, %v5556_v8  ;;  %v5506_v54 = vld [vmem:[#allocation2 + $0xd8] sm:$0xff]  ;;  %v5507_v46 = vld [vmem:[#allocation2 + $0xe0] sm:$0xff] }
 0x38d   : > { %v9407_v47 = vpop.permute.xlu1 %9406  ;;  %v9427_v9 = vpop.permute.xlu0 %9426 }
 0x38e   : > { %v9409_v6 = vunpack.i.h.bf16 %v9407_v47  ;;  %v9408_v19 = vunpack.i.l.bf16 %v9407_v47  ;;  %v9429_v51 = vunpack.i.h.bf16 %v9427_v9  ;;  %v9452_v2 = vpop.permute.xlu2 %9451  ;;  %v9428_v55 = vunpack.i.l.bf16 %v9427_v9 }
 0x38f   : > { %v9454_v8 = vunpack.i.h.bf16 %v9452_v2  ;;  %v9453_v0 = vunpack.i.l.bf16 %v9452_v2 }
 0x390   : > { %v4357_v59 = vsel %vm2283_vm4, %v4325_v21, %v9408_v19  ;;  %v4358_v24 = vsel %vm2283_vm4, %v4326_v4, %v9409_v6  ;;  %v6523_v12 = vsel %vm2283_vm4, %v6491_v10, %v9429_v51  ;;  %v6522_v25 = vsel %vm2283_vm4, %v6490_v29, %v9428_v55  ;;  %v5558_v55 = vld [vmem:[#allocation2 + $0x4a] sm:$0xff] }
 0x391   : > { %v4496_v3 = vpack.c.bf16 %v4358_v24, %v4357_v59  ;;  %v6654_v40 = vpack.c.bf16 %v6523_v12, %v6522_v25  ;;  %v9399_v6 = vunpack.i.h.bf16 %v13115_v27  ;;  %v9398_v19 = vunpack.i.l.bf16 %v13115_v27  ;;  %v5559_v59 = vld [vmem:[#allocation2 + $0x52] sm:$0xff]  ;;  %v13206_v12 = vpop.f32.mrf.mxu0 }
 0x392   : > { %9616 = vrot.lane.b32.xlu0 %v9615_v52, %s10532_s23  ;;  %v9404_v21 = vunpack.i.h.bf16 %v13129_v36  ;;  %v9403_v4 = vunpack.i.l.bf16 %v13129_v36  ;;  %v9625_v10 = vpack.i.bf16 %v5507_v46, %v5506_v54  ;;  %v9630_v24 = vpack.i.bf16 %v5559_v59, %v5558_v55  ;;  %14907 = vst [vmem:[#allocation25_spill] sm:$0xff] %v13206_v12  ;;  %v13217_v52 = vpop.f32.mrf.mxu1  ;;  %v5508_v54 = vld [vmem:[#allocation2 + $0xf0] sm:$0xff]  ;;  %v5444_v55 = vld [vmem:[#allocation2 + $0xd9] sm:$0xff]  ;;  %v5445_v59 = vld [vmem:[#allocation2 + $0xe1] sm:$0xff] }
 0x393   : > { %4766 = vmatmul.bf16.gmra.mxu0 %v4496_v3  ;;  %6910 = vmatmul.bf16.gmra.mxu2 %v6654_v40  ;;  %v4296_v29 = vsel %vm550_vm1, %v12794_v53, %v9399_v6  ;;  %v4295_v27 = vsel %vm550_vm1, %v12798_v63, %v9398_v19  ;;  %v5509_v40 = vld [vmem:[#allocation2 + $0xf8] sm:$0xff]  ;;  %v9414_v46 = vunpack.i.h.bf16 %v13062_v31  ;;  %v5477_v6 = vld [vmem:[#allocation2 + $0xe2] sm:$0xff] }
 0x394   : > { %9611 = vrot.lane.b32.xlu2 %v9610_v13, %s10533_s26  ;;  %9621 = vrot.lane.b32.xlu1 %v9620_v1, %s10534_s27  ;;  %v4327_v2 = vsel %vm2250_vm3, %v4295_v27, %v9403_v4  ;;  %v4328_v28 = vsel %vm2250_vm3, %v4296_v29, %v9404_v21  ;;  %v9645_v19 = vpack.i.bf16 %v5509_v40, %v5508_v54  ;;  %v13223_v21 = vld [vmem:[#allocation2 + $0x78] sm:$0xff]  ;;  %v13225_v4 = vld [vmem:[#allocation2 + $0x80] sm:$0xff]  ;;  %v9438_v29 = vunpack.i.l.bf16 %v13117_v58 }
 0x395   : > { %v13189_v23 = vpop.permute.xlu0 %9456  ;;  %v9432_v47 = vpop.permute.xlu1 %9431  ;;  %v4359_v53 = vsel %vm2283_vm4, %v4327_v2, %v9453_v0  ;;  %v4360_v63 = vsel %vm2283_vm4, %v4328_v28, %v9454_v8  ;;  %v9635_v2 = vpack.i.bf16 %v5445_v59, %v5444_v55  ;;  %v13619_v12 = vld [vmem:[#allocation2 + $0xb1] sm:$0xff] }
 0x396   : > { %v13191_v9 = vpop.permute.xlu2 %9486  ;;  %v9434_v32 = vunpack.i.h.bf16 %v9432_v47  ;;  %v9433_v13 = vunpack.i.l.bf16 %v9432_v47  ;;  %v4499_v1 = vpack.c.bf16 %v4360_v63, %v4359_v53  ;;  %v10494_v53 = vld [vmem:[#allocation2 + $0x121] sm:$0xff] }
 0x397   : > { %v4826_v48 = vpop.f32.mrf.mxu3 }
 0x398   : > { %v13195_v51 = vadd.f32 %v4826_v48, %v4737_v11  ;;  %v5476_v11 = vld [vmem:[#allocation2 + $0xda] sm:$0xff]  ;;  %v9413_v48 = vunpack.i.l.bf16 %v13062_v31  ;;  %v6460_v47 = vsel %vm550_vm1, %v13223_v21, %v9433_v13  ;;  %v6461_v8 = vsel %vm550_vm1, %v13225_v4, %v9434_v32 }
 0x399   : > { %v6492_v54 = vsel %vm2250_vm3, %v6460_v47, %v9438_v29 }
 0x39a   : > { %14906 = vst [vmem:[#allocation24_spill] sm:$0xff] %v13195_v51  ;;  %9626 = vrot.lane.b32.xlu0 %v9625_v10, %s10534_s27  ;;  %v9640_v10 = vpack.i.bf16 %v5477_v6, %v5476_v11  ;;  %v4389_v63 = vsel %vm550_vm1, %v10494_v53, %v9413_v48  ;;  %v4742_v6 = vpop.f32.mrf.mxu0  ;;  %v13245_v59 = vpop.f32.mrf.mxu1  ;;  %v5527_v51 = vld [vmem:[#allocation2 + $0x51] sm:$0xff] }
 0x39b   : > { %14909 = vst [vmem:[#allocation27_spill] sm:$0xff] %v13245_v59  ;;  %v5526_v59 = vld [vmem:[#allocation2 + $0x49] sm:$0xff] }
 0x39c   : > { %5318 = vrot.lane.b32.xlu2 %v12497_v44, %s10534_s27  ;;  %9631 = vrot.lane.b32.xlu1 %v9630_v24, %s10533_s26  ;;  %v9439_v24 = vunpack.i.h.bf16 %v13117_v58 }
 0x39d   : > { %v9462_v36 = vpop.permute.xlu0 %9461  ;;  %v13211_v3 = vpop.permute.xlu1 %9441 }
 0x39e   : > { %v13213_v25 = vpop.permute.xlu2 %9511  ;;  %v9464_v0 = vunpack.i.h.bf16 %v9462_v36  ;;  %v9463_v31 = vunpack.i.l.bf16 %v9462_v36  ;;  %v6493_v58 = vsel %vm2250_vm3, %v6461_v8, %v9439_v24 }
 0x39f   : > { %v13219_v44 = vpop.f32.mrf.mxu3 }
 0x3a0   : > { %14908 = vst [vmem:[#allocation26_spill] sm:$0xff] %v13219_v44 }
 0x3a2   : > { %5320 = vrot.lane.b32.xlu0 %v12537_v33, %s10534_s27  ;;  %v10493_v33 = vld [vmem:[#allocation2 + $0x129] sm:$0xff] }
 0x3a3   : > { %4771 = vmatmul.bf16.gmra.mxu0 %v4499_v1  ;;  %v4390_v28 = vsel %vm550_vm1, %v10493_v33, %v9414_v46 }
 0x3a4   : > { %9646 = vrot.lane.b32.xlu2 %v9645_v19, %s10534_s27  ;;  %9641 = vrot.lane.b32.xlu1 %v9640_v10, %s10532_s23  ;;  %v4421_v19 = vsel %vm2250_vm3, %v4389_v63, %v9463_v31  ;;  %v4422_v55 = vsel %vm2250_vm3, %v4390_v28, %v9464_v0  ;;  %v9650_v31 = vpack.i.bf16 %v13153_v62, %v13157_v22  ;;  %v13261_v62 = vld [vmem:[#allocation2 + $0x98] sm:$0xff] }
 0x3a5   : > { %v9472_v27 = vpop.permute.xlu0 %9471  ;;  %v9467_v40 = vpop.permute.xlu1 %9466  ;;  %v5447_v22 = vld [vmem:[#allocation2 + $0xf9] sm:$0xff] }
 0x3a6   : > { %v9474_v32 = vunpack.i.h.bf16 %v9472_v27  ;;  %v9473_v36 = vunpack.i.l.bf16 %v9472_v27  ;;  %v9517_v13 = vpop.permute.xlu2 %9516  ;;  %v9469_v11 = vunpack.i.h.bf16 %v9467_v40  ;;  %v9468_v1 = vunpack.i.l.bf16 %v9467_v40  ;;  %v5623_v40 = vld [vmem:[#allocation2 + $0x69] sm:$0xff] }
 0x3a8   : > { %v4831_v10 = vpop.f32.mrf.mxu3  ;;  %v6524_v46 = vsel %vm2283_vm4, %v6492_v54, %v9473_v36  ;;  %v6525_v48 = vsel %vm2283_vm4, %v6493_v58, %v9474_v32  ;;  %v4453_v33 = vsel %vm2283_vm4, %v4421_v19, %v9468_v1  ;;  %v4454_v47 = vsel %vm2283_vm4, %v4422_v55, %v9469_v11  ;;  %v13259_v11 = vld [vmem:[#allocation2 + $0x90] sm:$0xff]  ;;  %v5622_v1 = vld [vmem:[#allocation2 + $0x61] sm:$0xff]  ;;  %v13267_v19 = vpop.f32.mrf.mxu1 }
 0x3a9   : > { %v13247_v27 = vadd.f32 %v4831_v10, %v4742_v6  ;;  %v6657_v29 = vpack.c.bf16 %v6525_v48, %v6524_v46  ;;  %v4497_v8 = vpack.c.bf16 %v4454_v47, %v4453_v33  ;;  %v9655_v54 = vpack.i.bf16 %v5623_v40, %v5622_v1  ;;  %v5446_v58 = vld [vmem:[#allocation2 + $0xf1] sm:$0xff]  ;;  %14911 = vst [vmem:[#allocation29_spill] sm:$0xff] %v13267_v19  ;;  %v3242_v1 = vld [vmem:[#allocation2 + $0x140] sm:$0xff] }
 0x3aa   : > { %9636 = vrot.lane.b32.xlu0 %v9635_v2, %s10533_s26  ;;  %v9660_v6 = vpack.i.bf16 %v5447_v22, %v5446_v58  ;;  %v9519_v46 = vunpack.i.h.bf16 %v9517_v13  ;;  %v9518_v48 = vunpack.i.l.bf16 %v9517_v13  ;;  %v9443_v13 = vunpack.i.l.bf16 %v13211_v3 }
 0x3ab   : > { %14910 = vst [vmem:[#allocation28_spill] sm:$0xff] %v13247_v27  ;;  %6915 = vmatmul.bf16.gmra.mxu2 %v6657_v29  ;;  %4855 = vmatmul.bf16.gmra.mxu3 %v4497_v8  ;;  %v9459_v22 = vunpack.i.h.bf16 %v13189_v23 }
 0x3ac   : > { %9651 = vrot.lane.b32.xlu2 %v9650_v31, %s10532_s23  ;;  %5322 = vrot.lane.b32.xlu1 %v12578_v5, %s10534_s27 }
 0x3ad   : > { %v9477_v0 = vpop.permute.xlu0 %9476  ;;  %v9482_v24 = vpop.permute.xlu1 %9481 }
 0x3ae   : > { %v9479_v28 = vunpack.i.h.bf16 %v9477_v0  ;;  %v9478_v53 = vunpack.i.l.bf16 %v9477_v0  ;;  %v13257_v63 = vpop.permute.xlu2 %9521  ;;  %v9484_v32 = vunpack.i.h.bf16 %v9482_v24  ;;  %v9483_v36 = vunpack.i.l.bf16 %v9482_v24  ;;  %v5478_v0 = vld [vmem:[#allocation2 + $0xf2] sm:$0xff]  ;;  %v5479_v24 = vld [vmem:[#allocation2 + $0xfa] sm:$0xff] }
 0x3b0   : > { %v6462_v2 = vsel %vm550_vm1, %v13259_v11, %v9478_v53  ;;  %v6463_v5 = vsel %vm550_vm1, %v13261_v62, %v9479_v28  ;;  %v13281_v28 = vpop.f32.mrf.mxu0  ;;  %v9444_v53 = vunpack.i.h.bf16 %v13211_v3  ;;  %v13285_v40 = vpop.f32.mrf.mxu3 }
 0x3b1   : > { %v6494_v55 = vsel %vm2250_vm3, %v6462_v2, %v9483_v36  ;;  %v6495_v10 = vsel %vm2250_vm3, %v6463_v5, %v9484_v32  ;;  %14912 = vst [vmem:[#allocation30_spill] sm:$0xff] %v13281_v28  ;;  %v9665_v36 = vpack.i.bf16 %v5479_v24, %v5478_v0  ;;  %v9458_v2 = vunpack.i.l.bf16 %v13189_v23  ;;  %v3241_v5 = vld [vmem:[#allocation2 + $0x138] sm:$0xff]  ;;  %v13294_v3 = vpop.f32.mrf.mxu1 }
 0x3b2   : > { %9656 = vrot.lane.b32.xlu0 %v9655_v54, %s10534_s27  ;;  %v6526_v8 = vsel %vm2283_vm4, %v6494_v55, %v9518_v48  ;;  %v6527_v31 = vsel %vm2283_vm4, %v6495_v10, %v9519_v46  ;;  %14913 = vst [vmem:[#allocation31_spill] sm:$0xff] %v13285_v40  ;;  %v4298_v54 = vsel %vm550_vm1, %v3242_v1, %v9444_v53  ;;  %v9448_v55 = vunpack.i.l.bf16 %v13133_v37  ;;  %v5653_v28 = vld [vmem:[#allocation2 + $0x52] sm:$0xff] }
 0x3b3   : > { %v6660_v32 = vpack.c.bf16 %v6527_v31, %v6526_v8  ;;  %v4297_v58 = vsel %vm550_vm1, %v3241_v5, %v9443_v13  ;;  %14914 = vst [vmem:[#allocation32_spill] sm:$0xff] %v13294_v3  ;;  %v4392_v23 = vsel %vm550_vm1, %v12858_v45, %v9459_v22  ;;  %v4391_v46 = vsel %vm550_vm1, %v12862_v20, %v9458_v2  ;;  %v5652_v3 = vld [vmem:[#allocation2 + $0x4a] sm:$0xff] }
 0x3b4   : > { %9661 = vrot.lane.b32.xlu2 %v9660_v6, %s10533_s26  ;;  %v9449_v6 = vunpack.i.h.bf16 %v13133_v37  ;;  %v8485_v37 = vld [vmem:[%s14864_s10 + $0x78] sm:$0xff]  ;;  %v4329_v45 = vsel %vm2250_vm3, %v4297_v58, %v9448_v55  ;;  %v9514_v20 = vunpack.i.h.bf16 %v13213_v25  ;;  %v10495_v58 = vld [vmem:[#allocation2 + $0x62] sm:$0xff]  ;;  %v6647_v19 = vpack.c.bf16 %v5653_v28, %v5652_v3 }
 0x3b5   : > { %v13273_v33 = vpop.permute.xlu0 %9491  ;;  %v13275_v47 = vpop.permute.xlu1 %9501  ;;  %6971 = vmatpush.bf16.msra.mxu0 %v8485_v37  ;;  %v13630_v28 = vld [vmem:[#allocation2 + $0xa9] sm:$0xff] }
 0x3b6   : > { %v13277_v29 = vpop.permute.xlu2 %9546  ;;  %v4330_v13 = vsel %vm2250_vm3, %v4298_v54, %v9449_v6  ;;  %v10496_v54 = vld [vmem:[#allocation2 + $0x6a] sm:$0xff] }
 0x3b7   : > { %v9670_v6 = vpack.i.bf16 %v10496_v54, %v10495_v58  ;;  %v8482_v58 = vld [vmem:[%s14864_s10 + $0x60] sm:$0xff] }
 0x3ba   : > { %9666 = vrot.lane.b32.xlu0 %v9665_v36, %s10532_s23  ;;  %v4747_v36 = vpop.f32.mrf.mxu0 }
 0x3bb   : > { %6920 = vmatmul.bf16.gmra.mxu2 %v6660_v32  ;;  %v9513_v32 = vunpack.i.l.bf16 %v13213_v25  ;;  %v8484_v25 = vld [vmem:[%s14864_s10 + $0x70] sm:$0xff] }
 0x3bc   : > { %5324 = vrot.lane.b32.xlu2 %v12615_v56, %s10534_s27  ;;  %v8487_v56 = vld [vmem:[%s14864_s10 + $0x88] sm:$0xff]  ;;  %6972 = vmatpush.bf16.msra.mxu0 %v8484_v25 }
 0x3bd   : > { %v9497_v10 = vpop.permute.xlu0 %9496  ;;  %v9507_v48 = vpop.permute.xlu1 %9506  ;;  %7066 = vmatpush.bf16.msra.mxu3 %v8487_v56 }
 0x3be   : > { %v9499_v8 = vunpack.i.h.bf16 %v9497_v10  ;;  %v9498_v31 = vunpack.i.l.bf16 %v9497_v10  ;;  %v13302_v0 = vpop.permute.xlu2 %9551  ;;  %v9509_v24 = vunpack.i.h.bf16 %v9507_v48  ;;  %v9508_v53 = vunpack.i.l.bf16 %v9507_v48  ;;  %v4836_v22 = vpop.f32.mrf.mxu3 }
 0x3bf   : > { %v13318_v48 = vadd.f32 %v4836_v22, %v4747_v36 }
 0x3c0   : > { %v4361_v2 = vsel %vm2283_vm4, %v4329_v45, %v9498_v31  ;;  %v4362_v5 = vsel %vm2283_vm4, %v4330_v13, %v9499_v8  ;;  %v4424_v1 = vsel %vm2250_vm3, %v4392_v23, %v9509_v24  ;;  %v4423_v10 = vsel %vm2250_vm3, %v4391_v46, %v9508_v53  ;;  %v13329_v24 = vpop.f32.mrf.mxu1  ;;  %v8483_v13 = vld [vmem:[%s14864_s10 + $0x68] sm:$0xff] }
 0x3c1   : > { %14915 = vst [vmem:[#allocation33_spill] sm:$0xff] %v13318_v48  ;;  %v4502_v55 = vpack.c.bf16 %v4362_v5, %v4361_v2  ;;  %v4455_v31 = vsel %vm2283_vm4, %v4423_v10, %v9513_v32  ;;  %v4456_v8 = vsel %vm2283_vm4, %v4424_v1, %v9514_v20  ;;  %v9489_v53 = vunpack.i.h.bf16 %v13191_v9  ;;  %6973 = vmatpush.bf16.msra.mxu0 %v8483_v13 }
 0x3c2   : > { %9671 = vrot.lane.b32.xlu0 %v9670_v6, %s10533_s26  ;;  %v4500_v56 = vpack.c.bf16 %v4456_v8, %v4455_v31  ;;  %14916 = vst [vmem:[#allocation34_spill] sm:$0xff] %v13329_v24  ;;  %v9488_v45 = vunpack.i.l.bf16 %v13191_v9  ;;  %v9494_v20 = vunpack.i.h.bf16 %v13273_v33  ;;  %v9493_v32 = vunpack.i.l.bf16 %v13273_v33  ;;  %v8481_v8 = vld [vmem:[%s14864_s10 + $0x58] sm:$0xff] }
 0x3c3   : > { %4776 = vmatmul.bf16.gmra.mxu0 %v4502_v55  ;;  %v4300_v5 = vsel %vm550_vm1, %v12943_v34, %v9489_v53  ;;  %v9524_v34 = vunpack.i.h.bf16 %v13257_v63  ;;  %v9523_v31 = vunpack.i.l.bf16 %v13257_v63 }
 0x3c4   : > { %4860 = vmatmul.bf16.gmra.mxu3 %v4500_v56  ;;  %v4299_v1 = vsel %vm550_vm1, %v12950_v41, %v9488_v45  ;;  %v4332_v33 = vsel %vm2250_vm3, %v4300_v5, %v9494_v20 }
 0x3c5   : > { %v9527_v23 = vpop.permute.xlu0 %9526  ;;  %v13326_v46 = vpop.permute.xlu1 %9536  ;;  %v4331_v54 = vsel %vm2250_vm3, %v4299_v1, %v9493_v32  ;;  %6974 = vmatpush.bf16.msra.mxu0 %v8482_v58  ;;  %v6465_v45 = vsel %vm550_vm1, %v12945_v39, %v9524_v34  ;;  %v6464_v63 = vsel %vm550_vm1, %v12956_v61, %v9523_v31  ;;  %v9503_v58 = vunpack.i.l.bf16 %v13275_v47  ;;  %v3370_v31 = vld [vmem:[#allocation2 + $0x159] sm:$0xff] }
 0x3c6   : > { %v5307_v37 = vpop.permute.xlu2 %5306  ;;  %v9529_v56 = vunpack.i.h.bf16 %v9527_v23 }
 0x3c7   : > { %5382 = vst.msk [vmem:[#allocation2 + $0x109] sm:$0xff] %vm550_vm1, %v5307_v37  ;;  %v9528_v37 = vunpack.i.l.bf16 %v9527_v23  ;;  %v8480_v23 = vld [vmem:[%s14864_s10 + $0x50] sm:$0xff] }
 0x3c8   : > { %v13351_v55 = vpop.f32.mrf.mxu1  ;;  %v6497_v39 = vsel %vm2250_vm3, %v6465_v45, %v9529_v56 }
 0x3c9   : > { %14917 = vst [vmem:[#allocation35_spill] sm:$0xff] %v13351_v55  ;;  %6975 = vmatpush.bf16.msra.mxu0 %v8481_v8  ;;  %v9538_v8 = vunpack.i.l.bf16 %v13326_v46 }
 0x3cd   : > { %v9532_v36 = vpop.permute.xlu0 %9531  ;;  %v9542_v22 = vpop.permute.xlu1 %9541  ;;  %6976 = vmatpush.bf16.msra.mxu0 %v8480_v23 }
 0x3ce   : > { %v13338_v2 = vpop.permute.xlu2 %9571  ;;  %v9544_v9 = vunpack.i.h.bf16 %v9542_v22  ;;  %v9543_v10 = vunpack.i.l.bf16 %v9542_v22  ;;  %v9533_v13 = vunpack.i.l.bf16 %v9532_v36  ;;  %v9534_v22 = vunpack.i.h.bf16 %v9532_v36 }
 0x3d0   : > { %v4363_v6 = vsel %vm2283_vm4, %v4331_v54, %v9543_v10  ;;  %v4364_v25 = vsel %vm2283_vm4, %v4332_v33, %v9544_v9  ;;  %v9504_v9 = vunpack.i.h.bf16 %v13275_v47  ;;  %v6496_v10 = vsel %vm2250_vm3, %v6464_v63, %v9528_v37  ;;  %v3245_v33 = vld [vmem:[#allocation2 + $0x168] sm:$0xff]  ;;  %v13380_v45 = vpop.f32.mrf.mxu1 }
 0x3d1   : > { %v4505_v41 = vpack.c.bf16 %v4364_v25, %v4363_v6  ;;  %v9554_v54 = vunpack.i.h.bf16 %v13302_v0  ;;  %v9553_v6 = vunpack.i.l.bf16 %v13302_v0  ;;  %v3246_v25 = vld [vmem:[#allocation2 + $0x170] sm:$0xff]  ;;  %v4301_v34 = vsel %vm550_vm1, %v3245_v33, %v9533_v13  ;;  %14918 = vst [vmem:[#allocation36_spill] sm:$0xff] %v13380_v45 }
 0x3d2   : > { %v4302_v56 = vsel %vm550_vm1, %v3246_v25, %v9534_v22  ;;  %v3369_v0 = vld [vmem:[#allocation2 + $0x151] sm:$0xff]  ;;  %v4394_v63 = vsel %vm550_vm1, %v3370_v31, %v9504_v9  ;;  %v9539_v13 = vunpack.i.h.bf16 %v13326_v46 }
 0x3d3   : > { %4781 = vmatmul.bf16.gmra.mxu0 %v4505_v41  ;;  %v4393_v22 = vsel %vm550_vm1, %v3369_v0, %v9503_v58  ;;  %v5650_v45 = vld [vmem:[#allocation2 + $0x32] sm:$0xff] }
 0x3d5   : > { %v5309_v53 = vpop.permute.xlu0 %5308  ;;  %v9562_v20 = vpop.permute.xlu1 %9561 }
 0x3d6   : > { %5383 = vst.msk [vmem:[#allocation2 + $0x111] sm:$0xff] %vm550_vm1, %v5309_v53  ;;  %v9577_v32 = vpop.permute.xlu2 %9576  ;;  %v9564_v5 = vunpack.i.h.bf16 %v9562_v20  ;;  %v9563_v1 = vunpack.i.l.bf16 %v9562_v20  ;;  %v8479_v53 = vld [vmem:[%s14864_s10 + $0x48] sm:$0xff]  ;;  %v13382_v20 = vpop.f32.mrf.mxu0 }
 0x3d7   : > { %v9579_v47 = vunpack.i.h.bf16 %v9577_v32  ;;  %v9578_v37 = vunpack.i.l.bf16 %v9577_v32  ;;  %14919 = vst [vmem:[#allocation37_spill] sm:$0xff] %v13382_v20  ;;  %v4426_v32 = vsel %vm2250_vm3, %v4394_v63, %v9554_v54  ;;  %6977 = vmatpush.bf16.msra.mxu0 %v8479_v53  ;;  %v4334_v54 = vsel %vm2250_vm3, %v4302_v56, %v9539_v13  ;;  %v8478_v53 = vld [vmem:[%s14864_s10 + $0x40] sm:$0xff] }
 0x3d8   : > { %v6528_v61 = vsel %vm2283_vm4, %v6496_v10, %v9563_v1  ;;  %v6529_v36 = vsel %vm2283_vm4, %v6497_v39, %v9564_v5  ;;  %v13386_v5 = vld [vmem:[#allocation2 + $0x108] sm:$0xff]  ;;  %v13390_v1 = vpop.f32.mrf.mxu3 }
 0x3d9   : > { %v6663_v41 = vpack.c.bf16 %v6529_v36, %v6528_v61  ;;  %14920 = vst [vmem:[#allocation38_spill] sm:$0xff] %v13390_v1  ;;  %v4333_v61 = vsel %vm2250_vm3, %v4301_v34, %v9538_v8  ;;  %v4366_v8 = vsel %vm2283_vm4, %v4334_v54, %v9579_v47  ;;  %v13417_v47 = vld [vmem:[#allocation2 + $0x81] sm:$0xff]  ;;  %v4930_v54 = vpop.f32.mrf.mxu1 }
 0x3da   : > { %v4365_v34 = vsel %vm2283_vm4, %v4333_v61, %v9578_v37 }
 0x3db   : > { %6925 = vmatmul.bf16.gmra.mxu2 %v6663_v41  ;;  %v4425_v41 = vsel %vm2250_vm3, %v4393_v22, %v9553_v6  ;;  %6978 = vmatpush.bf16.msra.mxu0 %v8478_v53  ;;  %v4508_v63 = vpack.c.bf16 %v4366_v8, %v4365_v34  ;;  %v9549_v34 = vunpack.i.h.bf16 %v13277_v29  ;;  %v9548_v8 = vunpack.i.l.bf16 %v13277_v29 }
 0x3dd   : > { %v9557_v23 = vpop.permute.xlu0 %9556  ;;  %v13392_v10 = vld [vmem:[#allocation2 + $0x110] sm:$0xff]  ;;  %v13395_v46 = vpop.permute.xlu1 %9566 }
 0x3de   : > { %v5480_v39 = vld [vmem:[#allocation2 + $0x10a] sm:$0xff]  ;;  %v5481_v33 = vld [vmem:[#allocation2 + $0x112] sm:$0xff]  ;;  %v9559_v9 = vunpack.i.h.bf16 %v9557_v23  ;;  %v9558_v36 = vunpack.i.l.bf16 %v9557_v23  ;;  %v5313_v25 = vpop.permute.xlu2 %5312  ;;  %v13399_v58 = vpack.i.bf16 %v13392_v10, %v13386_v5  ;;  %v4752_v13 = vpop.f32.mrf.mxu0 }
 0x3df   : > { %5385 = vst.msk [vmem:[#allocation2 + $0x129] sm:$0xff] %vm550_vm1, %v5313_v25  ;;  %v13404_v31 = vpack.i.bf16 %v5481_v33, %v5480_v39  ;;  %v5449_v37 = vld [vmem:[#allocation2 + $0x111] sm:$0xff]  ;;  %v5448_v23 = vld [vmem:[#allocation2 + $0x109] sm:$0xff] }
 0x3e0   : > { %9676 = vrot.lane.b32.xlu1 %v13399_v58, %s10534_s27  ;;  %v4457_v0 = vsel %vm2283_vm4, %v4425_v41, %v9558_v36  ;;  %v4458_v56 = vsel %vm2283_vm4, %v4426_v32, %v9559_v9  ;;  %v9680_v61 = vpack.i.bf16 %v5449_v37, %v5448_v23  ;;  %v13423_v32 = vld [vmem:[#allocation2 + $0x79] sm:$0xff]  ;;  %v10497_v37 = vld [vmem:[#allocation2 + $0x171] sm:$0xff]  ;;  %v4395_v23 = vsel %vm550_vm1, %v12995_v17, %v9548_v8 }
 0x3e1   : > { %9691 = vrot.lane.b32.xlu2 %v13404_v31, %s10532_s23  ;;  %v4503_v6 = vpack.c.bf16 %v4458_v56, %v4457_v0  ;;  %v9695_v25 = vpack.i.bf16 %v13417_v47, %v13423_v32 }
 0x3e3   : > { %4865 = vmatmul.bf16.gmra.mxu3 %v4503_v6  ;;  %4786 = vmatmul.bf16.gmra.mxu0 %v4508_v63  ;;  %v9685_v63 = vpack.i.bf16 %v13225_v4, %v13223_v21 }
 0x3e5   : > { %v13419_v22 = vpop.permute.xlu0 %9581  ;;  %v9592_v9 = vpop.permute.xlu1 %9591 }
 0x3e6   : > { %v13421_v39 = vpop.permute.xlu2 %9606  ;;  %v4841_v33 = vpop.f32.mrf.mxu3  ;;  %v9584_v8 = vunpack.i.h.bf16 %v13419_v22 }
 0x3e7   : > { %v4842_v36 = vadd.f32 %v4841_v33, %v4752_v13  ;;  %v4396_v13 = vsel %vm550_vm1, %v10497_v37, %v9549_v34  ;;  %v13446_v17 = vpop.f32.mrf.mxu0 }
 0x3e8   : > { %9681 = vrot.lane.b32.xlu1 %v9680_v61, %s10533_s26  ;;  %v9594_v61 = vunpack.i.h.bf16 %v9592_v9  ;;  %14922 = vst [vmem:[#allocation40_spill] sm:$0xff] %v13446_v17  ;;  %v5483_v17 = vld [vmem:[#allocation2 + $0x12a] sm:$0xff] }
 0x3e9   : > { %v13428_v41 = vadd.f32 %v4930_v54, %v4842_v36  ;;  %9696 = vrot.lane.b32.xlu2 %v9695_v25, %s10534_s27  ;;  %v9593_v36 = vunpack.i.l.bf16 %v9592_v9  ;;  %v3501_v54 = vld [vmem:[#allocation2 + $0x19a] sm:$0xff] }
 0x3eb   : > { %14921 = vst [vmem:[#allocation39_spill] sm:$0xff] %v13428_v41 }
 0x3ed   : > { %v9587_v53 = vpop.permute.xlu0 %9586  ;;  %v5311_v33 = vpop.permute.xlu1 %5310 }
 0x3ee   : > { %v9589_v0 = vunpack.i.h.bf16 %v9587_v53  ;;  %v9588_v56 = vunpack.i.l.bf16 %v9587_v53  ;;  %v13433_v6 = vpop.permute.xlu2 %9611  ;;  %5384 = vst.msk [vmem:[#allocation2 + $0x121] sm:$0xff] %vm550_vm1, %v5311_v33  ;;  %v3502_v53 = vld [vmem:[#allocation2 + $0x1a2] sm:$0xff] }
 0x3ef   : > { %v4510_v34 = vpack.c.bf16 %v3502_v53, %v3501_v54  ;;  %v8486_v33 = vld [vmem:[%s14864_s10 + $0x80] sm:$0xff]  ;;  %v13459_v54 = vpop.f32.mrf.mxu3 }
 0x3f0   : > { %v4428_v29 = vsel %vm2250_vm3, %v4396_v13, %v9589_v0  ;;  %v4427_v25 = vsel %vm2250_vm3, %v4395_v23, %v9588_v56  ;;  %9686 = vrot.lane.b32.xlu1 %v9685_v63, %s10532_s23  ;;  %v9583_v0 = vunpack.i.l.bf16 %v13419_v22  ;;  %v5522_v56 = vld [vmem:[#allocation2 + $0x19] sm:$0xff]  ;;  %14923 = vst [vmem:[#allocation41_spill] sm:$0xff] %v13459_v54  ;;  %7067 = vmatpush.bf16.msra.mxu3 %v8486_v33 }
 0x3f1   : > { %v4459_v21 = vsel %vm2283_vm4, %v4427_v25, %v9593_v36  ;;  %v4460_v4 = vsel %vm2283_vm4, %v4428_v29, %v9594_v61  ;;  %8276 = vmatmul.msk.bf16.gmra.mxu1 %vm550_vm1, %v4510_v34  ;;  %v5523_v36 = vld [vmem:[#allocation2 + $0x21] sm:$0xff]  ;;  %v14924_v34 = vld [vmem:[#allocation8_spill] sm:$0xff] }
 0x3f2   : > { %v4506_v37 = vpack.c.bf16 %v4460_v4, %v4459_v21  ;;  %v4397_v41 = vsel %vm550_vm1, %v13078_v35, %v9583_v0 }
 0x3f4   : > { %4870 = vmatmul.bf16.gmra.mxu3 %v4506_v37  ;;  %v9609_v37 = vunpack.i.h.bf16 %v13421_v39 }
 0x3f5   : > { %v9597_v9 = vpop.permute.xlu0 %9596  ;;  %v9602_v61 = vpop.permute.xlu1 %9601  ;;  %v13455_v29 = vld [vmem:[#allocation2 + $0x120] sm:$0xff]  ;;  %v13457_v25 = vld [vmem:[#allocation2 + $0x128] sm:$0xff] }
 0x3f6   : > { %v9599_v63 = vunpack.i.h.bf16 %v9597_v9  ;;  %v9598_v13 = vunpack.i.l.bf16 %v9597_v9  ;;  %v5319_v23 = vpop.permute.xlu2 %5318  ;;  %v9604_v53 = vunpack.i.h.bf16 %v9602_v61  ;;  %v9603_v22 = vunpack.i.l.bf16 %v9602_v61  ;;  %v14925_v61 = vld [vmem:[#allocation4_spill] sm:$0xff]  ;;  %v5482_v54 = vld [vmem:[#allocation2 + $0x122] sm:$0xff] }
 0x3f7   : > { %5388 = vst.msk [vmem:[#allocation2 + $0x151] sm:$0xff] %vm550_vm1, %v5319_v23  ;;  %v9608_v9 = vunpack.i.l.bf16 %v13421_v39  ;;  %v13469_v23 = vpack.i.bf16 %v13457_v25, %v13455_v29  ;;  %v8539_v33 = vunpack.i.h.bf16 %v14925_v61 }
 0x3f8   : > { %v6547_v21 = vsel %vm550_vm1, %v5523_v36, %v9599_v63  ;;  %v6546_v4 = vsel %vm550_vm1, %v5522_v56, %v9598_v13  ;;  %5328 = vrot.lane.b32.xlu1 %v14924_v34, %s10534_s27  ;;  %v4398_v63 = vsel %vm550_vm1, %v13072_v26, %v9584_v8  ;;  %v8538_v36 = vunpack.i.l.bf16 %v14925_v61 }
 0x3f9   : > { %v6579_v56 = vsel %vm2250_vm3, %v6547_v21, %v9604_v53  ;;  %v6578_v13 = vsel %vm2250_vm3, %v6546_v4, %v9603_v22  ;;  %9701 = vrot.lane.b32.xlu0 %v13469_v23, %s10534_s27  ;;  %v4430_v8 = vsel %vm2250_vm3, %v4398_v63, %v8539_v33  ;;  %v8491_v53 = vld [vmem:[%s14867_s13 + $0x8] sm:$0xff]  ;;  %v14926_v22 = vld [vmem:[#allocation3_spill] sm:$0xff] }
 0x3fa   : > { %v6610_v39 = vsel %vm2283_vm4, %v6578_v13, %v9608_v9  ;;  %v6611_v34 = vsel %vm2283_vm4, %v6579_v56, %v9609_v37  ;;  %v4429_v26 = vsel %vm2250_vm3, %v4397_v41, %v8538_v36  ;;  %v8544_v21 = vunpack.i.h.bf16 %v14926_v22  ;;  %v4757_v37 = vpop.f32.mrf.mxu0  ;;  %7676 = vmatpush.bf16.msra.mxu2 %v8491_v53  ;;  %v13510_v53 = vld [vmem:[#allocation2 + $0x99] sm:$0xff] }
 0x3fb   : > { %v6643_v35 = vpack.c.bf16 %v6611_v34, %v6610_v39  ;;  %v8543_v4 = vunpack.i.l.bf16 %v14926_v22  ;;  %v13493_v56 = vpack.i.bf16 %v5483_v17, %v5482_v54  ;;  %v9614_v36 = vunpack.i.h.bf16 %v13433_v6  ;;  %v14928_v17 = vld [vmem:[#allocation7_spill] sm:$0xff] }
 0x3fc   : > { %v4462_v61 = vsel %vm2283_vm4, %v4430_v8, %v8544_v21  ;;  %v9613_v39 = vunpack.i.l.bf16 %v13433_v6  ;;  %v13506_v34 = vld [vmem:[#allocation2 + $0x91] sm:$0xff] }
 0x3fd   : > { %v5315_v0 = vpop.permute.xlu0 %5314  ;;  %6979 = vmatmul.bf16.vlgmr.msra.gmra.mxu0 %v6643_v35  ;;  %v5317_v13 = vpop.permute.xlu1 %5316  ;;  %v4461_v63 = vsel %vm2283_vm4, %v4429_v26, %v8543_v4  ;;  %v9730_v6 = vpack.i.bf16 %v13510_v53, %v13506_v34  ;;  %v5450_v4 = vld [vmem:[#allocation2 + $0x121] sm:$0xff] }
 0x3fe   : > { %5386 = vst.msk [vmem:[#allocation2 + $0x139] sm:$0xff] %vm550_vm1, %v5315_v0  ;;  %v13491_v9 = vpop.permute.xlu2 %9646  ;;  %v4509_v54 = vpack.c.bf16 %v4462_v61, %v4461_v63  ;;  %v13508_v35 = vpop.f32.mrf.mxu1  ;;  %v6548_v63 = vsel %vm550_vm1, %v13143_v38, %v9613_v39 }
 0x3ff   : > { %5387 = vst.msk [vmem:[#allocation2 + $0x141] sm:$0xff] %vm550_vm1, %v5317_v13  ;;  %v4846_v41 = vpop.f32.mrf.mxu3  ;;  %v9568_v13 = vunpack.i.l.bf16 %v13395_v46 }
 0x400   : > { %9711 = vrot.lane.b32.xlu1 %v13493_v56, %s10532_s23  ;;  %v13500_v33 = vadd.f32 %v4846_v41, %v4757_v37  ;;  %14929 = vst [vmem:[#allocation4_spill] sm:$0xff] %v13508_v35  ;;  %v9569_v37 = vunpack.i.h.bf16 %v13395_v46  ;;  %v6549_v41 = vsel %vm550_vm1, %v13135_v60, %v9614_v36  ;;  %v5451_v46 = vld [vmem:[#allocation2 + $0x129] sm:$0xff] }
 0x401   : > { %5326 = vrot.lane.b32.xlu0 %v14928_v17, %s10534_s27  ;;  %v9705_v38 = vpack.i.bf16 %v5451_v46, %v5450_v4  ;;  %v13556_v46 = vld [vmem:[#allocation2 + $0x82] sm:$0xff] }
 0x402   : > { %14927 = vst [vmem:[#allocation8_spill] sm:$0xff] %v13500_v33 }
 0x404   : > { %4875 = vmatmul.bf16.gmra.mxu3 %v4509_v54  ;;  %v13526_v54 = vpop.f32.mrf.mxu0 }
 0x405   : > { %v9617_v0 = vpop.permute.xlu0 %9616  ;;  %v13514_v21 = vld [vmem:[#allocation2 + $0x138] sm:$0xff]  ;;  %14930 = vst [vmem:[#allocation3_spill] sm:$0xff] %v13526_v54  ;;  %v13539_v54 = vld [vmem:[#allocation2 + $0xc0] sm:$0xff] }
 0x406   : > { %v9619_v26 = vunpack.i.h.bf16 %v9617_v0  ;;  %v9618_v8 = vunpack.i.l.bf16 %v9617_v0  ;;  %v13512_v22 = vpop.permute.xlu2 %9651  ;;  %v9622_v61 = vpop.permute.xlu1 %9621  ;;  %v13524_v17 = vld [vmem:[#allocation2 + $0x140] sm:$0xff] }
 0x407   : > { %v9624_v0 = vunpack.i.h.bf16 %v9622_v61  ;;  %v9623_v33 = vunpack.i.l.bf16 %v9622_v61  ;;  %v13530_v48 = vpop.f32.mrf.mxu3  ;;  %v13535_v60 = vpack.i.bf16 %v13524_v17, %v13514_v21  ;;  %v13541_v61 = vld [vmem:[#allocation2 + $0xc8] sm:$0xff] }
 0x408   : > { %v6580_v35 = vsel %vm2250_vm3, %v6548_v63, %v9618_v8  ;;  %v6581_v55 = vsel %vm2250_vm3, %v6549_v41, %v9619_v26  ;;  %14931 = vst [vmem:[#allocation7_spill] sm:$0xff] %v13530_v48  ;;  %9731 = vrot.lane.b32.xlu1 %v9730_v6, %s10534_s27  ;;  %v6466_v8 = vsel %vm550_vm1, %v13539_v54, %v9568_v13 }
 0x409   : > { %v6612_v36 = vsel %vm2283_vm4, %v6580_v35, %v9623_v33  ;;  %v6613_v39 = vsel %vm2283_vm4, %v6581_v55, %v9624_v0  ;;  %9716 = vrot.lane.b32.xlu2 %v13535_v60, %s10534_s27  ;;  %9706 = vrot.lane.b32.xlu0 %v9705_v38, %s10533_s26  ;;  %v6467_v6 = vsel %vm550_vm1, %v13541_v61, %v9569_v37  ;;  %v9574_v33 = vunpack.i.h.bf16 %v13338_v2  ;;  %v13554_v0 = vld [vmem:[#allocation2 + $0x7a] sm:$0xff]  ;;  %v13558_v38 = vpop.f32.mrf.mxu1 }
 0x40a   : > { %v6646_v26 = vpack.c.bf16 %v6613_v39, %v6612_v36  ;;  %v9573_v55 = vunpack.i.l.bf16 %v13338_v2  ;;  %14932 = vst [vmem:[#allocation42_spill] sm:$0xff] %v13558_v38  ;;  %v9720_v20 = vpack.i.bf16 %v13556_v46, %v13554_v0  ;;  %v9725_v38 = vpack.i.bf16 %v13261_v62, %v13259_v11 }
 0x40b   : > { %v6499_v36 = vsel %vm2250_vm3, %v6467_v6, %v9574_v33  ;;  %v5452_v33 = vld [vmem:[#allocation2 + $0x139] sm:$0xff] }
 0x40c   : > { %v6498_v37 = vsel %vm2250_vm3, %v6466_v8, %v9573_v55  ;;  %v4762_v39 = vpop.f32.mrf.mxu0 }
 0x40d   : > { %v9627_v35 = vpop.permute.xlu0 %9626  ;;  %6984 = vmatmul.bf16.gmra.mxu0 %v6646_v26  ;;  %v5651_v26 = vld [vmem:[#allocation2 + $0x3a] sm:$0xff] }
 0x40e   : > { %v9629_v4 = vunpack.i.h.bf16 %v9627_v35  ;;  %v9628_v41 = vunpack.i.l.bf16 %v9627_v35  ;;  %v13552_v63 = vpop.permute.xlu2 %9661  ;;  %v13560_v13 = vpop.permute.xlu1 %9631  ;;  %v6644_v8 = vpack.c.bf16 %v5651_v26, %v5650_v45  ;;  %v13584_v45 = vld [vmem:[#allocation2 + $0x150] sm:$0xff] }
 0x40f   : > { %v4851_v2 = vpop.f32.mrf.mxu3 }
 0x410   : > { %v6530_v48 = vsel %vm2283_vm4, %v6498_v37, %v9628_v41  ;;  %v6531_v35 = vsel %vm2283_vm4, %v6499_v36, %v9629_v4  ;;  %v13566_v1 = vadd.f32 %v4851_v2, %v4762_v39  ;;  %v5453_v4 = vld [vmem:[#allocation2 + $0x141] sm:$0xff]  ;;  %v13588_v2 = vld [vmem:[#allocation2 + $0x92] sm:$0xff] }
 0x411   : > { %v6666_v24 = vpack.c.bf16 %v6531_v35, %v6530_v48  ;;  %9721 = vrot.lane.b32.xlu2 %v9720_v20, %s10533_s26  ;;  %9726 = vrot.lane.b32.xlu0 %v9725_v38, %s10532_s23  ;;  %v5484_v41 = vld [vmem:[#allocation2 + $0x13a] sm:$0xff]  ;;  %v5485_v37 = vld [vmem:[#allocation2 + $0x142] sm:$0xff]  ;;  %v9735_v11 = vpack.i.bf16 %v5453_v4, %v5452_v33  ;;  %v13579_v48 = vpop.f32.mrf.mxu1  ;;  %v5597_v35 = vld [vmem:[#allocation2 + $0xb0] sm:$0xff] }
 0x412   : > { %14933 = vst [vmem:[#allocation43_spill] sm:$0xff] %v13566_v1  ;;  %v13577_v62 = vpack.i.bf16 %v5485_v37, %v5484_v41  ;;  %v13596_v41 = vld [vmem:[#allocation2 + $0xd8] sm:$0xff]  ;;  %v13598_v37 = vld [vmem:[#allocation2 + $0xe0] sm:$0xff] }
 0x413   : > { %6930 = vmatmul.bf16.gmra.mxu2 %v6666_v24  ;;  %14934 = vst [vmem:[#allocation44_spill] sm:$0xff] %v13579_v48 }
 0x414   : > { %8349 = vmatmul.msk.bf16.vlgmr.msra.gmra.mxu3 %vm550_vm1, %v6644_v8  ;;  %v9649_v8 = vunpack.i.h.bf16 %v13491_v9 }
 0x415   : > { %v5321_v6 = vpop.permute.xlu0 %5320 }
 0x416   : > { %5389 = vst.msk [vmem:[#allocation2 + $0x159] sm:$0xff] %vm550_vm1, %v5321_v6  ;;  %v5325_v55 = vpop.permute.xlu2 %5324  ;;  %v9642_v36 = vpop.permute.xlu1 %9641  ;;  %v9648_v6 = vunpack.i.l.bf16 %v13491_v9  ;;  %v13607_v9 = vld [vmem:[#allocation2 + $0x9a] sm:$0xff] }
 0x417   : > { %5391 = vst.msk [vmem:[#allocation2 + $0x171] sm:$0xff] %vm550_vm1, %v5325_v55  ;;  %v9644_v33 = vunpack.i.h.bf16 %v9642_v36  ;;  %v9643_v55 = vunpack.i.l.bf16 %v9642_v36  ;;  %v5596_v36 = vld [vmem:[#allocation2 + $0xa8] sm:$0xff]  ;;  %v9740_v27 = vpack.i.bf16 %v13607_v9, %v13588_v2 }
 0x418   : > { %v9750_v40 = vpack.i.bf16 %v5597_v35, %v5596_v36 }
 0x419   : > { %9736 = vrot.lane.b32.xlu2 %v9735_v11, %s10533_s26  ;;  %9746 = vrot.lane.b32.xlu0 %v13577_v62, %s10532_s23  ;;  %v9634_v11 = vunpack.i.h.bf16 %v13560_v13  ;;  %v13621_v35 = vpop.f32.mrf.mxu1 }
 0x41a   : > { %14935 = vst [vmem:[#allocation45_spill] sm:$0xff] %v13621_v35 }
 0x41d   : > { %v9637_v24 = vpop.permute.xlu0 %9636  ;;  %v13586_v20 = vld [vmem:[#allocation2 + $0x158] sm:$0xff] }
 0x41e   : > { %v9639_v38 = vunpack.i.h.bf16 %v9637_v24  ;;  %v9638_v39 = vunpack.i.l.bf16 %v9637_v24  ;;  %v13592_v26 = vpack.i.bf16 %v13586_v20, %v13584_v45  ;;  %v5323_v4 = vpop.permute.xlu1 %5322  ;;  %v9633_v24 = vunpack.i.l.bf16 %v13560_v13  ;;  %v5486_v36 = vld [vmem:[#allocation2 + $0x152] sm:$0xff] }
 0x41f   : > { %5390 = vst.msk [vmem:[#allocation2 + $0x169] sm:$0xff] %vm550_vm1, %v5323_v4 }
 0x420   : > { %v6469_v1 = vsel %vm550_vm1, %v13598_v37, %v9639_v38  ;;  %v6468_v48 = vsel %vm550_vm1, %v13596_v41, %v9638_v39  ;;  %9756 = vrot.lane.b32.xlu1 %v13592_v26, %s10534_s27 }
 0x421   : > { %v6500_v13 = vsel %vm2250_vm3, %v6468_v48, %v9643_v55  ;;  %v6501_v4 = vsel %vm2250_vm3, %v6469_v1, %v9644_v33  ;;  %9741 = vrot.lane.b32.xlu2 %v9740_v27, %s10533_s26  ;;  %9751 = vrot.lane.b32.xlu0 %v9750_v40, %s10532_s23  ;;  %v13623_v48 = vpop.f32.mrf.mxu0  ;;  %v6551_v1 = vsel %vm550_vm1, %v5527_v51, %v9634_v11  ;;  %v9653_v33 = vunpack.i.l.bf16 %v13512_v22  ;;  %v5455_v51 = vld [vmem:[#allocation2 + $0x159] sm:$0xff]  ;;  %v13634_v11 = vpop.f32.mrf.mxu3 }
 0x422   : > { %v6532_v38 = vsel %vm2283_vm4, %v6500_v13, %v9648_v6  ;;  %v6533_v39 = vsel %vm2283_vm4, %v6501_v4, %v9649_v8  ;;  %v6550_v6 = vsel %vm550_vm1, %v5526_v59, %v9633_v24  ;;  %v9654_v8 = vunpack.i.h.bf16 %v13512_v22  ;;  %v5487_v13 = vld [vmem:[#allocation2 + $0x15a] sm:$0xff]  ;;  %14936 = vst [vmem:[#allocation46_spill] sm:$0xff] %v13634_v11 }
 0x423   : > { %v6669_v44 = vpack.c.bf16 %v6533_v39, %v6532_v38  ;;  %v9760_v55 = vpack.i.bf16 %v13619_v12, %v13630_v28  ;;  %v6582_v59 = vsel %vm2250_vm3, %v6550_v6, %v9653_v33  ;;  %v13641_v4 = vpack.i.bf16 %v5487_v13, %v5486_v36 }
 0x424   : > { %8350 = vmatmul.msk.bf16.gmra.mxu3 %vm550_vm1, %v6647_v19  ;;  %v6583_v22 = vsel %vm2250_vm3, %v6551_v1, %v9654_v8  ;;  %v5454_v19 = vld [vmem:[#allocation2 + $0x151] sm:$0xff]  ;;  %v13646_v1 = vpop.f32.mrf.mxu1  ;;  %v9780_v13 = vpack.i.bf16 %v13541_v61, %v13539_v54 }
 0x425   : > { %v9657_v27 = vpop.permute.xlu0 %9656  ;;  %6935 = vmatmul.bf16.gmra.mxu2 %v6669_v44  ;;  %v9765_v38 = vpack.i.bf16 %v5455_v51, %v5454_v19  ;;  %14937 = vst [vmem:[#allocation47_spill] sm:$0xff] %v13646_v1  ;;  %v13648_v8 = vld [vmem:[#allocation2 + $0xaa] sm:$0xff]  ;;  %v14940_v19 = vld [vmem:[#allocation5_spill] sm:$0xff]  ;;  %v5489_v61 = vld [vmem:[#allocation2 + $0x172] sm:$0xff] }
 0x426   : > { %v9659_v40 = vunpack.i.h.bf16 %v9657_v27  ;;  %v9658_v3 = vunpack.i.l.bf16 %v9657_v27  ;;  %v5518_v27 = vld [vmem:[#allocation2 + $0x168] sm:$0xff]  ;;  %v5519_v6 = vld [vmem:[#allocation2 + $0x170] sm:$0xff] }
 0x427   : > { %v10501_v1 = vld [vmem:[#allocation2 + $0xf0] sm:$0xff] }
 0x428   : > { %9761 = vrot.lane.b32.xlu1 %v9760_v55, %s10534_s27  ;;  %v6614_v44 = vsel %vm2283_vm4, %v6582_v59, %v9658_v3  ;;  %v6615_v24 = vsel %vm2283_vm4, %v6583_v22, %v9659_v40  ;;  %v13650_v3 = vld [vmem:[#allocation2 + $0xb2] sm:$0xff]  ;;  %v13652_v40 = vpack.i.bf16 %v5519_v6, %v5518_v27  ;;  %v5631_v59 = vld [vmem:[#allocation2 + $0xc9] sm:$0xff] }
 0x429   : > { %v6649_v39 = vpack.c.bf16 %v6615_v24, %v6614_v44  ;;  %9776 = vrot.lane.b32.xlu0 %v13641_v4, %s10532_s23  ;;  %9766 = vrot.lane.b32.xlu2 %v9765_v38, %s10533_s26  ;;  %v4767_v33 = vpop.f32.mrf.mxu0  ;;  %v9770_v51 = vpack.i.bf16 %v13650_v3, %v13648_v8  ;;  %v14939_v22 = vld [vmem:[#allocation6_spill] sm:$0xff] }
 0x42a   : > { %v14941_v44 = vpack.c.bf16 %v14939_v22, %v14940_v19  ;;  %v5630_v24 = vld [vmem:[#allocation2 + $0xc1] sm:$0xff]  ;;  %v5488_v27 = vld [vmem:[#allocation2 + $0x16a] sm:$0xff] }
 0x42b   : > { %6989 = vmatmul.bf16.gmra.mxu0 %v6649_v39  ;;  %v9790_v39 = vpack.i.bf16 %v5631_v59, %v5630_v24  ;;  %v5456_v6 = vld [vmem:[#allocation2 + $0x169] sm:$0xff] }
 0x42c   : > { %v13670_v54 = vpop.f32.mrf.mxu1  ;;  %v13683_v59 = vld [vmem:[#allocation2 + $0xca] sm:$0xff] }
 0x42d   : > { %14943 = vst [vmem:[#allocation5_spill] sm:$0xff] %v13670_v54  ;;  %v5602_v54 = vld [vmem:[#allocation2 + $0xf0] sm:$0xff] }
 0x42e   : > { %v4856_v55 = vpop.f32.mrf.mxu3 }
 0x42f   : > { %v13654_v36 = vadd.f32 %v4856_v55, %v4767_v33  ;;  %v5457_v33 = vld [vmem:[#allocation2 + $0x171] sm:$0xff]  ;;  %v13673_v55 = vpack.i.bf16 %v5489_v61, %v5488_v27  ;;  %v6653_v27 = vpack.c.bf16 %v13556_v46, %v13554_v0  ;;  %v13698_v61 = vld [vmem:[#allocation2 + $0xda] sm:$0xff]  ;;  %v9667_v46 = vpop.permute.xlu0 %9666 }
 0x430   : > { %9786 = vrot.lane.b32.xlu1 %v13652_v40, %s10534_s27 }
 0x431   : > { %14938 = vst [vmem:[#allocation48_spill] sm:$0xff] %v13654_v36  ;;  %9781 = vrot.lane.b32.xlu0 %v9780_v13, %s10532_s23  ;;  %9771 = vrot.lane.b32.xlu2 %v9770_v51, %s10533_s26  ;;  %v13668_v38 = vpop.f32.mrf.mxu0  ;;  %v13675_v13 = vpack.i.bf16 %v5457_v33, %v5456_v6  ;;  %v13681_v51 = vld [vmem:[#allocation2 + $0xc2] sm:$0xff]  ;;  %v5603_v6 = vld [vmem:[#allocation2 + $0xf8] sm:$0xff] }
 0x432   : > { %14942 = vst [vmem:[#allocation6_spill] sm:$0xff] %v13668_v38  ;;  %v9800_v24 = vpack.i.bf16 %v13683_v59, %v13681_v51  ;;  %v9830_v36 = vpack.i.bf16 %v5603_v6, %v5602_v54  ;;  %v10499_v54 = vld [vmem:[#allocation2 + $0xfa] sm:$0xff] }
 0x434   : > { %8351 = vmatmul.msk.bf16.gmra.mxu3 %vm550_vm1, %v14941_v44  ;;  %v9810_v44 = vpack.i.bf16 %v13598_v37, %v13596_v41  ;;  %v13700_v41 = vld [vmem:[#allocation2 + $0xe2] sm:$0xff] }
 0x436   : > { %v13685_v19 = vpop.f32.mrf.mxu3 }
 0x437   : > { %14944 = vst [vmem:[#allocation49_spill] sm:$0xff] %v13685_v19  ;;  %v9669_v19 = vunpack.i.h.bf16 %v9667_v46 }
 0x438   : > { %9791 = vrot.lane.b32.xlu1 %v9790_v39, %s10534_s27  ;;  %v13691_v39 = vpop.f32.mrf.mxu1 }
 0x439   : > { %9806 = vrot.lane.b32.xlu0 %v13673_v55, %s10532_s23  ;;  %9796 = vrot.lane.b32.xlu2 %v13675_v13, %s10533_s26  ;;  %v4772_v22 = vpop.f32.mrf.mxu0  ;;  %14945 = vst [vmem:[#allocation50_spill] sm:$0xff] %v13691_v39 }
 0x440   : > { %v13710_v0 = vpop.f32.mrf.mxu1 }
 0x441   : > { %9811 = vrot.lane.b32.xlu0 %v9810_v44, %s10532_s23  ;;  %9801 = vrot.lane.b32.xlu2 %v9800_v24, %s10533_s26  ;;  %v9825_v44 = vpack.i.bf16 %v13700_v41, %v13698_v61  ;;  %v13706_v39 = vpop.f32.mrf.mxu0  ;;  %14948 = vst [vmem:[#allocation53_spill] sm:$0xff] %v13710_v0  ;;  %v9664_v24 = vunpack.i.h.bf16 %v13552_v63 }
 0x442   : > { %14947 = vst [vmem:[#allocation52_spill] sm:$0xff] %v13706_v39  ;;  %v6656_v39 = vpack.c.bf16 %v13607_v9, %v13588_v2 }
 0x444   : > { %8352 = vmatmul.msk.bf16.gmra.mxu3 %vm550_vm1, %v6653_v27  ;;  %v9663_v27 = vunpack.i.l.bf16 %v13552_v63 }
 0x446   : > { %v6470_v0 = vsel %vm550_vm1, %v10501_v1, %v9663_v27  ;;  %v9692_v27 = vpop.permute.xlu2 %9691 }
 0x447   : > { %v4861_v33 = vpop.f32.mrf.mxu3 }
 0x448   : > { %v13702_v37 = vadd.f32 %v4861_v33, %v4772_v22  ;;  %v9668_v22 = vunpack.i.l.bf16 %v9667_v46  ;;  %v10498_v33 = vld [vmem:[#allocation2 + $0xf2] sm:$0xff] }
 0x449   : > { %9831 = vrot.lane.b32.xlu0 %v9830_v36, %s10532_s23  ;;  %9826 = vrot.lane.b32.xlu2 %v9825_v44, %s10533_s26  ;;  %v9840_v6 = vpack.i.bf16 %v10499_v54, %v10498_v33  ;;  %v10500_v36 = vld [vmem:[#allocation2 + $0xf8] sm:$0xff] }
 0x44a   : > { %14946 = vst [vmem:[#allocation51_spill] sm:$0xff] %v13702_v37  ;;  %v4777_v37 = vpop.f32.mrf.mxu0  ;;  %v6471_v44 = vsel %vm550_vm1, %v10500_v36, %v9664_v24  ;;  %v6502_v33 = vsel %vm2250_vm3, %v6470_v0, %v9668_v22  ;;  %v13726_v24 = vpop.f32.mrf.mxu1 }
 0x44b   : > { %v6503_v54 = vsel %vm2250_vm3, %v6471_v44, %v9669_v19  ;;  %14949 = vst [vmem:[#allocation54_spill] sm:$0xff] %v13726_v24  ;;  %v9672_v19 = vpop.permute.xlu0 %9671 }
 0x44c   : > { %v9674_v22 = vunpack.i.h.bf16 %v9672_v19 }
 0x44e   : > { %v9697_v36 = vpop.permute.xlu2 %9696 }
 0x44f   : > { %v13732_v0 = vpop.f32.mrf.mxu3 }
 0x450   : > { %14950 = vst [vmem:[#allocation55_spill] sm:$0xff] %v13732_v0 }
 0x451   : > { %9846 = vrot.lane.b32.xlu0 %v13399_v58, %s10532_s23  ;;  %9841 = vrot.lane.b32.xlu2 %v9840_v6, %s10533_s26  ;;  %v9673_v6 = vunpack.i.l.bf16 %v9672_v19 }
 0x452   : > { %v9677_v38 = vpop.permute.xlu1 %9676 }
 0x453   : > { %v9679_v63 = vunpack.i.h.bf16 %v9677_v38  ;;  %v9678_v46 = vunpack.i.l.bf16 %v9677_v38  ;;  %v4779_v38 = vpop.f32.mrf.mxu0 }
 0x454   : > { %8353 = vmatmul.msk.bf16.gmra.mxu3 %vm550_vm1, %v6656_v39  ;;  %v4955_v39 = vpop.f32.mrf.mxu1 }
 0x455   : > { %v6534_v2 = vsel %vm2283_vm4, %v6502_v33, %v9678_v46  ;;  %v6535_v9 = vsel %vm2283_vm4, %v6503_v54, %v9679_v63  ;;  %v5528_v63 = vld [vmem:[#allocation2 + $0x61] sm:$0xff]  ;;  %v5529_v46 = vld [vmem:[#allocation2 + $0x69] sm:$0xff] }
 0x456   : > { %v6672_v1 = vpack.c.bf16 %v6535_v9, %v6534_v2  ;;  %v6553_v54 = vsel %vm550_vm1, %v5529_v46, %v9674_v22  ;;  %v6552_v2 = vsel %vm550_vm1, %v5528_v63, %v9673_v6  ;;  %v9698_v9 = vunpack.i.l.bf16 %v9697_v36  ;;  %v13750_v6 = vld [vmem:[%s14862_s8] ss:$0 sm:$0xff] }
 0x458   : > { %6940 = vmatmul.bf16.gmra.mxu2 %v6672_v1  ;;  %v9699_v1 = vunpack.i.h.bf16 %v9697_v36 }
 0x459   : > { %9861 = vrot.lane.b32.xlu0 %v13469_v23, %s10532_s23  ;;  %9856 = vrot.lane.b32.xlu2 %v13404_v31, %s10533_s26  ;;  %v6659_v31 = vpack.c.bf16 %v13650_v3, %v13648_v8 }
 0x45a   : > { %v9682_v58 = vpop.permute.xlu1 %9681 }
 0x45b   : > { %v9684_v8 = vunpack.i.h.bf16 %v9682_v58  ;;  %v9683_v3 = vunpack.i.l.bf16 %v9682_v58 }
 0x45c   : > { %v4957_v63 = vpop.f32.mrf.mxu1 }
 0x45d   : > { %v6472_v58 = vsel %vm550_vm1, %v13386_v5, %v9683_v3 }
 0x461   : > { %9876 = vrot.lane.b32.xlu0 %v13535_v60, %s10532_s23  ;;  %9871 = vrot.lane.b32.xlu2 %v13493_v56, %s10533_s26  ;;  %v4782_v60 = vpop.f32.mrf.mxu0 }
 0x462   : > { %v9687_v44 = vpop.permute.xlu1 %9686 }
 0x463   : > { %v9689_v23 = vunpack.i.h.bf16 %v9687_v44  ;;  %v9688_v33 = vunpack.i.l.bf16 %v9687_v44 }
 0x464   : > { %8354 = vmatmul.msk.bf16.gmra.mxu3 %vm550_vm1, %v6659_v31 }
 0x465   : > { %v6584_v19 = vsel %vm2250_vm3, %v6552_v2, %v9688_v33  ;;  %v6585_v24 = vsel %vm2250_vm3, %v6553_v54, %v9689_v23  ;;  %v13755_v23 = vld [vmem:[%s14863_s9] ss:$0 sm:$0xff] }
 0x466   : > { %v4866_v0 = vpop.f32.mrf.mxu3  ;;  %v6616_v56 = vsel %vm2283_vm4, %v6584_v19, %v9698_v9  ;;  %v6617_v35 = vsel %vm2283_vm4, %v6585_v24, %v9699_v1 }
 0x467   : > { %v4867_v44 = vadd.f32 %v4866_v0, %v4777_v37  ;;  %v6652_v22 = vpack.c.bf16 %v6617_v35, %v6616_v56  ;;  %v13757_v37 = vpop.f32.mrf.mxu2  ;;  %v6473_v35 = vsel %vm550_vm1, %v13392_v10, %v9684_v8  ;;  %v9694_v0 = vunpack.i.h.bf16 %v9692_v27 }
 0x469   : > { %v4956_v36 = vadd.f32 %v4955_v39, %v4867_v44  ;;  %6994 = vmatmul.bf16.gmra.mxu0 %v6652_v22  ;;  %9891 = vrot.lane.b32.xlu0 %v13592_v26, %s10532_s23  ;;  %v9693_v39 = vunpack.i.l.bf16 %v9692_v27  ;;  %v6505_v19 = vsel %vm2250_vm3, %v6473_v35, %v9694_v0  ;;  %v4784_v10 = vpop.f32.mrf.mxu0  ;;  %v13777_v27 = vpop.permute.xlu2 %9716 }
 0x46a   : > { %v5329_v46 = vpop.permute.xlu1 %5328  ;;  %9886 = vrot.lane.b32.xlu2 %v13577_v62, %s10533_s26 }
 0x46b   : > { %v5000_v24 = vmul.f32 %v13750_v6, %v4956_v36  ;;  %5393 = vst.msk [vmem:[#allocation2 + $0x189] sm:$0xff] %vm550_vm1, %v5329_v46  ;;  %v9702_v31 = vpop.permute.xlu0 %9701  ;;  %v6504_v1 = vsel %vm2250_vm3, %v6472_v58, %v9693_v39  ;;  %v4960_v36 = vpop.f32.mrf.mxu1 }
 0x46c   : > { %v9704_v54 = vunpack.i.h.bf16 %v9702_v31  ;;  %v9703_v2 = vunpack.i.l.bf16 %v9702_v31 }
 0x46d   : > { %v13770_v33 = vadd.f32 %v13755_v23, %v5000_v24 }
 0x46e   : > { %v4868_v26 = vpop.f32.mrf.mxu3  ;;  %v6536_v56 = vsel %vm2283_vm4, %v6504_v1, %v9703_v2  ;;  %v6537_v5 = vsel %vm2283_vm4, %v6505_v19, %v9704_v54  ;;  %v9718_v1 = vunpack.i.l.bf16 %v13777_v27 }
 0x46f   : > { %v5068_v9 = vsub.f32 0.0, %v13770_v33  ;;  %v4869_v62 = vadd.f32 %v4868_v26, %v4779_v38  ;;  %v6675_v3 = vpack.c.bf16 %v6537_v5, %v6536_v56  ;;  %v6662_v38 = vpack.c.bf16 %v13683_v59, %v13681_v51  ;;  %v13786_v46 = vpop.f32.mrf.mxu2 }
 0x471   : > { %v5126_v44 = vmul.f32 1.442695, %v5068_v9  ;;  %v4958_v8 = vadd.f32 %v4957_v63, %v4869_v62  ;;  %9906 = vrot.lane.b32.xlu0 %v13652_v40, %s10532_s23  ;;  %6945 = vmatmul.bf16.gmra.mxu2 %v6675_v3  ;;  %v8489_v40 = vld [vmem:[%s14869_s15 + $0x8] sm:$0xff]  ;;  %v13800_v39 = vpop.f32.mrf.mxu0  ;;  %v9722_v54 = vpop.permute.xlu2 %9721  ;;  %v9719_v62 = vunpack.i.h.bf16 %v13777_v27 }
 0x472   : > { %9901 = vrot.lane.b32.xlu2 %v13641_v4, %s10533_s26  ;;  %v8490_v4 = vld [vmem:[%s14867_s13] sm:$0xff]  ;;  %7503 = vmatpush.bf16.msra.mxu1 %v8489_v40  ;;  %v9712_v31 = vpop.permute.xlu1 %9711  ;;  %v9724_v3 = vunpack.i.h.bf16 %v9722_v54 }
 0x473   : > { %10211 = vpow2.f32 %v5126_v44  ;;  %v5001_v22 = vmul.f32 %v13750_v6, %v4958_v8  ;;  %v5327_v63 = vpop.permute.xlu0 %5326  ;;  %7677 = vmatpush.bf16.msra.mxu2 %v8490_v4  ;;  %v4962_v8 = vpop.f32.mrf.mxu1 }
 0x474   : > { %8355 = vmatmul.msk.bf16.gmra.mxu3 %vm550_vm1, %v6662_v38  ;;  %5392 = vst.msk [vmem:[#allocation2 + $0x181] sm:$0xff] %vm550_vm1, %v5327_v63  ;;  %v9713_v63 = vunpack.i.l.bf16 %v9712_v31 }
 0x475   : > { %v13789_v24 = vadd.f32 %v13755_v23, %v5001_v22  ;;  %v9723_v22 = vunpack.i.l.bf16 %v9722_v54 }
 0x477   : > { %v5069_v51 = vsub.f32 0.0, %v13789_v24  ;;  %v4871_v59 = vpop.f32.mrf.mxu3  ;;  %v13804_v9 = vpop.f32.mrf.mxu2 }
 0x478   : > { %v4872_v0 = vadd.f32 %v4871_v59, %v4782_v60 }
 0x479   : > { %v10212_v35 = vpop.eup %10211  ;;  %v5128_v58 = vmul.f32 1.442695, %v5069_v51  ;;  %v13814_v51 = vld [vmem:[#allocation2 + $0x18a] sm:$0xff] }
 0x47a   : > { %v4961_v2 = vadd.f32 %v4960_v36, %v4872_v0  ;;  %9916 = vrot.lane.b32.xlu2 %v13673_v55, %s10533_s26  ;;  %v5164_v26 = vadd.f32 1.0, %v10212_v35  ;;  %v9714_v55 = vunpack.i.h.bf16 %v9712_v31 }
 0x47b   : > { %10213 = vpow2.f32 %v5128_v58  ;;  %v9707_v56 = vpop.permute.xlu0 %9706  ;;  %v5614_v60 = vld [vmem:[#allocation2 + $0x180] sm:$0xff]  ;;  %v5615_v5 = vld [vmem:[#allocation2 + $0x188] sm:$0xff] }
 0x47c   : > { %v5002_v19 = vmul.f32 %v13750_v6, %v4961_v2  ;;  %v13809_v44 = vld [vmem:[#allocation2 + $0x182] sm:$0xff]  ;;  %v9709_v38 = vunpack.i.h.bf16 %v9707_v56  ;;  %v9708_v36 = vunpack.i.l.bf16 %v9707_v56  ;;  %v9920_v4 = vpack.i.bf16 %v5615_v5, %v5614_v60  ;;  %v5616_v56 = vld [vmem:[#allocation2 + $0x198] sm:$0xff] }
 0x47d   : > { %10215 = vrcp.f32 %v5164_v26  ;;  %v9930_v58 = vpack.i.bf16 %v13814_v51, %v13809_v44  ;;  %v5617_v60 = vld [vmem:[#allocation2 + $0x1a0] sm:$0xff] }
 0x47e   : > { %v13812_v40 = vadd.f32 %v13755_v23, %v5002_v19  ;;  %v6474_v27 = vsel %vm550_vm1, %v13455_v29, %v9708_v36  ;;  %v6475_v59 = vsel %vm550_vm1, %v13457_v25, %v9709_v38  ;;  %9921 = vrot.lane.b32.xlu0 %v9920_v4, %s10532_s23  ;;  %9816 = vrot.lane.b32.xlu1 %v9920_v4, %s10534_s27  ;;  %v13829_v5 = vld [vmem:[#allocation2 + $0xd9] sm:$0xff]  ;;  %v13836_v4 = vld [vmem:[#allocation2 + $0xe1] sm:$0xff] }
 0x47f   : > { %v4873_v35 = vpop.f32.mrf.mxu3  ;;  %v6506_v2 = vsel %vm2250_vm3, %v6474_v27, %v9713_v63  ;;  %v6507_v26 = vsel %vm2250_vm3, %v6475_v59, %v9714_v55  ;;  %v6665_v55 = vpack.c.bf16 %v13700_v41, %v13698_v61  ;;  %v4789_v63 = vpop.f32.mrf.mxu0  ;;  %v6555_v61 = vsel %vm550_vm1, %v13417_v47, %v9724_v3 }
 0x480   : > { %v5070_v31 = vsub.f32 0.0, %v13812_v40  ;;  %v4874_v54 = vadd.f32 %v4873_v35, %v4784_v10  ;;  %v6538_v19 = vsel %vm2283_vm4, %v6506_v2, %v9718_v1  ;;  %v6539_v25 = vsel %vm2283_vm4, %v6507_v26, %v9719_v62  ;;  %v9732_v1 = vpop.permute.xlu1 %9731  ;;  %v13838_v62 = vpop.permute.xlu2 %9736 }
 0x481   : > { %v10214_v0 = vpop.eup %10213  ;;  %v6678_v10 = vpack.c.bf16 %v6539_v25, %v6538_v19  ;;  %v9820_v35 = vpack.i.bf16 %v13836_v4, %v13829_v5  ;;  %v6554_v41 = vsel %vm550_vm1, %v13423_v32, %v9723_v22  ;;  %v13848_v2 = vpop.f32.mrf.mxu2  ;;  %v9733_v26 = vunpack.i.l.bf16 %v9732_v1 }
 0x482   : > { %v5165_v29 = vadd.f32 1.0, %v10214_v0  ;;  %v5130_v36 = vmul.f32 1.442695, %v5070_v31  ;;  %v4963_v11 = vadd.f32 %v4962_v8, %v4874_v54  ;;  %9931 = vrot.lane.b32.xlu2 %v9930_v58, %s10533_s26  ;;  %v9935_v8 = vpack.i.bf16 %v5617_v60, %v5616_v56  ;;  %v4965_v54 = vpop.f32.mrf.mxu1  ;;  %s8416_s26 = sshll.u32 %s15016_s25, 8 }
 0x483   : > { %v9727_v59 = vpop.permute.xlu0 %9726  ;;  %6950 = vmatmul.bf16.gmra.mxu2 %v6678_v10  ;;  %v10216_v58 = vpop.eup %10215  ;;  %s14622_s22 = scalar_lea.vmem %s14871_s17, %s8416_s26 }
 0x484   : > { %10217 = vrcp.f32 %v5165_v29  ;;  %v5003_v27 = vmul.f32 %v13750_v6, %v4963_v11  ;;  %8356 = vmatmul.msk.bf16.gmra.mxu3 %vm550_vm1, %v6665_v55  ;;  %v9729_v0 = vunpack.i.h.bf16 %v9727_v59  ;;  %v9728_v31 = vunpack.i.l.bf16 %v9727_v59 }
 0x485   : > { %10219 = vpow2.f32 %v5130_v36  ;;  %v9734_v11 = vunpack.i.h.bf16 %v9732_v1  ;;  %v13862_v10 = vmul.f32 %v10216_v58, %v13770_v33  ;;  %v9738_v33 = vunpack.i.l.bf16 %v13838_v62  ;;  %v13873_v58 = vld [vmem:[#allocation2 + $0xf1] sm:$0xff] }
 0x486   : > { %v13851_v29 = vadd.f32 %v13755_v23, %v5003_v27  ;;  %v6586_v19 = vsel %vm2250_vm3, %v6554_v41, %v9728_v31  ;;  %v6587_v25 = vsel %vm2250_vm3, %v6555_v61, %v9729_v0  ;;  %9936 = vrot.lane.b32.xlu0 %v9935_v8, %s10532_s23  ;;  %9821 = vrot.lane.b32.xlu1 %v9820_v35, %s10534_s27  ;;  %v13867_v8 = vld [vmem:[#allocation2 + $0xf9] sm:$0xff] }
 0x487   : > { %v4876_v56 = vpop.f32.mrf.mxu3  ;;  %v6618_v3 = vsel %vm2283_vm4, %v6586_v19, %v9733_v26  ;;  %v6619_v22 = vsel %vm2283_vm4, %v6587_v25, %v9734_v11  ;;  %14951 = vst [vmem:[#allocation56_spill] sm:$0xff] %v13862_v10  ;;  %v6980_v59 = vpop.f32.mrf.mxu0 }
 0x488   : > { %v5071_v47 = vsub.f32 0.0, %v13851_v29  ;;  %v4877_v32 = vadd.f32 %v4876_v56, %v13800_v39  ;;  %v6655_v36 = vpack.c.bf16 %v6619_v22, %v6618_v3  ;;  %v9739_v56 = vunpack.i.h.bf16 %v13838_v62  ;;  %v13888_v62 = vld [vmem:[#allocation2 + $0x111] sm:$0xff] }
 0x489   : > { %v13875_v0 = vpop.f32.mrf.mxu2  ;;  %v6476_v3 = vsel %vm550_vm1, %v13514_v21, %v9738_v33 }
 0x48a   : > { %v10218_v60 = vpop.eup %10217  ;;  %v5132_v55 = vmul.f32 1.442695, %v5071_v47  ;;  %v4966_v1 = vadd.f32 %v4965_v54, %v4877_v32  ;;  %6999 = vmatmul.bf16.gmra.mxu0 %v6655_v36  ;;  %v9835_v54 = vpack.i.bf16 %v13867_v8, %v13873_v58  ;;  %v4967_v25 = vpop.f32.mrf.mxu1 }
 0x48b   : > { %v13865_v27 = vmul.f32 %v10218_v60, %v13789_v24  ;;  %v10220_v35 = vpop.eup %10219  ;;  %v9747_v61 = vpop.permute.xlu0 %9746 }
 0x48c   : > { %10221 = vpow2.f32 %v5132_v55  ;;  %v5004_v39 = vmul.f32 %v13750_v6, %v4966_v1  ;;  %v9742_v24 = vpop.permute.xlu2 %9741  ;;  %v5166_v11 = vadd.f32 1.0, %v10220_v35  ;;  %v9748_v26 = vunpack.i.l.bf16 %v9747_v61 }
 0x48d   : > { %v9749_v22 = vunpack.i.h.bf16 %v9747_v61  ;;  %v14952_v61 = vpack.c.bf16 %v13003_v57, %v13001_v16  ;;  %v13910_v57 = vld [vmem:[%s14865_s11] ss:$0 sm:$0xff] }
 0x48e   : > { %v13878_v31 = vadd.f32 %v13755_v23, %v5004_v39  ;;  %9836 = vrot.lane.b32.xlu1 %v9835_v54, %s10534_s27  ;;  %10223 = vrcp.f32 %v5166_v11  ;;  %v6508_v38 = vsel %vm2250_vm3, %v6476_v3, %v9748_v26  ;;  %v6477_v54 = vsel %vm550_vm1, %v13524_v17, %v9739_v56 }
 0x48f   : > { %v4878_v19 = vpop.f32.mrf.mxu3  ;;  %v9744_v11 = vunpack.i.h.bf16 %v9742_v24  ;;  %v6982_v26 = vpop.f32.mrf.mxu0  ;;  %v6981_v17 = vadd.f32 %v6980_v59, %v13757_v37 }
 0x490   : > { %v5072_v47 = vsub.f32 0.0, %v13878_v31  ;;  %v4879_v32 = vadd.f32 %v4878_v19, %v4789_v63  ;;  %v9743_v19 = vunpack.i.l.bf16 %v9742_v24 }
 0x492   : > { %v9757_v60 = vpop.permute.xlu1 %9756  ;;  %v10222_v36 = vpop.eup %10221  ;;  %v5134_v55 = vmul.f32 1.442695, %v5072_v47  ;;  %v4968_v1 = vadd.f32 %v4967_v25, %v4879_v32  ;;  %v6509_v25 = vsel %vm2250_vm3, %v6477_v54, %v9749_v22  ;;  %v13899_v47 = vld [vmem:[#allocation2 + $0x109] sm:$0xff] }
 0x493   : > { %v9759_v39 = vunpack.i.h.bf16 %v9757_v60  ;;  %v9758_v35 = vunpack.i.l.bf16 %v9757_v60  ;;  %v5167_v41 = vadd.f32 1.0, %v10222_v36  ;;  %v9752_v21 = vpop.permute.xlu0 %9751  ;;  %v9850_v16 = vpack.i.bf16 %v13888_v62, %v13899_v47  ;;  %v13913_v22 = vpop.f32.mrf.mxu2  ;;  %v13920_v36 = vld [vmem:[%s14866_s12] ss:$0 sm:$0xff] }
 0x494   : > { %10225 = vpow2.f32 %v5134_v55  ;;  %v5005_v63 = vmul.f32 %v13750_v6, %v4968_v1  ;;  %8357 = vmatmul.msk.bf16.gmra.mxu3 %vm550_vm1, %v14952_v61  ;;  %v9753_v24 = vunpack.i.l.bf16 %v9752_v21  ;;  %v9767_v37 = vpop.permute.xlu2 %9766  ;;  %v5638_v55 = vld [vmem:[#allocation2 + $0x121] sm:$0xff]  ;;  %v10224_v1 = vpop.eup %10223 }
 0x495   : > { %v6540_v33 = vsel %vm2283_vm4, %v6508_v38, %v9758_v35  ;;  %10227 = vrcp.f32 %v5167_v41  ;;  %v6541_v38 = vsel %vm2283_vm4, %v6509_v25, %v9759_v39  ;;  %v9754_v41 = vunpack.i.h.bf16 %v9752_v21 }
 0x496   : > { %v13903_v56 = vadd.f32 %v13755_v23, %v5005_v63  ;;  %v6681_v3 = vpack.c.bf16 %v6541_v38, %v6540_v33  ;;  %9851 = vrot.lane.b32.xlu1 %v9850_v16, %s10534_s27  ;;  %v6557_v39 = vsel %vm550_vm1, %v13510_v53, %v9744_v11  ;;  %v6556_v35 = vsel %vm550_vm1, %v13506_v34, %v9743_v19 }
 0x497   : > { %v7069_v32 = vpop.f32.mrf.mxu3  ;;  %v6588_v38 = vsel %vm2250_vm3, %v6556_v35, %v9753_v24  ;;  %v5669_v35 = vld [vmem:[#allocation2 + $0x112] sm:$0xff] }
 0x498   : > { %v5073_v59 = vsub.f32 0.0, %v13903_v56  ;;  %v7070_v60 = vadd.f32 %v7069_v32, %v6981_v17  ;;  %6955 = vmatmul.bf16.gmra.mxu2 %v6681_v3  ;;  %v5639_v17 = vld [vmem:[#allocation2 + $0x129] sm:$0xff]  ;;  %v6589_v32 = vsel %vm2250_vm3, %v6557_v39, %v9754_v41  ;;  %v13935_v3 = vmul.f32 %v10224_v1, %v13812_v40  ;;  %v8488_v40 = vld [vmem:[%s14869_s15] sm:$0xff] }
 0x499   : > { %v9865_v10 = vpack.i.bf16 %v5639_v17, %v5638_v55  ;;  %v5668_v39 = vld [vmem:[#allocation2 + $0x10a] sm:$0xff]  ;;  %7504 = vmatpush.bf16.msra.mxu1 %v8488_v40 }
 0x49a   : > { %v9762_v54 = vpop.permute.xlu1 %9761  ;;  %v10226_v63 = vpop.eup %10225  ;;  %v5136_v21 = vmul.f32 1.442695, %v5073_v59  ;;  %v7153_v61 = vmul.f32 %v13910_v57, %v7070_v60  ;;  %v9769_v59 = vunpack.i.h.bf16 %v9767_v37  ;;  %v9768_v60 = vunpack.i.l.bf16 %v9767_v37 }
 0x49b   : > { %v9764_v33 = vunpack.i.h.bf16 %v9762_v54  ;;  %v9763_v25 = vunpack.i.l.bf16 %v9762_v54  ;;  %v10228_v16 = vpop.eup %10227  ;;  %v9777_v34 = vpop.permute.xlu0 %9776  ;;  %v6983_v54 = vadd.f32 %v6982_v26, %v13786_v46  ;;  %v5168_v24 = vadd.f32 1.0, %v10226_v63 }
 0x49c   : > { %10229 = vpow2.f32 %v5136_v21  ;;  %v13930_v53 = vadd.f32 %v13920_v36, %v7153_v61  ;;  %v13940_v21 = vmul.f32 %v10228_v16, %v13851_v29  ;;  %v6985_v61 = vpop.f32.mrf.mxu0  ;;  %v9778_v17 = vunpack.i.l.bf16 %v9777_v34  ;;  %v13945_v37 = vpop.f32.mrf.mxu2 }
 0x49d   : > { %v6620_v11 = vsel %vm2283_vm4, %v6588_v38, %v9763_v25  ;;  %v6621_v19 = vsel %vm2283_vm4, %v6589_v32, %v9764_v33  ;;  %v9779_v25 = vunpack.i.h.bf16 %v9777_v34  ;;  %v6479_v29 = vsel %vm550_vm1, %v13586_v20, %v9769_v59  ;;  %v9772_v34 = vpop.permute.xlu2 %9771  ;;  %v5641_v20 = vld [vmem:[#allocation2 + $0x141] sm:$0xff] }
 0x49e   : > { %v7221_v41 = vsub.f32 0.0, %v13930_v53  ;;  %v6658_v55 = vpack.c.bf16 %v6621_v19, %v6620_v11  ;;  %9866 = vrot.lane.b32.xlu1 %v9865_v10, %s10534_s27  ;;  %v6478_v63 = vsel %vm550_vm1, %v13584_v45, %v9768_v60  ;;  %v6671_v38 = vpack.c.bf16 %v5669_v35, %v5668_v39 }
 0x49f   : > { %v7071_v33 = vpop.f32.mrf.mxu3  ;;  %10231 = vrcp.f32 %v5168_v24  ;;  %v9774_v39 = vunpack.i.h.bf16 %v9772_v34  ;;  %v9773_v35 = vunpack.i.l.bf16 %v9772_v34 }
 0x4a0   : > { %v7253_v46 = vmul.f32 1.442695, %v7221_v41  ;;  %v7072_v26 = vadd.f32 %v7071_v33, %v6983_v54  ;;  %7004 = vmatmul.bf16.gmra.mxu0 %v6658_v55  ;;  %v6510_v41 = vsel %vm2250_vm3, %v6478_v63, %v9778_v17  ;;  %v6511_v55 = vsel %vm2250_vm3, %v6479_v29, %v9779_v25  ;;  %v5640_v33 = vld [vmem:[#allocation2 + $0x139] sm:$0xff] }
 0x4a1   : > { %v6986_v17 = vadd.f32 %v6985_v61, %v13804_v9  ;;  %v9880_v40 = vpack.i.bf16 %v5641_v20, %v5640_v33  ;;  %v6558_v34 = vsel %vm550_vm1, %v13630_v28, %v9773_v35  ;;  %v5643_v33 = vld [vmem:[#allocation2 + $0x159] sm:$0xff] }
 0x4a2   : > { %v9787_v16 = vpop.permute.xlu1 %9786  ;;  %v10230_v32 = vpop.eup %10229  ;;  %v7154_v11 = vmul.f32 %v13910_v57, %v7072_v26  ;;  %10233 = vpow2.f32 %v7253_v46 }
 0x4a3   : > { %v9789_v10 = vunpack.i.h.bf16 %v9787_v16  ;;  %v9788_v19 = vunpack.i.l.bf16 %v9787_v16  ;;  %v5169_v54 = vadd.f32 1.0, %v10230_v32  ;;  %v9782_v59 = vpop.permute.xlu0 %9781 }
 0x4a4   : > { %v13958_v45 = vadd.f32 %v13920_v36, %v7154_v11  ;;  %8358 = vmatmul.msk.bf16.gmra.mxu3 %vm550_vm1, %v6671_v38  ;;  %v9784_v46 = vunpack.i.h.bf16 %v9782_v59  ;;  %v9783_v29 = vunpack.i.l.bf16 %v9782_v59  ;;  %v6559_v11 = vsel %vm550_vm1, %v13619_v12, %v9774_v39  ;;  %v5642_v39 = vld [vmem:[#allocation2 + $0x151] sm:$0xff] }
 0x4a5   : > { %v6542_v60 = vsel %vm2283_vm4, %v6510_v41, %v9788_v19  ;;  %v6543_v24 = vsel %vm2283_vm4, %v6511_v55, %v9789_v10  ;;  %10235 = vrcp.f32 %v5169_v54  ;;  %v10232_v16 = vpop.eup %10231  ;;  %v6987_v10 = vpop.f32.mrf.mxu0 }
 0x4a6   : > { %v7222_v25 = vsub.f32 0.0, %v13958_v45  ;;  %v6684_v26 = vpack.c.bf16 %v6543_v24, %v6542_v60  ;;  %9881 = vrot.lane.b32.xlu1 %v9880_v40, %s10534_s27  ;;  %v13970_v19 = vpop.f32.mrf.mxu2  ;;  %v13974_v59 = vmul.f32 %v10232_v16, %v13878_v31  ;;  %v6590_v12 = vsel %vm2250_vm3, %v6558_v34, %v9783_v29 }
 0x4a7   : > { %v7074_v63 = vpop.f32.mrf.mxu3  ;;  %v6591_v28 = vsel %vm2250_vm3, %v6559_v11, %v9784_v46  ;;  %v9895_v40 = vpack.i.bf16 %v5643_v33, %v5642_v39  ;;  %v6988_v31 = vadd.f32 %v6987_v10, %v13848_v2 }
 0x4a8   : > { %v7255_v32 = vmul.f32 1.442695, %v7222_v25  ;;  %v7075_v38 = vadd.f32 %v7074_v63, %v6986_v17  ;;  %6960 = vmatmul.bf16.gmra.mxu2 %v6684_v26  ;;  %v10234_v61 = vpop.eup %10233  ;;  %14953 = vst [vmem:[#allocation57_spill] sm:$0xff] %v13974_v59  ;;  %v5670_v63 = vld [vmem:[#allocation2 + $0x122] sm:$0xff]  ;;  %v14967_v59 = vld [vmem:[#allocation15_spill] sm:$0xff] }
 0x4a9   : > { %v7317_v25 = vadd.f32 1.0, %v10234_v61 }
 0x4aa   : > { %v9792_v9 = vpop.permute.xlu1 %9791  ;;  %10237 = vpow2.f32 %v7255_v32  ;;  %v7155_v54 = vmul.f32 %v13910_v57, %v7075_v38 }
 0x4ab   : > { %v9794_v41 = vunpack.i.h.bf16 %v9792_v9  ;;  %v9793_v55 = vunpack.i.l.bf16 %v9792_v9  ;;  %v10236_v20 = vpop.eup %10235  ;;  %10239 = vrcp.f32 %v7317_v25  ;;  %v5671_v9 = vld [vmem:[#allocation2 + $0x12a] sm:$0xff] }
 0x4ac   : > { %v13979_v60 = vmul.f32 %v10236_v20, %v13903_v56  ;;  %v13982_v24 = vadd.f32 %v13920_v36, %v7155_v54  ;;  %v6674_v10 = vpack.c.bf16 %v5671_v9, %v5670_v63 }
 0x4ad   : > { %v6622_v35 = vsel %vm2283_vm4, %v6590_v12, %v9793_v55  ;;  %v6623_v17 = vsel %vm2283_vm4, %v6591_v28, %v9794_v41  ;;  %v6990_v34 = vpop.f32.mrf.mxu0 }
 0x4ae   : > { %14954 = vst [vmem:[#allocation58_spill] sm:$0xff] %v13979_v60  ;;  %v7223_v26 = vsub.f32 0.0, %v13982_v24  ;;  %v6661_v29 = vpack.c.bf16 %v6623_v17, %v6622_v35  ;;  %9896 = vrot.lane.b32.xlu1 %v9895_v40, %s10534_s27  ;;  %v13991_v61 = vpop.f32.mrf.mxu2  ;;  %v6991_v41 = vadd.f32 %v6990_v34, %v13875_v0 }
 0x4af   : > { %v7076_v56 = vpop.f32.mrf.mxu3 }
 0x4b0   : > { %v10238_v16 = vpop.eup %10237  ;;  %v7257_v32 = vmul.f32 1.442695, %v7223_v26  ;;  %v7077_v38 = vadd.f32 %v7076_v56, %v6988_v31  ;;  %7009 = vmatmul.bf16.gmra.mxu0 %v6661_v29  ;;  %v5646_v26 = vld [vmem:[#allocation2 + $0x181] sm:$0xff] }
 0x4b1   : > { %v7318_v11 = vadd.f32 1.0, %v10238_v16  ;;  %v10240_v33 = vpop.eup %10239  ;;  %v5647_v16 = vld [vmem:[#allocation2 + $0x189] sm:$0xff] }
 0x4b2   : > { %v7156_v2 = vmul.f32 %v13910_v57, %v7077_v38  ;;  %v7381_v17 = vmul.f32 %v10240_v33, %v13930_v53  ;;  %v9925_v38 = vpack.i.bf16 %v5647_v16, %v5646_v26 }
 0x4b3   : > { %10241 = vrcp.f32 %v7318_v11  ;;  %v5673_v11 = vld [vmem:[#allocation2 + $0x142] sm:$0xff] }
 0x4b4   : > { %10243 = vpow2.f32 %v7257_v32  ;;  %v7192_v54 = vadd.f32 %v13920_v36, %v7156_v2  ;;  %8359 = vmatmul.msk.bf16.gmra.mxu3 %vm550_vm1, %v6674_v10 }
 0x4b5   : > { %v6992_v31 = vpop.f32.mrf.mxu0 }
 0x4b6   : > { %v7224_v55 = vsub.f32 0.0, %v7192_v54  ;;  %9911 = vrot.lane.b32.xlu1 %v13675_v13, %s10534_s27  ;;  %v14002_v0 = vpop.f32.mrf.mxu2  ;;  %v6993_v13 = vadd.f32 %v6992_v31, %v13913_v22 }
 0x4b7   : > { %v7079_v20 = vpop.f32.mrf.mxu3 }
 0x4b8   : > { %v7259_v12 = vmul.f32 1.442695, %v7224_v55  ;;  %v7080_v28 = vadd.f32 %v7079_v20, %v6991_v41  ;;  %v5648_v41 = vld [vmem:[#allocation2 + $0x199] sm:$0xff]  ;;  %v5649_v55 = vld [vmem:[#allocation2 + $0x1a1] sm:$0xff] }
 0x4b9   : > { %v10242_v39 = vpop.eup %10241 }
 0x4ba   : > { %v10244_v35 = vpop.eup %10243  ;;  %v7382_v25 = vmul.f32 %v10242_v39, %v13958_v45  ;;  %10245 = vpow2.f32 %v7259_v12  ;;  %v7157_v40 = vmul.f32 %v13910_v57, %v7080_v28  ;;  %v5672_v45 = vld [vmem:[#allocation2 + $0x13a] sm:$0xff]  ;;  %v9940_v28 = vpack.i.bf16 %v5649_v55, %v5648_v41 }
 0x4bb   : > { %v7319_v63 = vadd.f32 1.0, %v10244_v35  ;;  %v6677_v20 = vpack.c.bf16 %v5673_v11, %v5672_v45  ;;  %v14955_v45 = vld [vmem:[#allocation16_spill] sm:$0xff]  ;;  %v14956_v11 = vld [vmem:[#allocation17_spill] sm:$0xff] }
 0x4bc   : > { %v7413_v29 = vpack.c.bf16 %v7382_v25, %v7381_v17  ;;  %v7193_v56 = vadd.f32 %v13920_v36, %v7157_v40 }
 0x4bd   : > { %10247 = vrcp.f32 %v7319_v63 }
 0x4be   : > { %v7225_v32 = vsub.f32 0.0, %v7193_v56  ;;  %8373 = vmatmul.msk.bf16.vlgmr.msra.gmra.mxu1 %vm550_vm1, %v7413_v29  ;;  %9926 = vrot.lane.b32.xlu1 %v9925_v38, %s10534_s27  ;;  %v14009_v22 = vpop.f32.mrf.mxu2 }
 0x4bf   : > { %v7081_v53 = vpop.f32.mrf.mxu3 }
 0x4c0   : > { %v10246_v34 = vpop.eup %10245  ;;  %v7261_v9 = vmul.f32 1.442695, %v7225_v32  ;;  %v7082_v2 = vadd.f32 %v7081_v53, %v6993_v13  ;;  %v5674_v13 = vld [vmem:[#allocation2 + $0x152] sm:$0xff]  ;;  %v5675_v32 = vld [vmem:[#allocation2 + $0x15a] sm:$0xff] }
 0x4c1   : > { %v7320_v10 = vadd.f32 1.0, %v10246_v34  ;;  %v4804_v34 = vadd.f32 %v14956_v11, %v14955_v45  ;;  %v14962_v45 = vld [vmem:[#allocation18_spill] sm:$0xff]  ;;  %v14963_v11 = vld [vmem:[#allocation11_spill] sm:$0xff] }
 0x4c2   : > { %v7158_v33 = vmul.f32 %v13910_v57, %v7082_v2 }
 0x4c3   : > { %10249 = vrcp.f32 %v7320_v10  ;;  %v10248_v35 = vpop.eup %10247  ;;  %v14959_v10 = vld [vmem:[#allocation10_spill] sm:$0xff] }
 0x4c4   : > { %10251 = vpow2.f32 %v7261_v9  ;;  %v7194_v12 = vadd.f32 %v13920_v36, %v7158_v33  ;;  %8360 = vmatmul.msk.bf16.gmra.mxu3 %vm550_vm1, %v6677_v20  ;;  %v7383_v31 = vmul.f32 %v10248_v35, %v13982_v24  ;;  %v6680_v9 = vpack.c.bf16 %v5675_v32, %v5674_v13  ;;  %v14957_v24 = vld [vmem:[#allocation14_spill] sm:$0xff]  ;;  %v14960_v32 = vld [vmem:[#allocation19_spill] sm:$0xff] }
 0x4c5   : > { %v4893_v41 = vadd.f32 %v14959_v10, %v4804_v34  ;;  %v4896_v34 = vadd.f32 %v14963_v11, %v14962_v45 }
 0x4c6   : > { %v7226_v39 = vsub.f32 0.0, %v7194_v12  ;;  %9941 = vrot.lane.b32.xlu1 %v9940_v28, %s10534_s27  ;;  %v14015_v16 = vpop.f32.mrf.mxu2 }
 0x4c7   : > { %v7084_v10 = vpop.f32.mrf.mxu3 }
 0x4c8   : > { %v7263_v17 = vmul.f32 1.442695, %v7226_v39  ;;  %v4975_v39 = vmul.f32 %v13750_v6, %v4893_v41 }
 0x4c9   : > { %v10250_v25 = vpop.eup %10249 }
 0x4ca   : > { %v10252_v40 = vpop.eup %10251  ;;  %v7384_v26 = vmul.f32 %v10250_v25, %v7192_v54  ;;  %10253 = vpow2.f32 %v7263_v17  ;;  %v14958_v54 = vld [vmem:[#allocation9_spill] sm:$0xff] }
 0x4cb   : > { %v7321_v63 = vadd.f32 1.0, %v10252_v40  ;;  %v4891_v2 = vadd.f32 %v14958_v54, %v14957_v24  ;;  %v14964_v54 = vld [vmem:[#allocation12_spill] sm:$0xff] }
 0x4cc   : > { %v7414_v29 = vpack.c.bf16 %v7384_v26, %v7383_v31  ;;  %v14032_v31 = vadd.f32 %v13755_v23, %v4975_v39  ;;  %v5676_v26 = vld [vmem:[#allocation2 + $0x16a] sm:$0xff] }
 0x4cd   : > { %10255 = vrcp.f32 %v7321_v63  ;;  %v4974_v28 = vmul.f32 %v13750_v6, %v4891_v2  ;;  %v5677_v63 = vld [vmem:[#allocation2 + $0x172] sm:$0xff] }
 0x4ce   : > { %8374 = vmatmul.msk.bf16.gmra.mxu1 %vm550_vm1, %v7414_v29  ;;  %v14024_v33 = vpop.f32.mrf.mxu2  ;;  %v5043_v13 = vsub.f32 0.0, %v14032_v31 }
 0x4cf   : > { %v14029_v40 = vadd.f32 %v13755_v23, %v4974_v28 }
 0x4d0   : > { %v10254_v38 = vpop.eup %10253  ;;  %v5076_v24 = vmul.f32 1.442695, %v5043_v13 }
 0x4d1   : > { %v7322_v53 = vadd.f32 1.0, %v10254_v38  ;;  %v5042_v29 = vsub.f32 0.0, %v14029_v40  ;;  %v14961_v38 = vld [vmem:[#allocation20_spill] sm:$0xff] }
 0x4d3   : > { %10257 = vrcp.f32 %v7322_v53  ;;  %v10256_v55 = vpop.eup %10255  ;;  %v4809_v53 = vadd.f32 %v14961_v38, %v14960_v32 }
 0x4d4   : > { %8361 = vmatmul.msk.bf16.gmra.mxu3 %vm550_vm1, %v6680_v9  ;;  %v7385_v35 = vmul.f32 %v10256_v55, %v7193_v56  ;;  %v5074_v9 = vmul.f32 1.442695, %v5042_v29  ;;  %v4976_v55 = vmul.f32 %v13750_v6, %v4896_v34 }
 0x4d5   : > { %v4898_v2 = vadd.f32 %v14964_v54, %v4809_v53  ;;  %v14965_v53 = vld [vmem:[#allocation22_spill] sm:$0xff] }
 0x4d6   : > { %v14039_v56 = vpop.f32.mrf.mxu2  ;;  %10259 = vpow2.f32 %v5074_v9 }
 0x4d7   : > { %10261 = vpow2.f32 %v5076_v24  ;;  %v4977_v39 = vmul.f32 %v13750_v6, %v4898_v2  ;;  %v7086_v2 = vpop.f32.mrf.mxu3 }
 0x4d9   : > { %v10258_v20 = vpop.eup %10257  ;;  %v14058_v13 = vadd.f32 %v13755_v23, %v4977_v39 }
 0x4da   : > { %v7386_v17 = vmul.f32 %v10258_v20, %v7194_v12  ;;  %v6683_v12 = vpack.c.bf16 %v5677_v63, %v5676_v26  ;;  %v9807_v26 = vpop.permute.xlu0 %9806 }
 0x4db   : > { %v5045_v39 = vsub.f32 0.0, %v14058_v13 }
 0x4dc   : > { %v7415_v25 = vpack.c.bf16 %v7386_v17, %v7385_v35  ;;  %v9797_v17 = vpop.permute.xlu2 %9796  ;;  %v10260_v32 = vpop.eup %10259 }
 0x4dd   : > { %v10262_v9 = vpop.eup %10261  ;;  %v9799_v24 = vunpack.i.h.bf16 %v9797_v17  ;;  %v9798_v54 = vunpack.i.l.bf16 %v9797_v17 }
 0x4de   : > { %8375 = vmatmul.msk.bf16.gmra.mxu1 %vm550_vm1, %v7415_v25  ;;  %v14048_v35 = vpop.f32.mrf.mxu2  ;;  %v14051_v25 = vadd.f32 %v13755_v23, %v4976_v55  ;;  %v5139_v46 = vadd.f32 1.0, %v10262_v9 }
 0x4e0   : > { %v5044_v38 = vsub.f32 0.0, %v14051_v25 }
 0x4e2   : > { %v5078_v1 = vmul.f32 1.442695, %v5044_v38 }
 0x4e4   : > { %8362 = vmatmul.msk.bf16.gmra.mxu3 %vm550_vm1, %v6683_v12  ;;  %v14966_v12 = vld [vmem:[#allocation23_spill] sm:$0xff] }
 0x4e5   : > { %v4814_v45 = vadd.f32 %v14966_v12, %v14965_v53 }
 0x4e6   : > { %v6995_v41 = vpop.f32.mrf.mxu0  ;;  %v14068_v60 = vpop.f32.mrf.mxu2 }
 0x4e7   : > { %v6996_v20 = vadd.f32 %v6995_v41, %v13945_v37  ;;  %v9808_v41 = vunpack.i.l.bf16 %v9807_v26  ;;  %v4903_v53 = vadd.f32 %v14967_v59, %v4814_v45  ;;  %v9812_v45 = vpop.permute.xlu0 %9811 }
 0x4e9   : > { %v7085_v28 = vadd.f32 %v7084_v10, %v6996_v20  ;;  %v9809_v10 = vunpack.i.h.bf16 %v9807_v26 }
 0x4eb   : > { %v7159_v29 = vmul.f32 %v13910_v57, %v7085_v28  ;;  %v5138_v28 = vadd.f32 1.0, %v10260_v32 }
 0x4ed   : > { %v14055_v63 = vadd.f32 %v13920_v36, %v7159_v29 }
 0x4ee   : > { %v6997_v37 = vpop.f32.mrf.mxu0 }
 0x4ef   : > { %v7227_v11 = vsub.f32 0.0, %v14055_v63  ;;  %v6998_v34 = vadd.f32 %v6997_v37, %v13970_v19  ;;  %v10502_v19 = vld [vmem:[#allocation2 + $0x170] sm:$0xff]  ;;  %v10503_v37 = vld [vmem:[#allocation2 + $0x168] sm:$0xff] }
 0x4f0   : > { %v9817_v29 = vpop.permute.xlu1 %9816  ;;  %v6481_v17 = vsel %vm550_vm1, %v10502_v19, %v9799_v24  ;;  %v6480_v26 = vsel %vm550_vm1, %v10503_v37, %v9798_v54  ;;  %v5080_v24 = vmul.f32 1.442695, %v5045_v39  ;;  %v14969_v19 = vld [vmem:[#allocation21_spill] sm:$0xff] }
 0x4f1   : > { %v7265_v55 = vmul.f32 1.442695, %v7227_v11  ;;  %v7087_v20 = vadd.f32 %v7086_v2, %v6998_v34  ;;  %v9802_v11 = vpop.permute.xlu2 %9801  ;;  %v9819_v34 = vunpack.i.h.bf16 %v9817_v29  ;;  %v9818_v32 = vunpack.i.l.bf16 %v9817_v29 }
 0x4f2   : > { %v14968_v2 = vpack.c.bf16 %v13814_v51, %v13809_v44  ;;  %v6512_v59 = vsel %vm2250_vm3, %v6480_v26, %v9808_v41  ;;  %v6513_v38 = vsel %vm2250_vm3, %v6481_v17, %v9809_v10  ;;  %v9804_v29 = vunpack.i.h.bf16 %v9802_v11  ;;  %v14970_v41 = vld [vmem:[#allocation13_spill] sm:$0xff] }
 0x4f3   : > { %v7160_v12 = vmul.f32 %v13910_v57, %v7087_v20  ;;  %10263 = vpow2.f32 %v7265_v55  ;;  %v6544_v54 = vsel %vm2283_vm4, %v6512_v59, %v9818_v32  ;;  %v6545_v20 = vsel %vm2283_vm4, %v6513_v38, %v9819_v34  ;;  %v14089_v59 = vpop.f32.mrf.mxu2 }
 0x4f4   : > { %8363 = vmatmul.msk.bf16.gmra.mxu3 %vm550_vm1, %v14968_v2  ;;  %10265 = vrcp.f32 %v5138_v28  ;;  %v6687_v51 = vpack.c.bf16 %v6545_v20, %v6544_v54  ;;  %v4901_v37 = vadd.f32 %v14970_v41, %v14969_v19  ;;  %v9803_v10 = vunpack.i.l.bf16 %v9802_v11  ;;  %v10504_v28 = vld [vmem:[#allocation2 + $0xc9] sm:$0xff]  ;;  %v10505_v11 = vld [vmem:[#allocation2 + $0xc1] sm:$0xff] }
 0x4f5   : > { %v14079_v9 = vadd.f32 %v13920_v36, %v7160_v12  ;;  %10267 = vpow2.f32 %v5078_v1  ;;  %v9814_v17 = vunpack.i.h.bf16 %v9812_v45  ;;  %v4979_v55 = vmul.f32 %v13750_v6, %v4903_v53 }
 0x4f6   : > { %10269 = vrcp.f32 %v5139_v46  ;;  %v9813_v12 = vunpack.i.l.bf16 %v9812_v45  ;;  %6965 = vmatmul.bf16.gmra.mxu2 %v6687_v51  ;;  %v6561_v32 = vsel %vm550_vm1, %v10504_v28, %v9804_v29  ;;  %v4978_v1 = vmul.f32 %v13750_v6, %v4901_v37  ;;  %v9832_v28 = vpop.permute.xlu0 %9831 }
 0x4f7   : > { %v7228_v44 = vsub.f32 0.0, %v14079_v9  ;;  %10271 = vpow2.f32 %v5080_v24  ;;  %v6560_v46 = vsel %vm550_vm1, %v10505_v11, %v9803_v10  ;;  %v6593_v53 = vsel %vm2250_vm3, %v6561_v32, %v9814_v17 }
 0x4f8   : > { %v9822_v26 = vpop.permute.xlu1 %9821  ;;  %v14094_v24 = vadd.f32 %v13755_v23, %v4979_v55  ;;  %v6592_v54 = vsel %vm2250_vm3, %v6560_v46, %v9813_v12  ;;  %v14100_v37 = vadd.f32 %v13755_v23, %v4978_v1  ;;  %v4819_v55 = vadd.f32 %v13068_v50, %v13066_v15  ;;  %v7089_v46 = vpop.f32.mrf.mxu3 }
 0x4f9   : > { %v7267_v39 = vmul.f32 1.442695, %v7228_v44  ;;  %v10264_v34 = vpop.eup %10263  ;;  %v9824_v2 = vunpack.i.h.bf16 %v9822_v26  ;;  %v9823_v38 = vunpack.i.l.bf16 %v9822_v26  ;;  %v9827_v12 = vpop.permute.xlu2 %9826  ;;  %v4906_v15 = vadd.f32 %v13119_v30, %v13048_v7 }
 0x4fa   : > { %v10266_v45 = vpop.eup %10265  ;;  %v7323_v44 = vadd.f32 1.0, %v10264_v34  ;;  %v5047_v17 = vsub.f32 0.0, %v14094_v24  ;;  %v9828_v11 = vunpack.i.l.bf16 %v9827_v12  ;;  %v4908_v50 = vadd.f32 %v13145_v14, %v4819_v55  ;;  %v14120_v14 = vld [vmem:[%s14862_s8] ss:$0 sm:$0xff] }
 0x4fb   : > { %10273 = vpow2.f32 %v7267_v39  ;;  %v6625_v20 = vsel %vm2283_vm4, %v6593_v53, %v9824_v2  ;;  %v10268_v29 = vpop.eup %10267  ;;  %v6624_v6 = vsel %vm2283_vm4, %v6592_v54, %v9823_v38  ;;  %v5046_v2 = vsub.f32 0.0, %v14100_v37  ;;  %v14111_v38 = vpop.f32.mrf.mxu2 }
 0x4fc   : > { %v10270_v51 = vpop.eup %10269  ;;  %v6664_v19 = vpack.c.bf16 %v6625_v20, %v6624_v6  ;;  %10275 = vrcp.f32 %v7323_v44  ;;  %v5140_v32 = vadd.f32 1.0, %v10268_v29  ;;  %v5202_v23 = vmul.f32 %v10266_v45, %v14029_v40 }
 0x4fd   : > { %v10272_v41 = vpop.eup %10271  ;;  %v5203_v26 = vmul.f32 %v10270_v51, %v14032_v31  ;;  %v5084_v1 = vmul.f32 1.442695, %v5047_v17  ;;  %v9829_v31 = vunpack.i.h.bf16 %v9827_v12  ;;  %v9833_v54 = vunpack.i.l.bf16 %v9832_v28 }
 0x4fe   : > { %7014 = vmatmul.bf16.gmra.mxu0 %v6664_v19  ;;  %v5141_v34 = vadd.f32 1.0, %v10272_v41  ;;  %v9834_v29 = vunpack.i.h.bf16 %v9832_v28  ;;  %v5082_v6 = vmul.f32 1.442695, %v5046_v2  ;;  %v6562_v19 = vsel %vm550_vm1, %v13829_v5, %v9828_v11 }
 0x4ff   : > { %v7586_v20 = vpack.c.bf16 %v5203_v26, %v5202_v23  ;;  %v4980_v41 = vmul.f32 %v14120_v14, %v4906_v15  ;;  %v6563_v17 = vsel %vm550_vm1, %v13836_v4, %v9829_v31  ;;  %v6594_v55 = vsel %vm2250_vm3, %v6562_v19, %v9833_v54  ;;  %v14136_v4 = vld [vmem:[%s14863_s9] ss:$0 sm:$0xff] }
 0x500   : > { %v9837_v53 = vpop.permute.xlu1 %9836  ;;  %v6595_v5 = vsel %vm2250_vm3, %v6563_v17, %v9834_v29  ;;  %v4911_v54 = vadd.f32 %v13185_v43, %v13106_v18  ;;  %v9847_v18 = vpop.permute.xlu0 %9846 }
 0x501   : > { %v10274_v10 = vpop.eup %10273  ;;  %v9839_v40 = vunpack.i.h.bf16 %v9837_v53  ;;  %v9838_v45 = vunpack.i.l.bf16 %v9837_v53  ;;  %v9842_v19 = vpop.permute.xlu2 %9841 }
 0x502   : > { %v7324_v39 = vadd.f32 1.0, %v10274_v10  ;;  %v10276_v44 = vpop.eup %10275  ;;  %v4981_v10 = vmul.f32 %v14120_v14, %v4908_v50 }
 0x503   : > { %v7387_v12 = vmul.f32 %v10276_v44, %v14055_v63  ;;  %v6626_v26 = vsel %vm2283_vm4, %v6594_v55, %v9838_v45  ;;  %v14139_v63 = vadd.f32 %v14136_v4, %v4980_v41  ;;  %v9844_v55 = vunpack.i.h.bf16 %v9842_v19 }
 0x504   : > { %10277 = vrcp.f32 %v7324_v39 }
 0x505   : > { %10279 = vrcp.f32 %v5141_v34  ;;  %v6627_v34 = vsel %vm2283_vm4, %v6595_v5, %v9839_v40  ;;  %v5048_v45 = vsub.f32 0.0, %v14139_v63  ;;  %v9843_v5 = vunpack.i.l.bf16 %v9842_v19 }
 0x506   : > { %10281 = vrcp.f32 %v5140_v32  ;;  %8397 = vmatmul.msk.bf16.vlgmr.msra.gmra.mxu2 %vm550_vm1, %v7586_v20  ;;  %v6667_v15 = vpack.c.bf16 %v6627_v34, %v6626_v26  ;;  %v4824_v20 = vadd.f32 %v13172_v42, %v13151_v49  ;;  %v4982_v49 = vmul.f32 %v14120_v14, %v4911_v54 }
 0x507   : > { %v7000_v51 = vpop.f32.mrf.mxu0  ;;  %10283 = vpow2.f32 %v5084_v1  ;;  %v14144_v1 = vpop.f32.mrf.mxu2  ;;  %v5086_v17 = vmul.f32 1.442695, %v5048_v45 }
 0x508   : > { %v7001_v7 = vadd.f32 %v7000_v51, %v13991_v61  ;;  %10285 = vpow2.f32 %v5082_v6  ;;  %v4913_v42 = vadd.f32 %v13217_v52, %v4824_v20  ;;  %v14169_v52 = vadd.f32 %v14136_v4, %v4982_v49 }
 0x50a   : > { %v10278_v30 = vpop.eup %10277  ;;  %v7090_v61 = vadd.f32 %v7089_v46, %v7001_v7  ;;  %v7091_v46 = vpop.f32.mrf.mxu3 }
 0x50b   : > { %v7388_v39 = vmul.f32 %v10278_v30, %v14079_v9  ;;  %v10280_v28 = vpop.eup %10279  ;;  %v14142_v9 = vadd.f32 %v14136_v4, %v4981_v10  ;;  %v9852_v10 = vpop.permute.xlu1 %9851 }
 0x50c   : > { %v7161_v32 = vmul.f32 %v13910_v57, %v7090_v61  ;;  %v10282_v23 = vpop.eup %10281  ;;  %v5205_v31 = vmul.f32 %v10280_v28, %v14058_v13  ;;  %v9848_v61 = vunpack.i.l.bf16 %v9847_v18  ;;  %v9854_v34 = vunpack.i.h.bf16 %v9852_v10 }
 0x50d   : > { %v7416_v2 = vpack.c.bf16 %v7388_v39, %v7387_v12  ;;  %v10284_v11 = vpop.eup %10283  ;;  %v5204_v40 = vmul.f32 %v10282_v23, %v14051_v25  ;;  %v5049_v51 = vsub.f32 0.0, %v14142_v9  ;;  %v9849_v12 = vunpack.i.h.bf16 %v9847_v18 }
 0x50e   : > { %v14147_v53 = vadd.f32 %v13920_v36, %v7161_v32  ;;  %7019 = vmatmul.bf16.gmra.mxu0 %v6667_v15  ;;  %v10286_v6 = vpop.eup %10285  ;;  %v5143_v30 = vadd.f32 1.0, %v10284_v11  ;;  %v9853_v28 = vunpack.i.l.bf16 %v9852_v10  ;;  %v4983_v32 = vmul.f32 %v14120_v14, %v4913_v42  ;;  %v9857_v42 = vpop.permute.xlu2 %9856 }
 0x50f   : > { %8376 = vmatmul.msk.bf16.gmra.mxu1 %vm550_vm1, %v7416_v2  ;;  %v7002_v50 = vpop.f32.mrf.mxu0  ;;  %v7587_v43 = vpack.c.bf16 %v5205_v31, %v5204_v40  ;;  %v5142_v41 = vadd.f32 1.0, %v10286_v6  ;;  %v5088_v25 = vmul.f32 1.442695, %v5049_v51  ;;  %v14166_v26 = vpop.f32.mrf.mxu2  ;;  %v6565_v11 = vsel %vm550_vm1, %v13867_v8, %v9844_v55  ;;  %v14972_v55 = vld [vmem:[#allocation26_spill] sm:$0xff] }
 0x510   : > { %v7229_v29 = vsub.f32 0.0, %v14147_v53  ;;  %v7003_v44 = vadd.f32 %v7002_v50, %v14002_v0  ;;  %v6597_v50 = vsel %vm2250_vm3, %v6565_v11, %v9849_v12  ;;  %v14184_v6 = vadd.f32 %v14136_v4, %v4983_v32 }
 0x511   : > { %v6629_v20 = vsel %vm2283_vm4, %v6597_v50, %v9854_v34  ;;  %v9862_v34 = vpop.permute.xlu0 %9861 }
 0x512   : > { %v7269_v13 = vmul.f32 1.442695, %v7229_v29  ;;  %v7092_v7 = vadd.f32 %v7091_v46, %v7003_v44  ;;  %v7094_v2 = vpop.f32.mrf.mxu3  ;;  %v6564_v46 = vsel %vm550_vm1, %v13873_v58, %v9843_v5  ;;  %v5050_v44 = vsub.f32 0.0, %v14169_v52 }
 0x513   : > { %v6596_v15 = vsel %vm2250_vm3, %v6564_v46, %v9848_v61 }
 0x514   : > { %v7162_v0 = vmul.f32 %v13910_v57, %v7092_v7  ;;  %10287 = vpow2.f32 %v7269_v13  ;;  %v6628_v54 = vsel %vm2283_vm4, %v6596_v15, %v9853_v28  ;;  %v9858_v15 = vunpack.i.l.bf16 %v9857_v42 }
 0x515   : > { %10289 = vrcp.f32 %v5143_v30  ;;  %v6670_v51 = vpack.c.bf16 %v6629_v20, %v6628_v54  ;;  %v9864_v20 = vunpack.i.h.bf16 %v9862_v34 }
 0x516   : > { %v14164_v39 = vadd.f32 %v13920_v36, %v7162_v0  ;;  %10291 = vrcp.f32 %v5142_v41  ;;  %8398 = vmatmul.msk.bf16.gmra.mxu2 %vm550_vm1, %v7587_v43  ;;  %v5090_v43 = vmul.f32 1.442695, %v5050_v44  ;;  %v5051_v41 = vsub.f32 0.0, %v14184_v6 }
 0x517   : > { %10293 = vpow2.f32 %v5088_v25  ;;  %v14187_v13 = vpop.f32.mrf.mxu2  ;;  %v14971_v25 = vld [vmem:[#allocation25_spill] sm:$0xff] }
 0x518   : > { %v7230_v23 = vsub.f32 0.0, %v14164_v39  ;;  %10295 = vpow2.f32 %v5086_v17  ;;  %v4829_v5 = vadd.f32 %v14972_v55, %v14971_v25 }
 0x51a   : > { %v7271_v31 = vmul.f32 1.442695, %v7230_v23  ;;  %v10288_v29 = vpop.eup %10287  ;;  %v7096_v12 = vpop.f32.mrf.mxu3 }
 0x51b   : > { %v10290_v40 = vpop.eup %10289  ;;  %v7325_v7 = vadd.f32 1.0, %v10288_v29  ;;  %v9867_v23 = vpop.permute.xlu1 %9866  ;;  %v9863_v29 = vunpack.i.l.bf16 %v9862_v34 }
 0x51c   : > { %10297 = vpow2.f32 %v7271_v31  ;;  %v10292_v45 = vpop.eup %10291  ;;  %v5207_v49 = vmul.f32 %v10290_v40, %v14094_v24  ;;  %v5092_v24 = vmul.f32 1.442695, %v5051_v41  ;;  %v14973_v31 = vld [vmem:[#allocation29_spill] sm:$0xff]  ;;  %v9869_v44 = vunpack.i.h.bf16 %v9867_v23 }
 0x51d   : > { %v7005_v8 = vpop.f32.mrf.mxu0  ;;  %v10294_v19 = vpop.eup %10293  ;;  %10299 = vrcp.f32 %v7325_v7  ;;  %v4918_v54 = vadd.f32 %v14973_v31, %v4829_v5 }
 0x51e   : > { %v7006_v58 = vadd.f32 %v7005_v8, %v14009_v22  ;;  %v10296_v18 = vpop.eup %10295  ;;  %7024 = vmatmul.bf16.gmra.mxu0 %v6670_v51  ;;  %v5206_v22 = vmul.f32 %v10292_v45, %v14100_v37  ;;  %v5145_v17 = vadd.f32 1.0, %v10294_v19  ;;  %10301 = vpow2.f32 %v5090_v43  ;;  %v14975_v43 = vld [vmem:[#allocation27_spill] sm:$0xff] }
 0x51f   : > { %v5144_v61 = vadd.f32 1.0, %v10296_v18  ;;  %v9868_v8 = vunpack.i.l.bf16 %v9867_v23  ;;  %v14206_v19 = vpop.f32.mrf.mxu2  ;;  %v14974_v18 = vld [vmem:[#allocation24_spill] sm:$0xff] }
 0x520   : > { %v7095_v30 = vadd.f32 %v7094_v2, %v7006_v58  ;;  %v9859_v2 = vunpack.i.h.bf16 %v9857_v42  ;;  %v7588_v46 = vpack.c.bf16 %v5207_v49, %v5206_v22  ;;  %v4916_v41 = vadd.f32 %v14975_v43, %v14974_v18 }
 0x521   : > { %v4985_v49 = vmul.f32 %v14120_v14, %v4918_v54 }
 0x522   : > { %v7163_v10 = vmul.f32 %v13910_v57, %v7095_v30  ;;  %v10298_v0 = vpop.eup %10297  ;;  %v6567_v51 = vsel %vm550_vm1, %v13888_v62, %v9859_v2  ;;  %v7099_v25 = vpop.f32.mrf.mxu3 }
 0x523   : > { %v7326_v28 = vadd.f32 1.0, %v10298_v0  ;;  %v10300_v45 = vpop.eup %10299  ;;  %v14225_v2 = vadd.f32 %v14136_v4, %v4985_v49 }
 0x524   : > { %v14196_v32 = vadd.f32 %v13920_v36, %v7163_v10  ;;  %v10302_v30 = vpop.eup %10301  ;;  %v6599_v10 = vsel %vm2250_vm3, %v6567_v51, %v9864_v20  ;;  %v7389_v55 = vmul.f32 %v10300_v45, %v14147_v53  ;;  %v14977_v45 = vld [vmem:[#allocation31_spill] sm:$0xff] }
 0x525   : > { %v7007_v11 = vpop.f32.mrf.mxu0  ;;  %10303 = vrcp.f32 %v7326_v28  ;;  %v6631_v22 = vsel %vm2283_vm4, %v6599_v10, %v9869_v44  ;;  %v9872_v44 = vpop.permute.xlu2 %9871 }
 0x526   : > { %v7231_v37 = vsub.f32 0.0, %v14196_v32  ;;  %v7008_v50 = vadd.f32 %v7007_v11, %v14015_v16  ;;  %10305 = vrcp.f32 %v5145_v17  ;;  %8399 = vmatmul.msk.bf16.gmra.mxu2 %vm550_vm1, %v7588_v46  ;;  %v6566_v16 = vsel %vm550_vm1, %v13899_v47, %v9858_v15 }
 0x527   : > { %10307 = vrcp.f32 %v5144_v61  ;;  %v6598_v42 = vsel %vm2250_vm3, %v6566_v16, %v9863_v29  ;;  %v5146_v15 = vadd.f32 1.0, %v10302_v30  ;;  %v14229_v31 = vpop.f32.mrf.mxu2  ;;  %v5053_v29 = vsub.f32 0.0, %v14225_v2  ;;  %v9882_v16 = vpop.permute.xlu1 %9881 }
 0x528   : > { %v7273_v40 = vmul.f32 1.442695, %v7231_v37  ;;  %v7097_v58 = vadd.f32 %v7096_v12, %v7008_v50  ;;  %10309 = vpow2.f32 %v5092_v24  ;;  %v6630_v47 = vsel %vm2283_vm4, %v6598_v42, %v9868_v8  ;;  %v9877_v8 = vpop.permute.xlu0 %9876 }
 0x529   : > { %v4984_v24 = vmul.f32 %v14120_v14, %v4916_v41  ;;  %v6673_v23 = vpack.c.bf16 %v6631_v22, %v6630_v47  ;;  %v9873_v18 = vunpack.i.l.bf16 %v9872_v44  ;;  %v5096_v42 = vmul.f32 1.442695, %v5053_v29  ;;  %v14264_v29 = vld [vmem:[%s14866_s12] ss:$0 sm:$0xff] }
 0x52a   : > { %v7164_v7 = vmul.f32 %v13910_v57, %v7097_v58  ;;  %10311 = vpow2.f32 %v7273_v40  ;;  %v14976_v58 = vld [vmem:[#allocation30_spill] sm:$0xff]  ;;  %v9879_v10 = vunpack.i.h.bf16 %v9877_v8  ;;  %v9884_v22 = vunpack.i.h.bf16 %v9882_v16 }
 0x52b   : > { %v10304_v0 = vpop.eup %10303  ;;  %v14234_v20 = vadd.f32 %v14136_v4, %v4984_v24  ;;  %v4834_v51 = vadd.f32 %v14977_v45, %v14976_v58 }
 0x52c   : > { %v14215_v62 = vadd.f32 %v13920_v36, %v7164_v7  ;;  %v10306_v17 = vpop.eup %10305  ;;  %v7390_v5 = vmul.f32 %v10304_v0, %v14164_v39  ;;  %v7101_v0 = vpop.f32.mrf.mxu3 }
 0x52d   : > { %v7010_v12 = vpop.f32.mrf.mxu0  ;;  %v10308_v28 = vpop.eup %10307  ;;  %v5209_v53 = vmul.f32 %v10306_v17, %v14142_v9  ;;  %v5052_v49 = vsub.f32 0.0, %v14234_v20  ;;  %v9883_v17 = vunpack.i.l.bf16 %v9882_v16 }
 0x52e   : > { %v7232_v61 = vsub.f32 0.0, %v14215_v62  ;;  %v7011_v34 = vadd.f32 %v7010_v12, %v14024_v33  ;;  %v7417_v11 = vpack.c.bf16 %v7390_v5, %v7389_v55  ;;  %v10310_v46 = vpop.eup %10309  ;;  %7029 = vmatmul.bf16.gmra.mxu0 %v6673_v23  ;;  %v5208_v54 = vmul.f32 %v10308_v28, %v14139_v63  ;;  %v14978_v5 = vld [vmem:[#allocation28_spill] sm:$0xff]  ;;  %v10508_v23 = vld [vmem:[#allocation2 + $0x129] sm:$0xff] }
 0x52f   : > { %v5147_v9 = vadd.f32 1.0, %v10310_v46  ;;  %v9874_v63 = vunpack.i.h.bf16 %v9872_v44  ;;  %v14979_v12 = vld [vmem:[#allocation32_spill] sm:$0xff]  ;;  %v10509_v46 = vld [vmem:[#allocation2 + $0x121] sm:$0xff] }
 0x530   : > { %v7275_v37 = vmul.f32 1.442695, %v7232_v61  ;;  %v7100_v50 = vadd.f32 %v7099_v25, %v7011_v34  ;;  %8377 = vmatmul.msk.bf16.gmra.mxu1 %vm550_vm1, %v7417_v11  ;;  %v10312_v39 = vpop.eup %10311  ;;  %v7589_v30 = vpack.c.bf16 %v5209_v53, %v5208_v54  ;;  %v4921_v61 = vadd.f32 %v14979_v12, %v14978_v5  ;;  %v14980_v34 = vld [vmem:[#allocation34_spill] sm:$0xff]  ;;  %v14259_v54 = vpop.f32.mrf.mxu2 }
 0x531   : > { %v7327_v7 = vadd.f32 1.0, %v10312_v39  ;;  %v4923_v28 = vadd.f32 %v14980_v34, %v4834_v51  ;;  %v6569_v11 = vsel %vm550_vm1, %v10508_v23, %v9874_v63  ;;  %v5094_v53 = vmul.f32 1.442695, %v5052_v49 }
 0x532   : > { %10313 = vpow2.f32 %v7275_v37  ;;  %v7165_v33 = vmul.f32 %v13910_v57, %v7100_v50  ;;  %v14254_v37 = vld [vmem:[%s14865_s11] ss:$0 sm:$0xff]  ;;  %v4986_v58 = vmul.f32 %v14120_v14, %v4921_v61 }
 0x533   : > { %10315 = vrcp.f32 %v5146_v15  ;;  %v6568_v15 = vsel %vm550_vm1, %v10509_v46, %v9873_v18  ;;  %v4987_v45 = vmul.f32 %v14120_v14, %v4923_v28 }
 0x534   : > { %v14238_v40 = vadd.f32 %v13920_v36, %v7165_v33  ;;  %v9878_v36 = vunpack.i.l.bf16 %v9877_v8  ;;  %10317 = vrcp.f32 %v7327_v7  ;;  %v6601_v33 = vsel %vm2250_vm3, %v6569_v11, %v9879_v10 }
 0x535   : > { %v7012_v57 = vpop.f32.mrf.mxu0  ;;  %10319 = vrcp.f32 %v5147_v9  ;;  %v6633_v9 = vsel %vm2283_vm4, %v6601_v33, %v9884_v22  ;;  %v14275_v18 = vadd.f32 %v14136_v4, %v4986_v58  ;;  %v14982_v22 = vld [vmem:[#allocation38_spill] sm:$0xff] }
 0x536   : > { %v7233_v43 = vsub.f32 0.0, %v14238_v40  ;;  %v7013_v41 = vadd.f32 %v7012_v57, %v14039_v56  ;;  %8400 = vmatmul.msk.bf16.gmra.mxu2 %vm550_vm1, %v7589_v30  ;;  %v6600_v39 = vsel %vm2250_vm3, %v6568_v15, %v9878_v36  ;;  %v9887_v36 = vpop.permute.xlu2 %9886 }
 0x537   : > { %v6632_v8 = vsel %vm2283_vm4, %v6600_v39, %v9883_v17  ;;  %v5054_v34 = vsub.f32 0.0, %v14275_v18  ;;  %v9889_v23 = vunpack.i.h.bf16 %v9887_v36  ;;  %v9888_v11 = vunpack.i.l.bf16 %v9887_v36  ;;  %v14983_v39 = vld [vmem:[#allocation36_spill] sm:$0xff] }
 0x538   : > { %v10314_v47 = vpop.eup %10313  ;;  %v7277_v25 = vmul.f32 1.442695, %v7233_v43  ;;  %v7102_v55 = vadd.f32 %v7101_v0, %v7013_v41  ;;  %v6676_v7 = vpack.c.bf16 %v6633_v9, %v6632_v8  ;;  %v14278_v43 = vadd.f32 %v14136_v4, %v4987_v45  ;;  %v14984_v45 = vld [vmem:[#allocation33_spill] sm:$0xff] }
 0x539   : > { %v7328_v24 = vadd.f32 1.0, %v10314_v47  ;;  %v10316_v56 = vpop.eup %10315  ;;  %v14981_v47 = vld [vmem:[#allocation37_spill] sm:$0xff] }
 0x53a   : > { %v7166_v50 = vmul.f32 %v14254_v37, %v7102_v55  ;;  %v10318_v16 = vpop.eup %10317  ;;  %v4839_v17 = vadd.f32 %v14982_v22, %v14981_v47  ;;  %v14285_v55 = vpop.f32.mrf.mxu2  ;;  %v5210_v61 = vmul.f32 %v10316_v56, %v14169_v52  ;;  %v5098_v56 = vmul.f32 1.442695, %v5054_v34 }
 0x53b   : > { %10321 = vrcp.f32 %v7328_v24  ;;  %v10320_v57 = vpop.eup %10319  ;;  %v7391_v49 = vmul.f32 %v10318_v16, %v14196_v32  ;;  %v5055_v32 = vsub.f32 0.0, %v14278_v43 }
 0x53c   : > { %10323 = vpow2.f32 %v7277_v25  ;;  %v14267_v44 = vadd.f32 %v14264_v29, %v7166_v50  ;;  %v5211_v0 = vmul.f32 %v10320_v57, %v14184_v6  ;;  %v9892_v25 = vpop.permute.xlu0 %9891  ;;  %v4928_v33 = vadd.f32 %v14983_v39, %v4839_v17 }
 0x53d   : > { %10325 = vpow2.f32 %v5096_v42  ;;  %v9894_v6 = vunpack.i.h.bf16 %v9892_v25  ;;  %v9893_v46 = vunpack.i.l.bf16 %v9892_v25  ;;  %v5100_v9 = vmul.f32 1.442695, %v5055_v32 }
 0x53e   : > { %v7234_v51 = vsub.f32 0.0, %v14267_v44  ;;  %10327 = vpow2.f32 %v5094_v53  ;;  %7034 = vmatmul.bf16.gmra.mxu0 %v6676_v7  ;;  %v7590_v15 = vpack.c.bf16 %v5211_v0, %v5210_v61  ;;  %v10512_v7 = vld [vmem:[#allocation2 + $0x141] sm:$0xff] }
 0x53f   : > { %v6571_v57 = vsel %vm550_vm1, %v10512_v7, %v9889_v23  ;;  %v14988_v7 = vld [vmem:[#allocation4_spill] sm:$0xff] }
 0x540   : > { %v7279_v30 = vmul.f32 1.442695, %v7234_v51  ;;  %v14985_v51 = vld [vmem:[#allocation35_spill] sm:$0xff] }
 0x541   : > { %v10322_v63 = vpop.eup %10321  ;;  %v4926_v16 = vadd.f32 %v14985_v51, %v14984_v45 }
 0x542   : > { %v10324_v41 = vpop.eup %10323  ;;  %v7392_v42 = vmul.f32 %v10322_v63, %v14215_v62  ;;  %10329 = vpow2.f32 %v7279_v30  ;;  %v9897_v62 = vpop.permute.xlu1 %9896  ;;  %v10513_v30 = vld [vmem:[#allocation2 + $0x139] sm:$0xff] }
 0x543   : > { %v10326_v10 = vpop.eup %10325  ;;  %v7329_v28 = vadd.f32 1.0, %v10324_v41  ;;  %v9899_v8 = vunpack.i.h.bf16 %v9897_v62  ;;  %v9898_v52 = vunpack.i.l.bf16 %v9897_v62  ;;  %v6570_v63 = vsel %vm550_vm1, %v10513_v30, %v9888_v11  ;;  %v14303_v47 = vpop.f32.mrf.mxu2 }
 0x544   : > { %v7418_v5 = vpack.c.bf16 %v7392_v42, %v7391_v49  ;;  %v10328_v12 = vpop.eup %10327  ;;  %v5149_v24 = vadd.f32 1.0, %v10326_v10  ;;  %v6602_v41 = vsel %vm2250_vm3, %v6570_v63, %v9893_v46  ;;  %v6603_v49 = vsel %vm2250_vm3, %v6571_v57, %v9894_v6  ;;  %v14986_v46 = vld [vmem:[#allocation40_spill] sm:$0xff] }
 0x545   : > { %v5148_v53 = vadd.f32 1.0, %v10328_v12  ;;  %10331 = vrcp.f32 %v7329_v28  ;;  %v4989_v42 = vmul.f32 %v14120_v14, %v4928_v33  ;;  %v6634_v10 = vsel %vm2283_vm4, %v6602_v41, %v9898_v52  ;;  %v10514_v41 = vld [vmem:[#allocation2 + $0x159] sm:$0xff] }
 0x546   : > { %8378 = vmatmul.msk.bf16.gmra.mxu1 %vm550_vm1, %v7418_v5  ;;  %8401 = vmatmul.msk.bf16.gmra.mxu2 %vm550_vm1, %v7590_v15  ;;  %10333 = vrcp.f32 %v5149_v24  ;;  %v6635_v36 = vsel %vm2283_vm4, %v6603_v49, %v9899_v8  ;;  %v4988_v0 = vmul.f32 %v14120_v14, %v4926_v16  ;;  %v9902_v24 = vpop.permute.xlu2 %9901  ;;  %v14987_v15 = vld [vmem:[#allocation41_spill] sm:$0xff] }
 0x547   : > { %v6679_v17 = vpack.c.bf16 %v6635_v36, %v6634_v10  ;;  %v14306_v5 = vadd.f32 %v14136_v4, %v4989_v42  ;;  %v10515_v42 = vld [vmem:[#allocation2 + $0x151] sm:$0xff] }
 0x548   : > { %v10330_v50 = vpop.eup %10329  ;;  %v14309_v34 = vadd.f32 %v14136_v4, %v4988_v0 }
 0x549   : > { %v7330_v58 = vadd.f32 1.0, %v10330_v50  ;;  %v5057_v6 = vsub.f32 0.0, %v14306_v5  ;;  %v4844_v50 = vadd.f32 %v14987_v15, %v14986_v46 }
 0x54a   : > { %v9912_v8 = vpop.permute.xlu1 %9911 }
 0x54b   : > { %10335 = vrcp.f32 %v7330_v58  ;;  %v10332_v22 = vpop.eup %10331  ;;  %v5104_v16 = vmul.f32 1.442695, %v5057_v6  ;;  %v4933_v57 = vadd.f32 %v14988_v7, %v4844_v50  ;;  %v9914_v30 = vunpack.i.h.bf16 %v9912_v8 }
 0x54c   : > { %10337 = vrcp.f32 %v5148_v53  ;;  %v10334_v25 = vpop.eup %10333  ;;  %v7393_v32 = vmul.f32 %v10332_v22, %v14238_v40  ;;  %v9907_v53 = vpop.permute.xlu0 %9906  ;;  %v5056_v40 = vsub.f32 0.0, %v14309_v34  ;;  %v9913_v63 = vunpack.i.l.bf16 %v9912_v8 }
 0x54d   : > { %10339 = vpow2.f32 %v5100_v9  ;;  %v5213_v23 = vmul.f32 %v10334_v25, %v14225_v2  ;;  %v14319_v9 = vpop.f32.mrf.mxu2  ;;  %v9909_v58 = vunpack.i.h.bf16 %v9907_v53  ;;  %v9908_v45 = vunpack.i.l.bf16 %v9907_v53 }
 0x54e   : > { %10341 = vpow2.f32 %v5098_v56  ;;  %7039 = vmatmul.bf16.gmra.mxu0 %v6679_v17  ;;  %v9904_v56 = vunpack.i.h.bf16 %v9902_v24  ;;  %v4991_v22 = vmul.f32 %v14120_v14, %v4933_v57 }
 0x550   : > { %v6573_v49 = vsel %vm550_vm1, %v10514_v41, %v9904_v56  ;;  %v14337_v6 = vadd.f32 %v14136_v4, %v4991_v22  ;;  %v5550_v22 = vld [vmem:[#allocation2 + $0x169] sm:$0xff] }
 0x551   : > { %v10336_v12 = vpop.eup %10335  ;;  %v6605_v0 = vsel %vm2250_vm3, %v6573_v49, %v9909_v58  ;;  %v14990_v58 = vld [vmem:[#allocation3_spill] sm:$0xff] }
 0x552   : > { %v10338_v61 = vpop.eup %10337  ;;  %v7394_v62 = vmul.f32 %v10336_v12, %v14267_v44  ;;  %v9903_v44 = vunpack.i.l.bf16 %v9902_v24  ;;  %v6637_v25 = vsel %vm2283_vm4, %v6605_v0, %v9914_v30  ;;  %v5680_v12 = vld [vmem:[#allocation2 + $0x19a] sm:$0xff]  ;;  %v14333_v24 = vpop.f32.mrf.mxu3 }
 0x553   : > { %v10340_v28 = vpop.eup %10339  ;;  %v5212_v33 = vmul.f32 %v10338_v61, %v14234_v20  ;;  %v5102_v20 = vmul.f32 1.442695, %v5056_v40  ;;  %v5681_v61 = vld [vmem:[#allocation2 + $0x1a2] sm:$0xff] }
 0x554   : > { %v10342_v11 = vpop.eup %10341  ;;  %v7419_v39 = vpack.c.bf16 %v7394_v62, %v7393_v32  ;;  %v5151_v52 = vadd.f32 1.0, %v10340_v28  ;;  %v6572_v10 = vsel %vm550_vm1, %v10515_v42, %v9903_v44  ;;  %v14989_v32 = vld [vmem:[#allocation39_spill] sm:$0xff]  ;;  %v6689_v28 = vpack.c.bf16 %v5681_v61, %v5680_v12  ;;  %v9922_v40 = vpop.permute.xlu0 %9921 }
 0x555   : > { %v5150_v2 = vadd.f32 1.0, %v10342_v11  ;;  %v7591_v51 = vpack.c.bf16 %v5213_v23, %v5212_v33  ;;  %v6604_v36 = vsel %vm2250_vm3, %v6572_v10, %v9908_v45  ;;  %v4990_v62 = vmul.f32 %v14120_v14, %v14989_v32  ;;  %v14339_v46 = vpop.f32.mrf.mxu2  ;;  %v14991_v45 = vld [vmem:[#allocation7_spill] sm:$0xff]  ;;  %v14993_v32 = vld [vmem:[#allocation8_spill] sm:$0xff] }
 0x556   : > { %8379 = vmatmul.msk.bf16.gmra.mxu1 %vm550_vm1, %v7419_v39  ;;  %10343 = vrcp.f32 %v5151_v52  ;;  %v6636_v17 = vsel %vm2283_vm4, %v6604_v36, %v9913_v63  ;;  %8364 = vmatmul.msk.bf16.gmra.mxu3 %vm550_vm1, %v6689_v28  ;;  %v9917_v39 = vpop.permute.xlu2 %9916  ;;  %v5059_v52 = vsub.f32 0.0, %v14337_v6  ;;  %v9924_v63 = vunpack.i.h.bf16 %v9922_v40  ;;  %v14992_v36 = vld [vmem:[#allocation44_spill] sm:$0xff] }
 0x557   : > { %8402 = vmatmul.msk.bf16.gmra.mxu2 %vm550_vm1, %v7591_v51  ;;  %10345 = vrcp.f32 %v5150_v2  ;;  %v6682_v23 = vpack.c.bf16 %v6637_v25, %v6636_v17  ;;  %v14342_v50 = vadd.f32 %v14136_v4, %v4990_v62  ;;  %v4849_v51 = vadd.f32 %v14991_v45, %v14990_v58  ;;  %v5551_v17 = vld [vmem:[#allocation2 + $0x171] sm:$0xff]  ;;  %v14994_v62 = vld [vmem:[#allocation42_spill] sm:$0xff] }
 0x558   : > { %10347 = vpow2.f32 %v5104_v16  ;;  %v9927_v16 = vpop.permute.xlu1 %9926  ;;  %v9919_v7 = vunpack.i.h.bf16 %v9917_v39  ;;  %v9918_v57 = vunpack.i.l.bf16 %v9917_v39  ;;  %v4936_v28 = vadd.f32 %v14994_v62, %v14993_v32 }
 0x559   : > { %10349 = vpow2.f32 %v5102_v20  ;;  %v5058_v2 = vsub.f32 0.0, %v14342_v50  ;;  %v9923_v20 = vunpack.i.l.bf16 %v9922_v40  ;;  %v9929_v42 = vunpack.i.h.bf16 %v9927_v16 }
 0x55a   : > { %v14350_v49 = vpop.f32.mrf.mxu3  ;;  %v9928_v10 = vunpack.i.l.bf16 %v9927_v16  ;;  %v4938_v0 = vadd.f32 %v14992_v36, %v4849_v51  ;;  %v6575_v25 = vsel %vm550_vm1, %v5551_v17, %v9919_v7  ;;  %v6574_v12 = vsel %vm550_vm1, %v5550_v22, %v9918_v57  ;;  %v14995_v16 = vld [vmem:[#allocation46_spill] sm:$0xff] }
 0x55b   : > { %v4854_v7 = vadd.f32 %v14995_v16, %v13623_v48  ;;  %v14998_v48 = vld [vmem:[#allocation47_spill] sm:$0xff] }
 0x55c   : > { %v10344_v11 = vpop.eup %10343  ;;  %v4993_v39 = vmul.f32 %v14120_v14, %v4938_v0 }
 0x55d   : > { %v10346_v15 = vpop.eup %10345  ;;  %v5215_v33 = vmul.f32 %v10344_v11, %v14278_v43  ;;  %v5108_v43 = vmul.f32 1.442695, %v5059_v52  ;;  %v14356_v61 = vpop.f32.mrf.mxu2  ;;  %v6606_v11 = vsel %vm2250_vm3, %v6574_v12, %v9923_v20  ;;  %v4943_v12 = vadd.f32 %v14998_v48, %v4854_v7 }
 0x55e   : > { %7044 = vmatmul.bf16.gmra.mxu0 %v6682_v23  ;;  %v10348_v53 = vpop.eup %10347  ;;  %v5214_v56 = vmul.f32 %v10346_v15, %v14275_v18  ;;  %v5106_v18 = vmul.f32 1.442695, %v5058_v2  ;;  %v6607_v23 = vsel %vm2250_vm3, %v6575_v25, %v9924_v63  ;;  %v6638_v15 = vsel %vm2283_vm4, %v6606_v11, %v9928_v10  ;;  %v9932_v57 = vpop.permute.xlu2 %9931  ;;  %v14997_v10 = vld [vmem:[#allocation45_spill] sm:$0xff] }
 0x55f   : > { %v10350_v8 = vpop.eup %10349  ;;  %v5153_v44 = vadd.f32 1.0, %v10348_v53  ;;  %v6639_v53 = vsel %vm2283_vm4, %v6607_v23, %v9929_v42  ;;  %v9937_v63 = vpop.permute.xlu0 %9936  ;;  %v14996_v42 = vld [vmem:[#allocation43_spill] sm:$0xff]  ;;  %v9934_v0 = vunpack.i.h.bf16 %v9932_v57  ;;  %v9933_v22 = vunpack.i.l.bf16 %v9932_v57 }
 0x560   : > { %v5152_v30 = vadd.f32 1.0, %v10350_v8  ;;  %v7592_v41 = vpack.c.bf16 %v5215_v33, %v5214_v56  ;;  %v4992_v8 = vmul.f32 %v14120_v14, %v4936_v28  ;;  %v6685_v52 = vpack.c.bf16 %v6639_v53, %v6638_v15  ;;  %v10516_v15 = vld [vmem:[#allocation2 + $0x181] sm:$0xff] }
 0x561   : > { %10351 = vrcp.f32 %v5153_v44  ;;  %v14367_v56 = vadd.f32 %v14136_v4, %v4993_v39  ;;  %v9939_v32 = vunpack.i.h.bf16 %v9937_v63  ;;  %v6576_v53 = vsel %vm550_vm1, %v10516_v15, %v9933_v22  ;;  %v10517_v39 = vld [vmem:[#allocation2 + $0x189] sm:$0xff] }
 0x562   : > { %10353 = vrcp.f32 %v5152_v30  ;;  %v14369_v2 = vpop.f32.mrf.mxu3  ;;  %v14373_v51 = vadd.f32 %v14136_v4, %v4992_v8 }
 0x563   : > { %10355 = vpow2.f32 %v5108_v43  ;;  %v5061_v43 = vsub.f32 0.0, %v14367_v56 }
 0x564   : > { %10357 = vpow2.f32 %v5106_v18  ;;  %v4941_v18 = vadd.f32 %v14997_v10, %v14996_v42  ;;  %v5060_v25 = vsub.f32 0.0, %v14373_v51 }
 0x565   : > { %v14378_v20 = vpop.f32.mrf.mxu2  ;;  %v5112_v23 = vmul.f32 1.442695, %v5061_v43 }
 0x566   : > { %v4994_v11 = vmul.f32 %v14120_v14, %v4941_v18  ;;  %v5110_v8 = vmul.f32 1.442695, %v5060_v25  ;;  %v15000_v25 = vld [vmem:[#allocation49_spill] sm:$0xff] }
 0x567   : > { %8403 = vmatmul.msk.bf16.gmra.mxu2 %vm550_vm1, %v7592_v41  ;;  %v10352_v33 = vpop.eup %10351 }
 0x568   : > { %v10354_v40 = vpop.eup %10353  ;;  %v5217_v58 = vmul.f32 %v10352_v33, %v14306_v5  ;;  %v9942_v5 = vpop.permute.xlu1 %9941  ;;  %v6577_v33 = vsel %vm550_vm1, %v10517_v39, %v9934_v0  ;;  %v14399_v57 = vadd.f32 %v14136_v4, %v4994_v11 }
 0x569   : > { %v10356_v44 = vpop.eup %10355  ;;  %v5216_v30 = vmul.f32 %v10354_v40, %v14309_v34  ;;  %v9938_v34 = vunpack.i.l.bf16 %v9937_v63  ;;  %v9944_v62 = vunpack.i.h.bf16 %v9942_v5  ;;  %v9943_v28 = vunpack.i.l.bf16 %v9942_v5 }
 0x56a   : > { %v10358_v45 = vpop.eup %10357  ;;  %v5155_v41 = vadd.f32 1.0, %v10356_v44  ;;  %v6609_v44 = vsel %vm2250_vm3, %v6577_v33, %v9939_v32  ;;  %v5062_v18 = vsub.f32 0.0, %v14399_v57 }
 0x56b   : > { %v5154_v36 = vadd.f32 1.0, %v10358_v45  ;;  %v7593_v17 = vpack.c.bf16 %v5217_v58, %v5216_v30  ;;  %v6608_v40 = vsel %vm2250_vm3, %v6576_v53, %v9938_v34  ;;  %v14392_v58 = vpop.f32.mrf.mxu3  ;;  %v6641_v7 = vsel %vm2283_vm4, %v6609_v44, %v9944_v62 }
 0x56c   : > { %10359 = vrcp.f32 %v5155_v41  ;;  %v6640_v16 = vsel %vm2283_vm4, %v6608_v40, %v9943_v28  ;;  %v5114_v62 = vmul.f32 1.442695, %v5062_v18  ;;  %v15001_v28 = vld [vmem:[#allocation48_spill] sm:$0xff] }
 0x56d   : > { %10361 = vrcp.f32 %v5154_v36  ;;  %v6688_v42 = vpack.c.bf16 %v6641_v7, %v6640_v16 }
 0x56e   : > { %7049 = vmatmul.bf16.gmra.mxu0 %v6685_v52  ;;  %v4995_v52 = vmul.f32 %v14120_v14, %v4943_v12  ;;  %10363 = vpow2.f32 %v5112_v23  ;;  %v15002_v23 = vld [vmem:[#allocation5_spill] sm:$0xff] }
 0x56f   : > { %10365 = vpow2.f32 %v5110_v8  ;;  %v15003_v8 = vld [vmem:[#allocation50_spill] sm:$0xff] }
 0x570   : > { %v14402_v41 = vadd.f32 %v14136_v4, %v4995_v52  ;;  %10367 = vpow2.f32 %v5114_v62 }
 0x572   : > { %v10360_v63 = vpop.eup %10359  ;;  %v5063_v22 = vsub.f32 0.0, %v14402_v41 }
 0x573   : > { %v10362_v10 = vpop.eup %10361  ;;  %v5219_v36 = vmul.f32 %v10360_v63, %v14337_v6  ;;  %v14420_v15 = vpop.f32.mrf.mxu3  ;;  %v14431_v63 = vld [vmem:[%s14868_s14] ss:$0 sm:$0xff] }
 0x574   : > { %v10364_v0 = vpop.eup %10363  ;;  %v5218_v32 = vmul.f32 %v10362_v10, %v14342_v50  ;;  %v5116_v33 = vmul.f32 1.442695, %v5063_v22 }
 0x575   : > { %v10366_v34 = vpop.eup %10365  ;;  %v5157_v6 = vadd.f32 1.0, %v10364_v0 }
 0x576   : > { %v7594_v39 = vpack.c.bf16 %v5219_v36, %v5218_v32  ;;  %v5156_v44 = vadd.f32 1.0, %v10366_v34  ;;  %v10368_v36 = vpop.eup %10367 }
 0x577   : > { %8404 = vmatmul.msk.bf16.gmra.mxu2 %vm550_vm1, %v7593_v17  ;;  %v14999_v17 = vld [vmem:[#allocation6_spill] sm:$0xff]  ;;  %10369 = vrcp.f32 %v5157_v6  ;;  %v15005_v6 = vld [vmem:[#allocation55_spill] sm:$0xff] }
 0x578   : > { %v4859_v48 = vadd.f32 %v15000_v25, %v14999_v17  ;;  %10371 = vpow2.f32 %v5116_v33 }
 0x579   : > { %v14394_v45 = vpop.f32.mrf.mxu2  ;;  %10373 = vrcp.f32 %v5156_v44 }
 0x57a   : > { %v4948_v52 = vadd.f32 %v15003_v8, %v4859_v48 }
 0x57b   : > { %v7015_v30 = vpop.f32.mrf.mxu0  ;;  %v14448_v48 = vpop.f32.mrf.mxu3 }
 0x57c   : > { %v7016_v43 = vadd.f32 %v7015_v30, %v14048_v35 }
 0x57d   : > { %v10370_v25 = vpop.eup %10369 }
 0x57e   : > { %v7105_v5 = vadd.f32 %v14333_v24, %v7016_v43  ;;  %7054 = vmatmul.bf16.gmra.mxu0 %v6688_v42  ;;  %v4946_v24 = vadd.f32 %v15002_v23, %v15001_v28  ;;  %v4997_v43 = vmul.f32 %v14120_v14, %v4948_v52  ;;  %v5158_v23 = vadd.f32 1.0, %v10368_v36 }
 0x57f   : > { %v5221_v8 = vmul.f32 %v10370_v25, %v14367_v56  ;;  %v15008_v25 = vld [vmem:[#allocation53_spill] sm:$0xff] }
 0x580   : > { %v7167_v12 = vmul.f32 %v14254_v37, %v7105_v5  ;;  %v4996_v16 = vmul.f32 %v14120_v14, %v4946_v24  ;;  %v14443_v0 = vadd.f32 %v14136_v4, %v4997_v43  ;;  %v15004_v24 = vld [vmem:[#allocation52_spill] sm:$0xff] }
 0x581   : > { %v14413_v35 = vpop.f32.mrf.mxu2 }
 0x582   : > { %v14418_v11 = vadd.f32 %v14264_v29, %v7167_v12  ;;  %v14436_v10 = vadd.f32 %v14136_v4, %v4996_v16  ;;  %v10372_v12 = vpop.eup %10371 }
 0x583   : > { %v7017_v53 = vpop.f32.mrf.mxu0  ;;  %v10374_v28 = vpop.eup %10373  ;;  %v5159_v52 = vadd.f32 1.0, %v10372_v12 }
 0x584   : > { %v7235_v50 = vsub.f32 0.0, %v14418_v11  ;;  %v7018_v40 = vadd.f32 %v7017_v53, %v14068_v60  ;;  %v5064_v32 = vsub.f32 0.0, %v14436_v10  ;;  %v4864_v53 = vadd.f32 %v15005_v6, %v15004_v24 }
 0x586   : > { %v7281_v7 = vmul.f32 1.442695, %v7235_v50  ;;  %v7107_v30 = vadd.f32 %v14350_v49, %v7018_v40  ;;  %v5220_v40 = vmul.f32 %v10374_v28, %v14373_v51  ;;  %v5118_v44 = vmul.f32 1.442695, %v5064_v32 }
 0x587   : > { %8405 = vmatmul.msk.bf16.gmra.mxu2 %vm550_vm1, %v7594_v39 }
 0x588   : > { %v7168_v60 = vmul.f32 %v14254_v37, %v7107_v30  ;;  %10375 = vpow2.f32 %v7281_v7  ;;  %v15006_v7 = vld [vmem:[#allocation54_spill] sm:$0xff] }
 0x589   : > { %v7679_v42 = vpop.f32.mrf.mxu2  ;;  %v4953_v30 = vadd.f32 %v15006_v7, %v4864_v53 }
 0x58a   : > { %v14439_v49 = vadd.f32 %v14264_v29, %v7168_v60  ;;  %v7680_v18 = vadd.f32 %v14431_v63, %v7679_v42 }
 0x58b   : > { %v7020_v5 = vpop.f32.mrf.mxu0  ;;  %v4999_v32 = vmul.f32 %v14120_v14, %v4953_v30  ;;  %v10518_v14 = vld [vmem:[%s14862_s8] ss:$0 sm:$0xff] }
 0x58c   : > { %v7236_v22 = vsub.f32 0.0, %v14439_v49  ;;  %v7021_v17 = vadd.f32 %v7020_v5, %v14089_v59  ;;  %7791 = vrot.lane.b32.xlu2 %v7680_v18, %s10535_s20  ;;  %v5065_v59 = vsub.f32 0.0, %v14443_v0  ;;  %v7595_v5 = vpack.c.bf16 %v5221_v8, %v5220_v40  ;;  %v10519_v30 = vld [vmem:[%s14863_s9] ss:$0 sm:$0xff] }
 0x58e   : > { %v7283_v34 = vmul.f32 1.442695, %v7236_v22  ;;  %v7110_v62 = vadd.f32 %v14369_v2, %v7021_v17  ;;  %v10376_v39 = vpop.eup %10375  ;;  %v5120_v42 = vmul.f32 1.442695, %v5065_v59  ;;  %v15007_v17 = vld [vmem:[#allocation51_spill] sm:$0xff] }
 0x58f   : > { %v7331_v43 = vadd.f32 1.0, %v10376_v39  ;;  %v4951_v12 = vadd.f32 %v15008_v25, %v15007_v17  ;;  %v14482_v39 = vadd.f32 %v14136_v4, %v4999_v32 }
 0x590   : > { %10377 = vpow2.f32 %v7283_v34  ;;  %v7169_v33 = vmul.f32 %v14254_v37, %v7110_v62  ;;  %v14471_v34 = vpop.f32.mrf.mxu3 }
 0x591   : > { %v7681_v50 = vpop.f32.mrf.mxu2  ;;  %10379 = vrcp.f32 %v5158_v23  ;;  %v4998_v53 = vmul.f32 %v10518_v14, %v4951_v12 }
 0x592   : > { %v14459_v2 = vadd.f32 %v14264_v29, %v7169_v33  ;;  %v7682_v16 = vadd.f32 %v14431_v63, %v7681_v50  ;;  %10381 = vrcp.f32 %v5159_v52 }
 0x593   : > { %v7022_v60 = vpop.f32.mrf.mxu0  ;;  %10383 = vpow2.f32 %v5118_v44  ;;  %v14491_v4 = vadd.f32 %v10519_v30, %v4998_v53  ;;  %v14520_v30 = vpop.f32.mrf.mxu1 }
 0x594   : > { %v7237_v18 = vsub.f32 0.0, %v14459_v2  ;;  %v7023_v56 = vadd.f32 %v7022_v60, %v14111_v38  ;;  %7793 = vrot.lane.b32.xlu0 %v7682_v16, %s10535_s20  ;;  %10385 = vrcp.f32 %v7331_v43  ;;  %v5067_v43 = vsub.f32 0.0, %v14482_v39 }
 0x595   : > { %10387 = vpow2.f32 %v5120_v42 }
 0x596   : > { %v10378_v51 = vpop.eup %10377  ;;  %v7285_v36 = vmul.f32 1.442695, %v7237_v18  ;;  %v7112_v22 = vadd.f32 %v14392_v58, %v7023_v56  ;;  %v5124_v32 = vmul.f32 1.442695, %v5067_v43 }
 0x597   : > { %8406 = vmatmul.msk.bf16.gmra.mxu2 %vm550_vm1, %v7595_v5  ;;  %v7332_v38 = vadd.f32 1.0, %v10378_v51  ;;  %v10380_v28 = vpop.eup %10379 }
 0x598   : > { %v7170_v62 = vmul.f32 %v14254_v37, %v7112_v22  ;;  %v10382_v6 = vpop.eup %10381  ;;  %v14499_v51 = vpop.f32.mrf.mxu3 }
 0x599   : > { %10389 = vrcp.f32 %v7332_v38  ;;  %v7684_v23 = vpop.f32.mrf.mxu2  ;;  %v10384_v33 = vpop.eup %10383  ;;  %v5223_v60 = vmul.f32 %v10382_v6, %v14402_v41 }
 0x59a   : > { %10391 = vpow2.f32 %v7285_v36  ;;  %v14475_v58 = vadd.f32 %v14264_v29, %v7170_v62  ;;  %v7685_v24 = vadd.f32 %v14431_v63, %v7684_v23  ;;  %v10386_v50 = vpop.eup %10385  ;;  %v5160_v5 = vadd.f32 1.0, %v10384_v33 }
 0x59b   : > { %v7025_v59 = vpop.f32.mrf.mxu0  ;;  %v10388_v40 = vpop.eup %10387 }
 0x59c   : > { %v7238_v8 = vsub.f32 0.0, %v14475_v58  ;;  %v7026_v52 = vadd.f32 %v7025_v59, %v14144_v1  ;;  %7795 = vrot.lane.b32.xlu1 %v7685_v24, %s10535_s20  ;;  %v7395_v1 = vmul.f32 %v10386_v50, %v14418_v11  ;;  %v5161_v22 = vadd.f32 1.0, %v10388_v40 }
 0x59d   : > { %v5066_v11 = vsub.f32 0.0, %v14491_v4 }
 0x59e   : > { %v7287_v44 = vmul.f32 1.442695, %v7238_v8  ;;  %v7115_v16 = vadd.f32 %v14420_v15, %v7026_v52  ;;  %v5222_v15 = vmul.f32 %v10380_v28, %v14399_v57 }
 0x59f   : > { %v10390_v7 = vpop.eup %10389  ;;  %v5122_v6 = vmul.f32 1.442695, %v5066_v11 }
 0x5a0   : > { %v10392_v42 = vpop.eup %10391  ;;  %v7396_v18 = vmul.f32 %v10390_v7, %v14439_v49  ;;  %10393 = vpow2.f32 %v7287_v44  ;;  %v7171_v56 = vmul.f32 %v14254_v37, %v7115_v16  ;;  %v7596_v62 = vpack.c.bf16 %v5223_v60, %v5222_v15  ;;  %v7124_v52 = vpop.f32.mrf.mxu3 }
 0x5a1   : > { %v7686_v36 = vpop.f32.mrf.mxu2  ;;  %v7333_v12 = vadd.f32 1.0, %v10392_v42  ;;  %10395 = vrcp.f32 %v5160_v5 }
 0x5a2   : > { %v14502_v17 = vadd.f32 %v14264_v29, %v7171_v56  ;;  %v7687_v41 = vadd.f32 %v14431_v63, %v7686_v36  ;;  %v7420_v25 = vpack.c.bf16 %v7396_v18, %v7395_v1  ;;  %10397 = vrcp.f32 %v5161_v22 }
 0x5a3   : > { %v7027_v49 = vpop.f32.mrf.mxu0  ;;  %10399 = vrcp.f32 %v7333_v12 }
 0x5a4   : > { %v7239_v38 = vsub.f32 0.0, %v14502_v17  ;;  %v7028_v57 = vadd.f32 %v7027_v49, %v14166_v26  ;;  %8380 = vmatmul.msk.bf16.gmra.mxu1 %vm550_vm1, %v7420_v25  ;;  %7797 = vrot.lane.b32.xlu2 %v7687_v41, %s10535_s20  ;;  %10401 = vpow2.f32 %v5124_v32 }
 0x5a6   : > { %v10394_v28 = vpop.eup %10393  ;;  %v7289_v23 = vmul.f32 1.442695, %v7239_v38  ;;  %v7117_v24 = vadd.f32 %v14448_v48, %v7028_v57 }
 0x5a7   : > { %8407 = vmatmul.msk.bf16.gmra.mxu2 %vm550_vm1, %v7596_v62  ;;  %v7334_v14 = vadd.f32 1.0, %v10394_v28  ;;  %v10396_v8 = vpop.eup %10395 }
 0x5a8   : > { %v7172_v53 = vmul.f32 %v14254_v37, %v7117_v24  ;;  %v10398_v50 = vpop.eup %10397  ;;  %v5224_v36 = vmul.f32 %v10396_v8, %v14436_v10  ;;  %v7126_v32 = vpop.f32.mrf.mxu3 }
 0x5a9   : > { %10403 = vrcp.f32 %v7334_v14  ;;  %v7689_v26 = vpop.f32.mrf.mxu2  ;;  %v10400_v16 = vpop.eup %10399  ;;  %v5225_v1 = vmul.f32 %v10398_v50, %v14443_v0 }
 0x5aa   : > { %10405 = vpow2.f32 %v7289_v23  ;;  %v14514_v59 = vadd.f32 %v14264_v29, %v7172_v53  ;;  %v7690_v33 = vadd.f32 %v14431_v63, %v7689_v26  ;;  %v10402_v7 = vpop.eup %10401  ;;  %v7397_v56 = vmul.f32 %v10400_v16, %v14459_v2  ;;  %v14538_v23 = vpop.f32.mrf.mxu1 }
 0x5ab   : > { %10407 = vpow2.f32 %v5122_v6  ;;  %v7030_v48 = vpop.f32.mrf.mxu0  ;;  %v5163_v41 = vadd.f32 1.0, %v10402_v7  ;;  %v7597_v10 = vpack.c.bf16 %v5225_v1, %v5224_v36 }
 0x5ac   : > { %v7240_v40 = vsub.f32 0.0, %v14514_v59  ;;  %v7031_v44 = vadd.f32 %v7030_v48, %v14187_v13  ;;  %7799 = vrot.lane.b32.xlu0 %v7690_v33, %s10535_s20 }
 0x5ae   : > { %v7291_v43 = vmul.f32 1.442695, %v7240_v40  ;;  %v7120_v60 = vadd.f32 %v14471_v34, %v7031_v44 }
 0x5af   : > { %v10404_v42 = vpop.eup %10403 }
 0x5b0   : > { %v10406_v18 = vpop.eup %10405  ;;  %v7398_v15 = vmul.f32 %v10404_v42, %v14475_v58  ;;  %10409 = vpow2.f32 %v7291_v43  ;;  %v7173_v13 = vmul.f32 %v14254_v37, %v7120_v60  ;;  %v7129_v16 = vpop.f32.mrf.mxu3 }
 0x5b1   : > { %v10408_v5 = vpop.eup %10407  ;;  %v7691_v22 = vpop.f32.mrf.mxu2  ;;  %v7335_v0 = vadd.f32 1.0, %v10406_v18  ;;  %10411 = vrcp.f32 %v5163_v41 }
 0x5b2   : > { %v14529_v25 = vadd.f32 %v14264_v29, %v7173_v13  ;;  %v7692_v34 = vadd.f32 %v14431_v63, %v7691_v22  ;;  %v7421_v11 = vpack.c.bf16 %v7398_v15, %v7397_v56  ;;  %v5162_v49 = vadd.f32 1.0, %v10408_v5  ;;  %v14550_v56 = vpop.f32.mrf.mxu1 }
 0x5b3   : > { %v7032_v12 = vpop.f32.mrf.mxu0  ;;  %10413 = vrcp.f32 %v7335_v0 }
 0x5b4   : > { %v7241_v2 = vsub.f32 0.0, %v14529_v25  ;;  %v7033_v58 = vadd.f32 %v7032_v12, %v14206_v19  ;;  %8381 = vmatmul.msk.bf16.gmra.mxu1 %vm550_vm1, %v7421_v11  ;;  %7801 = vrot.lane.b32.xlu1 %v7692_v34, %s10535_s20  ;;  %10415 = vrcp.f32 %v5162_v49 }
 0x5b6   : > { %v10410_v38 = vpop.eup %10409  ;;  %v7293_v57 = vmul.f32 1.442695, %v7241_v2  ;;  %v7122_v62 = vadd.f32 %v14499_v51, %v7033_v58 }
 0x5b7   : > { %8408 = vmatmul.msk.bf16.gmra.mxu2 %vm550_vm1, %v7597_v10  ;;  %v7336_v28 = vadd.f32 1.0, %v10410_v38  ;;  %v10412_v26 = vpop.eup %10411 }
 0x5b8   : > { %v7174_v19 = vmul.f32 %v14254_v37, %v7122_v62  ;;  %v5227_v7 = vmul.f32 %v10412_v26, %v14482_v39  ;;  %v7131_v0 = vpop.f32.mrf.mxu3 }
 0x5b9   : > { %10417 = vrcp.f32 %v7336_v28  ;;  %v7694_v24 = vpop.f32.mrf.mxu2  ;;  %v10414_v8 = vpop.eup %10413 }
 0x5ba   : > { %10419 = vpow2.f32 %v7293_v57  ;;  %v7210_v6 = vadd.f32 %v14264_v29, %v7174_v19  ;;  %v7695_v14 = vadd.f32 %v14431_v63, %v7694_v24  ;;  %v10416_v48 = vpop.eup %10415  ;;  %v7399_v60 = vmul.f32 %v10414_v8, %v14502_v17  ;;  %v14564_v58 = vpop.f32.mrf.mxu1 }
 0x5bb   : > { %v7035_v53 = vpop.f32.mrf.mxu0 }
 0x5bc   : > { %v7242_v33 = vsub.f32 0.0, %v7210_v6  ;;  %v7036_v51 = vadd.f32 %v7035_v53, %v14229_v31  ;;  %7803 = vrot.lane.b32.xlu2 %v7695_v14, %s10535_s20  ;;  %v5226_v31 = vmul.f32 %v10416_v48, %v14491_v4 }
 0x5be   : > { %v7295_v50 = vmul.f32 1.442695, %v7242_v33  ;;  %v7125_v40 = vadd.f32 %v7124_v52, %v7036_v51  ;;  %v7598_v36 = vpack.c.bf16 %v5227_v7, %v5226_v31 }
 0x5bf   : > { %v10418_v44 = vpop.eup %10417 }
 0x5c0   : > { %v10420_v43 = vpop.eup %10419  ;;  %v7400_v42 = vmul.f32 %v10418_v44, %v14514_v59  ;;  %10421 = vpow2.f32 %v7295_v50  ;;  %v7175_v1 = vmul.f32 %v14254_v37, %v7125_v40  ;;  %v7134_v8 = vpop.f32.mrf.mxu3 }
 0x5c1   : > { %v7696_v18 = vpop.f32.mrf.mxu2  ;;  %v7337_v39 = vadd.f32 1.0, %v10420_v43  ;;  %v15009_v43 = vld [vmem:[#allocation56_spill] sm:$0xff] }
 0x5c2   : > { %v14553_v15 = vadd.f32 %v14264_v29, %v7175_v1  ;;  %v7697_v52 = vadd.f32 %v14431_v63, %v7696_v18  ;;  %v7422_v13 = vpack.c.bf16 %v7400_v42, %v7399_v60  ;;  %v15010_v60 = vpack.c.bf16 %v13865_v27, %v15009_v43 }
 0x5c3   : > { %v7037_v5 = vpop.f32.mrf.mxu0  ;;  %10423 = vrcp.f32 %v7337_v39 }
 0x5c4   : > { %v7243_v17 = vsub.f32 0.0, %v14553_v15  ;;  %v7038_v59 = vadd.f32 %v7037_v5, %v14259_v54  ;;  %8382 = vmatmul.msk.bf16.gmra.mxu1 %vm550_vm1, %v7422_v13  ;;  %7805 = vrot.lane.b32.xlu0 %v7697_v52, %s10535_s20 }
 0x5c6   : > { %v10422_v4 = vpop.eup %10421  ;;  %v7297_v22 = vmul.f32 1.442695, %v7243_v17  ;;  %v7127_v41 = vadd.f32 %v7126_v32, %v7038_v59 }
 0x5c7   : > { %8409 = vmatmul.msk.bf16.gmra.mxu2 %vm550_vm1, %v7598_v36  ;;  %v7338_v34 = vadd.f32 1.0, %v10422_v4 }
 0x5c8   : > { %v7176_v11 = vmul.f32 %v14254_v37, %v7127_v41  ;;  %v7136_v5 = vpop.f32.mrf.mxu3  ;;  %v14595_v41 = vld [vmem:[%s14865_s11] ss:$0 sm:$0xff] }
 0x5c9   : > { %10425 = vrcp.f32 %v7338_v34  ;;  %v7699_v12 = vpop.f32.mrf.mxu2  ;;  %v10424_v38 = vpop.eup %10423  ;;  %v14601_v34 = vld [vmem:[%s14870_s16] ss:$0 sm:$0xff] }
 0x5ca   : > { %10427 = vpow2.f32 %v7297_v22  ;;  %v7212_v54 = vadd.f32 %v14264_v29, %v7176_v11  ;;  %v7700_v49 = vadd.f32 %v14431_v63, %v7699_v12  ;;  %v7401_v24 = vmul.f32 %v10424_v38, %v14529_v25 }
 0x5cb   : > { %v7040_v2 = vpop.f32.mrf.mxu0  ;;  %v7507_v38 = vadd.f32 %v14601_v34, %v14520_v30 }
 0x5cc   : > { %v7244_v10 = vsub.f32 0.0, %v7212_v54  ;;  %v7041_v32 = vadd.f32 %v7040_v2, %v14285_v55  ;;  %7807 = vrot.lane.b32.xlu1 %v7700_v49, %s10535_s20 }
 0x5ce   : > { %v7299_v57 = vmul.f32 1.442695, %v7244_v10  ;;  %v7130_v62 = vadd.f32 %v7129_v16, %v7041_v32 }
 0x5cf   : > { %v10426_v28 = vpop.eup %10425 }
 0x5d0   : > { %v10428_v19 = vpop.eup %10427  ;;  %v7402_v14 = vmul.f32 %v10426_v28, %v7210_v6  ;;  %10429 = vpow2.f32 %v7299_v57  ;;  %v7177_v53 = vmul.f32 %v14254_v37, %v7130_v62  ;;  %v14578_v6 = vpop.f32.mrf.mxu1 }
 0x5d1   : > { %v7701_v26 = vpop.f32.mrf.mxu2  ;;  %v7339_v48 = vadd.f32 1.0, %v10428_v19 }
 0x5d2   : > { %v14571_v33 = vadd.f32 %v14264_v29, %v7177_v53  ;;  %v7702_v51 = vadd.f32 %v14431_v63, %v7701_v26  ;;  %v7423_v55 = vpack.c.bf16 %v7402_v14, %v7401_v24  ;;  %v7139_v24 = vpop.f32.mrf.mxu3 }
 0x5d3   : > { %v7042_v50 = vpop.f32.mrf.mxu0  ;;  %10431 = vrcp.f32 %v7339_v48 }
 0x5d4   : > { %v7245_v40 = vsub.f32 0.0, %v14571_v33  ;;  %v7043_v44 = vadd.f32 %v7042_v50, %v14303_v47  ;;  %8383 = vmatmul.msk.bf16.gmra.mxu1 %vm550_vm1, %v7423_v55  ;;  %7809 = vrot.lane.b32.xlu2 %v7702_v51, %s10535_s20 }
 0x5d6   : > { %v10430_v25 = vpop.eup %10429  ;;  %v7301_v16 = vmul.f32 1.442695, %v7245_v40  ;;  %v7132_v7 = vadd.f32 %v7131_v0, %v7043_v44  ;;  %v14606_v0 = vld [vmem:[%s14866_s12] ss:$0 sm:$0xff] }
 0x5d7   : > { %8410 = vmatmul.msk.bf16.gmra.mxu2 %vm550_vm1, %v15010_v60  ;;  %v7340_v42 = vadd.f32 1.0, %v10430_v25 }
 0x5d8   : > { %v7178_v1 = vmul.f32 %v14254_v37, %v7132_v7  ;;  %v14589_v4 = vpop.f32.mrf.mxu1 }
 0x5d9   : > { %10433 = vrcp.f32 %v7340_v42  ;;  %v10432_v27 = vpop.eup %10431 }
 0x5da   : > { %v7704_v47 = vpop.f32.mrf.mxu2  ;;  %10435 = vpow2.f32 %v7301_v16  ;;  %v7214_v18 = vadd.f32 %v14264_v29, %v7178_v1  ;;  %v7403_v22 = vmul.f32 %v10432_v27, %v14553_v15  ;;  %v7141_v42 = vpop.f32.mrf.mxu3 }
 0x5db   : > { %v7705_v31 = vadd.f32 %v14431_v63, %v7704_v47  ;;  %v7045_v52 = vpop.f32.mrf.mxu0 }
 0x5dc   : > { %v7246_v13 = vsub.f32 0.0, %v7214_v18  ;;  %v7046_v39 = vadd.f32 %v7045_v52, %v14319_v9 }
 0x5dd   : > { %7811 = vrot.lane.b32.xlu0 %v7705_v31, %s10535_s20 }
 0x5de   : > { %v7303_v17 = vmul.f32 1.442695, %v7246_v13  ;;  %v7135_v59 = vadd.f32 %v7134_v8, %v7046_v39 }
 0x5df   : > { %v10434_v36 = vpop.eup %10433 }
 0x5e0   : > { %v10436_v37 = vpop.eup %10435  ;;  %v7404_v29 = vmul.f32 %v10434_v36, %v7212_v54  ;;  %10437 = vpow2.f32 %v7303_v17  ;;  %v7179_v9 = vmul.f32 %v14595_v41, %v7135_v59  ;;  %v14629_v53 = vpop.f32.mrf.mxu1  ;;  %v15012_v59 = vld [vmem:[#allocation58_spill] sm:$0xff]  ;;  %v15013_v36 = vld [vmem:[#allocation57_spill] sm:$0xff] }
 0x5e1   : > { %v7341_v49 = vadd.f32 1.0, %v10436_v37  ;;  %v15014_v37 = vpack.c.bf16 %v15012_v59, %v15013_v36 }
 0x5e2   : > { %v7706_v11 = vpop.f32.mrf.mxu2  ;;  %v14609_v15 = vadd.f32 %v14606_v0, %v7179_v9  ;;  %v7424_v54 = vpack.c.bf16 %v7404_v29, %v7403_v22 }
 0x5e3   : > { %v7707_v12 = vadd.f32 %v14431_v63, %v7706_v11  ;;  %v7047_v2 = vpop.f32.mrf.mxu0  ;;  %10439 = vrcp.f32 %v7341_v49  ;;  %v7144_v11 = vpop.f32.mrf.mxu3 }
 0x5e4   : > { %v7247_v10 = vsub.f32 0.0, %v14609_v15  ;;  %v7048_v32 = vadd.f32 %v7047_v2, %v14339_v46  ;;  %8384 = vmatmul.msk.bf16.gmra.mxu1 %vm550_vm1, %v7424_v54  ;;  %v15011_v46 = vpack.c.bf16 %v13940_v21, %v13935_v3 }
 0x5e5   : > { %7813 = vrot.lane.b32.xlu1 %v7707_v12, %s10535_s20 }
 0x5e6   : > { %v10438_v57 = vpop.eup %10437  ;;  %v7305_v62 = vmul.f32 1.442695, %v7247_v10  ;;  %v7137_v28 = vadd.f32 %v7136_v5, %v7048_v32  ;;  %v7792_v19 = vpop.permute.xlu2 %7791 }
 0x5e7   : > { %8411 = vmatmul.msk.bf16.gmra.mxu2 %vm550_vm1, %v15011_v46  ;;  %v7342_v14 = vadd.f32 1.0, %v10438_v57  ;;  %v7888_v30 = vsel %vm7887_vm5, %v7507_v38, %v7792_v19  ;;  %v7514_v38 = vadd.f32 %v14601_v34, %v14564_v58 }
 0x5e8   : > { %v7180_v26 = vmul.f32 %v14595_v41, %v7137_v28  ;;  %7921 = vst.msk [vmem:[%s14622_s22] sm:$0xff] %vm7920_vm6, %v7888_v30  ;;  %v14640_v47 = vpop.f32.mrf.mxu1 }
 0x5e9   : > { %10441 = vrcp.f32 %v7342_v14  ;;  %v10440_v50 = vpop.eup %10439 }
 0x5ea   : > { %v7709_v51 = vpop.f32.mrf.mxu2  ;;  %10443 = vpow2.f32 %v7305_v62  ;;  %v7216_v55 = vadd.f32 %v14606_v0, %v7180_v26  ;;  %v7405_v7 = vmul.f32 %v10440_v50, %v14571_v33 }
 0x5eb   : > { %v7710_v3 = vadd.f32 %v14431_v63, %v7709_v51  ;;  %v7050_v21 = vpop.f32.mrf.mxu0 }
 0x5ec   : > { %v7248_v8 = vsub.f32 0.0, %v7216_v55  ;;  %v7051_v48 = vadd.f32 %v7050_v21, %v14356_v61 }
 0x5ed   : > { %7815 = vrot.lane.b32.xlu2 %v7710_v3, %s10535_s20 }
 0x5ee   : > { %v7307_v40 = vmul.f32 1.442695, %v7248_v8  ;;  %v7140_v44 = vadd.f32 %v7139_v24, %v7051_v48  ;;  %v7146_v48 = vpop.f32.mrf.mxu3 }
 0x5ef   : > { %v10442_v25 = vpop.eup %10441 }
 0x5f0   : > { %v10444_v16 = vpop.eup %10443  ;;  %v7406_v43 = vmul.f32 %v10442_v25, %v7214_v18  ;;  %10445 = vpow2.f32 %v7307_v40  ;;  %v7181_v60 = vmul.f32 %v14595_v41, %v7140_v44  ;;  %v7509_v40 = vadd.f32 %v14601_v34, %v14538_v23 }
 0x5f1   : > { %v7343_v13 = vadd.f32 1.0, %v10444_v16 }
 0x5f2   : > { %v7711_v1 = vpop.f32.mrf.mxu2  ;;  %v14643_v31 = vadd.f32 %v14606_v0, %v7181_v60  ;;  %v7425_v52 = vpack.c.bf16 %v7406_v43, %v7405_v7 }
 0x5f3   : > { %v7712_v61 = vadd.f32 %v14431_v63, %v7711_v1  ;;  %v7052_v39 = vpop.f32.mrf.mxu0  ;;  %10447 = vrcp.f32 %v7343_v13 }
 0x5f4   : > { %v7249_v27 = vsub.f32 0.0, %v14643_v31  ;;  %v7053_v33 = vadd.f32 %v7052_v39, %v14378_v20  ;;  %8385 = vmatmul.msk.bf16.gmra.mxu1 %vm550_vm1, %v7425_v52  ;;  %v14655_v20 = vpop.f32.mrf.mxu1  ;;  %v7512_v39 = vadd.f32 %v14601_v34, %v14550_v56  ;;  %v7522_v56 = vadd.f32 %v14601_v34, %v14629_v53 }
 0x5f5   : > { %7817 = vrot.lane.b32.xlu0 %v7712_v61, %s10535_s20  ;;  %v7517_v53 = vadd.f32 %v14601_v34, %v14578_v6  ;;  %v7519_v6 = vadd.f32 %v14601_v34, %v14589_v4 }
 0x5f6   : > { %v10446_v18 = vpop.eup %10445  ;;  %v7309_v5 = vmul.f32 1.442695, %v7249_v27  ;;  %v7142_v17 = vadd.f32 %v7141_v42, %v7053_v33 }
 0x5f7   : > { %8412 = vmatmul.msk.bf16.gmra.mxu2 %vm550_vm1, %v15014_v37  ;;  %v7344_v22 = vadd.f32 1.0, %v10446_v18 }
 0x5f8   : > { %v7182_v29 = vmul.f32 %v14595_v41, %v7142_v17 }
 0x5f9   : > { %10449 = vrcp.f32 %v7344_v22  ;;  %v10448_v32 = vpop.eup %10447 }
 0x5fa   : > { %v7714_v9 = vpop.f32.mrf.mxu2  ;;  %10451 = vpow2.f32 %v7309_v5  ;;  %v7218_v12 = vadd.f32 %v14606_v0, %v7182_v29  ;;  %v7407_v14 = vmul.f32 %v10448_v32, %v14609_v15 }
 0x5fb   : > { %v7715_v54 = vadd.f32 %v14431_v63, %v7714_v9  ;;  %v7055_v49 = vpop.f32.mrf.mxu0 }
 0x5fc   : > { %v7250_v2 = vsub.f32 0.0, %v7218_v12  ;;  %v7056_v10 = vadd.f32 %v7055_v49, %v14394_v45  ;;  %v14672_v50 = vpop.f32.mrf.mxu1 }
 0x5fd   : > { %7819 = vrot.lane.b32.xlu1 %v7715_v54, %s10535_s20 }
 0x5fe   : > { %v7311_v57 = vmul.f32 1.442695, %v7250_v2  ;;  %v7145_v62 = vadd.f32 %v7144_v11, %v7056_v10  ;;  %v7798_v28 = vpop.permute.xlu2 %7797 }
 0x5ff   : > { %v10450_v46 = vpop.eup %10449  ;;  %v7891_v19 = vsel %vm7887_vm5, %v7514_v38, %v7798_v28 }
 0x600   : > { %v10452_v24 = vpop.eup %10451  ;;  %v7408_v30 = vmul.f32 %v10450_v46, %v7216_v55  ;;  %10453 = vpow2.f32 %v7311_v57  ;;  %v7183_v26 = vmul.f32 %v14595_v41, %v7145_v62  ;;  %7924 = vst.msk [vmem:[%s14622_s22 + $0x18] sm:$0xff] %vm7920_vm6, %v7891_v19 }
 0x601   : > { %v7345_v21 = vadd.f32 1.0, %v10452_v24 }
 0x602   : > { %v7716_v45 = vpop.f32.mrf.mxu2  ;;  %v14669_v51 = vadd.f32 %v14606_v0, %v7183_v26  ;;  %v7426_v3 = vpack.c.bf16 %v7408_v30, %v7407_v14 }
 0x603   : > { %v7717_v58 = vadd.f32 %v14431_v63, %v7716_v45  ;;  %v7057_v8 = vpop.f32.mrf.mxu0  ;;  %10455 = vrcp.f32 %v7345_v21 }
 0x604   : > { %v7251_v15 = vsub.f32 0.0, %v14669_v51  ;;  %v7058_v55 = vadd.f32 %v7057_v8, %v14413_v35  ;;  %8386 = vmatmul.msk.bf16.gmra.mxu1 %vm550_vm1, %v7426_v3  ;;  %v14686_v61 = vpop.f32.mrf.mxu1 }
 0x605   : > { %7821 = vrot.lane.b32.xlu2 %v7717_v58, %s10535_s20  ;;  %v7529_v58 = vadd.f32 %v14601_v34, %v14672_v50 }
 0x606   : > { %v10454_v44 = vpop.eup %10453  ;;  %v7313_v25 = vmul.f32 1.442695, %v7251_v15  ;;  %v7147_v16 = vadd.f32 %v7146_v48, %v7058_v55  ;;  %v7794_v7 = vpop.permute.xlu0 %7793  ;;  %v7524_v15 = vadd.f32 %v14601_v34, %v14640_v47 }
 0x607   : > { %v7346_v43 = vadd.f32 1.0, %v10454_v44  ;;  %v7889_v60 = vsel %vm7887_vm5, %v7509_v40, %v7794_v7 }
 0x608   : > { %v7184_v42 = vmul.f32 %v14595_v41, %v7147_v16  ;;  %7922 = vst.msk [vmem:[%s14622_s22 + $0x8] sm:$0xff] %vm7920_vm6, %v7889_v60  ;;  %v7527_v16 = vadd.f32 %v14601_v34, %v14655_v20 }
 0x609   : > { %10457 = vrcp.f32 %v7346_v43  ;;  %v10456_v13 = vpop.eup %10455 }
 0x60a   : > { %v7719_v35 = vpop.f32.mrf.mxu2  ;;  %10459 = vpow2.f32 %v7313_v25  ;;  %v7220_v1 = vadd.f32 %v14606_v0, %v7184_v42  ;;  %v7409_v17 = vmul.f32 %v10456_v13, %v14643_v31  ;;  %v7532_v13 = vadd.f32 %v14601_v34, %v14686_v61 }
 0x60b   : > { %v7720_v23 = vadd.f32 %v14431_v63, %v7719_v35 }
 0x60c   : > { %v7252_v52 = vsub.f32 0.0, %v7220_v1  ;;  %v14700_v9 = vpop.f32.mrf.mxu1 }
 0x60d   : > { %7823 = vrot.lane.b32.xlu0 %v7720_v23, %s10535_s20 }
 0x60e   : > { %v7315_v41 = vmul.f32 1.442695, %v7252_v52  ;;  %v7796_v27 = vpop.permute.xlu1 %7795 }
 0x60f   : > { %v10458_v33 = vpop.eup %10457  ;;  %v7890_v18 = vsel %vm7887_vm5, %v7512_v39, %v7796_v27 }
 0x610   : > { %v10460_v5 = vpop.eup %10459  ;;  %v7410_v0 = vmul.f32 %v10458_v33, %v7218_v12  ;;  %10461 = vpow2.f32 %v7315_v41  ;;  %7923 = vst.msk [vmem:[%s14622_s22 + $0x10] sm:$0xff] %vm7920_vm6, %v7890_v18 }
 0x611   : > { %v7347_v22 = vadd.f32 1.0, %v10460_v5  ;;  %v7534_v5 = vadd.f32 %v14601_v34, %v14700_v9 }
 0x612   : > { %v7721_v59 = vpop.f32.mrf.mxu2  ;;  %v7427_v37 = vpack.c.bf16 %v7410_v0, %v7409_v17 }
 0x613   : > { %v7722_v36 = vadd.f32 %v14431_v63, %v7721_v59  ;;  %10463 = vrcp.f32 %v7347_v22 }
 0x614   : > { %8387 = vmatmul.msk.bf16.gmra.mxu1 %vm550_vm1, %v7427_v37  ;;  %v7536_v57 = vpop.f32.mrf.mxu1 }
 0x615   : > { %7825 = vrot.lane.b32.xlu1 %v7722_v36, %s10535_s20  ;;  %v7537_v42 = vadd.f32 %v14601_v34, %v7536_v57 }
 0x616   : > { %v10462_v29 = vpop.eup %10461  ;;  %v7804_v31 = vpop.permute.xlu2 %7803 }
 0x617   : > { %v7348_v11 = vadd.f32 1.0, %v10462_v29  ;;  %v7894_v12 = vsel %vm7887_vm5, %v7522_v56, %v7804_v31 }
 0x618   : > { %7927 = vst.msk [vmem:[%s14622_s22 + $0x30] sm:$0xff] %vm7920_vm6, %v7894_v12 }
 0x619   : > { %10465 = vrcp.f32 %v7348_v11  ;;  %v10464_v2 = vpop.eup %10463 }
 0x61a   : > { %v7724_v54 = vpop.f32.mrf.mxu2  ;;  %v7411_v62 = vmul.f32 %v10464_v2, %v14669_v51 }
 0x61b   : > { %v7725_v49 = vadd.f32 %v14431_v63, %v7724_v54 }
 0x61c   : > { %v7538_v45 = vpop.f32.mrf.mxu1 }
 0x61d   : > { %7827 = vrot.lane.b32.xlu2 %v7725_v49, %s10535_s20  ;;  %v7539_v11 = vadd.f32 %v14601_v34, %v7538_v45 }
 0x61e   : > { %v7800_v10 = vpop.permute.xlu0 %7799 }
 0x61f   : > { %v10466_v32 = vpop.eup %10465  ;;  %v7892_v38 = vsel %vm7887_vm5, %v7517_v53, %v7800_v10 }
 0x620   : > { %v7412_v28 = vmul.f32 %v10466_v32, %v7220_v1  ;;  %7925 = vst.msk [vmem:[%s14622_s22 + $0x20] sm:$0xff] %vm7920_vm6, %v7892_v38 }
 0x622   : > { %v7726_v46 = vpop.f32.mrf.mxu2  ;;  %v7428_v24 = vpack.c.bf16 %v7412_v28, %v7411_v62 }
 0x623   : > { %v7727_v19 = vadd.f32 %v14431_v63, %v7726_v46 }
 0x624   : > { %8388 = vmatmul.msk.bf16.gmra.mxu1 %vm550_vm1, %v7428_v24  ;;  %v7541_v8 = vpop.f32.mrf.mxu1 }
 0x625   : > { %7829 = vrot.lane.b32.xlu0 %v7727_v19, %s10535_s20  ;;  %v7542_v53 = vadd.f32 %v14601_v34, %v7541_v8 }
 0x626   : > { %v7802_v14 = vpop.permute.xlu1 %7801 }
 0x627   : > { %v7893_v30 = vsel %vm7887_vm5, %v7519_v6, %v7802_v14  ;;  %v10522_v14 = vld [vmem:[%s14868_s14] ss:$0 sm:$0xff] }
 0x628   : > { %7926 = vst.msk [vmem:[%s14622_s22 + $0x28] sm:$0xff] %vm7920_vm6, %v7893_v30 }
 0x62a   : > { %v7729_v26 = vpop.f32.mrf.mxu2 }
 0x62b   : > { %v7730_v51 = vadd.f32 %v14431_v63, %v7729_v26 }
 0x62c   : > { %v7543_v25 = vpop.f32.mrf.mxu1 }
 0x62d   : > { %7831 = vrot.lane.b32.xlu1 %v7730_v51, %s10535_s20  ;;  %v7544_v37 = vadd.f32 %v14601_v34, %v7543_v25 }
 0x62e   : > { %v7810_v3 = vpop.permute.xlu2 %7809 }
 0x62f   : > { %v7897_v21 = vsel %vm7887_vm5, %v7529_v58, %v7810_v3 }
 0x630   : > { %7930 = vst.msk [vmem:[%s14622_s22 + $0x48] sm:$0xff] %vm7920_vm6, %v7897_v21 }
 0x632   : > { %v7731_v4 = vpop.f32.mrf.mxu2 }
 0x633   : > { %v7732_v48 = vadd.f32 %v14431_v63, %v7731_v4 }
 0x634   : > { %v7546_v35 = vpop.f32.mrf.mxu1 }
 0x635   : > { %7833 = vrot.lane.b32.xlu2 %v7732_v48, %s10535_s20 }
 0x636   : > { %v7806_v55 = vpop.permute.xlu0 %7805 }
 0x637   : > { %v7895_v40 = vsel %vm7887_vm5, %v7524_v15, %v7806_v55 }
 0x638   : > { %7928 = vst.msk [vmem:[%s14622_s22 + $0x38] sm:$0xff] %vm7920_vm6, %v7895_v40 }
 0x63a   : > { %v7734_v50 = vpop.f32.mrf.mxu2 }
 0x63b   : > { %v7735_v44 = vadd.f32 %v14431_v63, %v7734_v50 }
 0x63c   : > { %v7548_v27 = vpop.f32.mrf.mxu1 }
 0x63d   : > { %7835 = vrot.lane.b32.xlu0 %v7735_v44, %s10535_s20  ;;  %v7549_v21 = vadd.f32 %v14601_v34, %v7548_v27 }
 0x63e   : > { %v7808_v7 = vpop.permute.xlu1 %7807 }
 0x63f   : > { %v7896_v43 = vsel %vm7887_vm5, %v7527_v16, %v7808_v7 }
 0x640   : > { %7929 = vst.msk [vmem:[%s14622_s22 + $0x40] sm:$0xff] %vm7920_vm6, %v7896_v43 }
 0x642   : > { %v7736_v47 = vpop.f32.mrf.mxu2 }
 0x643   : > { %v7737_v60 = vadd.f32 %v14431_v63, %v7736_v47 }
 0x644   : > { %v7551_v59 = vpop.f32.mrf.mxu1 }
 0x645   : > { %7837 = vrot.lane.b32.xlu1 %v7737_v60, %s10535_s20  ;;  %v7552_v28 = vadd.f32 %v14601_v34, %v7551_v59 }
 0x647   : > { %v7816_v1 = vpop.permute.xlu2 %7815 }
 0x648   : > { %v7900_v23 = vsel %vm7887_vm5, %v7537_v42, %v7816_v1 }
 0x649   : > { %7933 = vst.msk [vmem:[%s14622_s22 + $0x60] sm:$0xff] %vm7920_vm6, %v7900_v23 }
 0x64a   : > { %v7739_v20 = vpop.f32.mrf.mxu2 }
 0x64b   : > { %v7740_v52 = vadd.f32 %v14431_v63, %v7739_v20 }
 0x64c   : > { %v7553_v31 = vpop.f32.mrf.mxu1 }
 0x64d   : > { %7839 = vrot.lane.b32.xlu2 %v7740_v52, %s10535_s20  ;;  %v7554_v50 = vadd.f32 %v14601_v34, %v7553_v31 }
 0x64f   : > { %v7812_v39 = vpop.permute.xlu0 %7811 }
 0x650   : > { %v7898_v41 = vsel %vm7887_vm5, %v7532_v13, %v7812_v39 }
 0x651   : > { %7931 = vst.msk [vmem:[%s14622_s22 + $0x50] sm:$0xff] %vm7920_vm6, %v7898_v41 }
 0x652   : > { %v7741_v33 = vpop.f32.mrf.mxu2 }
 0x653   : > { %v7742_v18 = vadd.f32 %v14431_v63, %v7741_v33 }
 0x654   : > { %v7556_v10 = vpop.f32.mrf.mxu1 }
 0x655   : > { %7841 = vrot.lane.b32.xlu0 %v7742_v18, %s10535_s20  ;;  %v7557_v7 = vadd.f32 %v14601_v34, %v7556_v10 }
 0x657   : > { %v7814_v17 = vpop.permute.xlu1 %7813 }
 0x658   : > { %v7899_v0 = vsel %vm7887_vm5, %v7534_v5, %v7814_v17 }
 0x659   : > { %7932 = vst.msk [vmem:[%s14622_s22 + $0x58] sm:$0xff] %vm7920_vm6, %v7899_v0 }
 0x65a   : > { %v7744_v61 = vpop.f32.mrf.mxu2 }
 0x65b   : > { %v7745_v36 = vadd.f32 %v14431_v63, %v7744_v61 }
 0x65c   : > { %v7558_v24 = vpop.f32.mrf.mxu1 }
 0x65d   : > { %7843 = vrot.lane.b32.xlu1 %v7745_v36, %s10535_s20  ;;  %v7559_v15 = vadd.f32 %v14601_v34, %v7558_v24 }
 0x65f   : > { %v7822_v22 = vpop.permute.xlu2 %7821 }
 0x660   : > { %v7903_v56 = vsel %vm7887_vm5, %v7544_v37, %v7822_v22 }
 0x661   : > { %7936 = vst.msk [vmem:[%s14622_s22 + $0x78] sm:$0xff] %vm7920_vm6, %v7903_v56 }
 0x662   : > { %v7746_v29 = vpop.f32.mrf.mxu2 }
 0x663   : > { %v7747_v9 = vadd.f32 %v14431_v63, %v7746_v29 }
 0x664   : > { %v7561_v58 = vpop.f32.mrf.mxu1 }
 0x665   : > { %7845 = vrot.lane.b32.xlu2 %v7747_v9, %s10535_s20  ;;  %v7562_v20 = vadd.f32 %v14601_v34, %v7561_v58 }
 0x667   : > { %v7818_v12 = vpop.permute.xlu0 %7817 }
 0x668   : > { %v7901_v54 = vsel %vm7887_vm5, %v7539_v11, %v7818_v12 }
 0x669   : > { %7934 = vst.msk [vmem:[%s14622_s22 + $0x68] sm:$0xff] %vm7920_vm6, %v7901_v54 }
 0x66a   : > { %v7749_v49 = vpop.f32.mrf.mxu2 }
 0x66b   : > { %v7750_v2 = vadd.f32 %v14431_v63, %v7749_v49 }
 0x66c   : > { %v7563_v48 = vpop.f32.mrf.mxu1 }
 0x66d   : > { %7847 = vrot.lane.b32.xlu0 %v7750_v2, %s10535_s20  ;;  %v7564_v41 = vadd.f32 %v14601_v34, %v7563_v48 }
 0x66f   : > { %v7820_v32 = vpop.permute.xlu1 %7819 }
 0x670   : > { %v7902_v38 = vsel %vm7887_vm5, %v7542_v53, %v7820_v32 }
 0x671   : > { %7935 = vst.msk [vmem:[%s14622_s22 + $0x70] sm:$0xff] %vm7920_vm6, %v7902_v38 }
 0x672   : > { %v7751_v57 = vpop.f32.mrf.mxu2 }
 0x673   : > { %v7752_v62 = vadd.f32 %v14431_v63, %v7751_v57  ;;  %v7547_v63 = vadd.f32 %v14601_v34, %v7546_v35 }
 0x674   : > { %v7566_v44 = vpop.f32.mrf.mxu1 }
 0x675   : > { %7849 = vrot.lane.b32.xlu1 %v7752_v62, %s10535_s20  ;;  %v7567_v42 = vadd.f32 %v14601_v34, %v7566_v44 }
 0x677   : > { %v7828_v46 = vpop.permute.xlu2 %7827 }
 0x678   : > { %v7906_v19 = vsel %vm7887_vm5, %v7552_v28, %v7828_v46 }
 0x679   : > { %7939 = vst.msk [vmem:[%s14622_s22 + $0x90] sm:$0xff] %vm7920_vm6, %v7906_v19 }
 0x67a   : > { %v7754_v6 = vpop.f32.mrf.mxu2 }
 0x67b   : > { %v7755_v30 = vadd.f32 %v10522_v14, %v7754_v6 }
 0x67c   : > { %v7568_v60 = vpop.f32.mrf.mxu1 }
 0x67d   : > { %7851 = vrot.lane.b32.xlu2 %v7755_v30, %s10535_s20  ;;  %v7569_v61 = vadd.f32 %v14601_v34, %v7568_v60 }
 0x67f   : > { %v7824_v26 = vpop.permute.xlu0 %7823 }
 0x680   : > { %v7904_v45 = vsel %vm7887_vm5, %v7547_v63, %v7824_v26 }
 0x681   : > { %7937 = vst.msk [vmem:[%s14622_s22 + $0x80] sm:$0xff] %vm7920_vm6, %v7904_v45 }
 0x682   : > { %v7756_v51 = vpop.f32.mrf.mxu2 }
 0x683   : > { %v7757_v3 = vadd.f32 %v10522_v14, %v7756_v51 }
 0x684   : > { %v7571_v23 = vpop.f32.mrf.mxu1 }
 0x685   : > { %7853 = vrot.lane.b32.xlu0 %v7757_v3, %s10535_s20  ;;  %v7572_v22 = vadd.f32 %v14601_v34, %v7571_v23 }
 0x687   : > { %v7826_v4 = vpop.permute.xlu1 %7825 }
 0x688   : > { %v7905_v8 = vsel %vm7887_vm5, %v7549_v21, %v7826_v4 }
 0x689   : > { %7938 = vst.msk [vmem:[%s14622_s22 + $0x88] sm:$0xff] %vm7920_vm6, %v7905_v8 }
 0x68c   : > { %v7573_v39 = vpop.f32.mrf.mxu1 }
 0x68d   : > { %v7574_v18 = vadd.f32 %v14601_v34, %v7573_v39 }
 0x68f   : > { %v7834_v55 = vpop.permute.xlu2 %7833 }
 0x690   : > { %v7909_v40 = vsel %vm7887_vm5, %v7559_v15, %v7834_v55 }
 0x691   : > { %7942 = vst.msk [vmem:[%s14622_s22 + $0xa8] sm:$0xff] %vm7920_vm6, %v7909_v40 }
 0x694   : > { %v7576_v5 = vpop.f32.mrf.mxu1 }
 0x695   : > { %v7577_v54 = vadd.f32 %v14601_v34, %v7576_v5 }
 0x697   : > { %v7830_v25 = vpop.permute.xlu0 %7829 }
 0x698   : > { %v7907_v16 = vsel %vm7887_vm5, %v7554_v50, %v7830_v25 }
 0x699   : > { %7940 = vst.msk [vmem:[%s14622_s22 + $0x98] sm:$0xff] %vm7920_vm6, %v7907_v16 }
 0x69c   : > { %v7578_v37 = vpop.f32.mrf.mxu1 }
 0x69d   : > { %v7579_v53 = vadd.f32 %v14601_v34, %v7578_v37 }
 0x69f   : > { %v7832_v43 = vpop.permute.xlu1 %7831 }
 0x6a0   : > { %v7908_v47 = vsel %vm7887_vm5, %v7557_v7, %v7832_v43 }
 0x6a1   : > { %7941 = vst.msk [vmem:[%s14622_s22 + $0xa0] sm:$0xff] %vm7920_vm6, %v7908_v47 }
 0x6a4   : > { %v7581_v9 = vpop.f32.mrf.mxu1 }
 0x6a5   : > { %v7582_v31 = vadd.f32 %v14601_v34, %v7581_v9 }
 0x6a7   : > { %v7840_v35 = vpop.permute.xlu2 %7839 }
 0x6a8   : > { %v7912_v1 = vsel %vm7887_vm5, %v7567_v42, %v7840_v35 }
 0x6a9   : > { %7945 = vst.msk [vmem:[%s14622_s22 + $0xc0] sm:$0xff] %vm7920_vm6, %v7912_v1 }
 0x6ac   : > { %v7583_v38 = vpop.f32.mrf.mxu1 }
 0x6ad   : > { %v7584_v57 = vadd.f32 %v14601_v34, %v7583_v38 }
 0x6af   : > { %v7836_v52 = vpop.permute.xlu0 %7835 }
 0x6b0   : > { %v7910_v13 = vsel %vm7887_vm5, %v7562_v20, %v7836_v52 }
 0x6b1   : > { %7943 = vst.msk [vmem:[%s14622_s22 + $0xb0] sm:$0xff] %vm7920_vm6, %v7910_v13 }
 0x6b7   : > { %v7838_v27 = vpop.permute.xlu1 %7837 }
 0x6b8   : > { %v7911_v33 = vsel %vm7887_vm5, %v7564_v41, %v7838_v27 }
 0x6b9   : > { %7944 = vst.msk [vmem:[%s14622_s22 + $0xb8] sm:$0xff] %vm7920_vm6, %v7911_v33 }
 0x6bf   : > { %v7846_v17 = vpop.permute.xlu2 %7845 }
 0x6c0   : > { %v7915_v0 = vsel %vm7887_vm5, %v7574_v18, %v7846_v17 }
 0x6c1   : > { %7948 = vst.msk [vmem:[%s14622_s22 + $0xd8] sm:$0xff] %vm7920_vm6, %v7915_v0 }
 0x6c7   : > { %v7842_v59 = vpop.permute.xlu0 %7841 }
 0x6c8   : > { %v7913_v36 = vsel %vm7887_vm5, %v7569_v61, %v7842_v59 }
 0x6c9   : > { %7946 = vst.msk [vmem:[%s14622_s22 + $0xc8] sm:$0xff] %vm7920_vm6, %v7913_v36 }
 0x6cf   : > { %v7844_v56 = vpop.permute.xlu1 %7843 }
 0x6d0   : > { %v7914_v29 = vsel %vm7887_vm5, %v7572_v22, %v7844_v56 }
 0x6d1   : > { %7947 = vst.msk [vmem:[%s14622_s22 + $0xd0] sm:$0xff] %vm7920_vm6, %v7914_v29 }
 0x6d7   : > { %v7852_v11 = vpop.permute.xlu2 %7851 }
 0x6d8   : > { %v7918_v12 = vsel %vm7887_vm5, %v7582_v31, %v7852_v11 }
 0x6d9   : > { %7951 = vst.msk [vmem:[%s14622_s22 + $0xf0] sm:$0xff] %vm7920_vm6, %v7918_v12 }
 0x6df   : > { %v7848_v49 = vpop.permute.xlu0 %7847 }
 0x6e0   : > { %v7916_v2 = vsel %vm7887_vm5, %v7577_v54, %v7848_v49 }
 0x6e1   : > { %7949 = vst.msk [vmem:[%s14622_s22 + $0xe0] sm:$0xff] %vm7920_vm6, %v7916_v2 }
 0x6e7   : > { %v7850_v10 = vpop.permute.xlu1 %7849 }
 0x6e8   : > { %v7917_v32 = vsel %vm7887_vm5, %v7579_v53, %v7850_v10 }
 0x6e9   : > { %7950 = vst.msk [vmem:[%s14622_s22 + $0xe8] sm:$0xff] %vm7920_vm6, %v7917_v32 }
 0x6f7   : > { %v7854_v62 = vpop.permute.xlu0 %7853 }
 0x6f8   : > { %v7919_v28 = vsel %vm7887_vm5, %v7584_v57, %v7854_v62 }
 0x6f9   : > { %7952 = vst.msk [vmem:[%s14622_s22 + $0xf8] sm:$0xff] %vm7920_vm6, %v7919_v28 }
 0x6fa PF: > { %s27_s24 = sadd.s32 1, %s10529_s24  }
 0x6fb   : > { %p24_p4 = scmp.ge.s32.totalorder %s27_s24, 4  }
 0x6fd   :  { %26 = sbr.rel (!%p24_p4) target bundleno = 3 (0x3), region = 120 }

</bundles_post_ra>
